<compile_context>
chip_gen: v5e
topology: v5e:2x2
jax: 0.10.0
libtpu: 0.0.40
codegen_flags: <defaults>
</compile_context>

<pallas_src>
import jax
import jax.numpy as jnp
from jax.experimental import pallas as pl
from jax.experimental.pallas import tpu as pltpu

# ---------------- small synthetic ViT config ----------------
IMG = 16            # image spatial size
PATCH = 8           # patch size (stride == kernel of the patch conv)
CHANNELS = 3        # image_channels (constants.IMAGE_CHANNELS default)
HIDDEN = 32         # config.hidden_size
HEADS = 4
HEAD_DIM = HIDDEN // HEADS
LAYERS = 2
INTER = 64          # intermediate (MLP) size
NUM_CLASSES = 10    # constants.NUM_CLASSES default
N_PATCHES = (IMG // PATCH) ** 2
T = N_PATCHES + 1   # +1 CLS token
T_PAD = 8           # token count padded to the sublane size -> aligned reshapes
DPATCH = CHANNELS * PATCH * PATCH
KEXP = HEADS * T_PAD    # head-unrolled key axis length
NCLS_PAD = 128      # lane-dense padded logits; wrapper slices [:, :NUM_CLASSES]
EPS = 1e-12         # HF ViT layer_norm_eps
SCALE = 1.0 / (HEAD_DIM ** 0.5)
CDT = jnp.bfloat16  # MXU input dtype (accumulation stays float32)


def _layernorm(x):
    # Affine-free LayerNorm: gamma/beta are folded into the following matmul.
    # f32 statistics (v5e has no bf16 VPU/EUP path).
    mu = jnp.mean(x, axis=-1, keepdims=True)
    xc = x - mu
    var = jnp.mean(xc * xc, axis=-1, keepdims=True)
    return xc * jax.lax.rsqrt(var + EPS)


def _gelu(x):
    # TODO(synk): HF ViT uses exact erf-GELU; tanh approximation used here for
    # portable Mosaic lowering (difference is ~1e-3 level).
    return jax.nn.gelu(x, approximate=True)


def vit_kernel(patches_ref, pos_ref, kbias_ref, head_mask_ref, block_ones_ref,
               patch_w_ref, qkv_w_ref, qkv_b_ref, ao_w_ref, ao_b_ref,
               fc1_w_ref, fc1_b_ref, fc2_w_ref, fc2_b_ref,
               clsf_w_ref, clsf_b_ref, out_ref):
    mb = patches_ref.shape[0]          # = B_BLK * T_PAD token rows in this block
    b_blk = mb // T_PAD

    # ---- patch embedding: one (mb x DPATCH)@(DPATCH x HIDDEN) matmul for the
    # whole image block.  CLS token + conv bias were folded into pos_ref.
    emb = jnp.dot(patches_ref[...], patch_w_ref[...],
                  preferred_element_type=jnp.float32)            # (mb, HIDDEN) f32
    tokens = (emb.reshape(b_blk, T_PAD, HIDDEN)
              + pos_ref[...][None]).reshape(mb, HIDDEN)

    attn_bias = kbias_ref[...][None]           # (1, T_PAD, KEXP): -1e30 on pad keys
    head_mask = head_mask_ref[...][None]       # (1, KEXP, HIDDEN): block-diag 0/1
    block_ones = block_ones_ref[...]           # (KEXP, KEXP): per-head block of 1s

    for l in range(LAYERS):
        # ---------- attention block (pre-LN; ln1 affine folded into qkv_w/b) ----------
        h = _layernorm(tokens)
        qkv = jnp.dot(h.astype(CDT), qkv_w_ref[l],               # fused QKV matmul
                      preferred_element_type=jnp.float32) + qkv_b_ref[l]
        qkv3 = qkv.reshape(b_blk, T_PAD, 3 * HIDDEN)             # tile-aligned split
        q = qkv3[:, :, :HIDDEN]                                  # SCALE pre-folded
        k = qkv3[:, :, HIDDEN:2 * HIDDEN]
        v = qkv3[:, :, 2 * HIDDEN:]

        # Heads unrolled into the key axis: K/V tiled HEADS times along tokens and
        # masked to their own head's feature columns, so one pair of image-batched
        # matmuls computes ALL heads' scores / contexts (no per-head loop).
        k_exp = (jnp.concatenate([k] * HEADS, axis=1) * head_mask).astype(CDT)
        v_exp = (jnp.concatenate([v] * HEADS, axis=1) * head_mask).astype(CDT)

        s = jnp.einsum('bqd,bkd->bqk', q.astype(CDT), k_exp,
                       preferred_element_type=jnp.float32) + attn_bias
        # Row-global max subtraction: identical constant for every head block, so
        # each head's softmax is still exact; pad keys carry -1e30 -> exp == 0.
        s = s - jnp.max(s, axis=-1, keepdims=True)
        p = jnp.exp(s).reshape(mb, KEXP)                         # f32 softmax
        denom = jnp.dot(p, block_ones, preferred_element_type=jnp.float32)
        p = (p * pl.reciprocal(denom, approx=True)).reshape(b_blk, T_PAD, KEXP)

        ctx = jnp.einsum('bqk,bkd->bqd', p.astype(CDT), v_exp,
                         preferred_element_type=jnp.float32).reshape(mb, HIDDEN)
        attn = jnp.dot(ctx.astype(CDT), ao_w_ref[l],
                       preferred_element_type=jnp.float32) + ao_b_ref[l]
        tokens = tokens + attn                                   # residual 1

        # ---------- MLP block (pre-LN; ln2 affine folded into fc1_w/b) ----------
        h2 = _layernorm(tokens)
        m = _gelu(jnp.dot(h2.astype(CDT), fc1_w_ref[l],
                          preferred_element_type=jnp.float32) + fc1_b_ref[l])
        m = jnp.dot(m.astype(CDT), fc2_w_ref[l],
                    preferred_element_type=jnp.float32) + fc2_b_ref[l]
        tokens = tokens + m                                      # residual 2

    # ---- CLS rows only: final LayerNorm (affine folded into classifier) + head.
    # Stride-8 sublane gather picks token 0 of each image; the (b_blk, 128) store
    # stays lane-dense while cutting writeback and the classifier matmul ~8x.
    cls = tokens.reshape(b_blk, T_PAD, HIDDEN)[:, 0, :]          # (b_blk, HIDDEN)
    cls = _layernorm(cls)
    out_ref[...] = jnp.dot(cls.astype(CDT), clsf_w_ref[...],
                           preferred_element_type=jnp.float32) + clsf_b_ref[...]


def init_params(key):
    std = 0.02
    ks = jax.random.split(key, 16)
    f32 = jnp.float32
    return {
        "patch_w": jax.random.normal(ks[0], (DPATCH, HIDDEN), f32) * std,
        "patch_b": jnp.zeros((1, HIDDEN), f32),
        "cls":     jax.random.normal(ks[1], (1, HIDDEN), f32) * std,
        "pos":     jax.random.normal(ks[2], (T, HIDDEN), f32) * std,
        "ln1_g":   jnp.ones((LAYERS, 1, HIDDEN), f32),
        "ln1_b":   jnp.zeros((LAYERS, 1, HIDDEN), f32),
        "q_w":     jax.random.normal(ks[3], (LAYERS, HIDDEN, HIDDEN), f32) * std,
        "q_b":     jnp.zeros((LAYERS, 1, HIDDEN), f32),
        "k_w":     jax.random.normal(ks[4], (LAYERS, HIDDEN, HIDDEN), f32) * std,
        "k_b":     jnp.zeros((LAYERS, 1, HIDDEN), f32),
        "v_w":     jax.random.normal(ks[5], (LAYERS, HIDDEN, HIDDEN), f32) * std,
        "v_b":     jnp.zeros((LAYERS, 1, HIDDEN), f32),
        "ao_w":    jax.random.normal(ks[6], (LAYERS, HIDDEN, HIDDEN), f32) * std,
        "ao_b":    jnp.zeros((LAYERS, 1, HIDDEN), f32),
        "ln2_g":   jnp.ones((LAYERS, 1, HIDDEN), f32),
        "ln2_b":   jnp.zeros((LAYERS, 1, HIDDEN), f32),
        "fc1_w":   jax.random.normal(ks[7], (LAYERS, HIDDEN, INTER), f32) * std,
        "fc1_b":   jnp.zeros((LAYERS, 1, INTER), f32),
        "fc2_w":   jax.random.normal(ks[8], (LAYERS, INTER, HIDDEN), f32) * std,
        "fc2_b":   jnp.zeros((LAYERS, 1, HIDDEN), f32),
        "lnf_g":   jnp.ones((1, HIDDEN), f32),
        "lnf_b":   jnp.zeros((1, HIDDEN), f32),
        "cls_w":   jax.random.normal(ks[9], (HIDDEN, NUM_CLASSES), f32) * std,
        "cls_b":   jnp.zeros((1, NUM_CLASSES), f32),
    }


def _full_spec(shape):
    nd = len(shape)
    return pl.BlockSpec(shape, lambda i, _nd=nd: (0,) * _nd)


def _prepare_weights(params):
    """Fold CLS/conv-bias into the positional table, fuse QKV (SCALE folded into Q),
    fold every LayerNorm's gamma/beta into the matmul that consumes it, pad the
    classifier to 128 lanes, and cast matmul weights to bf16 (biases stay f32)."""
    f32 = jnp.float32
    pos_all = jnp.concatenate(
        [params["pos"][0:1] + params["cls"],                # CLS row: cls + pos[0]
         params["pos"][1:] + params["patch_b"]], axis=0)    # conv bias folded in
    pos_all = jnp.pad(pos_all, ((0, T_PAD - T), (0, 0))).astype(f32)

    # fused QKV (columns are already head-major in HF ViT layout); SCALE into Q
    qkv_w = jnp.concatenate(
        [params["q_w"] * SCALE, params["k_w"], params["v_w"]], axis=-1)
    qkv_b = jnp.concatenate(
        [params["q_b"] * SCALE, params["k_b"], params["v_b"]], axis=-1)
    # fold ln1 affine: y = (x_norm*g + beta)@W + b = x_norm@(diag(g)W) + (beta@W + b)
    qkv_b = qkv_b + jnp.einsum('lij,ljk->lik', params["ln1_b"], qkv_w)
    qkv_w = qkv_w * params["ln1_g"][:, 0, :, None]

    # fold ln2 affine into fc1
    fc1_w, fc1_b = params["fc1_w"], params["fc1_b"]
    fc1_b = fc1_b + jnp.einsum('lij,ljk->lik', params["ln2_b"], fc1_w)
    fc1_w = fc1_w * params["ln2_g"][:, 0, :, None]

    # classifier padded to 128 lanes; final-LN affine folded in
    clsf_w = jnp.pad(params["cls_w"], ((0, 0), (0, NCLS_PAD - NUM_CLASSES)))
    clsf_b = jnp.pad(params["cls_b"], ((0, 0), (0, NCLS_PAD - NUM_CLASSES)))
    clsf_b = clsf_b + params["lnf_b"] @ clsf_w
    clsf_w = clsf_w * params["lnf_g"][0][:, None]

    weights = [
        params["patch_w"].astype(CDT),
        qkv_w.astype(CDT), qkv_b.astype(f32),
        params["ao_w"].astype(CDT), params["ao_b"].astype(f32),
        fc1_w.astype(CDT), fc1_b.astype(f32),
        params["fc2_w"].astype(CDT), params["fc2_b"].astype(f32),
        clsf_w.astype(CDT), clsf_b.astype(f32),
    ]
    return pos_all, weights


def _attention_constants():
    f32 = jnp.float32
    # additive bias masking pad keys, replicated per head block: (T_PAD, KEXP)
    kbias_row = jnp.where(jnp.arange(T_PAD) < T, 0.0, -1e30).astype(f32)
    kbias = jnp.broadcast_to(jnp.tile(kbias_row, (HEADS,))[None, :], (T_PAD, KEXP))
    # block-diagonal head mask over feature columns: (KEXP, HIDDEN)
    row_head = jnp.arange(KEXP) // T_PAD
    col_head = jnp.arange(HIDDEN) // HEAD_DIM
    head_mask = (row_head[:, None] == col_head[None, :]).astype(f32)
    # per-head block of ones for segmented softmax sums: (KEXP, KEXP)
    block_ones = (row_head[:, None] == row_head[None, :]).astype(f32)
    return kbias, head_mask, block_ones


def vehicle_image_classifier(x, params, b_blk=None):
    """x: (B, C, H, W) NCHW float32 -> logits (B, NUM_CLASSES) float32."""
    B = x.shape[0]
    if b_blk is None:
        # mb = b_blk*T_PAD: 128 fills v5e's 128-wide MXU M and keeps >=2 grid
        # blocks for v7x's two TensorCores at B>=32; 256 fills v6e/v7x MXU M
        # once B>=64 without collapsing the grid to a single block.
        b_blk = 32 if B >= 64 else 16
    b_blk = max(1, min(b_blk, B))
    n_blocks = (B + b_blk - 1) // b_blk
    B_pad = n_blocks * b_blk
    mb = b_blk * T_PAD

    # patchify NCHW exactly like Conv2d(kernel=p, stride=p) im2col (channel-major)
    p = PATCH
    xb = x.reshape(B, CHANNELS, IMG // p, p, IMG // p, p)
    xb = xb.transpose(0, 2, 4, 1, 3, 5).reshape(B, N_PATCHES, DPATCH)
    patches = jnp.concatenate(
        [jnp.zeros((B, 1, DPATCH), x.dtype),           # row 0 = CLS slot
         xb,
         jnp.zeros((B, T_PAD - T, DPATCH), x.dtype)],  # padded token rows
        axis=1)
    if B_pad > B:
        patches = jnp.concatenate(
            [patches, jnp.zeros((B_pad - B, T_PAD, DPATCH), x.dtype)], axis=0)
    patches_flat = patches.reshape(B_pad * T_PAD, DPATCH).astype(CDT)

    pos_all, weights = _prepare_weights(params)
    kbias, head_mask, block_ones = _attention_constants()

    consts = (pos_all, kbias, head_mask, block_ones)
    in_specs = ([pl.BlockSpec((mb, DPATCH), lambda i: (i, 0))]
                + [_full_spec(c.shape) for c in consts]
                + [_full_spec(w.shape) for w in weights])
    # NOTE: all weights stay VMEM-resident at this toy size; a real ViT-Base
    # checkpoint requires a per-layer grid axis / streamed weights (v7x: 64 MiB).

    out = pl.pallas_call(
        vit_kernel,
        out_shape=jax.ShapeDtypeStruct((B_pad, NCLS_PAD), jnp.float32),
        grid_spec=pltpu.PrefetchScalarGridSpec(
            num_scalar_prefetch=0,
            grid=(n_blocks,),
            in_specs=in_specs,
            out_specs=pl.BlockSpec((b_blk, NCLS_PAD), lambda i: (i, 0)),
        ),
        compiler_params=pltpu.CompilerParams(
            dimension_semantics=("parallel",)),   # image blocks are independent
    )(patches_flat, *consts, *weights)

    # first NUM_CLASSES lanes of each image's CLS logits
    return out[:B, :NUM_CLASSES]


if __name__ == "__main__":
    key = jax.random.PRNGKey(0)
    k_param, k_x = jax.random.split(key)
    params = init_params(k_param)
    B = 32
    x = jax.random.normal(k_x, (B, CHANNELS, IMG, IMG), jnp.float32)

    logits = vehicle_image_classifier(x, params)
    logits = jax.block_until_ready(logits)
    assert logits.shape == (B, NUM_CLASSES)
    assert bool(jnp.all(jnp.isfinite(logits)))
    print("KERNEL_OK")
</pallas_src>

<mosaic_0001>
module attributes {stable_mosaic.version = 11 : i64} {
  func.func @vit_kernel(%arg0: i32, %arg1: memref<128x192xbf16, #tpu.memory_space<vmem>>, %arg2: memref<8x32xf32, #tpu.memory_space<vmem>>, %arg3: memref<8x32xf32, #tpu.memory_space<vmem>>, %arg4: memref<32x32xf32, #tpu.memory_space<vmem>>, %arg5: memref<32x32xf32, #tpu.memory_space<vmem>>, %arg6: memref<192x32xbf16, #tpu.memory_space<vmem>>, %arg7: memref<2x32x96xbf16, #tpu.memory_space<vmem>>, %arg8: memref<2x1x96xf32, #tpu.memory_space<vmem>>, %arg9: memref<2x32x32xbf16, #tpu.memory_space<vmem>>, %arg10: memref<2x1x32xf32, #tpu.memory_space<vmem>>, %arg11: memref<2x32x64xbf16, #tpu.memory_space<vmem>>, %arg12: memref<2x1x64xf32, #tpu.memory_space<vmem>>, %arg13: memref<2x64x32xbf16, #tpu.memory_space<vmem>>, %arg14: memref<2x1x32xf32, #tpu.memory_space<vmem>>, %arg15: memref<32x128xbf16, #tpu.memory_space<vmem>>, %arg16: memref<1x128xf32, #tpu.memory_space<vmem>>, %arg17: memref<16x128xf32, #tpu.memory_space<vmem>>) attributes {dimension_semantics = [#tpu.dimension_semantics<parallel>], iteration_bounds = array<i64: 2>, scalar_prefetch = 0 : i64, scratch_operands = 0 : i64, tpu.core_type = #tpu.core_type<tc>, window_params = [{transform_indices = @transform_0, window_bounds = array<i64: 128, 192>}, {pipeline_mode = #tpu.pipeline_mode<synchronous>, transform_indices = @transform_1, window_bounds = array<i64: 8, 32>}, {pipeline_mode = #tpu.pipeline_mode<synchronous>, transform_indices = @transform_2, window_bounds = array<i64: 8, 32>}, {pipeline_mode = #tpu.pipeline_mode<synchronous>, transform_indices = @transform_3, window_bounds = array<i64: 32, 32>}, {pipeline_mode = #tpu.pipeline_mode<synchronous>, transform_indices = @transform_4, window_bounds = array<i64: 32, 32>}, {pipeline_mode = #tpu.pipeline_mode<synchronous>, transform_indices = @transform_5, window_bounds = array<i64: 192, 32>}, {pipeline_mode = #tpu.pipeline_mode<synchronous>, transform_indices = @transform_6, window_bounds = array<i64: 2, 32, 96>}, {pipeline_mode = #tpu.pipeline_mode<synchronous>, transform_indices = @transform_7, window_bounds = array<i64: 2, 1, 96>}, {pipeline_mode = #tpu.pipeline_mode<synchronous>, transform_indices = @transform_8, window_bounds = array<i64: 2, 32, 32>}, {pipeline_mode = #tpu.pipeline_mode<synchronous>, transform_indices = @transform_9, window_bounds = array<i64: 2, 1, 32>}, {pipeline_mode = #tpu.pipeline_mode<synchronous>, transform_indices = @transform_10, window_bounds = array<i64: 2, 32, 64>}, {pipeline_mode = #tpu.pipeline_mode<synchronous>, transform_indices = @transform_11, window_bounds = array<i64: 2, 1, 64>}, {pipeline_mode = #tpu.pipeline_mode<synchronous>, transform_indices = @transform_12, window_bounds = array<i64: 2, 64, 32>}, {pipeline_mode = #tpu.pipeline_mode<synchronous>, transform_indices = @transform_13, window_bounds = array<i64: 2, 1, 32>}, {pipeline_mode = #tpu.pipeline_mode<synchronous>, transform_indices = @transform_14, window_bounds = array<i64: 32, 128>}, {pipeline_mode = #tpu.pipeline_mode<synchronous>, transform_indices = @transform_15, window_bounds = array<i64: 1, 128>}, {transform_indices = @transform_16, window_bounds = array<i64: 16, 128>}]} {
    %c0 = arith.constant 0 : index
    %c0_0 = arith.constant 0 : index
    %0 = vector.load %arg1[%c0, %c0_0] : memref<128x192xbf16, #tpu.memory_space<vmem>>, vector<128x192xbf16>
    %c0_1 = arith.constant 0 : index
    %c0_2 = arith.constant 0 : index
    %1 = vector.load %arg6[%c0_1, %c0_2] : memref<192x32xbf16, #tpu.memory_space<vmem>>, vector<192x32xbf16>
    %cst = arith.constant dense<0.000000e+00> : vector<128x32xf32>
    %2 = tpu.matmul %0, %1, %cst {dimension_numbers = #tpu.dot_dimension_numbers<[1], [0], [0], [1], [0, 0, 1, 1], [], []>} : vector<128x192xbf16>, vector<192x32xbf16>, vector<128x32xf32> -> vector<128x32xf32>
    %3 = vector.shape_cast %2 : vector<128x32xf32> to vector<16x8x32xf32>
    %c0_3 = arith.constant 0 : index
    %c0_4 = arith.constant 0 : index
    %4 = vector.load %arg2[%c0_3, %c0_4] : memref<8x32xf32, #tpu.memory_space<vmem>>, vector<8x32xf32>
    %5 = vector.shape_cast %4 : vector<8x32xf32> to vector<1x8x32xf32>
    %6 = vector.broadcast %5 : vector<1x8x32xf32> to vector<16x8x32xf32>
    %7 = arith.addf %3, %6 : vector<16x8x32xf32>
    %8 = vector.shape_cast %7 : vector<16x8x32xf32> to vector<128x32xf32>
    %c0_5 = arith.constant 0 : index
    %c0_6 = arith.constant 0 : index
    %9 = vector.load %arg3[%c0_5, %c0_6] : memref<8x32xf32, #tpu.memory_space<vmem>>, vector<8x32xf32>
    %10 = vector.shape_cast %9 : vector<8x32xf32> to vector<1x8x32xf32>
    %c0_7 = arith.constant 0 : index
    %c0_8 = arith.constant 0 : index
    %11 = vector.load %arg4[%c0_7, %c0_8] : memref<32x32xf32, #tpu.memory_space<vmem>>, vector<32x32xf32>
    %12 = vector.shape_cast %11 : vector<32x32xf32> to vector<1x32x32xf32>
    %c0_9 = arith.constant 0 : index
    %c0_10 = arith.constant 0 : index
    %13 = vector.load %arg5[%c0_9, %c0_10] : memref<32x32xf32, #tpu.memory_space<vmem>>, vector<32x32xf32>
    %cst_11 = arith.constant dense<0.000000e+00> : vector<128xf32>
    %14 = vector.multi_reduction <add>, %8, %cst_11 [1] : vector<128x32xf32> to vector<128xf32>
    %15 = vector.shape_cast %14 : vector<128xf32> to vector<128x1xf32>
    %cst_12 = arith.constant 3.200000e+01 : f32
    %16 = vector.broadcast %cst_12 : f32 to vector<128x1xf32>
    %17 = arith.divf %15, %16 : vector<128x1xf32>
    %18 = vector.broadcast %17 : vector<128x1xf32> to vector<128x32xf32>
    %19 = arith.subf %8, %18 : vector<128x32xf32>
    %20 = arith.mulf %19, %19 : vector<128x32xf32>
    %cst_13 = arith.constant dense<0.000000e+00> : vector<128xf32>
    %21 = vector.multi_reduction <add>, %20, %cst_13 [1] : vector<128x32xf32> to vector<128xf32>
    %22 = vector.shape_cast %21 : vector<128xf32> to vector<128x1xf32>
    %cst_14 = arith.constant 3.200000e+01 : f32
    %23 = vector.broadcast %cst_14 : f32 to vector<128x1xf32>
    %24 = arith.divf %22, %23 : vector<128x1xf32>
    %cst_15 = arith.constant 9.99999996E-13 : f32
    %25 = vector.broadcast %cst_15 : f32 to vector<128x1xf32>
    %26 = arith.addf %24, %25 : vector<128x1xf32>
    %27 = math.rsqrt %26 : vector<128x1xf32>
    %28 = vector.broadcast %27 : vector<128x1xf32> to vector<128x32xf32>
    %29 = arith.mulf %19, %28 : vector<128x32xf32>
    %30 = arith.truncf %29 : vector<128x32xf32> to vector<128x32xbf16>
    %c0_16 = arith.constant 0 : index
    %c0_17 = arith.constant 0 : index
    %c0_18 = arith.constant 0 : index
    %31 = vector.load %arg7[%c0_16, %c0_17, %c0_18] : memref<2x32x96xbf16, #tpu.memory_space<vmem>>, vector<1x32x96xbf16>
    %32 = vector.shape_cast %31 : vector<1x32x96xbf16> to vector<32x96xbf16>
    %cst_19 = arith.constant dense<0.000000e+00> : vector<128x96xf32>
    %33 = tpu.matmul %30, %32, %cst_19 {dimension_numbers = #tpu.dot_dimension_numbers<[1], [0], [0], [1], [0, 0, 1, 1], [], []>} : vector<128x32xbf16>, vector<32x96xbf16>, vector<128x96xf32> -> vector<128x96xf32>
    %c0_20 = arith.constant 0 : index
    %c0_21 = arith.constant 0 : index
    %c0_22 = arith.constant 0 : index
    %34 = vector.load %arg8[%c0_20, %c0_21, %c0_22] : memref<2x1x96xf32, #tpu.memory_space<vmem>>, vector<1x1x96xf32>
    %35 = vector.shape_cast %34 : vector<1x1x96xf32> to vector<1x96xf32>
    %36 = vector.broadcast %35 : vector<1x96xf32> to vector<128x96xf32>
    %37 = arith.addf %33, %36 : vector<128x96xf32>
    %38 = vector.shape_cast %37 : vector<128x96xf32> to vector<16x8x96xf32>
    %39 = vector.extract_strided_slice %38 {offsets = [0, 0, 0], sizes = [16, 8, 32], strides = [1, 1, 1]} : vector<16x8x96xf32> to vector<16x8x32xf32>
    %40 = vector.extract_strided_slice %38 {offsets = [0, 0, 32], sizes = [16, 8, 32], strides = [1, 1, 1]} : vector<16x8x96xf32> to vector<16x8x32xf32>
    %41 = vector.extract_strided_slice %38 {offsets = [0, 0, 64], sizes = [16, 8, 32], strides = [1, 1, 1]} : vector<16x8x96xf32> to vector<16x8x32xf32>
    %42 = tpu.concatenate %40, %40, %40, %40 in 1 : vector<16x8x32xf32>, vector<16x8x32xf32>, vector<16x8x32xf32>, vector<16x8x32xf32> -> vector<16x32x32xf32>
    %43 = vector.broadcast %12 : vector<1x32x32xf32> to vector<16x32x32xf32>
    %44 = arith.mulf %42, %43 : vector<16x32x32xf32>
    %45 = arith.truncf %44 : vector<16x32x32xf32> to vector<16x32x32xbf16>
    %46 = tpu.concatenate %41, %41, %41, %41 in 1 : vector<16x8x32xf32>, vector<16x8x32xf32>, vector<16x8x32xf32>, vector<16x8x32xf32> -> vector<16x32x32xf32>
    %47 = vector.broadcast %12 : vector<1x32x32xf32> to vector<16x32x32xf32>
    %48 = arith.mulf %46, %47 : vector<16x32x32xf32>
    %49 = arith.truncf %48 : vector<16x32x32xf32> to vector<16x32x32xbf16>
    %50 = arith.truncf %39 : vector<16x8x32xf32> to vector<16x8x32xbf16>
    "tpu.trace_start"() <{level = 10 : i32, message = "bqd,bkd->bqk"}> : () -> ()
    %cst_23 = arith.constant dense<0.000000e+00> : vector<16x8x32xf32>
    %51 = tpu.matmul %50, %45, %cst_23 {dimension_numbers = #tpu.dot_dimension_numbers<[2], [2], [1], [1], [0, 0, 0, 1, 1, 1], [0], [0]>} : vector<16x8x32xbf16>, vector<16x32x32xbf16>, vector<16x8x32xf32> -> vector<16x8x32xf32>
    "tpu.trace_stop"() : () -> ()
    %52 = vector.broadcast %10 : vector<1x8x32xf32> to vector<16x8x32xf32>
    %53 = arith.addf %51, %52 : vector<16x8x32xf32>
    %cst_24 = arith.constant dense<0xFF800000> : vector<16x8xf32>
    %54 = vector.multi_reduction <maximumf>, %53, %cst_24 [2] : vector<16x8x32xf32> to vector<16x8xf32>
    %55 = vector.shape_cast %54 : vector<16x8xf32> to vector<16x8x1xf32>
    %56 = vector.broadcast %55 : vector<16x8x1xf32> to vector<16x8x32xf32>
    %57 = arith.subf %53, %56 : vector<16x8x32xf32>
    %58 = math.exp %57 : vector<16x8x32xf32>
    %59 = vector.shape_cast %58 : vector<16x8x32xf32> to vector<128x32xf32>
    %cst_25 = arith.constant dense<0.000000e+00> : vector<128x32xf32>
    %60 = tpu.matmul %59, %13, %cst_25 {dimension_numbers = #tpu.dot_dimension_numbers<[1], [0], [0], [1], [0, 0, 1, 1], [], []>} : vector<128x32xf32>, vector<32x32xf32>, vector<128x32xf32> -> vector<128x32xf32>
    %61 = tpu.reciprocal %60 {approx = true} : vector<128x32xf32> -> vector<128x32xf32>
    %62 = arith.mulf %59, %61 : vector<128x32xf32>
    %63 = vector.shape_cast %62 : vector<128x32xf32> to vector<16x8x32xf32>
    %64 = arith.truncf %63 : vector<16x8x32xf32> to vector<16x8x32xbf16>
    "tpu.trace_start"() <{level = 10 : i32, message = "bqk,bkd->bqd"}> : () -> ()
    %cst_26 = arith.constant dense<0.000000e+00> : vector<16x8x32xf32>
    %65 = tpu.matmul %64, %49, %cst_26 {dimension_numbers = #tpu.dot_dimension_numbers<[2], [1], [1], [2], [0, 0, 0, 1, 1, 2], [0], [0]>} : vector<16x8x32xbf16>, vector<16x32x32xbf16>, vector<16x8x32xf32> -> vector<16x8x32xf32>
    "tpu.trace_stop"() : () -> ()
    %66 = vector.shape_cast %65 : vector<16x8x32xf32> to vector<128x32xf32>
    %67 = arith.truncf %66 : vector<128x32xf32> to vector<128x32xbf16>
    %c0_27 = arith.constant 0 : index
    %c0_28 = arith.constant 0 : index
    %c0_29 = arith.constant 0 : index
    %68 = vector.load %arg9[%c0_27, %c0_28, %c0_29] : memref<2x32x32xbf16, #tpu.memory_space<vmem>>, vector<1x32x32xbf16>
    %69 = vector.shape_cast %68 : vector<1x32x32xbf16> to vector<32x32xbf16>
    %cst_30 = arith.constant dense<0.000000e+00> : vector<128x32xf32>
    %70 = tpu.matmul %67, %69, %cst_30 {dimension_numbers = #tpu.dot_dimension_numbers<[1], [0], [0], [1], [0, 0, 1, 1], [], []>} : vector<128x32xbf16>, vector<32x32xbf16>, vector<128x32xf32> -> vector<128x32xf32>
    %c0_31 = arith.constant 0 : index
    %c0_32 = arith.constant 0 : index
    %c0_33 = arith.constant 0 : index
    %71 = vector.load %arg10[%c0_31, %c0_32, %c0_33] : memref<2x1x32xf32, #tpu.memory_space<vmem>>, vector<1x1x32xf32>
    %72 = vector.shape_cast %71 : vector<1x1x32xf32> to vector<1x32xf32>
    %73 = vector.broadcast %72 : vector<1x32xf32> to vector<128x32xf32>
    %74 = arith.addf %70, %73 : vector<128x32xf32>
    %75 = arith.addf %8, %74 : vector<128x32xf32>
    %cst_34 = arith.constant dense<0.000000e+00> : vector<128xf32>
    %76 = vector.multi_reduction <add>, %75, %cst_34 [1] : vector<128x32xf32> to vector<128xf32>
    %77 = vector.shape_cast %76 : vector<128xf32> to vector<128x1xf32>
    %cst_35 = arith.constant 3.200000e+01 : f32
    %78 = vector.broadcast %cst_35 : f32 to vector<128x1xf32>
    %79 = arith.divf %77, %78 : vector<128x1xf32>
    %80 = vector.broadcast %79 : vector<128x1xf32> to vector<128x32xf32>
    %81 = arith.subf %75, %80 : vector<128x32xf32>
    %82 = arith.mulf %81, %81 : vector<128x32xf32>
    %cst_36 = arith.constant dense<0.000000e+00> : vector<128xf32>
    %83 = vector.multi_reduction <add>, %82, %cst_36 [1] : vector<128x32xf32> to vector<128xf32>
    %84 = vector.shape_cast %83 : vector<128xf32> to vector<128x1xf32>
    %cst_37 = arith.constant 3.200000e+01 : f32
    %85 = vector.broadcast %cst_37 : f32 to vector<128x1xf32>
    %86 = arith.divf %84, %85 : vector<128x1xf32>
    %cst_38 = arith.constant 9.99999996E-13 : f32
    %87 = vector.broadcast %cst_38 : f32 to vector<128x1xf32>
    %88 = arith.addf %86, %87 : vector<128x1xf32>
    %89 = math.rsqrt %88 : vector<128x1xf32>
    %90 = vector.broadcast %89 : vector<128x1xf32> to vector<128x32xf32>
    %91 = arith.mulf %81, %90 : vector<128x32xf32>
    %92 = arith.truncf %91 : vector<128x32xf32> to vector<128x32xbf16>
    %c0_39 = arith.constant 0 : index
    %c0_40 = arith.constant 0 : index
    %c0_41 = arith.constant 0 : index
    %93 = vector.load %arg11[%c0_39, %c0_40, %c0_41] : memref<2x32x64xbf16, #tpu.memory_space<vmem>>, vector<1x32x64xbf16>
    %94 = vector.shape_cast %93 : vector<1x32x64xbf16> to vector<32x64xbf16>
    %cst_42 = arith.constant dense<0.000000e+00> : vector<128x64xf32>
    %95 = tpu.matmul %92, %94, %cst_42 {dimension_numbers = #tpu.dot_dimension_numbers<[1], [0], [0], [1], [0, 0, 1, 1], [], []>} : vector<128x32xbf16>, vector<32x64xbf16>, vector<128x64xf32> -> vector<128x64xf32>
    %c0_43 = arith.constant 0 : index
    %c0_44 = arith.constant 0 : index
    %c0_45 = arith.constant 0 : index
    %96 = vector.load %arg12[%c0_43, %c0_44, %c0_45] : memref<2x1x64xf32, #tpu.memory_space<vmem>>, vector<1x1x64xf32>
    %97 = vector.shape_cast %96 : vector<1x1x64xf32> to vector<1x64xf32>
    %98 = vector.broadcast %97 : vector<1x64xf32> to vector<128x64xf32>
    %99 = arith.addf %95, %98 : vector<128x64xf32>
    %100 = arith.mulf %99, %99 : vector<128x64xf32>
    %101 = arith.mulf %99, %100 : vector<128x64xf32>
    %cst_46 = arith.constant 4.471500e-02 : f32
    %102 = vector.broadcast %cst_46 : f32 to vector<128x64xf32>
    %103 = arith.mulf %102, %101 : vector<128x64xf32>
    %104 = arith.addf %99, %103 : vector<128x64xf32>
    %cst_47 = arith.constant 0.797884583 : f32
    %105 = vector.broadcast %cst_47 : f32 to vector<128x64xf32>
    %106 = arith.mulf %105, %104 : vector<128x64xf32>
    %107 = math.tanh %106 : vector<128x64xf32>
    %cst_48 = arith.constant 1.000000e+00 : f32
    %108 = vector.broadcast %cst_48 : f32 to vector<128x64xf32>
    %109 = arith.addf %108, %107 : vector<128x64xf32>
    %cst_49 = arith.constant 5.000000e-01 : f32
    %110 = vector.broadcast %cst_49 : f32 to vector<128x64xf32>
    %111 = arith.mulf %110, %109 : vector<128x64xf32>
    %112 = arith.mulf %99, %111 : vector<128x64xf32>
    %113 = arith.truncf %112 : vector<128x64xf32> to vector<128x64xbf16>
    %c0_50 = arith.constant 0 : index
    %c0_51 = arith.constant 0 : index
    %c0_52 = arith.constant 0 : index
    %114 = vector.load %arg13[%c0_50, %c0_51, %c0_52] : memref<2x64x32xbf16, #tpu.memory_space<vmem>>, vector<1x64x32xbf16>
    %115 = vector.shape_cast %114 : vector<1x64x32xbf16> to vector<64x32xbf16>
    %cst_53 = arith.constant dense<0.000000e+00> : vector<128x32xf32>
    %116 = tpu.matmul %113, %115, %cst_53 {dimension_numbers = #tpu.dot_dimension_numbers<[1], [0], [0], [1], [0, 0, 1, 1], [], []>} : vector<128x64xbf16>, vector<64x32xbf16>, vector<128x32xf32> -> vector<128x32xf32>
    %c0_54 = arith.constant 0 : index
    %c0_55 = arith.constant 0 : index
    %c0_56 = arith.constant 0 : index
    %117 = vector.load %arg14[%c0_54, %c0_55, %c0_56] : memref<2x1x32xf32, #tpu.memory_space<vmem>>, vector<1x1x32xf32>
    %118 = vector.shape_cast %117 : vector<1x1x32xf32> to vector<1x32xf32>
    %119 = vector.broadcast %118 : vector<1x32xf32> to vector<128x32xf32>
    %120 = arith.addf %116, %119 : vector<128x32xf32>
    %121 = arith.addf %75, %120 : vector<128x32xf32>
    %cst_57 = arith.constant dense<0.000000e+00> : vector<128xf32>
    %122 = vector.multi_reduction <add>, %121, %cst_57 [1] : vector<128x32xf32> to vector<128xf32>
    %123 = vector.shape_cast %122 : vector<128xf32> to vector<128x1xf32>
    %cst_58 = arith.constant 3.200000e+01 : f32
    %124 = vector.broadcast %cst_58 : f32 to vector<128x1xf32>
    %125 = arith.divf %123, %124 : vector<128x1xf32>
    %126 = vector.broadcast %125 : vector<128x1xf32> to vector<128x32xf32>
    %127 = arith.subf %121, %126 : vector<128x32xf32>
    %128 = arith.mulf %127, %127 : vector<128x32xf32>
    %cst_59 = arith.constant dense<0.000000e+00> : vector<128xf32>
    %129 = vector.multi_reduction <add>, %128, %cst_59 [1] : vector<128x32xf32> to vector<128xf32>
    %130 = vector.shape_cast %129 : vector<128xf32> to vector<128x1xf32>
    %cst_60 = arith.constant 3.200000e+01 : f32
    %131 = vector.broadcast %cst_60 : f32 to vector<128x1xf32>
    %132 = arith.divf %130, %131 : vector<128x1xf32>
    %cst_61 = arith.constant 9.99999996E-13 : f32
    %133 = vector.broadcast %cst_61 : f32 to vector<128x1xf32>
    %134 = arith.addf %132, %133 : vector<128x1xf32>
    %135 = math.rsqrt %134 : vector<128x1xf32>
    %136 = vector.broadcast %135 : vector<128x1xf32> to vector<128x32xf32>
    %137 = arith.mulf %127, %136 : vector<128x32xf32>
    %138 = arith.truncf %137 : vector<128x32xf32> to vector<128x32xbf16>
    %c1 = arith.constant 1 : index
    %c0_62 = arith.constant 0 : index
    %c0_63 = arith.constant 0 : index
    %139 = vector.load %arg7[%c1, %c0_62, %c0_63] : memref<2x32x96xbf16, #tpu.memory_space<vmem>>, vector<1x32x96xbf16>
    %140 = vector.shape_cast %139 : vector<1x32x96xbf16> to vector<32x96xbf16>
    %cst_64 = arith.constant dense<0.000000e+00> : vector<128x96xf32>
    %141 = tpu.matmul %138, %140, %cst_64 {dimension_numbers = #tpu.dot_dimension_numbers<[1], [0], [0], [1], [0, 0, 1, 1], [], []>} : vector<128x32xbf16>, vector<32x96xbf16>, vector<128x96xf32> -> vector<128x96xf32>
    %c1_65 = arith.constant 1 : index
    %c0_66 = arith.constant 0 : index
    %c0_67 = arith.constant 0 : index
    %142 = vector.load %arg8[%c1_65, %c0_66, %c0_67] : memref<2x1x96xf32, #tpu.memory_space<vmem>>, vector<1x1x96xf32>
    %143 = vector.shape_cast %142 : vector<1x1x96xf32> to vector<1x96xf32>
    %144 = vector.broadcast %143 : vector<1x96xf32> to vector<128x96xf32>
    %145 = arith.addf %141, %144 : vector<128x96xf32>
    %146 = vector.shape_cast %145 : vector<128x96xf32> to vector<16x8x96xf32>
    %147 = vector.extract_strided_slice %146 {offsets = [0, 0, 0], sizes = [16, 8, 32], strides = [1, 1, 1]} : vector<16x8x96xf32> to vector<16x8x32xf32>
    %148 = vector.extract_strided_slice %146 {offsets = [0, 0, 32], sizes = [16, 8, 32], strides = [1, 1, 1]} : vector<16x8x96xf32> to vector<16x8x32xf32>
    %149 = vector.extract_strided_slice %146 {offsets = [0, 0, 64], sizes = [16, 8, 32], strides = [1, 1, 1]} : vector<16x8x96xf32> to vector<16x8x32xf32>
    %150 = tpu.concatenate %148, %148, %148, %148 in 1 : vector<16x8x32xf32>, vector<16x8x32xf32>, vector<16x8x32xf32>, vector<16x8x32xf32> -> vector<16x32x32xf32>
    %151 = vector.broadcast %12 : vector<1x32x32xf32> to vector<16x32x32xf32>
    %152 = arith.mulf %150, %151 : vector<16x32x32xf32>
    %153 = arith.truncf %152 : vector<16x32x32xf32> to vector<16x32x32xbf16>
    %154 = tpu.concatenate %149, %149, %149, %149 in 1 : vector<16x8x32xf32>, vector<16x8x32xf32>, vector<16x8x32xf32>, vector<16x8x32xf32> -> vector<16x32x32xf32>
    %155 = vector.broadcast %12 : vector<1x32x32xf32> to vector<16x32x32xf32>
    %156 = arith.mulf %154, %155 : vector<16x32x32xf32>
    %157 = arith.truncf %156 : vector<16x32x32xf32> to vector<16x32x32xbf16>
    %158 = arith.truncf %147 : vector<16x8x32xf32> to vector<16x8x32xbf16>
    "tpu.trace_start"() <{level = 10 : i32, message = "bqd,bkd->bqk"}> : () -> ()
    %cst_68 = arith.constant dense<0.000000e+00> : vector<16x8x32xf32>
    %159 = tpu.matmul %158, %153, %cst_68 {dimension_numbers = #tpu.dot_dimension_numbers<[2], [2], [1], [1], [0, 0, 0, 1, 1, 1], [0], [0]>} : vector<16x8x32xbf16>, vector<16x32x32xbf16>, vector<16x8x32xf32> -> vector<16x8x32xf32>
    "tpu.trace_stop"() : () -> ()
    %160 = vector.broadcast %10 : vector<1x8x32xf32> to vector<16x8x32xf32>
    %161 = arith.addf %159, %160 : vector<16x8x32xf32>
    %cst_69 = arith.constant dense<0xFF800000> : vector<16x8xf32>
    %162 = vector.multi_reduction <maximumf>, %161, %cst_69 [2] : vector<16x8x32xf32> to vector<16x8xf32>
    %163 = vector.shape_cast %162 : vector<16x8xf32> to vector<16x8x1xf32>
    %164 = vector.broadcast %163 : vector<16x8x1xf32> to vector<16x8x32xf32>
    %165 = arith.subf %161, %164 : vector<16x8x32xf32>
    %166 = math.exp %165 : vector<16x8x32xf32>
    %167 = vector.shape_cast %166 : vector<16x8x32xf32> to vector<128x32xf32>
    %cst_70 = arith.constant dense<0.000000e+00> : vector<128x32xf32>
    %168 = tpu.matmul %167, %13, %cst_70 {dimension_numbers = #tpu.dot_dimension_numbers<[1], [0], [0], [1], [0, 0, 1, 1], [], []>} : vector<128x32xf32>, vector<32x32xf32>, vector<128x32xf32> -> vector<128x32xf32>
    %169 = tpu.reciprocal %168 {approx = true} : vector<128x32xf32> -> vector<128x32xf32>
    %170 = arith.mulf %167, %169 : vector<128x32xf32>
    %171 = vector.shape_cast %170 : vector<128x32xf32> to vector<16x8x32xf32>
    %172 = arith.truncf %171 : vector<16x8x32xf32> to vector<16x8x32xbf16>
    "tpu.trace_start"() <{level = 10 : i32, message = "bqk,bkd->bqd"}> : () -> ()
    %cst_71 = arith.constant dense<0.000000e+00> : vector<16x8x32xf32>
    %173 = tpu.matmul %172, %157, %cst_71 {dimension_numbers = #tpu.dot_dimension_numbers<[2], [1], [1], [2], [0, 0, 0, 1, 1, 2], [0], [0]>} : vector<16x8x32xbf16>, vector<16x32x32xbf16>, vector<16x8x32xf32> -> vector<16x8x32xf32>
    "tpu.trace_stop"() : () -> ()
    %174 = vector.shape_cast %173 : vector<16x8x32xf32> to vector<128x32xf32>
    %175 = arith.truncf %174 : vector<128x32xf32> to vector<128x32xbf16>
    %c1_72 = arith.constant 1 : index
    %c0_73 = arith.constant 0 : index
    %c0_74 = arith.constant 0 : index
    %176 = vector.load %arg9[%c1_72, %c0_73, %c0_74] : memref<2x32x32xbf16, #tpu.memory_space<vmem>>, vector<1x32x32xbf16>
    %177 = vector.shape_cast %176 : vector<1x32x32xbf16> to vector<32x32xbf16>
    %cst_75 = arith.constant dense<0.000000e+00> : vector<128x32xf32>
    %178 = tpu.matmul %175, %177, %cst_75 {dimension_numbers = #tpu.dot_dimension_numbers<[1], [0], [0], [1], [0, 0, 1, 1], [], []>} : vector<128x32xbf16>, vector<32x32xbf16>, vector<128x32xf32> -> vector<128x32xf32>
    %c1_76 = arith.constant 1 : index
    %c0_77 = arith.constant 0 : index
    %c0_78 = arith.constant 0 : index
    %179 = vector.load %arg10[%c1_76, %c0_77, %c0_78] : memref<2x1x32xf32, #tpu.memory_space<vmem>>, vector<1x1x32xf32>
    %180 = vector.shape_cast %179 : vector<1x1x32xf32> to vector<1x32xf32>
    %181 = vector.broadcast %180 : vector<1x32xf32> to vector<128x32xf32>
    %182 = arith.addf %178, %181 : vector<128x32xf32>
    %183 = arith.addf %121, %182 : vector<128x32xf32>
    %cst_79 = arith.constant dense<0.000000e+00> : vector<128xf32>
    %184 = vector.multi_reduction <add>, %183, %cst_79 [1] : vector<128x32xf32> to vector<128xf32>
    %185 = vector.shape_cast %184 : vector<128xf32> to vector<128x1xf32>
    %cst_80 = arith.constant 3.200000e+01 : f32
    %186 = vector.broadcast %cst_80 : f32 to vector<128x1xf32>
    %187 = arith.divf %185, %186 : vector<128x1xf32>
    %188 = vector.broadcast %187 : vector<128x1xf32> to vector<128x32xf32>
    %189 = arith.subf %183, %188 : vector<128x32xf32>
    %190 = arith.mulf %189, %189 : vector<128x32xf32>
    %cst_81 = arith.constant dense<0.000000e+00> : vector<128xf32>
    %191 = vector.multi_reduction <add>, %190, %cst_81 [1] : vector<128x32xf32> to vector<128xf32>
    %192 = vector.shape_cast %191 : vector<128xf32> to vector<128x1xf32>
    %cst_82 = arith.constant 3.200000e+01 : f32
    %193 = vector.broadcast %cst_82 : f32 to vector<128x1xf32>
    %194 = arith.divf %192, %193 : vector<128x1xf32>
    %cst_83 = arith.constant 9.99999996E-13 : f32
    %195 = vector.broadcast %cst_83 : f32 to vector<128x1xf32>
    %196 = arith.addf %194, %195 : vector<128x1xf32>
    %197 = math.rsqrt %196 : vector<128x1xf32>
    %198 = vector.broadcast %197 : vector<128x1xf32> to vector<128x32xf32>
    %199 = arith.mulf %189, %198 : vector<128x32xf32>
    %200 = arith.truncf %199 : vector<128x32xf32> to vector<128x32xbf16>
    %c1_84 = arith.constant 1 : index
    %c0_85 = arith.constant 0 : index
    %c0_86 = arith.constant 0 : index
    %201 = vector.load %arg11[%c1_84, %c0_85, %c0_86] : memref<2x32x64xbf16, #tpu.memory_space<vmem>>, vector<1x32x64xbf16>
    %202 = vector.shape_cast %201 : vector<1x32x64xbf16> to vector<32x64xbf16>
    %cst_87 = arith.constant dense<0.000000e+00> : vector<128x64xf32>
    %203 = tpu.matmul %200, %202, %cst_87 {dimension_numbers = #tpu.dot_dimension_numbers<[1], [0], [0], [1], [0, 0, 1, 1], [], []>} : vector<128x32xbf16>, vector<32x64xbf16>, vector<128x64xf32> -> vector<128x64xf32>
    %c1_88 = arith.constant 1 : index
    %c0_89 = arith.constant 0 : index
    %c0_90 = arith.constant 0 : index
    %204 = vector.load %arg12[%c1_88, %c0_89, %c0_90] : memref<2x1x64xf32, #tpu.memory_space<vmem>>, vector<1x1x64xf32>
    %205 = vector.shape_cast %204 : vector<1x1x64xf32> to vector<1x64xf32>
    %206 = vector.broadcast %205 : vector<1x64xf32> to vector<128x64xf32>
    %207 = arith.addf %203, %206 : vector<128x64xf32>
    %208 = arith.mulf %207, %207 : vector<128x64xf32>
    %209 = arith.mulf %207, %208 : vector<128x64xf32>
    %cst_91 = arith.constant 4.471500e-02 : f32
    %210 = vector.broadcast %cst_91 : f32 to vector<128x64xf32>
    %211 = arith.mulf %210, %209 : vector<128x64xf32>
    %212 = arith.addf %207, %211 : vector<128x64xf32>
    %cst_92 = arith.constant 0.797884583 : f32
    %213 = vector.broadcast %cst_92 : f32 to vector<128x64xf32>
    %214 = arith.mulf %213, %212 : vector<128x64xf32>
    %215 = math.tanh %214 : vector<128x64xf32>
    %cst_93 = arith.constant 1.000000e+00 : f32
    %216 = vector.broadcast %cst_93 : f32 to vector<128x64xf32>
    %217 = arith.addf %216, %215 : vector<128x64xf32>
    %cst_94 = arith.constant 5.000000e-01 : f32
    %218 = vector.broadcast %cst_94 : f32 to vector<128x64xf32>
    %219 = arith.mulf %218, %217 : vector<128x64xf32>
    %220 = arith.mulf %207, %219 : vector<128x64xf32>
    %221 = arith.truncf %220 : vector<128x64xf32> to vector<128x64xbf16>
    %c1_95 = arith.constant 1 : index
    %c0_96 = arith.constant 0 : index
    %c0_97 = arith.constant 0 : index
    %222 = vector.load %arg13[%c1_95, %c0_96, %c0_97] : memref<2x64x32xbf16, #tpu.memory_space<vmem>>, vector<1x64x32xbf16>
    %223 = vector.shape_cast %222 : vector<1x64x32xbf16> to vector<64x32xbf16>
    %cst_98 = arith.constant dense<0.000000e+00> : vector<128x32xf32>
    %224 = tpu.matmul %221, %223, %cst_98 {dimension_numbers = #tpu.dot_dimension_numbers<[1], [0], [0], [1], [0, 0, 1, 1], [], []>} : vector<128x64xbf16>, vector<64x32xbf16>, vector<128x32xf32> -> vector<128x32xf32>
    %c1_99 = arith.constant 1 : index
    %c0_100 = arith.constant 0 : index
    %c0_101 = arith.constant 0 : index
    %225 = vector.load %arg14[%c1_99, %c0_100, %c0_101] : memref<2x1x32xf32, #tpu.memory_space<vmem>>, vector<1x1x32xf32>
    %226 = vector.shape_cast %225 : vector<1x1x32xf32> to vector<1x32xf32>
    %227 = vector.broadcast %226 : vector<1x32xf32> to vector<128x32xf32>
    %228 = arith.addf %224, %227 : vector<128x32xf32>
    %229 = arith.addf %183, %228 : vector<128x32xf32>
    %230 = vector.shape_cast %229 : vector<128x32xf32> to vector<16x8x32xf32>
    %231 = vector.extract_strided_slice %230 {offsets = [0, 0, 0], sizes = [16, 1, 32], strides = [1, 1, 1]} : vector<16x8x32xf32> to vector<16x1x32xf32>
    %232 = vector.shape_cast %231 : vector<16x1x32xf32> to vector<16x32xf32>
    %cst_102 = arith.constant dense<0.000000e+00> : vector<16xf32>
    %233 = vector.multi_reduction <add>, %232, %cst_102 [1] : vector<16x32xf32> to vector<16xf32>
    %234 = vector.shape_cast %233 : vector<16xf32> to vector<16x1xf32>
    %cst_103 = arith.constant 3.200000e+01 : f32
    %235 = vector.broadcast %cst_103 : f32 to vector<16x1xf32>
    %236 = arith.divf %234, %235 : vector<16x1xf32>
    %237 = vector.broadcast %236 : vector<16x1xf32> to vector<16x32xf32>
    %238 = arith.subf %232, %237 : vector<16x32xf32>
    %239 = arith.mulf %238, %238 : vector<16x32xf32>
    %cst_104 = arith.constant dense<0.000000e+00> : vector<16xf32>
    %240 = vector.multi_reduction <add>, %239, %cst_104 [1] : vector<16x32xf32> to vector<16xf32>
    %241 = vector.shape_cast %240 : vector<16xf32> to vector<16x1xf32>
    %cst_105 = arith.constant 3.200000e+01 : f32
    %242 = vector.broadcast %cst_105 : f32 to vector<16x1xf32>
    %243 = arith.divf %241, %242 : vector<16x1xf32>
    %cst_106 = arith.constant 9.99999996E-13 : f32
    %244 = vector.broadcast %cst_106 : f32 to vector<16x1xf32>
    %245 = arith.addf %243, %244 : vector<16x1xf32>
    %246 = math.rsqrt %245 : vector<16x1xf32>
    %247 = vector.broadcast %246 : vector<16x1xf32> to vector<16x32xf32>
    %248 = arith.mulf %238, %247 : vector<16x32xf32>
    %249 = arith.truncf %248 : vector<16x32xf32> to vector<16x32xbf16>
    %c0_107 = arith.constant 0 : index
    %c0_108 = arith.constant 0 : index
    %250 = vector.load %arg15[%c0_107, %c0_108] : memref<32x128xbf16, #tpu.memory_space<vmem>>, vector<32x128xbf16>
    %cst_109 = arith.constant dense<0.000000e+00> : vector<16x128xf32>
    %251 = tpu.matmul %249, %250, %cst_109 {dimension_numbers = #tpu.dot_dimension_numbers<[1], [0], [0], [1], [0, 0, 1, 1], [], []>} : vector<16x32xbf16>, vector<32x128xbf16>, vector<16x128xf32> -> vector<16x128xf32>
    %c0_110 = arith.constant 0 : index
    %c0_111 = arith.constant 0 : index
    %252 = vector.load %arg16[%c0_110, %c0_111] : memref<1x128xf32, #tpu.memory_space<vmem>>, vector<1x128xf32>
    %253 = vector.broadcast %252 : vector<1x128xf32> to vector<16x128xf32>
    %254 = arith.addf %251, %253 : vector<16x128xf32>
    %c0_112 = arith.constant 0 : index
    %c0_113 = arith.constant 0 : index
    %255 = vector.load %arg17[%c0_112, %c0_113] : memref<16x128xf32, #tpu.memory_space<vmem>>, vector<16x128xf32>
    tpu.vector_store %arg17[%c0_112, %c0_113], %254 {strides = array<i32>} : memref<16x128xf32, #tpu.memory_space<vmem>>, vector<16x128xf32>,
    return
  }
  func.func @transform_0(%arg0: i32) -> (i32, i32) {
    %c0_i32 = arith.constant 0 : i32
    %c0_i32_0 = arith.constant 0 : i32
    return %arg0, %c0_i32 : i32, i32
  }
  func.func @transform_1(%arg0: i32) -> (i32, i32) {
    %c0_i32 = arith.constant 0 : i32
    %c0_i32_0 = arith.constant 0 : i32
    %c0_i32_1 = arith.constant 0 : i32
    return %c0_i32, %c0_i32_0 : i32, i32
  }
  func.func @transform_2(%arg0: i32) -> (i32, i32) {
    %c0_i32 = arith.constant 0 : i32
    %c0_i32_0 = arith.constant 0 : i32
    %c0_i32_1 = arith.constant 0 : i32
    return %c0_i32, %c0_i32_0 : i32, i32
  }
  func.func @transform_3(%arg0: i32) -> (i32, i32) {
    %c0_i32 = arith.constant 0 : i32
    %c0_i32_0 = arith.constant 0 : i32
    %c0_i32_1 = arith.constant 0 : i32
    return %c0_i32, %c0_i32_0 : i32, i32
  }
  func.func @transform_4(%arg0: i32) -> (i32, i32) {
    %c0_i32 = arith.constant 0 : i32
    %c0_i32_0 = arith.constant 0 : i32
    %c0_i32_1 = arith.constant 0 : i32
    return %c0_i32, %c0_i32_0 : i32, i32
  }
  func.func @transform_5(%arg0: i32) -> (i32, i32) {
    %c0_i32 = arith.constant 0 : i32
    %c0_i32_0 = arith.constant 0 : i32
    %c0_i32_1 = arith.constant 0 : i32
    return %c0_i32, %c0_i32_0 : i32, i32
  }
  func.func @transform_6(%arg0: i32) -> (i32, i32, i32) {
    %c0_i32 = arith.constant 0 : i32
    %c0_i32_0 = arith.constant 0 : i32
    %c0_i32_1 = arith.constant 0 : i32
    %c0_i32_2 = arith.constant 0 : i32
    return %c0_i32, %c0_i32_0, %c0_i32_1 : i32, i32, i32
  }
  func.func @transform_7(%arg0: i32) -> (i32, i32, i32) {
    %c0_i32 = arith.constant 0 : i32
    %c0_i32_0 = arith.constant 0 : i32
    %c0_i32_1 = arith.constant 0 : i32
    %c0_i32_2 = arith.constant 0 : i32
    return %c0_i32, %c0_i32_0, %c0_i32_1 : i32, i32, i32
  }
  func.func @transform_8(%arg0: i32) -> (i32, i32, i32) {
    %c0_i32 = arith.constant 0 : i32
    %c0_i32_0 = arith.constant 0 : i32
    %c0_i32_1 = arith.constant 0 : i32
    %c0_i32_2 = arith.constant 0 : i32
    return %c0_i32, %c0_i32_0, %c0_i32_1 : i32, i32, i32
  }
  func.func @transform_9(%arg0: i32) -> (i32, i32, i32) {
    %c0_i32 = arith.constant 0 : i32
    %c0_i32_0 = arith.constant 0 : i32
    %c0_i32_1 = arith.constant 0 : i32
    %c0_i32_2 = arith.constant 0 : i32
    return %c0_i32, %c0_i32_0, %c0_i32_1 : i32, i32, i32
  }
  func.func @transform_10(%arg0: i32) -> (i32, i32, i32) {
    %c0_i32 = arith.constant 0 : i32
    %c0_i32_0 = arith.constant 0 : i32
    %c0_i32_1 = arith.constant 0 : i32
    %c0_i32_2 = arith.constant 0 : i32
    return %c0_i32, %c0_i32_0, %c0_i32_1 : i32, i32, i32
  }
  func.func @transform_11(%arg0: i32) -> (i32, i32, i32) {
    %c0_i32 = arith.constant 0 : i32
    %c0_i32_0 = arith.constant 0 : i32
    %c0_i32_1 = arith.constant 0 : i32
    %c0_i32_2 = arith.constant 0 : i32
    return %c0_i32, %c0_i32_0, %c0_i32_1 : i32, i32, i32
  }
  func.func @transform_12(%arg0: i32) -> (i32, i32, i32) {
    %c0_i32 = arith.constant 0 : i32
    %c0_i32_0 = arith.constant 0 : i32
    %c0_i32_1 = arith.constant 0 : i32
    %c0_i32_2 = arith.constant 0 : i32
    return %c0_i32, %c0_i32_0, %c0_i32_1 : i32, i32, i32
  }
  func.func @transform_13(%arg0: i32) -> (i32, i32, i32) {
    %c0_i32 = arith.constant 0 : i32
    %c0_i32_0 = arith.constant 0 : i32
    %c0_i32_1 = arith.constant 0 : i32
    %c0_i32_2 = arith.constant 0 : i32
    return %c0_i32, %c0_i32_0, %c0_i32_1 : i32, i32, i32
  }
  func.func @transform_14(%arg0: i32) -> (i32, i32) {
    %c0_i32 = arith.constant 0 : i32
    %c0_i32_0 = arith.constant 0 : i32
    %c0_i32_1 = arith.constant 0 : i32
    return %c0_i32, %c0_i32_0 : i32, i32
  }
  func.func @transform_15(%arg0: i32) -> (i32, i32) {
    %c0_i32 = arith.constant 0 : i32
    %c0_i32_0 = arith.constant 0 : i32
    %c0_i32_1 = arith.constant 0 : i32
    return %c0_i32, %c0_i32_0 : i32, i32
  }
  func.func @transform_16(%arg0: i32) -> (i32, i32) {
    %c0_i32 = arith.constant 0 : i32
    %c0_i32_0 = arith.constant 0 : i32
    return %arg0, %c0_i32 : i32, i32
  }
}

</mosaic_0001>

<bundles_post_ra>
// kernel: tpu_custom_call.1
= control target key start
LH: loop header
LB: loop body
LE: loop exit
PB: predicated region body
PF: predicated region fallthrough
CT: control target
= control target key end

     0   :  { %s11417_s0 = inlined_call_operand.vmem [shape: bf16[256,192], index: 0, kind: input, shape index: {}]   ;;  %s11418_s1 = inlined_call_operand.vmem [shape: f32[8,32], index: 1, kind: input, shape index: {}]   ;;  %s11419_s2 = inlined_call_operand.vmem [shape: f32[8,32], index: 2, kind: input, shape index: {}]   ;;  %s11420_s3 = inlined_call_operand.vmem [shape: f32[32,32], index: 3, kind: input, shape index: {}]   ;;  %s11421_s4 = inlined_call_operand.vmem [shape: f32[32,32], index: 4, kind: input, shape index: {}]   ;;  %s11422_s5 = inlined_call_operand.vmem [shape: bf16[192,32], index: 5, kind: input, shape index: {}]   ;;  %s11423_s6 = inlined_call_operand.vmem [shape: bf16[2,32,96], index: 6, kind: input, shape index: {}]   ;;  %s11424_s7 = inlined_call_operand.vmem [shape: f32[2,1,96], index: 7, kind: input, shape index: {}]   ;;  %s11425_s8 = inlined_call_operand.vmem [shape: bf16[2,32,32], index: 8, kind: input, shape index: {}]   ;;  %s11426_s9 = inlined_call_operand.vmem [shape: f32[2,1,32], index: 9, kind: input, shape index: {}]   ;;  %s11427_s10 = inlined_call_operand.vmem [shape: bf16[2,32,64], index: 10, kind: input, shape index: {}]   ;;  %s11428_s11 = inlined_call_operand.vmem [shape: f32[2,1,64], index: 11, kind: input, shape index: {}]   ;;  %s11429_s12 = inlined_call_operand.vmem [shape: bf16[2,64,32], index: 12, kind: input, shape index: {}]   ;;  %s11430_s13 = inlined_call_operand.vmem [shape: f32[2,1,32], index: 13, kind: input, shape index: {}]   ;;  %s11431_s14 = inlined_call_operand.vmem [shape: bf16[32,128], index: 14, kind: input, shape index: {}]   ;;  %s11432_s15 = inlined_call_operand.vmem [shape: f32[1,128], index: 15, kind: input, shape index: {}]   ;;  %s11433_s16 = inlined_call_operand.hbm [shape: f32[32,128], index: 16, kind: output, shape index: {}]  }
   0x1   :  { %11469 = sst [smem:[#allocation26_spill]] %s11417_s0 }
   0x2   :  { %11470 = sst [smem:[#allocation27_spill]] %s11418_s1 }
   0x3   :  { %11471 = sst [smem:[#allocation28_spill]] %s11419_s2 }
   0x4   :  { %21 = vsyncpa [#allocation3], 0 }
   0x5   :  { %23 = vsyncpa [#allocation3 + $0x1], 0  ;;  %s8189_s21 = smov 0   ;;  %s8191_s22 = smov 0  }
   0x6   :  { %s8193_s23 = smov 0   ;;  %s8195_s24 = smov 0  }
   0x7 LB: > { %11472 = sst [smem:[#allocation5_spill]] %s8084_s21  ;;  %s7180_s25 = sadd.s32 4294967295, %s8096_s24   ;;  %s8096_s24 = sphi %s8195_s24, %s11560_s24   ;;  %s8092_s23 = sphi %s8193_s23, %s11562_s23   ;;  %s8088_s22 = sphi %s8191_s22, %s11564_s22   ;;  %s8084_s21 = sphi %s8189_s21, %s11563_s21  }
   0x8   : > { %11473 = sst [smem:[#allocation6_spill]] %s8092_s23  ;;  %s7181_s26 = sadd.s32 4294967294, %s8096_s24  }
   0x9   : > { %11474 = sst [smem:[#allocation7_spill]] %s8096_s24  ;;  %s8212_s27 = sadd.s32 1, %s8096_s24  }
   0xa   : > { %11475 = sst [smem:[#allocation8_spill]] %s8212_s27  ;;  %s377_s28 = sadd.s32 1, %s8092_s23 }
   0xb   : > { %s374_s29 = ssub.s32 %s8096_s24, %s8212_s27  ;;  %p387_p0 = scmp.ne.s32.totalorder %s8092_s23, %s8088_s22 }
   0xc   : > { %p375_p1 = scmp.eq.s32.totalorder %s374_s29, 0  ;;  %p388_p2 = scmp.eq.s32.totalorder %s7180_s25, 1 }
   0xd   : > { %p393_p3 = scmp.ne.s32.totalorder %s8088_s22, %s8084_s21  ;;  %p394_p4 = scmp.eq.s32.totalorder %s7181_s26, 1 }
   0xe   : > { %s8222_s30 = scalar_select %p375_p1, %s8092_s23, %s377_s28  }
   0xf   : > { %p8224_p5 = por %p388_p2, %p387_p0  ;;  %p8228_p6 = por %p394_p4, %p393_p3 }
  0x10   : > { %11476 = sst [smem:[#allocation9_spill]] %s8222_s30  ;;  %p7184_p7 = scmp.ge.s32.totalorder %s8096_s24, 1 }
  0x11   : > { %s11478_s17 = scalar_select %p8228_p6, 1, 0 }
  0x12   : > { %p467_p8 = scmp.lt.s32.totalorder %s8096_s24, 3 }
  0x13   : > { %11479 = sst [smem:[#allocation10_spill]] %s11478_s17 }
  0x14   : > { %p468_p9 = pnand %p7184_p7, %p467_p8 }
  0x16   : > { %471 = sbr.rel (%p468_p9) target bundleno = 4943 (0x134f), region = 84 }
  0x1b   : > { %v7611_v0 = vld [vmem:[%s11422_s5 + $0x38] sm:$0xff]  ;;  %s8237_s20 = sshll.u32 %s7180_s25, 4  ;;  %v7610_v1 = vld [vmem:[%s11422_s5 + $0x30] sm:$0xff]  ;;  %v7609_v4 = vld [vmem:[%s11422_s5 + $0x28] sm:$0xff]  ;;  %s11480_s25 = sld [smem:[#allocation26_spill]]  ;;  %vm711_vm0 = vcmask 523264  }
  0x1c   : > { %p519_p10 = scmp.lt.s32.totalorder %s8237_s20, 31  ;;  %736 = vmatpush.bf16.msra.mxu0 %v7611_v0  ;;  %v7615_v2 = vld [vmem:[%s11422_s5 + $0x58] sm:$0xff]  ;;  %v7614_v3 = vld [vmem:[%s11422_s5 + $0x50] sm:$0xff]  ;;  %v7613_v5 = vld [vmem:[%s11422_s5 + $0x48] sm:$0xff]  ;;  %s11481_s1 = sld [smem:[#allocation27_spill]]  ;;  %vm860_vm1 = vcmask 261120  }
  0x1d   : > { %7639 = vmatpush.bf16.msra.mxu1 %v7615_v2  ;;  %v7608_v6 = vld [vmem:[%s11422_s5 + $0x20] sm:$0xff]  ;;  %v7607_v8 = vld [vmem:[%s11422_s5 + $0x18] sm:$0xff]  ;;  %v7606_v12 = vld [vmem:[%s11422_s5 + $0x10] sm:$0xff]  ;;  %s8099_s30 = smov 32   ;;  %s8100_s17 = smov 96  }
  0x1e   : > { %s520_s19 = scalar_select %p519_p10, %s8237_s20, 31  ;;  %v7612_v7 = vld [vmem:[%s11422_s5 + $0x40] sm:$0xff]  ;;  %v7605_v13 = vld [vmem:[%s11422_s5 + $0x8] sm:$0xff] }
  0x1f   : > { %v7604_v14 = vld [vmem:[%s11422_s5] sm:$0xff]  ;;  %s11509_s2 = sld [smem:[#allocation28_spill]]  ;;  %s8101_s23 = smov 64  }
  0x20   : > { %737 = vmatpush.bf16.msra.mxu0 %v7610_v1  ;;  %s7587_s28 = sshll.u32 %s520_s19, 3  ;;  %s8054_s19 = scalar_lea.hbm %s11433_s16, 32 }
  0x21   : > { %7640 = vmatpush.bf16.msra.mxu1 %v7614_v3  ;;  %s8265_s24 = scalar_lea.vmem %s11480_s25, %s7587_s28 }
  0x22   : > { %v7590_v9 = vld [vmem:[%s8265_s24 + $0x14] sm:$0xf]  ;;  %v7201_v10 = vld [vmem:[%s8265_s24 + $0x18] sm:$0xf0]  ;;  %v7191_v15 = vld [vmem:[%s8265_s24] sm:$0xf] }
  0x23   : > { %v7204_v11 = vor.u32 %v7590_v9, %v7201_v10  ;;  %v7589_v16 = vld [vmem:[%s8265_s24 + $0x4] sm:$0xf0]  ;;  %v7592_v18 = vld [vmem:[%s8265_s24 + $0x24] sm:$0xf]  ;;  %v7209_v19 = vld [vmem:[%s8265_s24 + $0x28] sm:$0xf0] }
  0x24   : > { %738 = vmatpush.bf16.msra.mxu0 %v7609_v4  ;;  %v7192_v17 = vor.u32 %v7589_v16, %v7191_v15  ;;  %v7212_v20 = vor.u32 %v7592_v18, %v7209_v19  ;;  %v7199_v21 = vld [vmem:[%s8265_s24 + $0x10] sm:$0xf]  ;;  %v7591_v22 = vld [vmem:[%s8265_s24 + $0x14] sm:$0xf0]  ;;  %v7594_v24 = vld [vmem:[%s8265_s24 + $0x34] sm:$0xf] }
  0x25   : > { %7641 = vmatpush.bf16.msra.mxu1 %v7613_v5  ;;  %v7200_v23 = vor.u32 %v7591_v22, %v7199_v21  ;;  %v7217_v25 = vld [vmem:[%s8265_s24 + $0x38] sm:$0xf0]  ;;  %v7207_v27 = vld [vmem:[%s8265_s24 + $0x20] sm:$0xf]  ;;  %v7593_v28 = vld [vmem:[%s8265_s24 + $0x24] sm:$0xf0] }
  0x26   : > { %v7220_v26 = vor.u32 %v7594_v24, %v7217_v25  ;;  %v7208_v29 = vor.u32 %v7593_v28, %v7207_v27  ;;  %v7596_v30 = vld [vmem:[%s8265_s24 + $0x44] sm:$0xf]  ;;  %v7225_v31 = vld [vmem:[%s8265_s24 + $0x48] sm:$0xf0]  ;;  %v7215_v33 = vld [vmem:[%s8265_s24 + $0x30] sm:$0xf] }
  0x27   : > { %v7228_v32 = vor.u32 %v7596_v30, %v7225_v31  ;;  %v7595_v34 = vld [vmem:[%s8265_s24 + $0x34] sm:$0xf0]  ;;  %v7598_v36 = vld [vmem:[%s8265_s24 + $0x54] sm:$0xf]  ;;  %v7233_v37 = vld [vmem:[%s8265_s24 + $0x58] sm:$0xf0] }
  0x28   : > { %739 = vmatpush.bf16.msra.mxu0 %v7608_v6  ;;  %v7216_v35 = vor.u32 %v7595_v34, %v7215_v33  ;;  %v7236_v38 = vor.u32 %v7598_v36, %v7233_v37  ;;  %v7223_v39 = vld [vmem:[%s8265_s24 + $0x40] sm:$0xf]  ;;  %v7597_v40 = vld [vmem:[%s8265_s24 + $0x44] sm:$0xf0]  ;;  %v7600_v42 = vld [vmem:[%s8265_s24 + $0x64] sm:$0xf] }
  0x29   : > { %7642 = vmatpush.bf16.msra.mxu1 %v7612_v7  ;;  %v7224_v41 = vor.u32 %v7597_v40, %v7223_v39  ;;  %v7241_v43 = vld [vmem:[%s8265_s24 + $0x68] sm:$0xf0]  ;;  %v7231_v45 = vld [vmem:[%s8265_s24 + $0x50] sm:$0xf]  ;;  %v7599_v46 = vld [vmem:[%s8265_s24 + $0x54] sm:$0xf0] }
  0x2a   : > { %v7244_v44 = vor.u32 %v7600_v42, %v7241_v43  ;;  %v7232_v47 = vor.u32 %v7599_v46, %v7231_v45  ;;  %v7602_v48 = vld [vmem:[%s8265_s24 + $0x74] sm:$0xf]  ;;  %v7249_v49 = vld [vmem:[%s8265_s24 + $0x78] sm:$0xf0]  ;;  %v7239_v51 = vld [vmem:[%s8265_s24 + $0x60] sm:$0xf] }
  0x2b   : > { %v7252_v50 = vor.u32 %v7602_v48, %v7249_v49  ;;  %v7601_v52 = vld [vmem:[%s8265_s24 + $0x64] sm:$0xf0]  ;;  %v7247_v54 = vld [vmem:[%s8265_s24 + $0x70] sm:$0xf]  ;;  %v7603_v55 = vld [vmem:[%s8265_s24 + $0x74] sm:$0xf0] }
  0x2c   : > { %740 = vmatpush.bf16.msra.mxu0 %v7607_v8  ;;  %7302 = vmatmul.msk.bf16.vlgmr.msra.gmra.mxu1 %vm711_vm0, %v7204_v11  ;;  %v7240_v53 = vor.u32 %v7601_v52, %v7239_v51  ;;  %v7248_v56 = vor.u32 %v7603_v55, %v7247_v54  ;;  %v7588_v57 = vld [vmem:[%s8265_s24 + $0x4] sm:$0xf]  ;;  %v7193_v58 = vld [vmem:[%s8265_s24 + $0x8] sm:$0xf0]  ;;  %v8098_v30 = vmov 32.0  }
  0x2d   : > { %v7196_v59 = vor.u32 %v7588_v57, %v7193_v58  ;;  %v8322_v0 = vld [vmem:[%s11481_s1] sm:$0xff]  ;;  %7699 = vrcp.f32 %v8098_v30 }
  0x30   : > { %741 = vmatpush.bf16.msra.mxu0 %v7606_v12 }
  0x33   : > { %v7700_v31 = vpop.eup %7699 }
  0x34   : > { %742 = vmatpush.bf16.msra.mxu0 %v7605_v13  ;;  %v910_v34 = vmul.f32 32.0, %v7700_v31  ;;  %vm914_vm2 = vweird.f32 %v7700_v31 }
  0x36   : > { %v911_v37 = vsub.f32 1.0, %v910_v34 }
  0x38   : > { %743 = vmatpush.bf16.msra.mxu0 %v7604_v14 }
  0x3b   : > { %744 = vmatmul.bf16.vlgmr.msra.gmra.mxu0 %v7192_v17 }
  0x3c   : > { %789 = vmatpush.bf16.msrb.mxu0 %v7615_v2  ;;  %7303 = vmatmul.msk.bf16.gmra.mxu1 %vm711_vm0, %v7212_v20 }
  0x40   : > { %790 = vmatpush.bf16.msrb.mxu0 %v7614_v3 }
  0x44   : > { %791 = vmatpush.bf16.msrb.mxu0 %v7613_v5 }
  0x48   : > { %792 = vmatpush.bf16.msrb.mxu0 %v7612_v7 }
  0x4b   : > { %749 = vmatmul.bf16.gmra.mxu0 %v7200_v23 }
  0x4c   : > { %7304 = vmatmul.msk.bf16.gmra.mxu1 %vm711_vm0, %v7220_v26 }
  0x5b   : > { %754 = vmatmul.bf16.gmra.mxu0 %v7208_v29 }
  0x5c   : > { %7305 = vmatmul.msk.bf16.gmra.mxu1 %vm711_vm0, %v7228_v32 }
  0x6b   : > { %759 = vmatmul.bf16.gmra.mxu0 %v7216_v35 }
  0x6c   : > { %7306 = vmatmul.msk.bf16.gmra.mxu1 %vm711_vm0, %v7236_v38 }
  0x7b   : > { %764 = vmatmul.bf16.gmra.mxu0 %v7224_v41  ;;  %v912_v41 = vmul.f32 %v7700_v31, %v911_v37 }
  0x7c   : > { %7307 = vmatmul.msk.bf16.gmra.mxu1 %vm711_vm0, %v7244_v44 }
  0x7d   : > { %v913_v45 = vadd.f32 %v7700_v31, %v912_v41 }
  0x7f   : > { %v8373_v49 = vsel %vm914_vm2, %v7700_v31, %v913_v45 }
  0x80   : > { %11483 = vst [vmem:[#allocation12_spill] sm:$0xff] %v8373_v49 }
  0x8b   : > { %769 = vmatmul.bf16.gmra.mxu0 %v7232_v47 }
  0x8c   : > { %7308 = vmatmul.msk.bf16.gmra.mxu1 %vm711_vm0, %v7252_v50 }
  0x9b   : > { %774 = vmatmul.bf16.gmra.mxu0 %v7240_v53 }
  0xa9   : > { %v799_v61 = vpop.f32.mrf.mxu1 }
  0xab   : > { %779 = vmatmul.bf16.gmra.mxu0 %v7248_v56 }
  0xb1   : > { %v801_v1 = vpop.f32.mrf.mxu1 }
  0xb8   : > { %v745_v60 = vpop.f32.mrf.mxu0 }
  0xb9   : > { %v804_v7 = vpop.f32.mrf.mxu1 }
  0xbb   : > { %7301 = vmatmul.msk.bf16.vlgmr.msrb.gmra.mxu0 %vm711_vm0, %v7196_v59 }
  0xc0   : > { %v747_v62 = vpop.f32.mrf.mxu0 }
  0xc1   : > { %v806_v11 = vpop.f32.mrf.mxu1 }
  0xc8   : > { %v750_v63 = vpop.f32.mrf.mxu0 }
  0xc9   : > { %v800_v2 = vadd.f32 %v799_v61, %v750_v63  ;;  %v809_v16 = vpop.f32.mrf.mxu1 }
  0xcb   : > { %v8325_v3 = vadd.f32 %v8322_v0, %v800_v2 }
  0xcd   : > { %v867_v4 = vsel %vm860_vm1, %v8325_v3, 0.0 }
  0xce   : > { %868 = vadd.xlane.f32.xlu1 %v867_v4 }
  0xd0   : > { %v752_v5 = vpop.f32.mrf.mxu0 }
  0xd1   : > { %v802_v6 = vadd.f32 %v801_v1, %v752_v5  ;;  %v811_v38 = vpop.f32.mrf.mxu1 }
  0xd3   : > { %v8330_v8 = vadd.f32 %v8322_v0, %v802_v6 }
  0xd5   : > { %v870_v9 = vsel %vm860_vm1, %v8330_v8, 0.0 }
  0xd6   : > { %871 = vadd.xlane.f32.xlu1 %v870_v9 }
  0xd8   : > { %v755_v10 = vpop.f32.mrf.mxu0 }
  0xd9   : > { %v805_v44 = vadd.f32 %v804_v7, %v755_v10  ;;  %v814_v48 = vpop.f32.mrf.mxu1 }
  0xdb   : > { %v8371_v47 = vadd.f32 %v8322_v0, %v805_v44 }
  0xdd   : > { %v873_v53 = vsel %vm860_vm1, %v8371_v47, 0.0 }
  0xe0   : > { %v757_v12 = vpop.f32.mrf.mxu0 }
  0xe1   : > { %v807_v13 = vadd.f32 %v806_v11, %v757_v12  ;;  %v816_v55 = vpop.f32.mrf.mxu1 }
  0xe3   : > { %v8335_v14 = vadd.f32 %v8322_v0, %v807_v13 }
  0xe5   : > { %v876_v15 = vsel %vm860_vm1, %v8335_v14, 0.0 }
  0xe6   : > { %877 = vadd.xlane.f32.xlu1 %v876_v15 }
  0xe8   : > { %v760_v17 = vpop.f32.mrf.mxu0 }
  0xe9   : > { %v810_v18 = vadd.f32 %v809_v16, %v760_v17 }
  0xeb   : > { %v8340_v19 = vadd.f32 %v8322_v0, %v810_v18 }
  0xed   : > { %11482 = vst [vmem:[#allocation11_spill] sm:$0xff] %v8340_v19  ;;  %v879_v20 = vsel %vm860_vm1, %v8340_v19, 0.0 }
  0xee   : > { %880 = vadd.xlane.f32.xlu1 %v879_v20 }
  0xf0   : > { %v8344_v21 = vpop.f32.mrf.mxu0 }
  0xf8   : > { %v8346_v22 = vpop.f32.mrf.mxu0 }
 0x100   : > { %v8348_v23 = vpop.f32.mrf.mxu0 }
 0x101   : > { %v817_v34 = vadd.f32 %v816_v55, %v8348_v23 }
 0x108   : > { %v770_v24 = vpop.f32.mrf.mxu0 }
 0x110   : > { %v8350_v25 = vpop.f32.mrf.mxu0 }
 0x118   : > { %v8352_v26 = vpop.f32.mrf.mxu0 }
 0x120   : > { %v8354_v27 = vpop.f32.mrf.mxu0 }
 0x128   : > { %v8356_v28 = vpop.f32.mrf.mxu0 }
 0x130   : > { %v8358_v29 = vpop.f32.mrf.mxu0 }
 0x138   : > { %v794_v32 = vpop.f32.mrf.mxu0 }
 0x139   : > { %v795_v33 = vadd.f32 %v794_v32, %v745_v60  ;;  %v819_v60 = vpop.f32.mrf.mxu1 }
 0x13b   : > { %v8361_v35 = vadd.f32 %v8322_v0, %v795_v33  ;;  %v812_v33 = vadd.f32 %v811_v38, %v8344_v21  ;;  %v815_v21 = vadd.f32 %v814_v48, %v8346_v22 }
 0x13d   : > { %v861_v36 = vsel %vm860_vm1, %v8361_v35, 0.0  ;;  %v8427_v41 = vadd.f32 %v8322_v0, %v812_v33 }
 0x13e   : > { %862 = vadd.xlane.f32.xlu0 %v861_v36 }
 0x13f   : > { %11485 = vst [vmem:[#allocation14_spill] sm:$0xff] %v8427_v41  ;;  %v882_v38 = vsel %vm860_vm1, %v8427_v41, 0.0 }
 0x140   : > { %v796_v39 = vpop.f32.mrf.mxu0 }
 0x141   : > { %v797_v40 = vadd.f32 %v796_v39, %v747_v62  ;;  %v869_v42 = vpop.xlane.xlu1 %868  ;;  %v820_v62 = vadd.f32 %v819_v60, %v770_v24  ;;  %v821_v16 = vpop.f32.mrf.mxu1 }
 0x142   : > { %v918_v12 = vmul.f32 %v8373_v49, %v869_v42  ;;  %v8430_v42 = vadd.f32 %v8322_v0, %v817_v34  ;;  %v822_v22 = vadd.f32 %v821_v16, %v8350_v25 }
 0x143   : > { %v8366_v43 = vadd.f32 %v8322_v0, %v797_v40  ;;  %v8392_v1 = vadd.f32 %v8322_v0, %v820_v62 }
 0x144   : > { %v8411_v17 = vsub.f32 %v8325_v3, %v918_v12  ;;  %11486 = vst [vmem:[#allocation15_spill] sm:$0xff] %v8430_v42  ;;  %v888_v45 = vsel %vm860_vm1, %v8430_v42, 0.0  ;;  %v8452_v55 = vadd.f32 %v8322_v0, %v822_v22 }
 0x145   : > { %v864_v46 = vsel %vm860_vm1, %v8366_v43, 0.0  ;;  %11484 = vst [vmem:[#allocation13_spill] sm:$0xff] %v8392_v1  ;;  %v891_v2 = vsel %vm860_vm1, %v8392_v1, 0.0 }
 0x146   : > { %865 = vadd.xlane.f32.xlu0 %v864_v46  ;;  %v950_v31 = vmul.f32 %v8411_v17, %v8411_v17  ;;  %11488 = vst [vmem:[#allocation17_spill] sm:$0xff] %v8452_v55 }
 0x148   : > { %v970_v36 = vsel %vm860_vm1, %v950_v31, 0.0 }
 0x149   : > { %v872_v50 = vpop.xlane.xlu1 %871  ;;  %v824_v39 = vpop.f32.mrf.mxu1 }
 0x14a   : > { %v919_v51 = vmul.f32 %v8373_v49, %v872_v50  ;;  %v8442_v50 = vadd.f32 %v8322_v0, %v815_v21 }
 0x14c   : > { %v8377_v52 = vsub.f32 %v8330_v8, %v919_v51  ;;  %11487 = vst [vmem:[#allocation16_spill] sm:$0xff] %v8442_v50 }
 0x14e   : > { %874 = vadd.xlane.f32.xlu0 %v873_v53  ;;  %v951_v54 = vmul.f32 %v8377_v52, %v8377_v52  ;;  %v885_v53 = vsel %vm860_vm1, %v8442_v50, 0.0 }
 0x150   : > { %v973_v56 = vsel %vm860_vm1, %v951_v54, 0.0 }
 0x151   : > { %v826_v46 = vpop.f32.mrf.mxu1 }
 0x152   : > { %v827_v48 = vadd.f32 %v826_v46, %v8354_v27  ;;  %v894_v27 = vsel %vm860_vm1, %v8452_v55, 0.0 }
 0x156   : > { %974 = vadd.xlane.f32.xlu0 %v973_v56  ;;  %v8455_v56 = vadd.f32 %v8322_v0, %v827_v48 }
 0x158   : > { %11489 = vst [vmem:[#allocation18_spill] sm:$0xff] %v8455_v56  ;;  %v900_v60 = vsel %vm860_vm1, %v8455_v56, 0.0 }
 0x159   : > { %v878_v57 = vpop.xlane.xlu1 %877 }
 0x15a   : > { %v921_v58 = vmul.f32 %v8373_v49, %v878_v57  ;;  %v829_v57 = vpop.f32.mrf.mxu1 }
 0x15b   : > { %v830_v25 = vadd.f32 %v829_v57, %v8356_v28 }
 0x15c   : > { %v8386_v59 = vsub.f32 %v8335_v14, %v921_v58  ;;  %v825_v58 = vadd.f32 %v824_v39, %v8352_v26 }
 0x15d   : > { %v8467_v62 = vadd.f32 %v8322_v0, %v830_v25 }
 0x15e   : > { %v953_v61 = vmul.f32 %v8386_v59, %v8386_v59 }
 0x15f   : > { %11491 = vst [vmem:[#allocation20_spill] sm:$0xff] %v8467_v62  ;;  %v903_v26 = vsel %vm860_vm1, %v8467_v62, 0.0 }
 0x160   : > { %v979_v63 = vsel %vm860_vm1, %v953_v61, 0.0  ;;  %v8464_v61 = vadd.f32 %v8322_v0, %v825_v58 }
 0x161   : > { %980 = vadd.xlane.f32.xlu1 %v979_v63  ;;  %v881_v40 = vpop.xlane.xlu1 %880 }
 0x162   : > { %v922_v44 = vmul.f32 %v8373_v49, %v881_v40  ;;  %11490 = vst [vmem:[#allocation19_spill] sm:$0xff] %v8464_v61  ;;  %v897_v63 = vsel %vm860_vm1, %v8464_v61, 0.0 }
 0x164   : > { %v8435_v23 = vsub.f32 %v8340_v19, %v922_v44 }
 0x166   : > { %v954_v51 = vmul.f32 %v8435_v23, %v8435_v23 }
 0x168   : > { %v982_v54 = vsel %vm860_vm1, %v954_v51, 0.0 }
 0x169   : > { %892 = vadd.xlane.f32.xlu1 %v891_v2  ;;  %v7617_v2 = vld [vmem:[%s11423_s6 + $0x8] sm:$0xff] }
 0x16a   : > { %1278 = vmatpush.bf16.msra.mxu0 %v7617_v2  ;;  %7643 = vmatpush.bf16.msra.mxu2 %v7617_v2 }
 0x1b1   : > { %v863_v4 = vpop.xlane.xlu0 %862 }
 0x1b2   : > { %v916_v5 = vmul.f32 %v8373_v49, %v863_v4 }
 0x1b4   : > { %v8398_v6 = vsub.f32 %v8361_v35, %v916_v5  ;;  %v7616_v5 = vld [vmem:[%s11423_s6] sm:$0xff] }
 0x1b5   : > { %1279 = vmatpush.bf16.msra.mxu0 %v7616_v5  ;;  %7644 = vmatpush.bf16.msra.mxu2 %v7616_v5 }
 0x1b6   : > { %v948_v7 = vmul.f32 %v8398_v6, %v8398_v6 }
 0x1b8   : > { %v964_v9 = vsel %vm860_vm1, %v948_v7, 0.0 }
 0x1b9   : > { %965 = vadd.xlane.f32.xlu2 %v964_v9  ;;  %v866_v10 = vpop.xlane.xlu0 %865 }
 0x1ba   : > { %v917_v11 = vmul.f32 %v8373_v49, %v866_v10 }
 0x1bc   : > { %v8406_v13 = vsub.f32 %v8366_v43, %v917_v11 }
 0x1be   : > { %v949_v15 = vmul.f32 %v8406_v13, %v8406_v13 }
 0x1c0   : > { %v967_v18 = vsel %vm860_vm1, %v949_v15, 0.0 }
 0x1c1   : > { %968 = vadd.xlane.f32.xlu2 %v967_v18  ;;  %v875_v20 = vpop.xlane.xlu0 %874 }
 0x1c2   : > { %v920_v24 = vmul.f32 %v8373_v49, %v875_v20 }
 0x1c4   : > { %v8416_v30 = vsub.f32 %v8371_v47, %v920_v24 }
 0x1c6   : > { %v952_v32 = vmul.f32 %v8416_v30, %v8416_v30 }
 0x1c8   : > { %v976_v37 = vsel %vm860_vm1, %v952_v32, 0.0 }
 0x1c9   : > { %971 = vadd.xlane.f32.xlu2 %v970_v36  ;;  %977 = vadd.xlane.f32.xlu0 %v976_v37  ;;  %v975_v28 = vpop.xlane.xlu0 %974 }
 0x1ca   : > { %v1015_v4 = vmul.f32 %v975_v28, %v8373_v49 }
 0x1cc   : > { %v8481_v10 = vadd.f32 1e-12, %v1015_v4 }
 0x1ce   : > { %vm1080_vm10 = vweird.f32 %v8481_v10 }
 0x1d1   : > { %883 = vadd.xlane.f32.xlu2 %v882_v38  ;;  %889 = vadd.xlane.f32.xlu0 %v888_v45 }
 0x1d4   : > { %v981_v24 = vpop.xlane.xlu1 %980 }
 0x1d5   : > { %v1017_v34 = vmul.f32 %v981_v24, %v8373_v49 }
 0x1d7   : > { %v8493_v45 = vadd.f32 1e-12, %v1017_v34 }
 0x1d9   : > { %886 = vadd.xlane.f32.xlu2 %v885_v53  ;;  %983 = vadd.xlane.f32.xlu0 %v982_v54 }
 0x1dc   : > { %v893_v57 = vpop.xlane.xlu1 %892 }
 0x1dd   : > { %v926_v28 = vmul.f32 %v8373_v49, %v893_v57 }
 0x1e1   : > { %895 = vadd.xlane.f32.xlu2 %v894_v27  ;;  %901 = vadd.xlane.f32.xlu0 %v900_v60 }
 0x1e9   : > { %898 = vadd.xlane.f32.xlu2 %v897_v63  ;;  %904 = vadd.xlane.f32.xlu0 %v903_v26 }
 0x22c   : > { %v966_v7 = vpop.xlane.xlu2 %965 }
 0x22d   : > { %v1012_v9 = vmul.f32 %v966_v7, %v8373_v49 }
 0x22f   : > { %v1028_v11 = vadd.f32 1e-12, %v1012_v9 }
 0x231   : > { %7701 = vrsqrt.f32 %v1028_v11  ;;  %vm1050_vm4 = vweird.f32 %v1028_v11 }
 0x232   : > { %7703 = vrsqrt.f32 %v8481_v10 }
 0x234   : > { %v969_v12 = vpop.xlane.xlu2 %968 }
 0x235   : > { %v1013_v15 = vmul.f32 %v969_v12, %v8373_v49 }
 0x237   : > { %v7702_v16 = vpop.eup %7701  ;;  %v1029_v18 = vadd.f32 1e-12, %v1013_v15 }
 0x238   : > { %v8485_v20 = vpop.eup %7703  ;;  %v1045_v31 = vmul.f32 %v7702_v16, %v1028_v11  ;;  %vm1051_vm3 = vweird.f32 %v7702_v16 }
 0x239   : > { %7705 = vrsqrt.f32 %v1029_v18  ;;  %v1075_v33 = vmul.f32 %v8485_v20, %v8481_v10  ;;  %vm8505_vm6 = vmor %vm1050_vm4, %vm1051_vm3  ;;  %vm1060_vm7 = vweird.f32 %v1029_v18  ;;  %vm1081_vm9 = vweird.f32 %v8485_v20 }
 0x23a   : > { %v1046_v32 = vmul.f32 %v7702_v16, %v1045_v31  ;;  %vm8542_vm12 = vmor %vm1080_vm10, %vm1081_vm9 }
 0x23b   : > { %v1076_v38 = vmul.f32 %v8485_v20, %v1075_v33 }
 0x23c   : > { %v1047_v36 = vmul.f32 0.5, %v1046_v32  ;;  %v972_v37 = vpop.xlane.xlu2 %971  ;;  %v978_v39 = vpop.xlane.xlu0 %977 }
 0x23d   : > { %v1014_v40 = vmul.f32 %v972_v37, %v8373_v49  ;;  %v1016_v44 = vmul.f32 %v978_v39, %v8373_v49  ;;  %v1077_v54 = vmul.f32 0.5, %v1076_v38 }
 0x23e   : > { %v1048_v22 = vsub.f32 1.5, %v1047_v36  ;;  %v8527_v36 = vsub.f32 %v8392_v1, %v926_v28 }
 0x23f   : > { %v7706_v21 = vpop.eup %7705  ;;  %v8495_v46 = vadd.f32 1e-12, %v1014_v40  ;;  %v8497_v51 = vadd.f32 1e-12, %v1016_v44  ;;  %v1078_v5 = vsub.f32 1.5, %v1077_v54 }
 0x240   : > { %v1055_v48 = vmul.f32 %v7706_v21, %v1029_v18  ;;  %v1049_v58 = vmul.f32 %v7702_v16, %v1048_v22  ;;  %vm1061_vm5 = vweird.f32 %v7706_v21 }
 0x241   : > { %7707 = vrsqrt.f32 %v8495_v46  ;;  %vm1062_vm8 = vmor %vm1060_vm7, %vm1061_vm5  ;;  %vm1070_vm13 = vweird.f32 %v8495_v46  ;;  %vm1090_vm3 = vweird.f32 %v8497_v51  ;;  %vm1100_vm5 = vweird.f32 %v8493_v45 }
 0x242   : > { %v1056_v53 = vmul.f32 %v7706_v21, %v1055_v48  ;;  %7709 = vrsqrt.f32 %v8497_v51  ;;  %v1053_v24 = vsel %vm8505_vm6, %v7702_v16, %v1049_v58  ;;  %v831_v58 = vpop.f32.mrf.mxu1 }
 0x243   : > { %7711 = vrsqrt.f32 %v8493_v45  ;;  %v1204_v18 = vmul.f32 %v1053_v24, %v8398_v6 }
 0x244   : > { %v1057_v25 = vmul.f32 0.5, %v1056_v53  ;;  %v884_v27 = vpop.xlane.xlu2 %883  ;;  %v890_v60 = vpop.xlane.xlu0 %889  ;;  %v1079_v53 = vmul.f32 %v8485_v20, %v1078_v5 }
 0x245   : > { %v923_v63 = vmul.f32 %v8373_v49, %v884_v27  ;;  %v925_v26 = vmul.f32 %v8373_v49, %v890_v60  ;;  %v958_v60 = vmul.f32 %v8527_v36, %v8527_v36 }
 0x246   : > { %v1058_v2 = vsub.f32 1.5, %v1057_v25 }
 0x247   : > { %v7708_v4 = vpop.eup %7707  ;;  %v8510_v9 = vsub.f32 %v8427_v41, %v923_v63  ;;  %v8513_v12 = vsub.f32 %v8430_v42, %v925_v26  ;;  %v1083_v26 = vsel %vm8542_vm12, %v8485_v20, %v1079_v53 }
 0x248   : > { %v8515_v15 = vpop.eup %7709  ;;  %v1059_v11 = vmul.f32 %v7706_v21, %v1058_v2  ;;  %v1065_v31 = vmul.f32 %v7708_v4, %v8495_v46  ;;  %vm1071_vm11 = vweird.f32 %v7708_v4  ;;  %v832_v2 = vadd.f32 %v831_v58, %v8358_v29 }
 0x249   : > { %v8520_v32 = vpop.eup %7711  ;;  %v955_v33 = vmul.f32 %v8510_v9, %v8510_v9  ;;  %v957_v34 = vmul.f32 %v8513_v12, %v8513_v12  ;;  %v1085_v16 = vmul.f32 %v8515_v15, %v8497_v51  ;;  %vm1072_vm14 = vmor %vm1070_vm13, %vm1071_vm11  ;;  %vm1091_vm15 = vweird.f32 %v8515_v15 }
 0x24a   : > { %v1063_v37 = vsel %vm1062_vm8, %v7706_v21, %v1059_v11  ;;  %v1066_v39 = vmul.f32 %v7708_v4, %v1065_v31  ;;  %v1095_v22 = vmul.f32 %v8520_v32, %v8493_v45  ;;  %v994_v31 = vsel %vm860_vm1, %v958_v60, 0.0  ;;  %vm1092_vm4 = vmor %vm1090_vm3, %vm1091_vm15  ;;  %v854_v60 = vld [vmem:[%s11420_s3 + $0x10] sm:$0xff] }
 0x24b   : > { %v1205_v40 = vmul.f32 %v1063_v37, %v8406_v13  ;;  %v985_v44 = vsel %vm860_vm1, %v955_v33, 0.0  ;;  %v991_v38 = vsel %vm860_vm1, %v957_v34, 0.0  ;;  %v1086_v57 = vmul.f32 %v8515_v15, %v1085_v16 }
 0x24c   : > { %v1067_v48 = vmul.f32 0.5, %v1066_v39  ;;  %986 = vadd.xlane.f32.xlu1 %v985_v44  ;;  %v887_v21 = vpop.xlane.xlu2 %886  ;;  %992 = vadd.xlane.f32.xlu2 %v991_v38  ;;  %v1096_v63 = vmul.f32 %v8520_v32, %v1095_v22  ;;  %v8560_v7 = vpop.xlane.xlu0 %983  ;;  %v1207_v33 = vmul.f32 %v1083_v26, %v8377_v52  ;;  %v8568_v16 = vadd.f32 %v8322_v0, %v832_v2 }
 0x24d   : > { %v924_v54 = vmul.f32 %v8373_v49, %v887_v21  ;;  %v1220_v6 = vpack.c.bf16 %v1205_v40, %v1204_v18  ;;  %v1087_v5 = vmul.f32 0.5, %v1086_v57  ;;  %vm1101_vm2 = vweird.f32 %v8520_v32 }
 0x24e   : > { %v1068_v13 = vsub.f32 1.5, %v1067_v48  ;;  %v1097_v34 = vmul.f32 0.5, %v1096_v63  ;;  %11496 = vst [vmem:[#allocation21_spill] sm:$0xff] %v8568_v16  ;;  %v906_v40 = vsel %vm860_vm1, %v8568_v16, 0.0  ;;  %vm1102_vm6 = vmor %vm1100_vm5, %vm1101_vm2  ;;  %v852_v63 = vld [vmem:[%s11420_s3] sm:$0xff] }
 0x24f   : > { %v8547_v27 = vsub.f32 %v8442_v50, %v924_v54  ;;  %7317 = vmatmul.msk.bf16.vlgmr.msra.gmra.mxu0 %vm860_vm1, %v1220_v6  ;;  %v1088_v29 = vsub.f32 1.5, %v1087_v5 }
 0x250   : > { %v1069_v10 = vmul.f32 %v7708_v4, %v1068_v13  ;;  %v1098_v18 = vsub.f32 1.5, %v1097_v34 }
 0x251   : > { %v956_v28 = vmul.f32 %v8547_v27, %v8547_v27 }
 0x252   : > { %v1073_v24 = vsel %vm1072_vm14, %v7708_v4, %v1069_v10  ;;  %v1099_v22 = vmul.f32 %v8520_v32, %v1098_v18 }
 0x253   : > { %v988_v11 = vsel %vm860_vm1, %v956_v28, 0.0  ;;  %v1206_v46 = vmul.f32 %v1073_v24, %v8411_v17  ;;  %v1089_v17 = vmul.f32 %v8515_v15, %v1088_v29  ;;  %v1018_v24 = vmul.f32 %v8560_v7, %v8373_v49 }
 0x254   : > { %989 = vadd.xlane.f32.xlu1 %v988_v11  ;;  %v896_v20 = vpop.xlane.xlu2 %895  ;;  %995 = vadd.xlane.f32.xlu2 %v994_v31  ;;  %v902_v0 = vpop.xlane.xlu0 %901  ;;  %v1103_v51 = vsel %vm1102_vm6, %v8520_v32, %v1099_v22  ;;  %v855_v32 = vld [vmem:[%s11420_s3 + $0x18] sm:$0xff] }
 0x255   : > { %v927_v37 = vmul.f32 %v8373_v49, %v896_v20  ;;  %v1221_v39 = vpack.c.bf16 %v1207_v33, %v1206_v46  ;;  %v1093_v21 = vsel %vm1092_vm4, %v8515_v15, %v1089_v17  ;;  %v929_v53 = vmul.f32 %v8373_v49, %v902_v0 }
 0x256   : > { %v1208_v13 = vmul.f32 %v1093_v21, %v8416_v30  ;;  %v1209_v15 = vmul.f32 %v1103_v51, %v8386_v59  ;;  %v853_v59 = vld [vmem:[%s11420_s3 + $0x8] sm:$0xff]  ;;  %v1034_v11 = vadd.f32 1e-12, %v1018_v24 }
 0x257   : > { %v8571_v4 = vsub.f32 %v8452_v55, %v927_v37  ;;  %7318 = vmatmul.msk.bf16.vlgmr.msra.gmra.mxu2 %vm860_vm1, %v1221_v39  ;;  %v8596_v57 = vsub.f32 %v8455_v56, %v929_v53 }
 0x258   : > { %v1222_v58 = vpack.c.bf16 %v1209_v15, %v1208_v13  ;;  %7713 = vrsqrt.f32 %v1034_v11  ;;  %vm1110_vm8 = vweird.f32 %v1034_v11 }
 0x259   : > { %v959_v52 = vmul.f32 %v8571_v4, %v8571_v4  ;;  %v961_v25 = vmul.f32 %v8596_v57, %v8596_v57 }
 0x25b   : > { %v997_v44 = vsel %vm860_vm1, %v959_v52, 0.0  ;;  %v1003_v30 = vsel %vm860_vm1, %v961_v25, 0.0 }
 0x25c   : > { %907 = vadd.xlane.f32.xlu1 %v906_v40  ;;  %v899_v38 = vpop.xlane.xlu2 %898  ;;  %998 = vadd.xlane.f32.xlu0 %v997_v44  ;;  %v905_v10 = vpop.xlane.xlu0 %904 }
 0x25d   : > { %v928_v48 = vmul.f32 %v8373_v49, %v899_v38  ;;  %v930_v26 = vmul.f32 %v8373_v49, %v905_v10 }
 0x25e   : > { %v7714_v31 = vpop.eup %7713 }
 0x25f   : > { %v8589_v54 = vsub.f32 %v8464_v61, %v928_v48  ;;  %v8618_v28 = vsub.f32 %v8467_v62, %v930_v26  ;;  %v1105_v46 = vmul.f32 %v7714_v31, %v1034_v11  ;;  %vm1111_vm7 = vweird.f32 %v7714_v31 }
 0x260   : > { %vm8640_vm9 = vmor %vm1110_vm8, %vm1111_vm7 }
 0x261   : > { %v960_v6 = vmul.f32 %v8589_v54, %v8589_v54  ;;  %v962_v2 = vmul.f32 %v8618_v28, %v8618_v28  ;;  %v1106_v29 = vmul.f32 %v7714_v31, %v1105_v46 }
 0x263   : > { %v1000_v45 = vsel %vm860_vm1, %v960_v6, 0.0  ;;  %v1006_v5 = vsel %vm860_vm1, %v962_v2, 0.0  ;;  %v1107_v52 = vmul.f32 0.5, %v1106_v29 }
 0x264   : > { %1001 = vadd.xlane.f32.xlu0 %v1000_v45 }
 0x265   : > { %v1108_v38 = vsub.f32 1.5, %v1107_v52 }
 0x267   : > { %7319 = vmatmul.msk.bf16.gmra.mxu2 %vm860_vm1, %v1222_v58  ;;  %v1109_v13 = vmul.f32 %v7714_v31, %v1108_v38 }
 0x269   : > { %v1113_v2 = vsel %vm8640_vm9, %v7714_v31, %v1109_v13 }
 0x26a   : > { %v1210_v31 = vmul.f32 %v1113_v2, %v8435_v23 }
 0x26c   : > { %1004 = vadd.xlane.f32.xlu0 %v1003_v30  ;;  %1331 = vrot.lane.b32.xlu2 %v855_v32, %s8099_s30 }
 0x274   : > { %1327 = vrot.lane.b32.xlu2 %v853_v59, %s8099_s30 }
 0x275   : > { %1329 = vrot.lane.b32.xlu1 %v854_v60, %s8099_s30 }
 0x280   : > { %1325 = vrot.lane.b32.xlu0 %v852_v63, %s8099_s30  ;;  %s7115_s30 = scalar_lea.hbm %s11433_s16, %s8237_s20 }
 0x281   : > { %s7118_s27 = sshll.u32 %s7115_s30, 4  ;;  %s7119_s27 = int_to_ptr.hbm [resolvable:$true] %s7118_s27 }
 0x282   : > { %s8048_s29 = sshra.s32 %s7119_s27, 4  ;;  %s8049_s29 = int_to_ptr.hbm [resolvable:$true] %s8048_s29 }
 0x283   : > { %s8050_s24 = scalar_lea.hbm %s8049_s29, 16  ;;  %p8055_p0 = scmp.lt.s32.totalorder %s8049_s29, %s11433_s16 }
 0x284   : > { %p8051_p11 = scmp.ne.s32.totalorder %s8049_s29, %s8050_s24  ;;  %p8056_p1 = scmp.lt.s32.totalorder %s8054_s19, %s8050_s24 }
 0x286   : > { %p8052_p12 = pnand %p8051_p11, %p8224_p5  ;;  %p8057_p2 = por %p8056_p1, %p8055_p0 }
 0x288   : > { %p8053_p13 = pneg %p8052_p12 }
 0x28a   : > { %p8058_p3 = pnand %p8057_p2, %p8053_p13 }
 0x29f   : > { %1007 = vadd.xlane.f32.xlu1 %v1006_v5 }
 0x2bf   : > { %v987_v33 = vpop.xlane.xlu1 %986  ;;  %v993_v34 = vpop.xlane.xlu2 %992 }
 0x2c0   : > { %v1019_v20 = vmul.f32 %v987_v33, %v8373_v49  ;;  %v1021_v37 = vmul.f32 %v993_v34, %v8373_v49 }
 0x2c2   : > { %v1035_v39 = vadd.f32 1e-12, %v1019_v20  ;;  %v8627_v18 = vadd.f32 1e-12, %v1021_v37 }
 0x2c4   : > { %7715 = vrsqrt.f32 %v1035_v39  ;;  %vm1120_vm11 = vweird.f32 %v1035_v39  ;;  %vm1140_vm3 = vweird.f32 %v8627_v18 }
 0x2c5   : > { %7717 = vrsqrt.f32 %v8627_v18 }
 0x2c7   : > { %v990_v17 = vpop.xlane.xlu1 %989  ;;  %v996_v40 = vpop.xlane.xlu2 %995 }
 0x2c8   : > { %v1020_v7 = vmul.f32 %v990_v17, %v8373_v49  ;;  %v1022_v48 = vmul.f32 %v996_v40, %v8373_v49 }
 0x2ca   : > { %v7716_v44 = vpop.eup %7715  ;;  %v1036_v0 = vadd.f32 1e-12, %v1020_v7  ;;  %v8636_v15 = vadd.f32 1e-12, %v1022_v48 }
 0x2cb   : > { %v1115_v22 = vmul.f32 %v7716_v44, %v1035_v39  ;;  %v8632_v21 = vpop.eup %7717  ;;  %vm1121_vm10 = vweird.f32 %v7716_v44 }
 0x2cc   : > { %7719 = vrsqrt.f32 %v1036_v0  ;;  %v1135_v45 = vmul.f32 %v8632_v21, %v8627_v18  ;;  %vm1122_vm12 = vmor %vm1120_vm11, %vm1121_vm10  ;;  %v1281_v37 = vpop.f32.mrf.mxu0  ;;  %vm1141_vm14 = vweird.f32 %v8632_v21  ;;  %vm1130_vm15 = vweird.f32 %v1036_v0 }
 0x2cd   : > { %v1116_v53 = vmul.f32 %v7716_v44, %v1115_v22  ;;  %7721 = vrsqrt.f32 %v8636_v15  ;;  %vm1142_vm4 = vmor %vm1140_vm3, %vm1141_vm14  ;;  %vm1150_vm5 = vweird.f32 %v8636_v15 }
 0x2ce   : > { %v1136_v24 = vmul.f32 %v8632_v21, %v1135_v45 }
 0x2cf   : > { %v1117_v51 = vmul.f32 0.5, %v1116_v53  ;;  %v908_v6 = vpop.xlane.xlu1 %907  ;;  %v999_v25 = vpop.xlane.xlu0 %998 }
 0x2d0   : > { %v931_v58 = vmul.f32 %v8373_v49, %v908_v6  ;;  %v1023_v30 = vmul.f32 %v999_v25, %v8373_v49  ;;  %v1137_v29 = vmul.f32 0.5, %v1136_v24  ;;  %v8669_v23 = vpop.permute.xlu2 %1331 }
 0x2d1   : > { %v1118_v32 = vsub.f32 1.5, %v1117_v51  ;;  %11499 = vst [vmem:[#allocation22_spill] sm:$0xff] %v8669_v23 }
 0x2d2   : > { %v7720_v59 = vpop.eup %7719  ;;  %v8645_v63 = vsub.f32 %v8568_v16, %v931_v58  ;;  %v8647_v26 = vadd.f32 1e-12, %v1023_v30  ;;  %v1138_v48 = vsub.f32 1.5, %v1137_v29 }
 0x2d3   : > { %v1125_v10 = vmul.f32 %v7720_v59, %v1036_v0  ;;  %v1119_v5 = vmul.f32 %v7716_v44, %v1118_v32  ;;  %v8659_v7 = vpop.eup %7721  ;;  %vm1131_vm13 = vweird.f32 %v7720_v59 }
 0x2d4   : > { %v963_v11 = vmul.f32 %v8645_v63, %v8645_v63  ;;  %7723 = vrsqrt.f32 %v8647_v26  ;;  %v1139_v58 = vmul.f32 %v8632_v21, %v1138_v48  ;;  %vm8681_vm2 = vmor %vm1130_vm15, %vm1131_vm13  ;;  %v1283_v60 = vpop.f32.mrf.mxu0  ;;  %vm1151_vm6 = vweird.f32 %v8659_v7 }
 0x2d5   : > { %v1126_v46 = vmul.f32 %v7720_v59, %v1125_v10  ;;  %v1123_v34 = vsel %vm1122_vm12, %v7716_v44, %v1119_v5  ;;  %v8667_v44 = vld [vmem:[%s11424_s7] ss:$0 sm:$0xff]  ;;  %vm8734_vm8 = vmor %vm1150_vm5, %vm1151_vm6  ;;  %vm1160_vm9 = vweird.f32 %v8647_v26 }
 0x2d6   : > { %v1009_v33 = vsel %vm860_vm1, %v963_v11, 0.0  ;;  %v1211_v39 = vmul.f32 %v1123_v34, %v8510_v9  ;;  %v1145_v9 = vmul.f32 %v8659_v7, %v8636_v15  ;;  %v8678_v13 = vadd.f32 %v8667_v44, %v1281_v37 }
 0x2d7   : > { %v1127_v20 = vmul.f32 0.5, %v1126_v46  ;;  %1010 = vadd.xlane.f32.xlu2 %v1009_v33  ;;  %v1002_v52 = vpop.xlane.xlu0 %1001  ;;  %v8698_v11 = vadd.f32 %v8667_v44, %v1283_v60  ;;  %v1143_v46 = vsel %vm1142_vm4, %v8632_v21, %v1139_v58 }
 0x2d8   : > { %v1223_v17 = vpack.c.bf16 %v1211_v39, %v1210_v31  ;;  %v1024_v6 = vmul.f32 %v1002_v52, %v8373_v49  ;;  %v1146_v32 = vmul.f32 %v8659_v7, %v1145_v9  ;;  %v1340_v33 = vmul.f32 %v8669_v23, %v8678_v13 }
 0x2d9   : > { %v1128_v40 = vsub.f32 1.5, %v1127_v20  ;;  %v1213_v31 = vmul.f32 %v1143_v46, %v8513_v12 }
 0x2da   : > { %v1286_v38 = vpop.f32.mrf.mxu2  ;;  %v8661_v22 = vpop.eup %7723  ;;  %7320 = vmatmul.msk.bf16.gmra.mxu2 %vm860_vm1, %v1223_v17  ;;  %v8693_v5 = vadd.f32 1e-12, %v1024_v6  ;;  %v1147_v34 = vmul.f32 0.5, %v1146_v32  ;;  %v1404_v39 = vpack.c.bf16 %v1340_v33, %v1340_v33 }
 0x2db   : > { %v1155_v53 = vmul.f32 %v8661_v22, %v8647_v26  ;;  %v1129_v51 = vmul.f32 %v7720_v59, %v1128_v40  ;;  %vm1161_vm7 = vweird.f32 %v8661_v22  ;;  %v1344_v26 = vmul.f32 %v8669_v23, %v8698_v11 }
 0x2dc   : > { %v1148_v29 = vsub.f32 1.5, %v1147_v34  ;;  %v1628_v6 = vunpack.c.l.b16 %v1404_v39  ;;  %vm8739_vm10 = vmor %vm1160_vm9, %vm1161_vm7  ;;  %vm1170_vm14 = vweird.f32 %v8693_v5 }
 0x2dd   : > { %v1156_v30 = vmul.f32 %v8661_v22, %v1155_v53  ;;  %v1133_v2 = vsel %vm8681_vm2, %v7720_v59, %v1129_v51  ;;  %v8705_v59 = vpop.permute.xlu2 %1327 }
 0x2de   : > { %v1212_v20 = vmul.f32 %v1133_v2, %v8547_v27  ;;  %11502 = vst [vmem:[#allocation23_spill] sm:$0xff] %v8705_v59  ;;  %v1342_v40 = vmul.f32 %v8705_v59, %v8698_v11  ;;  %v8716_v27 = vadd.f32 %v8667_v44, %v1286_v38  ;;  %v1338_v53 = vmul.f32 %v8705_v59, %v8678_v13 }
 0x2df   : > { %v1005_v45 = vpop.xlane.xlu0 %1004  ;;  %v1157_v18 = vmul.f32 0.5, %v1156_v30  ;;  %v1149_v38 = vmul.f32 %v8659_v7, %v1148_v29 }
 0x2e0   : > { %v1025_v10 = vmul.f32 %v1005_v45, %v8373_v49  ;;  %v1224_v17 = vpack.c.bf16 %v1213_v31, %v1212_v20  ;;  %v1406_v25 = vpack.c.bf16 %v1342_v40, %v1342_v40  ;;  %v1346_v15 = vmul.f32 %v8705_v59, %v8716_v27 }
 0x2e1   : > { %v1158_v52 = vsub.f32 1.5, %v1157_v18  ;;  %v1402_v60 = vpack.c.bf16 %v1338_v53, %v1338_v53  ;;  %v1153_v33 = vsel %vm8734_vm8, %v8659_v7, %v1149_v38 }
 0x2e2   : > { %v8689_v0 = vpop.f32.mrf.mxu2  ;;  %v8695_v24 = vadd.f32 1e-12, %v1025_v10  ;;  %v1662_v39 = vunpack.c.l.b16 %v1406_v25  ;;  %v1214_v53 = vmul.f32 %v1153_v33, %v8527_v36 }
 0x2e3   : > { %v1159_v58 = vmul.f32 %v8661_v22, %v1158_v52  ;;  %v1626_v29 = vunpack.c.l.b16 %v1402_v60 }
 0x2e4   : > { %7725 = vrsqrt.f32 %v8695_v24  ;;  %vm1180_vm13 = vweird.f32 %v8695_v24 }
 0x2e5   : > { %7727 = vrsqrt.f32 %v8693_v5  ;;  %v1163_v34 = vsel %vm8739_vm10, %v8661_v22, %v1159_v58 }
 0x2e7   : > { %v8708_v37 = vpop.permute.xlu1 %1329 }
 0x2e8   : > { %11503 = vst [vmem:[#allocation24_spill] sm:$0xff] %v8708_v37  ;;  %v1339_v21 = vmul.f32 %v8708_v37, %v8678_v13 }
 0x2ea   : > { %v1291_v48 = vpop.f32.mrf.mxu2  ;;  %v1403_v9 = vpack.c.bf16 %v1339_v21, %v1339_v21  ;;  %v8720_v51 = vpop.eup %7725  ;;  %7321 = vmatmul.msk.bf16.gmra.mxu2 %vm860_vm1, %v1224_v17  ;;  %v1410_v21 = vpack.c.bf16 %v1346_v15, %v1346_v15 }
 0x2eb   : > { %v8725_v45 = vpop.eup %7727  ;;  %v1175_v32 = vmul.f32 %v8720_v51, %v8695_v24  ;;  %vm1181_vm11 = vweird.f32 %v8720_v51 }
 0x2ec   : > { %v1627_v12 = vunpack.c.l.b16 %v1403_v9  ;;  %v1165_v46 = vmul.f32 %v8725_v45, %v8693_v5  ;;  %v8768_v9 = vadd.f32 %v8667_v44, %v1291_v48  ;;  %v1343_v48 = vmul.f32 %v8708_v37, %v8698_v11  ;;  %vm1182_vm15 = vmor %vm1180_vm13, %vm1181_vm11 }
 0x2ed   : > { %v1176_v18 = vmul.f32 %v8720_v51, %v1175_v32  ;;  %v1698_v36 = vunpack.c.l.b16 %v1410_v21  ;;  %v1408_v21 = vpack.c.bf16 %v1344_v26, %v1344_v26  ;;  %v1348_v26 = vmul.f32 %v8669_v23, %v8716_v27 }
 0x2ee   : > { %v1630_v30 = vpack.c.b16 %v1628_v6, %v1627_v12  ;;  %v1166_v40 = vmul.f32 %v8725_v45, %v1165_v46  ;;  %v1215_v12 = vmul.f32 %v1163_v34, %v8571_v4  ;;  %v1354_v34 = vmul.f32 %v8705_v59, %v8768_v9 }
 0x2ef   : > { %v1177_v32 = vmul.f32 0.5, %v1176_v18  ;;  %v1407_v62 = vpack.c.bf16 %v1343_v48, %v1343_v48  ;;  %vm1171_vm12 = vweird.f32 %v8725_v45  ;;  %v1412_v24 = vpack.c.bf16 %v1348_v26, %v1348_v26 }
 0x2f0   : > { %1633 = vrot.lane.b32.xlu0 %v1630_v30, %s8100_s17  ;;  %v1167_v2 = vmul.f32 0.5, %v1166_v40  ;;  %v1225_v46 = vpack.c.bf16 %v1215_v12, %v1214_v53  ;;  %v1418_v40 = vpack.c.bf16 %v1354_v34, %v1354_v34  ;;  %vm1172_vm2 = vmor %vm1170_vm14, %vm1171_vm12 }
 0x2f2   : > { %v1293_v20 = vpop.f32.mrf.mxu2  ;;  %v8755_v31 = vpop.permute.xlu0 %1325 }
 0x2f3   : > { %11508 = vst [vmem:[#allocation25_spill] sm:$0xff] %v8755_v31  ;;  %v8758_v52 = vadd.f32 %v8667_v44, %v1293_v20  ;;  %v1345_v7 = vmul.f32 %v8755_v31, %v8716_v27  ;;  %v1341_v22 = vmul.f32 %v8755_v31, %v8698_v11  ;;  %v1337_v17 = vmul.f32 %v8755_v31, %v8678_v13 }
 0x2f4   : > { %v1353_v15 = vmul.f32 %v8755_v31, %v8768_v9 }
 0x2f5   : > { %v1409_v6 = vpack.c.bf16 %v1345_v7, %v1345_v7  ;;  %v1405_v38 = vpack.c.bf16 %v1341_v22, %v1341_v22  ;;  %v1401_v58 = vpack.c.bf16 %v1337_v17, %v1337_v17  ;;  %v1359_v25 = vmul.f32 %v8708_v37, %v8758_v52 }
 0x2f6   : > { %v1360_v30 = vmul.f32 %v8669_v23, %v8758_v52  ;;  %v1178_v17 = vsub.f32 1.5, %v1177_v32  ;;  %v1417_v16 = vpack.c.bf16 %v1353_v15, %v1353_v15  ;;  %v1770_v32 = vunpack.c.l.b16 %v1418_v40 }
 0x2f7   : > { %v1697_v60 = vunpack.c.l.b16 %v1409_v6  ;;  %v1661_v10 = vunpack.c.l.b16 %v1405_v38  ;;  %v1625_v4 = vunpack.c.l.b16 %v1401_v58  ;;  %v1423_v33 = vpack.c.bf16 %v1359_v25, %v1359_v25 }
 0x2f8   : > { %v1424_v22 = vpack.c.bf16 %v1360_v30, %v1360_v30  ;;  %v1168_v6 = vsub.f32 1.5, %v1167_v2  ;;  %v1663_v38 = vunpack.c.l.b16 %v1407_v62  ;;  %v1179_v58 = vmul.f32 %v8720_v51, %v1178_v17 }
 0x2f9   : > { %v1701_v18 = vpack.c.b16 %v1698_v36, %v1697_v60  ;;  %v1665_v20 = vpack.c.b16 %v1662_v39, %v1661_v10  ;;  %v1629_v7 = vpack.c.b16 %v1626_v29, %v1625_v4  ;;  %v1807_v53 = vunpack.c.l.b16 %v1423_v33 }
 0x2fa   : > { %7322 = vmatmul.msk.bf16.gmra.mxu2 %vm860_vm1, %v1225_v46  ;;  %v1808_v12 = vunpack.c.l.b16 %v1424_v22  ;;  %v1347_v39 = vmul.f32 %v8708_v37, %v8716_v27  ;;  %v1769_v29 = vunpack.c.l.b16 %v1417_v16  ;;  %v1664_v25 = vunpack.c.l.b16 %v1408_v21 }
 0x2fb   : > { %1703 = vrot.lane.b32.xlu2 %v1701_v18, %s8100_s17  ;;  %1667 = vrot.lane.b32.xlu1 %v1665_v20, %s8100_s17  ;;  %v1169_v30 = vmul.f32 %v8725_v45, %v1168_v6  ;;  %v1183_v62 = vsel %vm1182_vm15, %v8720_v51, %v1179_v58  ;;  %v8800_v36 = vadd.f32 %v8667_v44, %v8689_v0  ;;  %v1700_v46 = vunpack.c.l.b16 %v1412_v24 }
 0x2fc   : > { %1631 = vrot.lane.b32.xlu0 %v1629_v7, %s8100_s17  ;;  %v1810_v15 = vpack.c.b16 %v1808_v12, %v1807_v53  ;;  %v1773_v48 = vpack.c.b16 %v1770_v32, %v1769_v29  ;;  %v1666_v16 = vpack.c.b16 %v1664_v25, %v1663_v38  ;;  %v1411_v60 = vpack.c.bf16 %v1347_v39, %v1347_v39 }
 0x2fd   : > { %v1173_v5 = vsel %vm1172_vm2, %v8725_v45, %v1169_v30  ;;  %v1217_v10 = vmul.f32 %v1183_v62, %v8596_v57  ;;  %v1351_v51 = vmul.f32 %v8708_v37, %v8800_v36  ;;  %v1352_v0 = vmul.f32 %v8669_v23, %v8800_v36 }
 0x2fe   : > { %v1699_v4 = vunpack.c.l.b16 %v1411_v60  ;;  %v1216_v2 = vmul.f32 %v1173_v5, %v8589_v54  ;;  %v1349_v57 = vmul.f32 %v8755_v31, %v8800_v36  ;;  %v1350_v54 = vmul.f32 %v8705_v59, %v8800_v36 }
 0x2ff   : > { %v1415_v18 = vpack.c.bf16 %v1351_v51, %v1351_v51  ;;  %v1416_v45 = vpack.c.bf16 %v1352_v0, %v1352_v0  ;;  %v1355_v40 = vmul.f32 %v8708_v37, %v8768_v9  ;;  %v1356_v53 = vmul.f32 %v8669_v23, %v8768_v9 }
 0x300   : > { %v1226_v33 = vpack.c.bf16 %v1217_v10, %v1216_v2  ;;  %v1702_v34 = vpack.c.b16 %v1700_v46, %v1699_v4  ;;  %v1413_v17 = vpack.c.bf16 %v1349_v57, %v1349_v57  ;;  %v1414_v21 = vpack.c.bf16 %v1350_v54, %v1350_v54 }
 0x301   : > { %v1735_v20 = vunpack.c.l.b16 %v1415_v18  ;;  %v1736_v7 = vunpack.c.l.b16 %v1416_v45  ;;  %v1419_v29 = vpack.c.bf16 %v1355_v40, %v1355_v40  ;;  %v1420_v38 = vpack.c.bf16 %v1356_v53, %v1356_v53 }
 0x302   : > { %v1733_v6 = vunpack.c.l.b16 %v1413_v17  ;;  %v1734_v12 = vunpack.c.l.b16 %v1414_v21  ;;  %v1357_v26 = vmul.f32 %v8755_v31, %v8758_v52  ;;  %v1358_v32 = vmul.f32 %v8705_v59, %v8758_v52 }
 0x303   : > { %1813 = vrot.lane.b32.xlu2 %v1810_v15, %s8100_s17  ;;  %1775 = vrot.lane.b32.xlu1 %v1773_v48, %s8100_s17  ;;  %v1738_v22 = vpack.c.b16 %v1736_v7, %v1735_v20  ;;  %v1771_v58 = vunpack.c.l.b16 %v1419_v29  ;;  %v1772_v25 = vunpack.c.l.b16 %v1420_v38 }
 0x304   : > { %1669 = vrot.lane.b32.xlu0 %v1666_v16, %s8100_s17  ;;  %v1737_v39 = vpack.c.b16 %v1734_v12, %v1733_v6  ;;  %v1421_v15 = vpack.c.bf16 %v1357_v26, %v1357_v26  ;;  %v1422_v48 = vpack.c.bf16 %v1358_v32, %v1358_v32 }
 0x305   : > { %v1774_v30 = vpack.c.b16 %v1772_v25, %v1771_v58 }
 0x306   : > { %v1805_v16 = vunpack.c.l.b16 %v1421_v15  ;;  %v1806_v62 = vunpack.c.l.b16 %v1422_v48 }
 0x308   : > { %v1809_v60 = vpack.c.b16 %v1806_v62, %v1805_v16 }
 0x30a   : > { %7323 = vmatmul.msk.bf16.gmra.mxu2 %vm860_vm1, %v1226_v33 }
 0x30c   : > { %1705 = vrot.lane.b32.xlu0 %v1702_v34, %s8100_s17 }
 0x312   : > { %v1008_v5 = vpop.xlane.xlu1 %1007 }
 0x313   : > { %v1026_v24 = vmul.f32 %v1008_v5, %v8373_v49 }
 0x314   : > { %1741 = vrot.lane.b32.xlu0 %v1738_v22, %s8100_s17 }
 0x315   : > { %v1042_v10 = vadd.f32 1e-12, %v1026_v24 }
 0x317   : > { %7729 = vrsqrt.f32 %v1042_v10  ;;  %vm1190_vm4 = vweird.f32 %v1042_v10 }
 0x31c   : > { %1739 = vrot.lane.b32.xlu0 %v1737_v39, %s8100_s17 }
 0x31d   : > { %v7730_v4 = vpop.eup %7729 }
 0x31e   : > { %v1185_v51 = vmul.f32 %v7730_v4, %v1042_v10  ;;  %vm1191_vm3 = vweird.f32 %v7730_v4 }
 0x31f   : > { %vm1192_vm5 = vmor %vm1190_vm4, %vm1191_vm3 }
 0x320   : > { %v1186_v0 = vmul.f32 %v7730_v4, %v1185_v51 }
 0x322   : > { %v1187_v34 = vmul.f32 0.5, %v1186_v0 }
 0x324   : > { %1777 = vrot.lane.b32.xlu0 %v1774_v30, %s8100_s17  ;;  %v1188_v45 = vsub.f32 1.5, %v1187_v34 }
 0x326   : > { %v1189_v7 = vmul.f32 %v7730_v4, %v1188_v45 }
 0x328   : > { %v1193_v17 = vsel %vm1192_vm5, %v7730_v4, %v1189_v7 }
 0x329   : > { %v1218_v12 = vmul.f32 %v1193_v17, %v8618_v28 }
 0x32c   : > { %1811 = vrot.lane.b32.xlu0 %v1809_v60, %s8100_s17 }
 0x34a   : > { %v1011_v2 = vpop.xlane.xlu2 %1010 }
 0x34b   : > { %v1027_v46 = vmul.f32 %v1011_v2, %v8373_v49 }
 0x34d   : > { %v1043_v33 = vadd.f32 1e-12, %v1027_v46 }
 0x34f   : > { %7731 = vrsqrt.f32 %v1043_v33  ;;  %vm1200_vm7 = vweird.f32 %v1043_v33 }
 0x355   : > { %v7732_v18 = vpop.eup %7731 }
 0x356   : > { %v1195_v20 = vmul.f32 %v7732_v18, %v1043_v33  ;;  %vm1201_vm6 = vweird.f32 %v7732_v18 }
 0x357   : > { %vm1202_vm8 = vmor %vm1200_vm7, %vm1201_vm6 }
 0x358   : > { %v1196_v57 = vmul.f32 %v7732_v18, %v1195_v20 }
 0x35a   : > { %v1197_v54 = vmul.f32 0.5, %v1196_v57 }
 0x35c   : > { %v1198_v22 = vsub.f32 1.5, %v1197_v54 }
 0x35d   : > { %v1296_v21 = vpop.f32.mrf.mxu2 }
 0x35e   : > { %v1199_v6 = vmul.f32 %v7732_v18, %v1198_v22  ;;  %v8832_v40 = vadd.f32 %v8667_v44, %v1296_v21 }
 0x360   : > { %v1203_v53 = vsel %vm1202_vm8, %v7732_v18, %v1199_v6  ;;  %v1361_v29 = vmul.f32 %v8755_v31, %v8832_v40  ;;  %v1362_v38 = vmul.f32 %v8705_v59, %v8832_v40  ;;  %v1363_v58 = vmul.f32 %v8708_v37, %v8832_v40 }
 0x361   : > { %v1219_v39 = vmul.f32 %v1203_v53, %v8645_v63  ;;  %v1364_v26 = vmul.f32 %v8669_v23, %v8832_v40 }
 0x362   : > { %v1634_v25 = vpop.permute.xlu0 %1633  ;;  %v1425_v15 = vpack.c.bf16 %v1361_v29, %v1361_v29  ;;  %v1426_v28 = vpack.c.bf16 %v1362_v38, %v1362_v38  ;;  %v1427_v63 = vpack.c.bf16 %v1363_v58, %v1363_v58 }
 0x363   : > { %v1642_v32 = vsel %vm860_vm1, %v1634_v25, 0  ;;  %v1227_v30 = vpack.c.bf16 %v1219_v39, %v1218_v12  ;;  %v1428_v48 = vpack.c.bf16 %v1364_v26, %v1364_v26 }
 0x364   : > { %1650 = vmatpush.bf16.xpose.msra.mxu3 %v1642_v32  ;;  %v1841_v16 = vunpack.c.l.b16 %v1425_v15  ;;  %v1842_v62 = vunpack.c.l.b16 %v1426_v28  ;;  %v1843_v5 = vunpack.c.l.b16 %v1427_v63 }
 0x365   : > { %7324 = vmatmul.msk.bf16.gmra.mxu2 %vm860_vm1, %v1227_v30  ;;  %v1298_v60 = vpop.f32.mrf.mxu2  ;;  %v1844_v24 = vunpack.c.l.b16 %v1428_v48 }
 0x366   : > { %v8847_v10 = vadd.f32 %v8667_v44, %v1298_v60  ;;  %v1845_v4 = vpack.c.b16 %v1842_v62, %v1841_v16  ;;  %v1605_v62 = vpack.c.bf16 %v8678_v13, %v8678_v13 }
 0x367   : > { %v1846_v51 = vpack.c.b16 %v1844_v24, %v1843_v5 }
 0x368   : > { %1847 = vrot.lane.b32.xlu2 %v1845_v4, %s8100_s17  ;;  %v1365_v2 = vmul.f32 %v8755_v31, %v8847_v10  ;;  %v1366_v46 = vmul.f32 %v8705_v59, %v8847_v10  ;;  %v1367_v0 = vmul.f32 %v8708_v37, %v8847_v10  ;;  %v1368_v33 = vmul.f32 %v8669_v23, %v8847_v10 }
 0x369   : > { %1849 = vrot.lane.b32.xlu1 %v1846_v51, %s8100_s17 }
 0x36a   : > { %v1429_v34 = vpack.c.bf16 %v1365_v2, %v1365_v2  ;;  %v1430_v18 = vpack.c.bf16 %v1366_v46, %v1366_v46  ;;  %v1431_v45 = vpack.c.bf16 %v1367_v0, %v1367_v0  ;;  %v1432_v20 = vpack.c.bf16 %v1368_v33, %v1368_v33 }
 0x36c   : > { %v1877_v57 = vunpack.c.l.b16 %v1429_v34  ;;  %v1878_v7 = vunpack.c.l.b16 %v1430_v18  ;;  %v1879_v54 = vunpack.c.l.b16 %v1431_v45  ;;  %v1880_v22 = vunpack.c.l.b16 %v1432_v20 }
 0x36d   : > { %v1301_v17 = vpop.f32.mrf.mxu2 }
 0x36e   : > { %v8860_v21 = vadd.f32 %v8667_v44, %v1301_v17  ;;  %v1632_v6 = vpop.permute.xlu0 %1631  ;;  %v1881_v53 = vpack.c.b16 %v1878_v7, %v1877_v57  ;;  %v1882_v12 = vpack.c.b16 %v1880_v22, %v1879_v54  ;;  %v1668_v7 = vpop.permute.xlu1 %1667 }
 0x36f   : > { %v1639_v39 = vsel %vm860_vm1, %v1632_v6, 0 }
 0x370   : > { %1651 = vmatpush.bf16.xpose.msra.mxu3 %v1639_v39  ;;  %1885 = vrot.lane.b32.xlu0 %v1882_v12, %s8100_s17  ;;  %v1371_v29 = vmul.f32 %v8708_v37, %v8860_v21  ;;  %v1372_v38 = vmul.f32 %v8669_v23, %v8860_v21  ;;  %v1369_v58 = vmul.f32 %v8755_v31, %v8860_v21 }
 0x371   : > { %1883 = vrot.lane.b32.xlu1 %v1881_v53, %s8100_s17  ;;  %v1370_v25 = vmul.f32 %v8705_v59, %v8860_v21 }
 0x372   : > { %v1435_v26 = vpack.c.bf16 %v1371_v29, %v1371_v29  ;;  %v1436_v32 = vpack.c.bf16 %v1372_v38, %v1372_v38  ;;  %v1433_v30 = vpack.c.bf16 %v1369_v58, %v1369_v58  ;;  %v1675_v58 = vsel %vm860_vm1, %v1668_v7, 0 }
 0x373   : > { %v1434_v15 = vpack.c.bf16 %v1370_v25, %v1370_v25 }
 0x374   : > { %v1915_v28 = vunpack.c.l.b16 %v1435_v26  ;;  %v1916_v63 = vunpack.c.l.b16 %v1436_v32  ;;  %v1913_v48 = vunpack.c.l.b16 %v1433_v30 }
 0x375   : > { %v1303_v16 = vpop.f32.mrf.mxu2  ;;  %v1914_v60 = vunpack.c.l.b16 %v1434_v15 }
 0x376   : > { %v8876_v5 = vadd.f32 %v8667_v44, %v1303_v16  ;;  %v1670_v24 = vpop.permute.xlu0 %1669  ;;  %v1918_v4 = vpack.c.b16 %v1916_v63, %v1915_v28 }
 0x377   : > { %7325 = vmatmul.msk.bf16.vlgmr.msra.gmra.mxu3 %vm860_vm1, %v1605_v62  ;;  %v1678_v51 = vsel %vm860_vm1, %v1670_v24, 0  ;;  %v1917_v2 = vpack.c.b16 %v1914_v60, %v1913_v48  ;;  %v1704_v62 = vpop.permute.xlu2 %1703 }
 0x378   : > { %1686 = vmatpush.bf16.xpose.msrb.mxu3 %v1678_v51  ;;  %1921 = vrot.lane.b32.xlu2 %v1918_v4, %s8100_s17  ;;  %v1375_v46 = vmul.f32 %v8708_v37, %v8876_v5  ;;  %v1376_v0 = vmul.f32 %v8669_v23, %v8876_v5  ;;  %v1373_v33 = vmul.f32 %v8755_v31, %v8876_v5 }
 0x379   : > { %1919 = vrot.lane.b32.xlu0 %v1917_v2, %s8100_s17  ;;  %v1374_v34 = vmul.f32 %v8705_v59, %v8876_v5  ;;  %v1606_v2 = vpack.c.bf16 %v8698_v11, %v8698_v11 }
 0x37a   : > { %v1439_v18 = vpack.c.bf16 %v1375_v46, %v1375_v46  ;;  %v1440_v45 = vpack.c.bf16 %v1376_v0, %v1376_v0  ;;  %v1437_v20 = vpack.c.bf16 %v1373_v33, %v1373_v33 }
 0x37b   : > { %v1438_v57 = vpack.c.bf16 %v1374_v34, %v1374_v34 }
 0x37c   : > { %v1951_v54 = vunpack.c.l.b16 %v1439_v18  ;;  %v1952_v22 = vunpack.c.l.b16 %v1440_v45  ;;  %v1949_v17 = vunpack.c.l.b16 %v1437_v20  ;;  %v1711_v45 = vsel %vm860_vm1, %v1704_v62, 0 }
 0x37d   : > { %v1306_v6 = vpop.f32.mrf.mxu2  ;;  %v1950_v53 = vunpack.c.l.b16 %v1438_v57 }
 0x37e   : > { %v8891_v12 = vadd.f32 %v8667_v44, %v1306_v6  ;;  %v1706_v39 = vpop.permute.xlu0 %1705  ;;  %v1954_v29 = vpack.c.b16 %v1952_v22, %v1951_v54 }
 0x37f   : > { %v1714_v38 = vsel %vm860_vm1, %v1706_v39, 0  ;;  %v1953_v25 = vpack.c.b16 %v1950_v53, %v1949_v17 }
 0x380   : > { %1687 = vmatpush.bf16.xpose.msrb.mxu3 %v1675_v58  ;;  %1957 = vrot.lane.b32.xlu1 %v1954_v29, %s8100_s17  ;;  %v1379_v26 = vmul.f32 %v8708_v37, %v8891_v12  ;;  %v1380_v32 = vmul.f32 %v8669_v23, %v8891_v12  ;;  %v1377_v30 = vmul.f32 %v8755_v31, %v8891_v12 }
 0x381   : > { %1955 = vrot.lane.b32.xlu0 %v1953_v25, %s8100_s17  ;;  %v1378_v15 = vmul.f32 %v8705_v59, %v8891_v12 }
 0x382   : > { %v1443_v28 = vpack.c.bf16 %v1379_v26, %v1379_v26  ;;  %v1444_v63 = vpack.c.bf16 %v1380_v32, %v1380_v32  ;;  %v1441_v48 = vpack.c.bf16 %v1377_v30, %v1377_v30 }
 0x383   : > { %v1442_v16 = vpack.c.bf16 %v1378_v15, %v1378_v15 }
 0x384   : > { %v1987_v60 = vunpack.c.l.b16 %v1443_v28  ;;  %v1988_v24 = vunpack.c.l.b16 %v1444_v63  ;;  %v1985_v4 = vunpack.c.l.b16 %v1441_v48 }
 0x385   : > { %v1308_v51 = vpop.f32.mrf.mxu2  ;;  %v1986_v46 = vunpack.c.l.b16 %v1442_v16 }
 0x386   : > { %v8908_v0 = vadd.f32 %v8667_v44, %v1308_v51  ;;  %v1742_v33 = vpop.permute.xlu0 %1741  ;;  %v1990_v34 = vpack.c.b16 %v1988_v24, %v1987_v60 }
 0x387   : > { %7326 = vmatmul.msk.bf16.vlgmr.msrb.gmra.mxu3 %vm860_vm1, %v1606_v2  ;;  %v1989_v18 = vpack.c.b16 %v1986_v46, %v1985_v4  ;;  %v1750_v22 = vsel %vm860_vm1, %v1742_v33, 0 }
 0x388   : > { %1722 = vmatpush.bf16.xpose.msra.mxu3 %v1714_v38  ;;  %1993 = vrot.lane.b32.xlu2 %v1990_v34, %s8100_s17  ;;  %v1383_v20 = vmul.f32 %v8708_v37, %v8908_v0  ;;  %v1384_v57 = vmul.f32 %v8669_v23, %v8908_v0  ;;  %v1381_v7 = vmul.f32 %v8755_v31, %v8908_v0 }
 0x389   : > { %v1382_v54 = vmul.f32 %v8705_v59, %v8908_v0  ;;  %1991 = vrot.lane.b32.xlu1 %v1989_v18, %s8100_s17 }
 0x38a   : > { %v1447_v17 = vpack.c.bf16 %v1383_v20, %v1383_v20  ;;  %v1448_v6 = vpack.c.bf16 %v1384_v57, %v1384_v57  ;;  %v1445_v53 = vpack.c.bf16 %v1381_v7, %v1381_v7 }
 0x38b   : > { %v1446_v39 = vpack.c.bf16 %v1382_v54, %v1382_v54 }
 0x38c   : > { %v2023_v29 = vunpack.c.l.b16 %v1447_v17  ;;  %v2024_v38 = vunpack.c.l.b16 %v1448_v6  ;;  %v2021_v58 = vunpack.c.l.b16 %v1445_v53 }
 0x38d   : > { %v2022_v25 = vunpack.c.l.b16 %v1446_v39  ;;  %v1311_v26 = vpop.f32.mrf.mxu2 }
 0x38e   : > { %v8924_v32 = vadd.f32 %v8667_v44, %v1311_v26  ;;  %v1740_v30 = vpop.permute.xlu0 %1739  ;;  %v2026_v15 = vpack.c.b16 %v2024_v38, %v2023_v29 }
 0x38f   : > { %v2025_v28 = vpack.c.b16 %v2022_v25, %v2021_v58  ;;  %v1747_v62 = vsel %vm860_vm1, %v1740_v30, 0  ;;  %v1776_v30 = vpop.permute.xlu1 %1775 }
 0x390   : > { %1723 = vmatpush.bf16.xpose.msra.mxu3 %v1711_v45  ;;  %2029 = vrot.lane.b32.xlu2 %v2026_v15, %s8100_s17  ;;  %v1385_v63 = vmul.f32 %v8755_v31, %v8924_v32  ;;  %v1386_v48 = vmul.f32 %v8705_v59, %v8924_v32  ;;  %v1387_v16 = vmul.f32 %v8708_v37, %v8924_v32 }
 0x391   : > { %2027 = vrot.lane.b32.xlu0 %v2025_v28, %s8100_s17  ;;  %v1388_v60 = vmul.f32 %v8669_v23, %v8924_v32  ;;  %v1607_v45 = vpack.c.bf16 %v8716_v27, %v8716_v27 }
 0x392   : > { %v1449_v24 = vpack.c.bf16 %v1385_v63, %v1385_v63  ;;  %v1450_v4 = vpack.c.bf16 %v1386_v48, %v1386_v48  ;;  %v1451_v51 = vpack.c.bf16 %v1387_v16, %v1387_v16 }
 0x393   : > { %v1452_v2 = vpack.c.bf16 %v1388_v60, %v1388_v60 }
 0x394   : > { %v2057_v46 = vunpack.c.l.b16 %v1449_v24  ;;  %v2058_v33 = vunpack.c.l.b16 %v1450_v4  ;;  %v2059_v34 = vunpack.c.l.b16 %v1451_v51  ;;  %v1814_v24 = vpop.permute.xlu2 %1813  ;;  %v1608_v4 = vpack.c.bf16 %v8800_v36, %v8800_v36 }
 0x395   : > { %v1313_v18 = vpop.f32.mrf.mxu2  ;;  %v2060_v20 = vunpack.c.l.b16 %v1452_v2  ;;  %v1822_v51 = vsel %vm860_vm1, %v1814_v24, 0 }
 0x396   : > { %v8940_v57 = vadd.f32 %v8667_v44, %v1313_v18  ;;  %v1778_v7 = vpop.permute.xlu0 %1777  ;;  %v2061_v54 = vpack.c.b16 %v2058_v33, %v2057_v46  ;;  %v1609_v33 = vpack.c.bf16 %v8768_v9, %v8768_v9 }
 0x397   : > { %7327 = vmatmul.msk.bf16.vlgmr.msra.gmra.mxu3 %vm860_vm1, %v1607_v45  ;;  %v2062_v17 = vpack.c.b16 %v2060_v20, %v2059_v34  ;;  %v1610_v34 = vpack.c.bf16 %v8758_v52, %v8758_v52 }
 0x398   : > { %1758 = vmatpush.bf16.xpose.msrb.mxu3 %v1750_v22  ;;  %v1786_v22 = vsel %vm860_vm1, %v1778_v7, 0  ;;  %2063 = vrot.lane.b32.xlu2 %v2061_v54, %s8100_s17  ;;  %v1389_v6 = vmul.f32 %v8755_v31, %v8940_v57  ;;  %v1390_v53 = vmul.f32 %v8705_v59, %v8940_v57  ;;  %v1391_v39 = vmul.f32 %v8708_v37, %v8940_v57 }
 0x399   : > { %2065 = vrot.lane.b32.xlu1 %v2062_v17, %s8100_s17  ;;  %v1392_v29 = vmul.f32 %v8669_v23, %v8940_v57 }
 0x39a   : > { %v1453_v38 = vpack.c.bf16 %v1389_v6, %v1389_v6  ;;  %v1454_v58 = vpack.c.bf16 %v1390_v53, %v1390_v53  ;;  %v1455_v25 = vpack.c.bf16 %v1391_v39, %v1391_v39 }
 0x39b   : > { %v1456_v26 = vpack.c.bf16 %v1392_v29, %v1392_v29 }
 0x39c   : > { %v2093_v15 = vunpack.c.l.b16 %v1453_v38  ;;  %v2094_v28 = vunpack.c.l.b16 %v1454_v58  ;;  %v2095_v63 = vunpack.c.l.b16 %v1455_v25  ;;  %v1611_v38 = vpack.c.bf16 %v8832_v40, %v8832_v40 }
 0x39d   : > { %v2096_v48 = vunpack.c.l.b16 %v1456_v26 }
 0x39e   : > { %v2097_v16 = vpack.c.b16 %v2094_v28, %v2093_v15  ;;  %v1812_v2 = vpop.permute.xlu0 %1811 }
 0x39f   : > { %v2098_v60 = vpack.c.b16 %v2096_v48, %v2095_v63  ;;  %v1819_v46 = vsel %vm860_vm1, %v1812_v2, 0 }
 0x3a0   : > { %1759 = vmatpush.bf16.xpose.msrb.mxu3 %v1747_v62  ;;  %v1783_v62 = vsel %vm860_vm1, %v1776_v30, 0 }
 0x3a1   : > { %2099 = vrot.lane.b32.xlu1 %v2097_v16, %s8100_s17  ;;  %2101 = vrot.lane.b32.xlu0 %v2098_v60, %s8100_s17 }
 0x3a7   : > { %7328 = vmatmul.msk.bf16.vlgmr.msrb.gmra.mxu3 %vm860_vm1, %v1608_v4 }
 0x3a8   : > { %1794 = vmatpush.bf16.xpose.msra.mxu3 %v1786_v22 }
 0x3b0   : > { %1795 = vmatpush.bf16.xpose.msra.mxu3 %v1783_v62 }
 0x3b7   : > { %7329 = vmatmul.msk.bf16.vlgmr.msra.gmra.mxu3 %vm860_vm1, %v1609_v33 }
 0x3b8   : > { %1830 = vmatpush.bf16.xpose.msrb.mxu3 %v1822_v51 }
 0x3c0   : > { %1831 = vmatpush.bf16.xpose.msrb.mxu3 %v1819_v46 }
 0x3c2   : > { %v1848_v18 = vpop.permute.xlu2 %1847 }
 0x3c3   : > { %v1855_v53 = vsel %vm860_vm1, %v1848_v18, 0 }
 0x3c7   : > { %7330 = vmatmul.msk.bf16.vlgmr.msrb.gmra.mxu3 %vm860_vm1, %v1610_v34 }
 0x3d2   : > { %v1922_v45 = vpop.permute.xlu2 %1921 }
 0x3d3   : > { %v1930_v20 = vsel %vm860_vm1, %v1922_v45, 0 }
 0x3d4   : > { %1938 = vmatpush.bf16.xpose.msrb.mxu2 %v1930_v20 }
 0x3db   : > { %v1850_v7 = vpop.permute.xlu1 %1849 }
 0x3dc   : > { %v1858_v54 = vsel %vm860_vm1, %v1850_v7, 0 }
 0x3dd   : > { %1866 = vmatpush.bf16.xpose.msra.mxu3 %v1858_v54 }
 0x3e2   : > { %v1994_v22 = vpop.permute.xlu2 %1993  ;;  %v1886_v17 = vpop.permute.xlu0 %1885 }
 0x3e3   : > { %v1894_v6 = vsel %vm860_vm1, %v1886_v17, 0  ;;  %v1884_v58 = vpop.permute.xlu1 %1883  ;;  %v2002_v2 = vsel %vm860_vm1, %v1994_v22, 0  ;;  %v1613_v17 = vpack.c.bf16 %v8860_v21, %v8860_v21 }
 0x3e4   : > { %v1891_v4 = vsel %vm860_vm1, %v1884_v58, 0 }
 0x3e5   : > { %1867 = vmatpush.bf16.xpose.msra.mxu3 %v1855_v53 }
 0x3e8   : > { %v1316_v39 = vpop.f32.mrf.mxu2 }
 0x3e9   : > { %v8973_v29 = vadd.f32 %v8667_v44, %v1316_v39 }
 0x3ea   : > { %v2030_v25 = vpop.permute.xlu2 %2029 }
 0x3eb   : > { %v1395_v26 = vmul.f32 %v8708_v37, %v8973_v29  ;;  %v1396_v30 = vmul.f32 %v8669_v23, %v8973_v29  ;;  %v1393_v15 = vmul.f32 %v8755_v31, %v8973_v29  ;;  %v1394_v28 = vmul.f32 %v8705_v59, %v8973_v29  ;;  %v1920_v48 = vpop.permute.xlu0 %1919 }
 0x3ec   : > { %v2038_v63 = vsel %vm860_vm1, %v2030_v25, 0  ;;  %7331 = vmatmul.msk.bf16.vlgmr.msra.gmra.mxu3 %vm860_vm1, %v1611_v38  ;;  %v1927_v16 = vsel %vm860_vm1, %v1920_v48, 0 }
 0x3ed   : > { %1902 = vmatpush.bf16.xpose.msrb.mxu3 %v1894_v6  ;;  %v1459_v62 = vpack.c.bf16 %v1395_v26, %v1395_v26  ;;  %v1460_v60 = vpack.c.bf16 %v1396_v30, %v1396_v30  ;;  %v1457_v24 = vpack.c.bf16 %v1393_v15, %v1393_v15  ;;  %1939 = vmatpush.bf16.xpose.msrb.mxu2 %v1927_v16 }
 0x3ee   : > { %v1458_v51 = vpack.c.bf16 %v1394_v28, %v1394_v28 }
 0x3ef   : > { %v2131_v46 = vunpack.c.l.b16 %v1459_v62  ;;  %v2132_v33 = vunpack.c.l.b16 %v1460_v60  ;;  %v2129_v34 = vunpack.c.l.b16 %v1457_v24 }
 0x3f0   : > { %v1318_v18 = vpop.f32.mrf.mxu2  ;;  %v2130_v45 = vunpack.c.l.b16 %v1458_v51 }
 0x3f1   : > { %v8991_v20 = vadd.f32 %v8667_v44, %v1318_v18  ;;  %v2134_v7 = vpack.c.b16 %v2132_v33, %v2131_v46  ;;  %v1614_v33 = vpack.c.bf16 %v8876_v5, %v8876_v5 }
 0x3f2   : > { %v2133_v54 = vpack.c.b16 %v2130_v45, %v2129_v34  ;;  %v1958_v6 = vpop.permute.xlu1 %1957 }
 0x3f3   : > { %2137 = vrot.lane.b32.xlu2 %v2134_v7, %s8100_s17  ;;  %v1397_v22 = vmul.f32 %v8755_v31, %v8991_v20  ;;  %v1398_v53 = vmul.f32 %v8705_v59, %v8991_v20  ;;  %v1399_v39 = vmul.f32 %v8708_v37, %v8991_v20  ;;  %v1400_v44 = vmul.f32 %v8669_v23, %v8991_v20  ;;  %v1956_v16 = vpop.permute.xlu0 %1955 }
 0x3f4   : > { %v1966_v38 = vsel %vm860_vm1, %v1958_v6, 0  ;;  %2135 = vrot.lane.b32.xlu0 %v2133_v54, %s8100_s17  ;;  %7333 = vmatmul.msk.bf16.vlgmr.msrb.gmra.mxu2 %vm860_vm1, %v1613_v17  ;;  %v1616_v7 = vpack.c.bf16 %v8908_v0, %v8908_v0  ;;  %v1615_v17 = vpack.c.bf16 %v8891_v12, %v8891_v12 }
 0x3f5   : > { %1903 = vmatpush.bf16.xpose.msrb.mxu3 %v1891_v4  ;;  %2046 = vmatpush.bf16.xpose.msra.mxu2 %v2038_v63  ;;  %v1461_v58 = vpack.c.bf16 %v1397_v22, %v1397_v22  ;;  %v1462_v25 = vpack.c.bf16 %v1398_v53, %v1398_v53  ;;  %v1463_v26 = vpack.c.bf16 %v1399_v39, %v1399_v39  ;;  %v2064_v53 = vpop.permute.xlu2 %2063 }
 0x3f6   : > { %1974 = vmatpush.bf16.xpose.msrb.mxu0 %v1966_v38  ;;  %v1464_v30 = vpack.c.bf16 %v1400_v44, %v1400_v44  ;;  %v1612_v4 = vpack.c.bf16 %v8847_v10, %v8847_v10  ;;  %v2071_v38 = vsel %vm860_vm1, %v2064_v53, 0 }
 0x3f7   : > { %v2165_v15 = vunpack.c.l.b16 %v1461_v58  ;;  %v2166_v28 = vunpack.c.l.b16 %v1462_v25  ;;  %v2167_v63 = vunpack.c.l.b16 %v1463_v26  ;;  %v9030_v25 = vld [vmem:[%s11509_s2] sm:$0xff] }
 0x3f8   : > { %v2168_v48 = vunpack.c.l.b16 %v1464_v30 }
 0x3f9   : > { %v2169_v62 = vpack.c.b16 %v2166_v28, %v2165_v15  ;;  %v1617_v28 = vpack.c.bf16 %v8924_v32, %v8924_v32 }
 0x3fa   : > { %v2170_v60 = vpack.c.b16 %v2168_v48, %v2167_v63  ;;  %v1653_v24 = vpop.f32.mrf.mxu3 }
 0x3fb   : > { %2171 = vrot.lane.b32.xlu2 %v2169_v62, %s8100_s17  ;;  %v1992_v51 = vpop.permute.xlu1 %1991  ;;  %v9033_v26 = vadd.f32 %v1653_v24, %v9030_v25  ;;  %v1618_v24 = vpack.c.bf16 %v8940_v57, %v8940_v57 }
 0x3fc   : > { %2173 = vrot.lane.b32.xlu1 %v2170_v60, %s8100_s17  ;;  %7332 = vmatmul.msk.bf16.vlgmr.msrb.gmra.mxu3 %vm860_vm1, %v1612_v4  ;;  %v1999_v46 = vsel %vm860_vm1, %v1992_v51, 0 }
 0x3fd   : > { %2010 = vmatpush.bf16.xpose.msra.mxu3 %v2002_v2  ;;  %v1963_v2 = vsel %vm860_vm1, %v1956_v16, 0  ;;  %v2197_v48 = vsel %vm860_vm1, %v9033_v26, -inf }
 0x3fe   : > { %1975 = vmatpush.bf16.xpose.msrb.mxu0 %v1963_v2 }
 0x402   : > { %v1655_v34 = vpop.f32.mrf.mxu3 }
 0x403   : > { %v2028_v18 = vpop.permute.xlu0 %2027 }
 0x404   : > { %v2035_v45 = vsel %vm860_vm1, %v2028_v18, 0 }
 0x405   : > { %2011 = vmatpush.bf16.xpose.msra.mxu3 %v1999_v46  ;;  %7334 = vmatmul.msk.bf16.vlgmr.msrb.gmra.mxu0 %vm860_vm1, %v1614_v33 }
 0x406   : > { %2047 = vmatpush.bf16.xpose.msra.mxu2 %v2035_v45 }
 0x40a   : > { %v1689_v54 = vpop.f32.mrf.mxu3 }
 0x40b   : > { %v2066_v6 = vpop.permute.xlu1 %2065  ;;  %v9045_v62 = vadd.f32 %v1689_v54, %v9030_v25 }
 0x40c   : > { %v2074_v22 = vsel %vm860_vm1, %v2066_v6, 0  ;;  %7335 = vmatmul.msk.bf16.vlgmr.msra.gmra.mxu3 %vm860_vm1, %v1615_v17 }
 0x40d   : > { %7336 = vmatmul.msk.bf16.vlgmr.msra.gmra.mxu2 %vm860_vm1, %v1616_v7  ;;  %2082 = vmatpush.bf16.xpose.msra.mxu0 %v2074_v22  ;;  %v2200_v51 = vsel %vm860_vm1, %v9045_v62, -inf }
 0x412   : > { %v1691_v39 = vpop.f32.mrf.mxu3 }
 0x413   : > { %v2102_v44 = vpop.permute.xlu0 %2101  ;;  %v2100_v30 = vpop.permute.xlu1 %2099  ;;  %v8025_v39 = vld [vmem:[%s11420_s3 + $0x10] sm:$0xff] }
 0x414   : > { %v2110_v58 = vsel %vm860_vm1, %v2102_v44, 0  ;;  %v2107_v63 = vsel %vm860_vm1, %v2100_v30, 0 }
 0x415   : > { %2083 = vmatpush.bf16.xpose.msra.mxu0 %v2071_v38  ;;  %2118 = vmatpush.bf16.xpose.msrb.mxu1 %v2110_v58  ;;  %v1619_v58 = vpack.c.bf16 %v8973_v29, %v8973_v29 }
 0x41a   : > { %v1725_v15 = vpop.f32.mrf.mxu3 }
 0x41b   : > { %v9042_v16 = vadd.f32 %v1725_v15, %v9030_v25 }
 0x41c   : > { %7337 = vmatmul.msk.bf16.vlgmr.msra.gmra.mxu0 %vm860_vm1, %v1617_v28 }
 0x41d   : > { %2119 = vmatpush.bf16.xpose.msrb.mxu1 %v2107_v63  ;;  %v2203_v4 = vsel %vm860_vm1, %v9042_v16, -inf }
 0x41e   : > { %2198 = vmax.xlane.f32.xlu0 %v2197_v48  ;;  %v859_v48 = vld [vmem:[%s11421_s4 + $0x18] sm:$0xff] }
 0x41f   : > { %2353 = vmatpush.msrb.mxu0 %v859_v48 }
 0x422   : > { %v1727_v60 = vpop.f32.mrf.mxu3 }
 0x424   : > { %2204 = vmax.xlane.f32.xlu2 %v2203_v4  ;;  %7338 = vmatmul.msk.bf16.vlgmr.msrb.gmra.mxu1 %vm860_vm1, %v1618_v24 }
 0x426   : > { %2201 = vmax.xlane.f32.xlu1 %v2200_v51 }
 0x42a   : > { %v1761_v2 = vpop.f32.mrf.mxu3 }
 0x42b   : > { %v9055_v46 = vadd.f32 %v1761_v2, %v9030_v25 }
 0x42d   : > { %v2206_v33 = vsel %vm860_vm1, %v9055_v46, -inf }
 0x42e   : > { %2207 = vmax.xlane.f32.xlu0 %v2206_v33  ;;  %v858_v33 = vld [vmem:[%s11421_s4 + $0x10] sm:$0xff] }
 0x42f   : > { %2354 = vmatpush.msrb.mxu0 %v858_v33 }
 0x432   : > { %v1763_v34 = vpop.f32.mrf.mxu3 }
 0x433   : > { %v1620_v34 = vpack.c.bf16 %v8991_v20, %v8991_v20 }
 0x43a   : > { %v1797_v18 = vpop.f32.mrf.mxu3 }
 0x43b   : > { %v9060_v45 = vadd.f32 %v1797_v18, %v9030_v25  ;;  %v857_v18 = vld [vmem:[%s11421_s4 + $0x8] sm:$0xff] }
 0x43c   : > { %2355 = vmatpush.msrb.mxu0 %v857_v18 }
 0x43d   : > { %v2209_v7 = vsel %vm860_vm1, %v9060_v45, -inf }
 0x43e   : > { %2210 = vmax.xlane.f32.xlu1 %v2209_v7  ;;  %v856_v7 = vld [vmem:[%s11421_s4] sm:$0xff] }
 0x43f   : > { %2356 = vmatpush.msrb.mxu0 %v856_v7 }
 0x442   : > { %v1799_v54 = vpop.f32.mrf.mxu3 }
 0x44a   : > { %v1833_v17 = vpop.f32.mrf.mxu3 }
 0x44b   : > { %v9095_v54 = vadd.f32 %v1833_v17, %v9030_v25 }
 0x44d   : > { %v2138_v6 = vpop.permute.xlu2 %2137  ;;  %v2212_v17 = vsel %vm860_vm1, %v9095_v54, -inf }
 0x44e   : > { %v2146_v22 = vsel %vm860_vm1, %v2138_v6, 0 }
 0x44f   : > { %2154 = vmatpush.bf16.xpose.msrb.mxu3 %v2146_v22 }
 0x452   : > { %v1835_v53 = vpop.f32.mrf.mxu3 }
 0x455   : > { %v2172_v63 = vpop.permute.xlu2 %2171 }
 0x456   : > { %v2179_v60 = vsel %vm860_vm1, %v2172_v63, 0 }
 0x457   : > { %1469 = vrot.lane.b32.xlu1 %v8025_v39, %s8101_s23 }
 0x466   : > { %v2136_v44 = vpop.permute.xlu0 %2135 }
 0x467   : > { %v2143_v38 = vsel %vm860_vm1, %v2136_v44, 0 }
 0x468   : > { %2155 = vmatpush.bf16.xpose.msrb.mxu3 %v2143_v38 }
 0x46e   : > { %v2174_v30 = vpop.permute.xlu1 %2173 }
 0x46f   : > { %v2182_v15 = vsel %vm860_vm1, %v2174_v30, 0  ;;  %7339 = vmatmul.msk.bf16.vlgmr.msrb.gmra.mxu3 %vm860_vm1, %v1619_v58  ;;  %v1869_v28 = vpop.f32.mrf.mxu3 }
 0x470   : > { %2190 = vmatpush.bf16.xpose.msrb.mxu2 %v2182_v15 }
 0x477   : > { %v1871_v24 = vpop.f32.mrf.mxu3  ;;  %v1941_v4 = vpop.f32.mrf.mxu2 }
 0x478   : > { %2191 = vmatpush.bf16.xpose.msrb.mxu2 %v2179_v60  ;;  %v9079_v51 = vadd.f32 %v1941_v4, %v9030_v25 }
 0x47a   : > { %v2221_v2 = vsel %vm860_vm1, %v9079_v51, -inf }
 0x47b   : > { %2222 = vmax.xlane.f32.xlu2 %v2221_v2 }
 0x47f   : > { %7340 = vmatmul.msk.bf16.vlgmr.msrb.gmra.mxu2 %vm860_vm1, %v1620_v34  ;;  %v1905_v6 = vpop.f32.mrf.mxu3  ;;  %v1943_v22 = vpop.f32.mrf.mxu2 }
 0x480   : > { %v9099_v53 = vadd.f32 %v1905_v6, %v9030_v25 }
 0x482   : > { %v1977_v39 = vpop.f32.mrf.mxu0  ;;  %v2218_v38 = vsel %vm860_vm1, %v9099_v53, -inf }
 0x483   : > { %v9102_v44 = vadd.f32 %v1977_v39, %v9030_v25  ;;  %2219 = vmax.xlane.f32.xlu1 %v2218_v38  ;;  %2213 = vmax.xlane.f32.xlu2 %v2212_v17 }
 0x485   : > { %v2224_v58 = vsel %vm860_vm1, %v9102_v44, -inf }
 0x486   : > { %2225 = vmax.xlane.f32.xlu0 %v2224_v58 }
 0x487   : > { %v1907_v30 = vpop.f32.mrf.mxu3 }
 0x48a   : > { %v1979_v15 = vpop.f32.mrf.mxu0 }
 0x48f   : > { %v2013_v48 = vpop.f32.mrf.mxu3 }
 0x490   : > { %v2049_v63 = vpop.f32.mrf.mxu2  ;;  %v9114_v24 = vadd.f32 %v2013_v48, %v9030_v25 }
 0x491   : > { %v9111_v60 = vadd.f32 %v2049_v63, %v9030_v25  ;;  %v2199_v4 = vpop.xlane.xlu0 %2198 }
 0x492   : > { %v2245_v2 = vsub.f32 %v9033_v26, %v2199_v4  ;;  %v2227_v34 = vsel %vm860_vm1, %v9114_v24, -inf }
 0x493   : > { %v2230_v33 = vsel %vm860_vm1, %v9111_v60, -inf  ;;  %2228 = vmax.xlane.f32.xlu1 %v2227_v34 }
 0x494   : > { %2231 = vmax.xlane.f32.xlu2 %v2230_v33  ;;  %v2261_v18 = vmul.f32 1.442695, %v2245_v2 }
 0x496   : > { %7733 = vpow2.f32 %v2261_v18 }
 0x497   : > { %v2015_v6 = vpop.f32.mrf.mxu3  ;;  %v2205_v17 = vpop.xlane.xlu2 %2204 }
 0x498   : > { %v2051_v7 = vpop.f32.mrf.mxu2  ;;  %v2247_v63 = vsub.f32 %v9042_v16, %v2205_v17 }
 0x499   : > { %v2202_v22 = vpop.xlane.xlu1 %2201  ;;  %v2085_v38 = vpop.f32.mrf.mxu0 }
 0x49a   : > { %v2246_v39 = vsub.f32 %v9045_v62, %v2202_v22  ;;  %v9123_v58 = vadd.f32 %v2085_v38, %v9030_v25  ;;  %v9133_v62 = vadd.f32 %v1869_v28, %v9030_v25  ;;  %v2265_v48 = vmul.f32 1.442695, %v2247_v63  ;;  %v8026_v28 = vld [vmem:[%s11420_s3 + $0x18] sm:$0xff] }
 0x49c   : > { %v9125_v26 = vpop.eup %7733  ;;  %v2263_v30 = vmul.f32 1.442695, %v2246_v39  ;;  %v2233_v15 = vsel %vm860_vm1, %v9123_v58, -inf  ;;  %v2215_v18 = vsel %vm860_vm1, %v9133_v62, -inf  ;;  %v8027_v39 = vld [vmem:[%s11420_s3 + $0x8] sm:$0xff] }
 0x49d   : > { %7341 = vmatmul.msk.f32.vlgmr.msrb.gmra.mxu0 %vm860_vm1, %v9125_v26  ;;  %2234 = vmax.xlane.f32.xlu0 %v2233_v15  ;;  %v8028_v15 = vld [vmem:[%s11420_s3] sm:$0xff] }
 0x49e   : > { %7735 = vpow2.f32 %v2263_v30 }
 0x49f   : > { %7737 = vpow2.f32 %v2265_v48 }
 0x4a1   : > { %v2087_v4 = vpop.f32.mrf.mxu0  ;;  %v2121_v2 = vpop.f32.mrf.mxu1 }
 0x4a2   : > { %v2208_v33 = vpop.xlane.xlu0 %2207 }
 0x4a3   : > { %v2248_v16 = vsub.f32 %v9055_v46, %v2208_v33 }
 0x4a4   : > { %v9135_v34 = vpop.eup %7735 }
 0x4a5   : > { %7342 = vmatmul.msk.f32.gmra.mxu0 %vm860_vm1, %v9135_v34  ;;  %2216 = vmax.xlane.f32.xlu0 %v2215_v18  ;;  %v2267_v7 = vmul.f32 1.442695, %v2248_v16  ;;  %v9146_v22 = vpop.eup %7737 }
 0x4a7   : > { %7739 = vpow2.f32 %v2267_v7 }
 0x4a9   : > { %v2123_v6 = vpop.f32.mrf.mxu1 }
 0x4ac   : > { %1471 = vrot.lane.b32.xlu2 %v8026_v28, %s8101_s23  ;;  %1467 = vrot.lane.b32.xlu1 %v8027_v39, %s8101_s23 }
 0x4ad   : > { %7343 = vmatmul.msk.f32.gmra.mxu0 %vm860_vm1, %v9146_v22  ;;  %v9155_v17 = vpop.eup %7739 }
 0x4b1   : > { %v2211_v46 = vpop.xlane.xlu1 %2210 }
 0x4b2   : > { %v2249_v38 = vsub.f32 %v9060_v45, %v2211_v46  ;;  %v9168_v45 = vadd.f32 %v2121_v2, %v9030_v25 }
 0x4b4   : > { %v2269_v30 = vmul.f32 1.442695, %v2249_v38  ;;  %v2236_v48 = vsel %vm860_vm1, %v9168_v45, -inf }
 0x4b5   : > { %7344 = vmatmul.msk.f32.gmra.mxu0 %vm860_vm1, %v9155_v17 }
 0x4b6   : > { %7741 = vpow2.f32 %v2269_v30 }
 0x4b9   : > { %1465 = vrot.lane.b32.xlu0 %v8028_v15, %s8101_s23 }
 0x4bc   : > { %v9163_v63 = vpop.eup %7741 }
 0x4bd   : > { %7345 = vmatmul.msk.f32.gmra.mxu0 %vm860_vm1, %v9163_v63 }
 0x4e3   : > { %2237 = vmax.xlane.f32.xlu0 %v2236_v48  ;;  %v9191_v48 = vpop.permute.xlu1 %1469 }
 0x4e4   : > { %v1479_v37 = vmul.f32 %v9191_v48, %v8678_v13  ;;  %v1487_v59 = vmul.f32 %v9191_v48, %v8716_v27  ;;  %v1491_v19 = vmul.f32 %v9191_v48, %v8800_v36 }
 0x4e6   : > { %v1551_v55 = vpack.c.bf16 %v1487_v59, %v1487_v59 }
 0x4e8   : > { %v2524_v49 = vunpack.c.l.b16 %v1551_v55 }
 0x4ee   : > { %v9172_v4 = vpop.xlane.xlu2 %2222 }
 0x4f2   : > { %v2157_v33 = vpop.f32.mrf.mxu3 }
 0x4f3   : > { %v9175_v18 = vadd.f32 %v2157_v33, %v9030_v25 }
 0x4f5   : > { %v2239_v16 = vsel %vm860_vm1, %v9175_v18, -inf }
 0x4f6   : > { %2240 = vmax.xlane.f32.xlu2 %v2239_v16  ;;  %v2214_v7 = vpop.xlane.xlu2 %2213  ;;  %v1483_v16 = vmul.f32 %v9191_v48, %v8698_v11  ;;  %v2220_v31 = vpop.xlane.xlu1 %2219 }
 0x4f7   : > { %v2250_v6 = vsub.f32 %v9095_v54, %v2214_v7  ;;  %v2252_v59 = vsub.f32 %v9099_v53, %v2220_v31 }
 0x4f9   : > { %v2271_v28 = vmul.f32 1.442695, %v2250_v6  ;;  %v9193_v54 = vpop.xlane.xlu0 %2225  ;;  %v1547_v6 = vpack.c.bf16 %v1483_v16, %v1483_v16 }
 0x4fa   : > { %v2159_v2 = vpop.f32.mrf.mxu3 }
 0x4fb   : > { %7743 = vpow2.f32 %v2271_v28  ;;  %v2492_v23 = vunpack.c.l.b16 %v1547_v6 }
 0x501   : > { %v9180_v46 = vpop.eup %7743 }
 0x502   : > { %v2193_v39 = vpop.f32.mrf.mxu2  ;;  %7346 = vmatmul.msk.f32.gmra.mxu0 %vm860_vm1, %v9180_v46 }
 0x503   : > { %v9183_v38 = vadd.f32 %v2193_v39, %v9030_v25 }
 0x505   : > { %v2242_v30 = vsel %vm860_vm1, %v9183_v38, -inf }
 0x506   : > { %2243 = vmax.xlane.f32.xlu1 %v2242_v30 }
 0x507   : > { %v9189_v15 = vpop.xlane.xlu2 %2231 }
 0x50a   : > { %v2195_v33 = vpop.f32.mrf.mxu2 }
 0x50f   : > { %v9197_v7 = vpop.permute.xlu2 %1471 }
 0x510   : > { %v1484_v25 = vmul.f32 %v9197_v7, %v8698_v11  ;;  %v9201_v28 = vpop.xlane.xlu0 %2234  ;;  %v1480_v39 = vmul.f32 %v9197_v7, %v8678_v13  ;;  %v1488_v30 = vmul.f32 %v9197_v7, %v8716_v27  ;;  %v1492_v6 = vmul.f32 %v9197_v7, %v8800_v36 }
 0x511   : > { %v1500_v55 = vmul.f32 %v9197_v7, %v8758_v52 }
 0x512   : > { %v1548_v2 = vpack.c.bf16 %v1484_v25, %v1484_v25  ;;  %v1544_v16 = vpack.c.bf16 %v1480_v39, %v1480_v39  ;;  %v1552_v61 = vpack.c.bf16 %v1488_v30, %v1488_v30  ;;  %v1543_v25 = vpack.c.bf16 %v1479_v37, %v1479_v37  ;;  %v9217_v39 = vpop.xlane.xlu1 %2228 }
 0x513   : > { %v1556_v37 = vpack.c.bf16 %v1492_v6, %v1492_v6 }
 0x514   : > { %v2493_v33 = vunpack.c.l.b16 %v1548_v2  ;;  %v2461_v42 = vunpack.c.l.b16 %v1544_v16  ;;  %v2525_v50 = vunpack.c.l.b16 %v1552_v61  ;;  %v2460_v41 = vunpack.c.l.b16 %v1543_v25 }
 0x515   : > { %v1555_v61 = vpack.c.bf16 %v1491_v19, %v1491_v19  ;;  %v1499_v16 = vmul.f32 %v9191_v48, %v8758_v52  ;;  %v2253_v19 = vsub.f32 %v9079_v51, %v9172_v4  ;;  %v1508_v25 = vmul.f32 %v9197_v7, %v8847_v10 }
 0x516   : > { %v2495_v56 = vpack.c.b16 %v2493_v33, %v2492_v23  ;;  %v2463_v30 = vpack.c.b16 %v2461_v42, %v2460_v41 }
 0x517   : > { %v2556_v33 = vunpack.c.l.b16 %v1555_v61  ;;  %v1563_v31 = vpack.c.bf16 %v1499_v16, %v1499_v16 }
 0x518   : > { %2498 = vrot.lane.b32.xlu2 %v2495_v56, %s8101_s23  ;;  %v2217_v1 = vpop.xlane.xlu0 %2216  ;;  %v2527_v56 = vpack.c.b16 %v2525_v50, %v2524_v49  ;;  %v1564_v50 = vpack.c.bf16 %v1500_v55, %v1500_v55 }
 0x519   : > { %v2251_v2 = vsub.f32 %v9133_v62, %v2217_v1  ;;  %v2557_v1 = vunpack.c.l.b16 %v1556_v37  ;;  %v2275_v62 = vmul.f32 1.442695, %v2252_v59  ;;  %v1572_v59 = vpack.c.bf16 %v1508_v25, %v1508_v25 }
 0x51a   : > { %v2621_v6 = vunpack.c.l.b16 %v1564_v50 }
 0x51b   : > { %v2273_v23 = vmul.f32 1.442695, %v2251_v2  ;;  %v2559_v42 = vpack.c.b16 %v2557_v1, %v2556_v33  ;;  %v2254_v33 = vsub.f32 %v9102_v44, %v9193_v54 }
 0x51d   : > { %7745 = vpow2.f32 %v2273_v23  ;;  %v2277_v23 = vmul.f32 1.442695, %v2253_v19  ;;  %v2279_v54 = vmul.f32 1.442695, %v2254_v33 }
 0x51e   : > { %v9228_v49 = vpop.permute.xlu1 %1467  ;;  %7747 = vpow2.f32 %v2275_v62 }
 0x51f   : > { %2466 = vrot.lane.b32.xlu1 %v2463_v30, %s8101_s23  ;;  %v1490_v53 = vmul.f32 %v9228_v49, %v8800_v36  ;;  %v1482_v2 = vmul.f32 %v9228_v49, %v8698_v11  ;;  %v1507_v30 = vmul.f32 %v9191_v48, %v8847_v10  ;;  %7749 = vpow2.f32 %v2277_v23 }
 0x520   : > { %2530 = vrot.lane.b32.xlu2 %v2527_v56, %s8101_s23  ;;  %v2620_v56 = vunpack.c.l.b16 %v1563_v31  ;;  %7751 = vpow2.f32 %v2279_v54 }
 0x521   : > { %v1554_v37 = vpack.c.bf16 %v1490_v53, %v1490_v53  ;;  %v1546_v62 = vpack.c.bf16 %v1482_v2, %v1482_v2  ;;  %v1571_v16 = vpack.c.bf16 %v1507_v30, %v1507_v30  ;;  %v2685_v53 = vunpack.c.l.b16 %v1572_v59 }
 0x522   : > { %v2623_v61 = vpack.c.b16 %v2621_v6, %v2620_v56  ;;  %v1478_v30 = vmul.f32 %v9228_v49, %v8678_v13 }
 0x523   : > { %v9226_v41 = vpop.eup %7745  ;;  %v2555_v31 = vunpack.c.l.b16 %v1554_v37  ;;  %v2491_v2 = vunpack.c.l.b16 %v1546_v62  ;;  %v2684_v23 = vunpack.c.l.b16 %v1571_v16 }
 0x524   : > { %7347 = vmatmul.msk.f32.gmra.mxu0 %vm860_vm1, %v9226_v41  ;;  %v9243_v51 = vpop.eup %7747 }
 0x525   : > { %v2687_v62 = vpack.c.b16 %v2685_v53, %v2684_v23 }
 0x527   : > { %2562 = vrot.lane.b32.xlu1 %v2559_v42, %s8101_s23 }
 0x52b   : > { %v9245_v4 = vpop.permute.xlu0 %1465 }
 0x52c   : > { %7348 = vmatmul.msk.f32.gmra.mxu0 %vm860_vm1, %v9243_v51  ;;  %v1489_v1 = vmul.f32 %v9245_v4, %v8800_v36  ;;  %v1481_v55 = vmul.f32 %v9245_v4, %v8698_v11  ;;  %v1493_v19 = vmul.f32 %v9245_v4, %v8768_v9  ;;  %v1494_v36 = vmul.f32 %v9228_v49, %v8768_v9 }
 0x52d   : > { %v1477_v11 = vmul.f32 %v9245_v4, %v8678_v13  ;;  %v1501_v44 = vmul.f32 %v9245_v4, %v8832_v40  ;;  %v2255_v13 = vsub.f32 %v9114_v24, %v9217_v39  ;;  %v1485_v53 = vmul.f32 %v9245_v4, %v8716_v27 }
 0x52e   : > { %v1553_v42 = vpack.c.bf16 %v1489_v1, %v1489_v1  ;;  %v1545_v50 = vpack.c.bf16 %v1481_v55, %v1481_v55  ;;  %v1557_v59 = vpack.c.bf16 %v1493_v19, %v1493_v19  ;;  %v9268_v1 = vpop.eup %7749  ;;  %v1558_v33 = vpack.c.bf16 %v1494_v36, %v1494_v36 }
 0x52f   : > { %2626 = vrot.lane.b32.xlu1 %v2623_v61, %s8101_s23  ;;  %v1502_v61 = vmul.f32 %v9228_v49, %v8832_v40  ;;  %v1541_v55 = vpack.c.bf16 %v1477_v11, %v1477_v11  ;;  %v1565_v16 = vpack.c.bf16 %v1501_v44, %v1501_v44  ;;  %v1516_v24 = vmul.f32 %v9197_v7, %v8876_v5 }
 0x530   : > { %v2554_v25 = vunpack.c.l.b16 %v1553_v42  ;;  %v2490_v6 = vunpack.c.l.b16 %v1545_v50  ;;  %v1542_v42 = vpack.c.bf16 %v1478_v30, %v1478_v30  ;;  %v2586_v50 = vunpack.c.l.b16 %v1557_v59 }
 0x531   : > { %v1566_v19 = vpack.c.bf16 %v1502_v61, %v1502_v61  ;;  %v2458_v11 = vunpack.c.l.b16 %v1541_v55  ;;  %v2587_v36 = vunpack.c.l.b16 %v1558_v33  ;;  %v2281_v39 = vmul.f32 1.442695, %v2255_v13 }
 0x532   : > { %v2558_v56 = vpack.c.b16 %v2555_v31, %v2554_v25  ;;  %v2494_v37 = vpack.c.b16 %v2491_v2, %v2490_v6  ;;  %v1505_v31 = vmul.f32 %v9245_v4, %v8847_v10  ;;  %v2650_v25 = vunpack.c.l.b16 %v1565_v16 }
 0x533   : > { %v1506_v6 = vmul.f32 %v9228_v49, %v8847_v10  ;;  %v2459_v2 = vunpack.c.l.b16 %v1542_v42  ;;  %v1486_v44 = vmul.f32 %v9228_v49, %v8716_v27  ;;  %v2590_v54 = vpack.c.b16 %v2587_v36, %v2586_v50 }
 0x534   : > { %7349 = vmatmul.msk.f32.gmra.mxu0 %vm860_vm1, %v9268_v1  ;;  %2560 = vrot.lane.b32.xlu2 %v2558_v56, %s8101_s23  ;;  %v2651_v23 = vunpack.c.l.b16 %v1566_v19  ;;  %v1569_v30 = vpack.c.bf16 %v1505_v31, %v1505_v31  ;;  %v1515_v56 = vmul.f32 %v9191_v48, %v8876_v5  ;;  %v1549_v61 = vpack.c.bf16 %v1485_v53, %v1485_v53 }
 0x535   : > { %2496 = vrot.lane.b32.xlu0 %v2494_v37, %s8101_s23  ;;  %v9289_v37 = vpop.eup %7751  ;;  %v2462_v59 = vpack.c.b16 %v2459_v2, %v2458_v11  ;;  %v1570_v55 = vpack.c.bf16 %v1506_v6, %v1506_v6  ;;  %7753 = vpow2.f32 %v2281_v39  ;;  %v2256_v27 = vsub.f32 %v9111_v60, %v9189_v15 }
 0x536   : > { %v2654_v10 = vpack.c.b16 %v2651_v23, %v2650_v25  ;;  %v1550_v33 = vpack.c.bf16 %v1486_v44, %v1486_v44  ;;  %v2682_v16 = vunpack.c.l.b16 %v1569_v30  ;;  %v1579_v13 = vpack.c.bf16 %v1515_v56, %v1515_v56 }
 0x537   : > { %2690 = vrot.lane.b32.xlu1 %v2687_v62, %s8101_s23  ;;  %v1580_v62 = vpack.c.bf16 %v1516_v24, %v1516_v24  ;;  %v1512_v42 = vmul.f32 %v9197_v7, %v8860_v21  ;;  %v2522_v50 = vunpack.c.l.b16 %v1549_v61  ;;  %v1496_v19 = vmul.f32 %v9197_v7, %v8768_v9 }
 0x538   : > { %v2683_v31 = vunpack.c.l.b16 %v1570_v55  ;;  %v1511_v53 = vmul.f32 %v9191_v48, %v8860_v21  ;;  %v1524_v60 = vmul.f32 %v9197_v7, %v8908_v0  ;;  %v2283_v15 = vmul.f32 1.442695, %v2256_v27 }
 0x539   : > { %v2749_v11 = vunpack.c.l.b16 %v1580_v62  ;;  %v2523_v36 = vunpack.c.l.b16 %v1550_v33  ;;  %v1495_v25 = vmul.f32 %v9191_v48, %v8768_v9  ;;  %v2748_v24 = vunpack.c.l.b16 %v1579_v13 }
 0x53a   : > { %v2686_v6 = vpack.c.b16 %v2683_v31, %v2682_v16  ;;  %v1576_v39 = vpack.c.bf16 %v1512_v42, %v1512_v42  ;;  %v1523_v2 = vmul.f32 %v9191_v48, %v8908_v0  ;;  %v1560_v23 = vpack.c.bf16 %v1496_v19, %v1496_v19 }
 0x53b   : > { %v9310_v44 = vpop.eup %7753  ;;  %v2751_v30 = vpack.c.b16 %v2749_v11, %v2748_v24  ;;  %v1575_v56 = vpack.c.bf16 %v1511_v53, %v1511_v53  ;;  %7755 = vpow2.f32 %v2283_v15  ;;  %v2257_v9 = vsub.f32 %v9123_v58, %v9201_v28 }
 0x53c   : > { %7350 = vmatmul.msk.f32.gmra.mxu0 %vm860_vm1, %v9289_v37  ;;  %2592 = vrot.lane.b32.xlu2 %v2590_v54, %s8101_s23  ;;  %v2526_v54 = vpack.c.b16 %v2523_v36, %v2522_v50  ;;  %v1559_v61 = vpack.c.bf16 %v1495_v25, %v1495_v25  ;;  %v1587_v55 = vpack.c.bf16 %v1523_v2, %v1523_v2  ;;  %v2589_v27 = vunpack.c.l.b16 %v1560_v23 }
 0x53d   : > { %2464 = vrot.lane.b32.xlu0 %v2462_v59, %s8101_s23  ;;  %v1588_v59 = vpack.c.bf16 %v1524_v60, %v1524_v60  ;;  %v1513_v62 = vmul.f32 %v9245_v4, %v8876_v5  ;;  %v1497_v33 = vmul.f32 %v9245_v4, %v8758_v52  ;;  %v2716_v16 = vunpack.c.l.b16 %v1575_v56 }
 0x53e   : > { %v1514_v42 = vmul.f32 %v9228_v49, %v8876_v5  ;;  %v1532_v58 = vmul.f32 %v9197_v7, %v8940_v57  ;;  %v2285_v28 = vmul.f32 1.442695, %v2257_v9  ;;  %v2588_v50 = vunpack.c.l.b16 %v1559_v61 }
 0x53f   : > { %2656 = vrot.lane.b32.xlu1 %v2654_v10, %s8101_s23  ;;  %v2717_v10 = vunpack.c.l.b16 %v1576_v39  ;;  %v2813_v13 = vunpack.c.l.b16 %v1588_v59  ;;  %v1498_v19 = vmul.f32 %v9228_v49, %v8758_v52  ;;  %v2812_v11 = vunpack.c.l.b16 %v1587_v55 }
 0x540   : > { %v1577_v53 = vpack.c.bf16 %v1513_v62, %v1513_v62  ;;  %v1531_v60 = vmul.f32 %v9191_v48, %v8940_v57  ;;  %v2591_v36 = vpack.c.b16 %v2589_v27, %v2588_v50  ;;  %v1561_v25 = vpack.c.bf16 %v1497_v33, %v1497_v33 }
 0x541   : > { %v2719_v31 = vpack.c.b16 %v2717_v10, %v2716_v16  ;;  %v9331_v15 = vpop.eup %7755  ;;  %v2815_v5 = vpack.c.b16 %v2813_v13, %v2812_v11  ;;  %v1596_v24 = vpack.c.bf16 %v1532_v58, %v1532_v58  ;;  %7757 = vpow2.f32 %v2285_v28 }
 0x542   : > { %v1562_v52 = vpack.c.bf16 %v1498_v19, %v1498_v19  ;;  %v2746_v39 = vunpack.c.l.b16 %v1577_v53  ;;  %v1595_v2 = vpack.c.bf16 %v1531_v60, %v1531_v60  ;;  %v2618_v23 = vunpack.c.l.b16 %v1561_v25 }
 0x543   : > { %v2877_v59 = vunpack.c.l.b16 %v1596_v24  ;;  %v1518_v9 = vmul.f32 %v9228_v49, %v8891_v12  ;;  %v1525_v61 = vmul.f32 %v9245_v4, %v8924_v32  ;;  %v1503_v55 = vmul.f32 %v9191_v48, %v8832_v40 }
 0x544   : > { %7351 = vmatmul.msk.f32.gmra.mxu0 %vm860_vm1, %v9310_v44  ;;  %2688 = vrot.lane.b32.xlu2 %v2686_v6, %s8101_s23  ;;  %v1578_v6 = vpack.c.bf16 %v1514_v42, %v1514_v42  ;;  %v2619_v10 = vunpack.c.l.b16 %v1562_v52  ;;  %v2876_v27 = vunpack.c.l.b16 %v1595_v2  ;;  %v1526_v16 = vmul.f32 %v9228_v49, %v8924_v32 }
 0x545   : > { %2528 = vrot.lane.b32.xlu0 %v2526_v54, %s8101_s23  ;;  %v1517_v54 = vmul.f32 %v9245_v4, %v8891_v12  ;;  %v1582_v50 = vpack.c.bf16 %v1518_v9, %v1518_v9  ;;  %v1589_v19 = vpack.c.bf16 %v1525_v61, %v1525_v61  ;;  %v1529_v60 = vmul.f32 %v9245_v4, %v8940_v57 }
 0x546   : > { %v2747_v56 = vunpack.c.l.b16 %v1578_v6  ;;  %v2622_v42 = vpack.c.b16 %v2619_v10, %v2618_v23  ;;  %v2879_v28 = vpack.c.b16 %v2877_v59, %v2876_v27  ;;  %v1590_v53 = vpack.c.bf16 %v1526_v16, %v1526_v16 }
 0x547   : > { %2754 = vrot.lane.b32.xlu1 %v2751_v30, %s8101_s23  ;;  %v1504_v30 = vmul.f32 %v9197_v7, %v8832_v40  ;;  %v1581_v33 = vpack.c.bf16 %v1517_v54, %v1517_v54  ;;  %v9350_v13 = vpop.eup %7757  ;;  %v1567_v40 = vpack.c.bf16 %v1503_v55, %v1503_v55  ;;  %v2779_v6 = vunpack.c.l.b16 %v1582_v50 }
 0x548   : > { %v2750_v62 = vpack.c.b16 %v2747_v56, %v2746_v39  ;;  %v2842_v24 = vunpack.c.l.b16 %v1589_v19  ;;  %v1530_v52 = vmul.f32 %v9228_v49, %v8940_v57  ;;  %v1540_v39 = vmul.f32 %v9197_v7, %v8991_v20 }
 0x549   : > { %v1568_v58 = vpack.c.bf16 %v1504_v30, %v1504_v30  ;;  %v2778_v11 = vunpack.c.l.b16 %v1581_v33  ;;  %v2652_v54 = vunpack.c.l.b16 %v1567_v40  ;;  %v1510_v23 = vmul.f32 %v9228_v49, %v8860_v21 }
 0x54a   : > { %v2843_v56 = vunpack.c.l.b16 %v1590_v53  ;;  %v1539_v59 = vmul.f32 %v9191_v48, %v8991_v20  ;;  %v1594_v10 = vpack.c.bf16 %v1530_v52, %v1530_v52  ;;  %v1604_v55 = vpack.c.bf16 %v1540_v39, %v1540_v39 }
 0x54b   : > { %v2653_v25 = vunpack.c.l.b16 %v1568_v58  ;;  %v2782_v30 = vpack.c.b16 %v2779_v6, %v2778_v11  ;;  %v1536_v33 = vmul.f32 %v9197_v7, %v8973_v29  ;;  %v1535_v50 = vmul.f32 %v9191_v48, %v8973_v29 }
 0x54c   : > { %7352 = vmatmul.msk.f32.gmra.mxu0 %vm860_vm1, %v9331_v15  ;;  %2722 = vrot.lane.b32.xlu2 %v2719_v31, %s8101_s23  ;;  %v2846_v57 = vpack.c.b16 %v2843_v56, %v2842_v24  ;;  %v1603_v27 = vpack.c.bf16 %v1539_v59, %v1539_v59  ;;  %v2875_v58 = vunpack.c.l.b16 %v1594_v10  ;;  %v2358_v56 = vpop.f32.mrf.mxu0 }
 0x54d   : > { %2594 = vrot.lane.b32.xlu0 %v2591_v36, %s8101_s23  ;;  %v2655_v9 = vpack.c.b16 %v2653_v25, %v2652_v54  ;;  %v1599_v6 = vpack.c.bf16 %v1535_v50, %v1535_v50 }
 0x54e   : > { %v2940_v53 = vunpack.c.l.b16 %v1603_v27 }
 0x54f   : > { %2818 = vrot.lane.b32.xlu1 %v2815_v5, %s8101_s23  ;;  %v1509_v5 = vmul.f32 %v9245_v4, %v8860_v21 }
 0x551   : > { %v1573_v61 = vpack.c.bf16 %v1509_v5, %v1509_v5 }
 0x553   : > { %v2714_v16 = vunpack.c.l.b16 %v1573_v61 }
 0x554   : > { %7353 = vmatmul.msk.f32.gmra.mxu0 %vm860_vm1, %v9350_v13  ;;  %2752 = vrot.lane.b32.xlu2 %v2750_v62, %s8101_s23  ;;  %v1574_v62 = vpack.c.bf16 %v1510_v23, %v1510_v23  ;;  %v2908_v23 = vunpack.c.l.b16 %v1599_v6 }
 0x555   : > { %2624 = vrot.lane.b32.xlu0 %v2622_v42, %s8101_s23  ;;  %v1520_v42 = vmul.f32 %v9197_v7, %v8891_v12 }
 0x556   : > { %v2238_v31 = vpop.xlane.xlu0 %2237  ;;  %v2715_v40 = vunpack.c.l.b16 %v1574_v62 }
 0x557   : > { %2882 = vrot.lane.b32.xlu1 %v2879_v28, %s8101_s23  ;;  %v2258_v36 = vsub.f32 %v9168_v45, %v2238_v31  ;;  %v1593_v45 = vpack.c.bf16 %v1529_v60, %v1529_v60  ;;  %v2941_v28 = vunpack.c.l.b16 %v1604_v55  ;;  %v1519_v31 = vmul.f32 %v9191_v48, %v8891_v12 }
 0x558   : > { %v1600_v60 = vpack.c.bf16 %v1536_v33, %v1536_v33  ;;  %v1584_v25 = vpack.c.bf16 %v1520_v42, %v1520_v42  ;;  %v1537_v12 = vmul.f32 %v9245_v4, %v8991_v20 }
 0x559   : > { %v2287_v2 = vmul.f32 1.442695, %v2258_v36  ;;  %v2874_v21 = vunpack.c.l.b16 %v1593_v45  ;;  %v2718_v36 = vpack.c.b16 %v2715_v40, %v2714_v16  ;;  %v2943_v5 = vpack.c.b16 %v2941_v28, %v2940_v53  ;;  %v2361_v40 = vpop.f32.mrf.mxu0 }
 0x55a   : > { %v1583_v24 = vpack.c.bf16 %v1519_v31, %v1519_v31  ;;  %v2909_v52 = vunpack.c.l.b16 %v1600_v60  ;;  %v2781_v39 = vunpack.c.l.b16 %v1584_v25 }
 0x55b   : > { %7759 = vpow2.f32 %v2287_v2  ;;  %v2878_v11 = vpack.c.b16 %v2875_v58, %v2874_v21  ;;  %v1521_v2 = vmul.f32 %v9245_v4, %v8908_v0  ;;  %v1527_v58 = vmul.f32 %v9191_v48, %v8924_v32 }
 0x55c   : > { %2784 = vrot.lane.b32.xlu2 %v2782_v30, %s8101_s23  ;;  %v1538_v30 = vmul.f32 %v9228_v49, %v8991_v20  ;;  %v2780_v59 = vunpack.c.l.b16 %v1583_v24  ;;  %v2911_v61 = vpack.c.b16 %v2909_v52, %v2908_v23  ;;  %v1534_v24 = vmul.f32 %v9228_v49, %v8973_v29 }
 0x55d   : > { %2658 = vrot.lane.b32.xlu0 %v2655_v9, %s8101_s23  ;;  %v1522_v9 = vmul.f32 %v9228_v49, %v8908_v0  ;;  %v1585_v62 = vpack.c.bf16 %v1521_v2, %v1521_v2  ;;  %v1591_v53 = vpack.c.bf16 %v1527_v58, %v1527_v58 }
 0x55e   : > { %v2783_v55 = vpack.c.b16 %v2781_v39, %v2780_v59  ;;  %v1602_v21 = vpack.c.bf16 %v1538_v30, %v1538_v30 }
 0x55f   : > { %2848 = vrot.lane.b32.xlu1 %v2846_v57, %s8101_s23  ;;  %v1601_v57 = vpack.c.bf16 %v1537_v12, %v1537_v12  ;;  %v1586_v27 = vpack.c.bf16 %v1522_v9, %v1522_v9  ;;  %v2810_v33 = vunpack.c.l.b16 %v1585_v62  ;;  %v2844_v6 = vunpack.c.l.b16 %v1591_v53 }
 0x560   : > { %v2939_v42 = vunpack.c.l.b16 %v1602_v21 }
 0x561   : > { %v9379_v19 = vpop.eup %7759  ;;  %v2938_v20 = vunpack.c.l.b16 %v1601_v57  ;;  %v2811_v0 = vunpack.c.l.b16 %v1586_v27  ;;  %v2364_v2 = vpop.f32.mrf.mxu0 }
 0x562   : > { %7354 = vmatmul.msk.f32.gmra.mxu0 %vm860_vm1, %v9379_v19 }
 0x563   : > { %v2942_v28 = vpack.c.b16 %v2939_v42, %v2938_v20  ;;  %v2814_v31 = vpack.c.b16 %v2811_v0, %v2810_v33 }
 0x564   : > { %2880 = vrot.lane.b32.xlu2 %v2878_v11, %s8101_s23 }
 0x565   : > { %2720 = vrot.lane.b32.xlu0 %v2718_v36, %s8101_s23  ;;  %v1533_v36 = vmul.f32 %v9245_v4, %v8973_v29 }
 0x567   : > { %2946 = vrot.lane.b32.xlu1 %v2943_v5, %s8101_s23  ;;  %v1597_v39 = vpack.c.bf16 %v1533_v36, %v1533_v36 }
 0x569   : > { %v2241_v54 = vpop.xlane.xlu2 %2240  ;;  %v2906_v23 = vunpack.c.l.b16 %v1597_v39 }
 0x56a   : > { %v2259_v45 = vsub.f32 %v9175_v18, %v2241_v54  ;;  %v1528_v18 = vmul.f32 %v9197_v7, %v8924_v32  ;;  %v1598_v54 = vpack.c.bf16 %v1534_v24, %v1534_v24 }
 0x56c   : > { %v2289_v10 = vmul.f32 1.442695, %v2259_v45  ;;  %2914 = vrot.lane.b32.xlu2 %v2911_v61, %s8101_s23  ;;  %v1592_v11 = vpack.c.bf16 %v1528_v18, %v1528_v18  ;;  %v2907_v30 = vunpack.c.l.b16 %v1598_v54 }
 0x56d   : > { %2786 = vrot.lane.b32.xlu0 %v2783_v55, %s8101_s23 }
 0x56e   : > { %7761 = vpow2.f32 %v2289_v10  ;;  %v2845_v60 = vunpack.c.l.b16 %v1592_v11  ;;  %v2910_v59 = vpack.c.b16 %v2907_v30, %v2906_v23 }
 0x570   : > { %v2847_v12 = vpack.c.b16 %v2845_v60, %v2844_v6 }
 0x572   : > { %v2499_v16 = vpop.permute.xlu2 %2498 }
 0x573   : > { %2511 = vmatpush.bf16.msra.mxu3 %v2499_v16 }
 0x574   : > { %v9403_v50 = vpop.eup %7761  ;;  %2944 = vrot.lane.b32.xlu2 %v2942_v28, %s8101_s23 }
 0x575   : > { %7355 = vmatmul.msk.f32.gmra.mxu0 %vm860_vm1, %v9403_v50  ;;  %2816 = vrot.lane.b32.xlu0 %v2814_v31, %s8101_s23 }
 0x579   : > { %v2244_v25 = vpop.xlane.xlu1 %2243 }
 0x57a   : > { %v2531_v32 = vpop.permute.xlu2 %2530  ;;  %v2260_v5 = vsub.f32 %v9183_v38, %v2244_v25  ;;  %v2367_v38 = vpop.f32.mrf.mxu0 }
 0x57b   : > { %2543 = vmatpush.bf16.msra.mxu2 %v2531_v32 }
 0x57c   : > { %v2291_v52 = vmul.f32 1.442695, %v2260_v5 }
 0x57d   : > { %2850 = vrot.lane.b32.xlu0 %v2847_v12, %s8101_s23 }
 0x57e   : > { %7763 = vpow2.f32 %v2291_v52 }
 0x57f   : > { %7765 = vrcp.f32 %v2361_v40 }
 0x580   : > { %7767 = vrcp.f32 %v2358_v56 }
 0x581   : > { %7769 = vrcp.f32 %v2364_v2 }
 0x582   : > { %v2370_v9 = vpop.f32.mrf.mxu0  ;;  %7771 = vrcp.f32 %v2367_v38 }
 0x583   : > { %7773 = vrcp.f32 %v2370_v9 }
 0x584   : > { %v9415_v45 = vpop.eup %7763 }
 0x585   : > { %7356 = vmatmul.msk.f32.gmra.mxu0 %vm860_vm1, %v9415_v45  ;;  %2912 = vrot.lane.b32.xlu0 %v2910_v59, %s8101_s23  ;;  %v7766_v10 = vpop.eup %7765 }
 0x586   : > { %v2423_v21 = vmul.f32 %v7766_v10, %v9135_v34  ;;  %v7768_v33 = vpop.eup %7767 }
 0x587   : > { %v2422_v42 = vmul.f32 %v7768_v33, %v9125_v26  ;;  %v7770_v56 = vpop.eup %7769 }
 0x588   : > { %v2439_v20 = vpack.c.bf16 %v2423_v21, %v2423_v21  ;;  %v2424_v34 = vmul.f32 %v7770_v56, %v9146_v22  ;;  %v7772_v26 = vpop.eup %7771 }
 0x589   : > { %v2438_v28 = vpack.c.bf16 %v2422_v42, %v2422_v42  ;;  %v2425_v36 = vmul.f32 %v7772_v26, %v9155_v17  ;;  %v7774_v25 = vpop.eup %7773 }
 0x58a   : > { %v2373_v61 = vpop.f32.mrf.mxu0  ;;  %v2440_v60 = vpack.c.bf16 %v2424_v34, %v2424_v34  ;;  %v2426_v24 = vmul.f32 %v7774_v25, %v9163_v63 }
 0x58b   : > { %7775 = vrcp.f32 %v2373_v61  ;;  %v2441_v22 = vpack.c.bf16 %v2425_v36, %v2425_v36 }
 0x58c   : > { %v2442_v39 = vpack.c.bf16 %v2426_v24, %v2426_v24 }
 0x58e   : > { %v2561_v55 = vpop.permute.xlu2 %2560 }
 0x591   : > { %v2467_v29 = vpop.permute.xlu1 %2466  ;;  %v7776_v52 = vpop.eup %7775 }
 0x592   : > { %2479 = vmatpush.bf16.msra.mxu1 %v2467_v29  ;;  %v2427_v2 = vmul.f32 %v7776_v52, %v9180_v46 }
 0x594   : > { %v2443_v54 = vpack.c.bf16 %v2427_v2, %v2427_v2 }
 0x596   : > { %v2593_v16 = vpop.permute.xlu2 %2592 }
 0x599   : > { %v2563_v62 = vpop.permute.xlu1 %2562 }
 0x59e   : > { %v2689_v31 = vpop.permute.xlu2 %2688 }
 0x5a1   : > { %v2376_v57 = vpop.f32.mrf.mxu0  ;;  %v2627_v0 = vpop.permute.xlu1 %2626 }
 0x5a2   : > { %7777 = vrcp.f32 %v2376_v57 }
 0x5a6   : > { %v2723_v6 = vpop.permute.xlu2 %2722 }
 0x5a7   : > { %v2497_v27 = vpop.permute.xlu0 %2496 }
 0x5a8   : > { %2512 = vmatpush.bf16.msra.mxu3 %v2497_v27  ;;  %v7778_v59 = vpop.eup %7777 }
 0x5a9   : > { %v2379_v18 = vpop.f32.mrf.mxu0  ;;  %v2691_v53 = vpop.permute.xlu1 %2690  ;;  %v2428_v46 = vmul.f32 %v7778_v59, %v9226_v41 }
 0x5aa   : > { %7779 = vrcp.f32 %v2379_v18 }
 0x5ab   : > { %7358 = vmatmul.msk.bf16.vlgmr.msra.gmra.mxu3 %vm860_vm1, %v2439_v20 }
 0x5ae   : > { %v2753_v63 = vpop.permute.xlu2 %2752 }
 0x5af   : > { %v2465_v58 = vpop.permute.xlu0 %2464 }
 0x5b0   : > { %2480 = vmatpush.bf16.msra.mxu1 %v2465_v58  ;;  %v7780_v38 = vpop.eup %7779 }
 0x5b1   : > { %v2382_v40 = vpop.f32.mrf.mxu0  ;;  %v2657_v12 = vpop.permute.xlu1 %2656  ;;  %v2429_v9 = vmul.f32 %v7780_v38, %v9243_v51 }
 0x5b2   : > { %7781 = vrcp.f32 %v2382_v40 }
 0x5b3   : > { %7357 = vmatmul.msk.bf16.vlgmr.msra.gmra.mxu1 %vm860_vm1, %v2438_v28 }
 0x5b4   : > { %2575 = vmatpush.bf16.msrb.mxu1 %v2563_v62  ;;  %v2445_v62 = vpack.c.bf16 %v2429_v9, %v2429_v9 }
 0x5b6   : > { %v2785_v10 = vpop.permute.xlu2 %2784 }
 0x5b7   : > { %v2529_v11 = vpop.permute.xlu0 %2528 }
 0x5b8   : > { %2576 = vmatpush.bf16.msrb.mxu1 %v2561_v55  ;;  %2544 = vmatpush.bf16.msra.mxu2 %v2529_v11  ;;  %v7782_v61 = vpop.eup %7781  ;;  %v2444_v55 = vpack.c.bf16 %v2428_v46, %v2428_v46 }
 0x5b9   : > { %v2385_v32 = vpop.f32.mrf.mxu0  ;;  %v2755_v30 = vpop.permute.xlu1 %2754  ;;  %v2430_v21 = vmul.f32 %v7782_v61, %v9268_v1 }
 0x5ba   : > { %7783 = vrcp.f32 %v2385_v32 }
 0x5bb   : > { %7359 = vmatmul.msk.bf16.vlgmr.msra.gmra.mxu2 %vm860_vm1, %v2440_v60  ;;  %v2446_v41 = vpack.c.bf16 %v2430_v21, %v2430_v21 }
 0x5bc   : > { %2639 = vmatpush.bf16.msrb.mxu2 %v2627_v0 }
 0x5be   : > { %v2881_v1 = vpop.permute.xlu2 %2880 }
 0x5bf   : > { %v2595_v5 = vpop.permute.xlu0 %2594 }
 0x5c0   : > { %2607 = vmatpush.bf16.msrb.mxu3 %v2595_v5  ;;  %v7784_v51 = vpop.eup %7783 }
 0x5c1   : > { %v2388_v23 = vpop.f32.mrf.mxu0  ;;  %v2819_v27 = vpop.permute.xlu1 %2818  ;;  %v2431_v0 = vmul.f32 %v7784_v51, %v9289_v37 }
 0x5c2   : > { %7785 = vrcp.f32 %v2388_v23 }
 0x5c3   : > { %7360 = vmatmul.msk.bf16.vlgmr.msrb.gmra.mxu1 %vm860_vm1, %v2441_v22  ;;  %v2447_v56 = vpack.c.bf16 %v2431_v0, %v2431_v0 }
 0x5c4   : > { %2608 = vmatpush.bf16.msrb.mxu3 %v2593_v16 }
 0x5c7   : > { %7361 = vmatmul.msk.bf16.vlgmr.msrb.gmra.mxu3 %vm860_vm1, %v2442_v39  ;;  %v2625_v17 = vpop.permute.xlu0 %2624 }
 0x5c8   : > { %2703 = vmatpush.bf16.msra.mxu3 %v2691_v53  ;;  %2640 = vmatpush.bf16.msrb.mxu2 %v2625_v17  ;;  %v7786_v18 = vpop.eup %7785  ;;  %v2915_v53 = vpop.permute.xlu2 %2914 }
 0x5c9   : > { %v2391_v57 = vpop.f32.mrf.mxu0  ;;  %v2883_v42 = vpop.permute.xlu1 %2882  ;;  %v2432_v58 = vmul.f32 %v7786_v18, %v9310_v44 }
 0x5ca   : > { %7787 = vrcp.f32 %v2391_v57 }
 0x5cb   : > { %7362 = vmatmul.msk.bf16.vlgmr.msrb.gmra.mxu2 %vm860_vm1, %v2443_v54  ;;  %v2448_v34 = vpack.c.bf16 %v2432_v58, %v2432_v58 }
 0x5cc   : > { %2704 = vmatpush.bf16.msra.mxu3 %v2689_v31  ;;  %2735 = vmatpush.bf16.msra.mxu2 %v2723_v6 }
 0x5cf   : > { %v2659_v29 = vpop.permute.xlu0 %2658 }
 0x5d0   : > { %2671 = vmatpush.bf16.msra.mxu1 %v2659_v29  ;;  %v7788_v28 = vpop.eup %7787  ;;  %v2945_v39 = vpop.permute.xlu2 %2944 }
 0x5d1   : > { %v2394_v33 = vpop.f32.mrf.mxu0  ;;  %v2433_v40 = vmul.f32 %v7788_v28, %v9331_v15  ;;  %v2849_v44 = vpop.permute.xlu1 %2848  ;;  %v7619_v15 = vld [vmem:[%s11425_s8 + $0x8] sm:$0xff] }
 0x5d2   : > { %7789 = vrcp.f32 %v2394_v33 }
 0x5d3   : > { %v2449_v37 = vpack.c.bf16 %v2433_v40, %v2433_v40 }
 0x5d4   : > { %2672 = vmatpush.bf16.msra.mxu1 %v2657_v12 }
 0x5d7   : > { %7363 = vmatmul.msk.bf16.vlgmr.msra.gmra.mxu1 %vm860_vm1, %v2444_v55  ;;  %7364 = vmatmul.msk.bf16.vlgmr.msra.gmra.mxu3 %vm860_vm1, %v2445_v62  ;;  %v2721_v20 = vpop.permute.xlu0 %2720 }
 0x5d8   : > { %2767 = vmatpush.bf16.msrb.mxu1 %v2755_v30  ;;  %2736 = vmatpush.bf16.msra.mxu2 %v2721_v20  ;;  %v7790_v60 = vpop.eup %7789 }
 0x5d9   : > { %v2434_v25 = vmul.f32 %v7790_v60, %v9350_v13  ;;  %v2947_v6 = vpop.permute.xlu1 %2946 }
 0x5db   : > { %7365 = vmatmul.msk.bf16.vlgmr.msra.gmra.mxu2 %vm860_vm1, %v2446_v41  ;;  %v2450_v22 = vpack.c.bf16 %v2434_v25, %v2434_v25 }
 0x5dc   : > { %2768 = vmatpush.bf16.msrb.mxu1 %v2753_v63  ;;  %2831 = vmatpush.bf16.msrb.mxu2 %v2819_v27  ;;  %v7618_v63 = vld [vmem:[%s11425_s8] sm:$0xff] }
 0x5df   : > { %v2787_v16 = vpop.permute.xlu0 %2786  ;;  %v2397_v31 = vpop.f32.mrf.mxu0 }
 0x5e0   : > { %2799 = vmatpush.bf16.msrb.mxu3 %v2787_v16  ;;  %7791 = vrcp.f32 %v2397_v31 }
 0x5e4   : > { %2800 = vmatpush.bf16.msrb.mxu3 %v2785_v10 }
 0x5e6   : > { %v7792_v26 = vpop.eup %7791 }
 0x5e7   : > { %7366 = vmatmul.msk.bf16.vlgmr.msrb.gmra.mxu1 %vm860_vm1, %v2447_v56  ;;  %7367 = vmatmul.msk.bf16.vlgmr.msrb.gmra.mxu3 %vm860_vm1, %v2448_v34  ;;  %v2817_v11 = vpop.permute.xlu0 %2816  ;;  %v2435_v32 = vmul.f32 %v7792_v26, %v9379_v19 }
 0x5e8   : > { %2895 = vmatpush.bf16.msra.mxu3 %v2883_v42  ;;  %2832 = vmatpush.bf16.msrb.mxu2 %v2817_v11 }
 0x5e9   : > { %v2451_v24 = vpack.c.bf16 %v2435_v32, %v2435_v32 }
 0x5eb   : > { %7368 = vmatmul.msk.bf16.vlgmr.msrb.gmra.mxu2 %vm860_vm1, %v2449_v37 }
 0x5ec   : > { %2896 = vmatpush.bf16.msra.mxu3 %v2881_v1  ;;  %2927 = vmatpush.bf16.msra.mxu2 %v2915_v53 }
 0x5ef   : > { %v2851_v36 = vpop.permute.xlu0 %2850 }
 0x5f0   : > { %3024 = vmatpush.bf16.msrb.mxu3 %v7619_v15  ;;  %2863 = vmatpush.bf16.msra.mxu1 %v2851_v36 }
 0x5f2   : > { %v2400_v5 = vpop.f32.mrf.mxu0 }
 0x5f3   : > { %7793 = vrcp.f32 %v2400_v5  ;;  %v9469_v5 = vld [vmem:[%s11426_s9] ss:$0 sm:$0xff] }
 0x5f4   : > { %2864 = vmatpush.bf16.msra.mxu1 %v2849_v44  ;;  %3025 = vmatpush.bf16.msrb.mxu3 %v7618_v63 }
 0x5f7   : > { %7369 = vmatmul.msk.bf16.vlgmr.msra.gmra.mxu1 %vm860_vm1, %v2450_v22  ;;  %7370 = vmatmul.msk.bf16.vlgmr.msra.gmra.mxu3 %vm860_vm1, %v2451_v24  ;;  %v2913_v52 = vpop.permute.xlu0 %2912 }
 0x5f8   : > { %2959 = vmatpush.bf16.msrb.mxu1 %v2947_v6  ;;  %2928 = vmatpush.bf16.msra.mxu2 %v2913_v52 }
 0x5f9   : > { %v7794_v12 = vpop.eup %7793 }
 0x5fa   : > { %v2436_v2 = vmul.f32 %v7794_v12, %v9403_v50 }
 0x5fc   : > { %2960 = vmatpush.bf16.msrb.mxu1 %v2945_v39  ;;  %v2452_v13 = vpack.c.bf16 %v2436_v2, %v2436_v2 }
 0x5fe   : > { %7371 = vmatmul.msk.bf16.vlgmr.msra.gmra.mxu2 %vm860_vm1, %v2452_v13 }
 0x602   : > { %v2403_v19 = vpop.f32.mrf.mxu0 }
 0x603   : > { %7795 = vrcp.f32 %v2403_v19 }
 0x609   : > { %v7796_v17 = vpop.eup %7795 }
 0x60a   : > { %v2437_v54 = vmul.f32 %v7796_v17, %v9415_v45 }
 0x60c   : > { %v2453_v23 = vpack.c.bf16 %v2437_v54, %v2437_v54 }
 0x60e   : > { %7372 = vmatmul.msk.bf16.vlgmr.msrb.gmra.mxu1 %vm860_vm1, %v2453_v23 }
 0x62e   : > { %v2514_v30 = vpop.f32.mrf.mxu3 }
 0x630   : > { %v2482_v59 = vpop.f32.mrf.mxu1 }
 0x631   : > { %v2966_v50 = vpack.c.bf16 %v2514_v30, %v2482_v59 }
 0x633   : > { %7381 = vmatmul.msk.bf16.vlgmr.msrb.gmra.mxu3 %vm860_vm1, %v2966_v50 }
 0x636   : > { %v2516_v38 = vpop.f32.mrf.mxu3 }
 0x638   : > { %v2484_v29 = vpop.f32.mrf.mxu1 }
 0x63e   : > { %v2546_v46 = vpop.f32.mrf.mxu2 }
 0x640   : > { %v2578_v9 = vpop.f32.mrf.mxu1 }
 0x641   : > { %v2967_v61 = vpack.c.bf16 %v2578_v9, %v2546_v46 }
 0x643   : > { %7382 = vmatmul.msk.bf16.gmra.mxu3 %vm860_vm1, %v2967_v61 }
 0x646   : > { %v2548_v45 = vpop.f32.mrf.mxu2 }
 0x648   : > { %v2580_v57 = vpop.f32.mrf.mxu1 }
 0x649   : > { %v11510_v57 = vld [vmem:[#allocation11_spill] sm:$0xff] }
 0x64a   : > { %v2610_v10 = vpop.f32.mrf.mxu3 }
 0x64e   : > { %v2642_v55 = vpop.f32.mrf.mxu2 }
 0x64f   : > { %v2968_v62 = vpack.c.bf16 %v2642_v55, %v2610_v10 }
 0x652   : > { %v2612_v21 = vpop.f32.mrf.mxu3 }
 0x653   : > { %7383 = vmatmul.msk.bf16.gmra.mxu3 %vm860_vm1, %v2968_v62 }
 0x654   : > { %v2674_v27 = vpop.f32.mrf.mxu1 }
 0x656   : > { %v2644_v20 = vpop.f32.mrf.mxu2 }
 0x65a   : > { %v2706_v41 = vpop.f32.mrf.mxu3 }
 0x65b   : > { %v2969_v18 = vpack.c.bf16 %v2706_v41, %v2674_v27  ;;  %v11511_v27 = vld [vmem:[#allocation12_spill] sm:$0xff] }
 0x65c   : > { %v2676_v51 = vpop.f32.mrf.mxu1 }
 0x65e   : > { %v2738_v33 = vpop.f32.mrf.mxu2 }
 0x662   : > { %v2708_v1 = vpop.f32.mrf.mxu3 }
 0x663   : > { %7384 = vmatmul.msk.bf16.gmra.mxu3 %vm860_vm1, %v2969_v18 }
 0x664   : > { %v2770_v16 = vpop.f32.mrf.mxu1 }
 0x665   : > { %v2970_v56 = vpack.c.bf16 %v2770_v16, %v2738_v33 }
 0x666   : > { %v2740_v42 = vpop.f32.mrf.mxu2 }
 0x667   : > { %v11512_v42 = vld [vmem:[#allocation14_spill] sm:$0xff] }
 0x66a   : > { %v2802_v0 = vpop.f32.mrf.mxu3 }
 0x66c   : > { %v2772_v58 = vpop.f32.mrf.mxu1 }
 0x66e   : > { %v2834_v28 = vpop.f32.mrf.mxu2 }
 0x66f   : > { %v2971_v44 = vpack.c.bf16 %v2834_v28, %v2802_v0 }
 0x672   : > { %v2804_v34 = vpop.f32.mrf.mxu3 }
 0x673   : > { %7385 = vmatmul.msk.bf16.gmra.mxu3 %vm860_vm1, %v2970_v56 }
 0x674   : > { %v2866_v40 = vpop.f32.mrf.mxu1 }
 0x676   : > { %v2836_v31 = vpop.f32.mrf.mxu2 }
 0x67a   : > { %v2898_v11 = vpop.f32.mrf.mxu3 }
 0x67b   : > { %v2972_v36 = vpack.c.bf16 %v2898_v11, %v2866_v40 }
 0x67c   : > { %v2868_v53 = vpop.f32.mrf.mxu1 }
 0x67d   : > { %v11513_v53 = vld [vmem:[#allocation16_spill] sm:$0xff] }
 0x681   : > { %v2930_v37 = vpop.f32.mrf.mxu2 }
 0x682   : > { %v2900_v60 = vpop.f32.mrf.mxu3 }
 0x683   : > { %7386 = vmatmul.msk.bf16.gmra.mxu3 %vm860_vm1, %v2971_v44 }
 0x689   : > { %v2932_v15 = vpop.f32.mrf.mxu2 }
 0x68b   : > { %v2962_v26 = vpop.f32.mrf.mxu1 }
 0x68c   : > { %v2973_v32 = vpack.c.bf16 %v2962_v26, %v2930_v37 }
 0x693   : > { %v2964_v25 = vpop.f32.mrf.mxu1  ;;  %7387 = vmatmul.msk.bf16.gmra.mxu3 %vm860_vm1, %v2972_v36 }
 0x6a3   : > { %7388 = vmatmul.msk.bf16.gmra.mxu3 %vm860_vm1, %v2973_v32 }
 0x6b6   : > { %v3027_v6 = vpop.f32.mrf.mxu3 }
 0x6b7   : > { %v3028_v22 = vadd.f32 %v9469_v5, %v3027_v6 }
 0x6b9   : > { %v9473_v24 = vadd.f32 %v3028_v22, %v8361_v35  ;;  %v11514_v22 = vld [vmem:[#allocation15_spill] sm:$0xff] }
 0x6bb   : > { %v3083_v52 = vsel %vm860_vm1, %v9473_v24, 0.0 }
 0x6bc   : > { %3084 = vadd.xlane.f32.xlu0 %v3083_v52 }
 0x6be   : > { %v3029_v12 = vpop.f32.mrf.mxu3 }
 0x6bf   : > { %v3030_v39 = vadd.f32 %v9469_v5, %v3029_v12 }
 0x6c1   : > { %v9479_v2 = vadd.f32 %v3030_v39, %v8366_v43 }
 0x6c3   : > { %v3086_v13 = vsel %vm860_vm1, %v9479_v2, 0.0 }
 0x6c4   : > { %3087 = vadd.xlane.f32.xlu1 %v3086_v13 }
 0x6c6   : > { %v3032_v19 = vpop.f32.mrf.mxu3 }
 0x6c7   : > { %v3033_v17 = vadd.f32 %v9469_v5, %v3032_v19 }
 0x6c9   : > { %v9485_v35 = vadd.f32 %v3033_v17, %v8325_v3 }
 0x6cb   : > { %v3089_v54 = vsel %vm860_vm1, %v9485_v35, 0.0 }
 0x6cc   : > { %3090 = vadd.xlane.f32.xlu2 %v3089_v54 }
 0x6ce   : > { %v3034_v23 = vpop.f32.mrf.mxu3 }
 0x6cf   : > { %v3035_v63 = vadd.f32 %v9469_v5, %v3034_v23 }
 0x6d1   : > { %v9491_v43 = vadd.f32 %v3035_v63, %v8330_v8 }
 0x6d3   : > { %v3092_v30 = vsel %vm860_vm1, %v9491_v43, 0.0 }
 0x6d4   : > { %3093 = vadd.xlane.f32.xlu0 %v3092_v30  ;;  %v11515_v30 = vld [vmem:[#allocation13_spill] sm:$0xff] }
 0x6d6   : > { %v3037_v59 = vpop.f32.mrf.mxu3 }
 0x6d7   : > { %v3038_v50 = vadd.f32 %v9469_v5, %v3037_v59 }
 0x6d9   : > { %v9497_v3 = vadd.f32 %v3038_v50, %v8371_v47 }
 0x6db   : > { %v3095_v38 = vsel %vm860_vm1, %v9497_v3, 0.0 }
 0x6dc   : > { %3096 = vadd.xlane.f32.xlu1 %v3095_v38 }
 0x6de   : > { %v3039_v29 = vpop.f32.mrf.mxu3 }
 0x6df   : > { %v3040_v46 = vadd.f32 %v9469_v5, %v3039_v29 }
 0x6e1   : > { %v9503_v8 = vadd.f32 %v3040_v46, %v8335_v14 }
 0x6e3   : > { %v3098_v9 = vsel %vm860_vm1, %v9503_v8, 0.0 }
 0x6e4   : > { %3099 = vadd.xlane.f32.xlu2 %v3098_v9 }
 0x6e6   : > { %v3042_v61 = vpop.f32.mrf.mxu3 }
 0x6e7   : > { %v3043_v45 = vadd.f32 %v9469_v5, %v3042_v61 }
 0x6e9   : > { %v9509_v47 = vadd.f32 %v3043_v45, %v11510_v57 }
 0x6eb   : > { %v3101_v10 = vsel %vm860_vm1, %v9509_v47, 0.0 }
 0x6ec   : > { %3102 = vadd.xlane.f32.xlu2 %v3101_v10  ;;  %v11516_v10 = vld [vmem:[#allocation17_spill] sm:$0xff] }
 0x6ee   : > { %v3044_v55 = vpop.f32.mrf.mxu3 }
 0x6ef   : > { %v3045_v51 = vadd.f32 %v9469_v5, %v3044_v55 }
 0x6f1   : > { %v9523_v0 = vadd.f32 %v3045_v51, %v11512_v42 }
 0x6f3   : > { %v3104_v40 = vsel %vm860_vm1, %v9523_v0, 0.0 }
 0x6f6   : > { %v3047_v62 = vpop.f32.mrf.mxu3 }
 0x6f7   : > { %v3048_v56 = vadd.f32 %v9469_v5, %v3047_v62 }
 0x6f9   : > { %v9536_v37 = vadd.f32 %v3048_v56, %v11513_v53 }
 0x6fb   : > { %v3107_v25 = vsel %vm860_vm1, %v9536_v37, 0.0 }
 0x6fe   : > { %v3049_v16 = vpop.f32.mrf.mxu3 }
 0x6ff   : > { %v3050_v26 = vadd.f32 %v9469_v5, %v3049_v16  ;;  %v11517_v16 = vld [vmem:[#allocation19_spill] sm:$0xff] }
 0x701   : > { %v9549_v52 = vadd.f32 %v3050_v26, %v11514_v22 }
 0x703   : > { %v3110_v17 = vsel %vm860_vm1, %v9549_v52, 0.0 }
 0x706   : > { %v3052_v60 = vpop.f32.mrf.mxu3 }
 0x707   : > { %v3053_v19 = vadd.f32 %v9469_v5, %v3052_v60 }
 0x709   : > { %v9562_v59 = vadd.f32 %v3053_v19, %v11515_v30 }
 0x70b   : > { %v3113_v46 = vsel %vm860_vm1, %v9562_v59, 0.0 }
 0x70e   : > { %v3054_v13 = vpop.f32.mrf.mxu3 }
 0x70f   : > { %v3055_v29 = vadd.f32 %v9469_v5, %v3054_v13 }
 0x711   : > { %v9575_v55 = vadd.f32 %v3055_v29, %v11516_v10 }
 0x713   : > { %v3116_v51 = vsel %vm860_vm1, %v9575_v55, 0.0 }
 0x716   : > { %v3057_v61 = vpop.f32.mrf.mxu3 }
 0x72f   : > { %v3085_v21 = vpop.xlane.xlu0 %3084 }
 0x730   : > { %v3131_v14 = vmul.f32 %v3085_v21, %v11511_v27 }
 0x732   : > { %v9515_v20 = vsub.f32 %v9473_v24, %v3131_v14  ;;  %v3058_v14 = vadd.f32 %v9469_v5, %v3057_v61 }
 0x734   : > { %v3163_v41 = vmul.f32 %v9515_v20, %v9515_v20  ;;  %v9588_v42 = vadd.f32 %v3058_v14, %v11517_v16 }
 0x736   : > { %v3179_v33 = vsel %vm860_vm1, %v3163_v41, 0.0 }
 0x737   : > { %v3088_v18 = vpop.xlane.xlu1 %3087  ;;  %3180 = vadd.xlane.f32.xlu0 %v3179_v33 }
 0x738   : > { %v3132_v1 = vmul.f32 %v3088_v18, %v11511_v27 }
 0x73a   : > { %v9526_v58 = vsub.f32 %v9479_v2, %v3132_v1  ;;  %v3059_v1 = vpop.f32.mrf.mxu3 }
 0x73c   : > { %v3164_v28 = vmul.f32 %v9526_v58, %v9526_v58 }
 0x73e   : > { %v3182_v34 = vsel %vm860_vm1, %v3164_v28, 0.0 }
 0x73f   : > { %v3091_v31 = vpop.xlane.xlu2 %3090  ;;  %3183 = vadd.xlane.f32.xlu1 %v3182_v34  ;;  %3105 = vadd.xlane.f32.xlu0 %v3104_v40  ;;  %v3060_v34 = vadd.f32 %v9469_v5, %v3059_v1 }
 0x740   : > { %v3133_v11 = vmul.f32 %v3091_v31, %v11511_v27  ;;  %v3119_v31 = vsel %vm860_vm1, %v9588_v42, 0.0 }
 0x742   : > { %v9539_v44 = vsub.f32 %v9485_v35, %v3133_v11  ;;  %v11518_v11 = vld [vmem:[#allocation18_spill] sm:$0xff]  ;;  %v3062_v60 = vpop.f32.mrf.mxu3 }
 0x743   : > { %v9600_v53 = vadd.f32 %v3060_v34, %v11518_v11 }
 0x744   : > { %v3165_v15 = vmul.f32 %v9539_v44, %v9539_v44 }
 0x745   : > { %v3122_v26 = vsel %vm860_vm1, %v9600_v53, 0.0 }
 0x746   : > { %v3185_v36 = vsel %vm860_vm1, %v3165_v15, 0.0  ;;  %v3063_v15 = vadd.f32 %v9469_v5, %v3062_v60 }
 0x747   : > { %3186 = vadd.xlane.f32.xlu1 %v3185_v36  ;;  %3108 = vadd.xlane.f32.xlu0 %v3107_v25  ;;  %v3094_v32 = vpop.xlane.xlu0 %3093  ;;  %v11519_v36 = vld [vmem:[#allocation20_spill] sm:$0xff] }
 0x748   : > { %v3134_v6 = vmul.f32 %v3094_v32, %v11511_v27  ;;  %v9606_v25 = vadd.f32 %v3063_v15, %v11519_v36 }
 0x74a   : > { %v9552_v12 = vsub.f32 %v9491_v43, %v3134_v6  ;;  %v3125_v32 = vsel %vm860_vm1, %v9606_v25, 0.0  ;;  %v3064_v1 = vpop.f32.mrf.mxu3 }
 0x74c   : > { %v3166_v39 = vmul.f32 %v9552_v12, %v9552_v12 }
 0x74e   : > { %v3188_v54 = vsel %vm860_vm1, %v3166_v39, 0.0 }
 0x74f   : > { %3111 = vadd.xlane.f32.xlu1 %v3110_v17  ;;  %v3097_v23 = vpop.xlane.xlu1 %3096  ;;  %3189 = vadd.xlane.f32.xlu2 %v3188_v54 }
 0x750   : > { %v3135_v63 = vmul.f32 %v3097_v23, %v11511_v27 }
 0x752   : > { %v9565_v50 = vsub.f32 %v9497_v3, %v3135_v63 }
 0x754   : > { %v3167_v38 = vmul.f32 %v9565_v50, %v9565_v50 }
 0x756   : > { %v3191_v9 = vsel %vm860_vm1, %v3167_v38, 0.0 }
 0x757   : > { %v3100_v45 = vpop.xlane.xlu2 %3099  ;;  %3114 = vadd.xlane.f32.xlu1 %v3113_v46  ;;  %3192 = vadd.xlane.f32.xlu2 %v3191_v9  ;;  %v7621_v9 = vld [vmem:[%s11427_s10 + $0x8] sm:$0xff] }
 0x758   : > { %v3136_v57 = vmul.f32 %v3100_v45, %v11511_v27  ;;  %3493 = vmatpush.bf16.msrb.mxu2 %v7621_v9 }
 0x75a   : > { %v9578_v62 = vsub.f32 %v9503_v8, %v3136_v57 }
 0x75c   : > { %v3168_v21 = vmul.f32 %v9578_v62, %v9578_v62 }
 0x75e   : > { %v3194_v41 = vsel %vm860_vm1, %v3168_v21, 0.0  ;;  %v7620_v21 = vld [vmem:[%s11427_s10] sm:$0xff] }
 0x75f   : > { %v3103_v33 = vpop.xlane.xlu2 %3102  ;;  %3195 = vadd.xlane.f32.xlu0 %v3194_v41  ;;  %3117 = vadd.xlane.f32.xlu2 %v3116_v51 }
 0x760   : > { %v3137_v18 = vmul.f32 %v3103_v33, %v11511_v27  ;;  %3494 = vmatpush.bf16.msrb.mxu2 %v7620_v21 }
 0x762   : > { %v9591_v28 = vsub.f32 %v9509_v47, %v3137_v18 }
 0x764   : > { %v3169_v56 = vmul.f32 %v9591_v28, %v9591_v28 }
 0x766   : > { %v3197_v40 = vsel %vm860_vm1, %v3169_v56, 0.0 }
 0x767   : > { %3198 = vadd.xlane.f32.xlu0 %v3197_v40  ;;  %3120 = vadd.xlane.f32.xlu2 %v3119_v31  ;;  %v3065_v31 = vadd.f32 %v9469_v5, %v3064_v1 }
 0x76f   : > { %3123 = vadd.xlane.f32.xlu0 %v3122_v26 }
 0x777   : > { %3126 = vadd.xlane.f32.xlu0 %v3125_v32 }
 0x7aa   : > { %v3181_v6 = vpop.xlane.xlu0 %3180 }
 0x7ab   : > { %v3227_v22 = vmul.f32 %v3181_v6, %v11511_v27 }
 0x7ad   : > { %v3243_v39 = vadd.f32 1e-12, %v3227_v22 }
 0x7af   : > { %7797 = vrsqrt.f32 %v3243_v39  ;;  %vm3265_vm10 = vweird.f32 %v3243_v39 }
 0x7b2   : > { %v3184_v13 = vpop.xlane.xlu1 %3183  ;;  %v3106_v19 = vpop.xlane.xlu0 %3105 }
 0x7b3   : > { %v3228_v17 = vmul.f32 %v3184_v13, %v11511_v27  ;;  %v3138_v54 = vmul.f32 %v3106_v19, %v11511_v27  ;;  %v11520_v19 = vld [vmem:[#allocation21_spill] sm:$0xff] }
 0x7b5   : > { %v7798_v23 = vpop.eup %7797  ;;  %v3244_v63 = vadd.f32 1e-12, %v3228_v17  ;;  %v9614_v30 = vsub.f32 %v9523_v0, %v3138_v54  ;;  %v9640_v17 = vadd.f32 %v3065_v31, %v11520_v19 }
 0x7b6   : > { %v3260_v38 = vmul.f32 %v7798_v23, %v3243_v39  ;;  %vm3266_vm9 = vweird.f32 %v7798_v23 }
 0x7b7   : > { %7799 = vrsqrt.f32 %v3244_v63  ;;  %v3170_v29 = vmul.f32 %v9614_v30, %v9614_v30  ;;  %vm3267_vm12 = vmor %vm3265_vm10, %vm3266_vm9  ;;  %vm3275_vm13 = vweird.f32 %v3244_v63 }
 0x7b8   : > { %v3261_v46 = vmul.f32 %v7798_v23, %v3260_v38 }
 0x7b9   : > { %v3200_v61 = vsel %vm860_vm1, %v3170_v29, 0.0 }
 0x7ba   : > { %v3262_v45 = vmul.f32 0.5, %v3261_v46  ;;  %v3187_v57 = vpop.xlane.xlu1 %3186  ;;  %3201 = vadd.xlane.f32.xlu1 %v3200_v61  ;;  %v3109_v10 = vpop.xlane.xlu0 %3108 }
 0x7bb   : > { %v3229_v14 = vmul.f32 %v3187_v57, %v11511_v27  ;;  %v3139_v41 = vmul.f32 %v3109_v10, %v11511_v27 }
 0x7bc   : > { %v3263_v16 = vsub.f32 1.5, %v3262_v45 }
 0x7bd   : > { %v7800_v51 = vpop.eup %7799  ;;  %v9627_v33 = vadd.f32 1e-12, %v3229_v14  ;;  %v9630_v18 = vsub.f32 %v9536_v37, %v3139_v41 }
 0x7be   : > { %v3270_v56 = vmul.f32 %v7800_v51, %v3244_v63  ;;  %v3264_v60 = vmul.f32 %v7798_v23, %v3263_v16  ;;  %vm3276_vm11 = vweird.f32 %v7800_v51 }
 0x7bf   : > { %7801 = vrsqrt.f32 %v9627_v33  ;;  %v3171_v34 = vmul.f32 %v9630_v18, %v9630_v18  ;;  %vm3277_vm14 = vmor %vm3275_vm13, %vm3276_vm11  ;;  %vm3285_vm2 = vweird.f32 %v9627_v33 }
 0x7c0   : > { %v3271_v40 = vmul.f32 %v7800_v51, %v3270_v56  ;;  %v3268_v38 = vsel %vm3267_vm12, %v7798_v23, %v3264_v60  ;;  %v3128_v23 = vsel %vm860_vm1, %v9640_v17, 0.0 }
 0x7c1   : > { %v3203_v11 = vsel %vm860_vm1, %v3171_v34, 0.0  ;;  %v3419_v45 = vmul.f32 %v3268_v38, %v9515_v20 }
 0x7c2   : > { %v3272_v15 = vmul.f32 0.5, %v3271_v40  ;;  %v3112_v26 = vpop.xlane.xlu1 %3111  ;;  %v3190_v36 = vpop.xlane.xlu2 %3189  ;;  %3204 = vadd.xlane.f32.xlu1 %v3203_v11 }
 0x7c3   : > { %v3140_v32 = vmul.f32 %v3112_v26, %v11511_v27  ;;  %v3230_v6 = vmul.f32 %v3190_v36, %v11511_v27 }
 0x7c4   : > { %v3273_v22 = vsub.f32 1.5, %v3272_v15 }
 0x7c5   : > { %v7802_v13 = vpop.eup %7801  ;;  %v9643_v5 = vsub.f32 %v9549_v52, %v3140_v32  ;;  %v3246_v54 = vadd.f32 1e-12, %v3230_v6 }
 0x7c6   : > { %v3274_v29 = vmul.f32 %v7800_v51, %v3273_v22  ;;  %v3280_v46 = vmul.f32 %v7802_v13, %v9627_v33  ;;  %vm3286_vm15 = vweird.f32 %v7802_v13 }
 0x7c7   : > { %7803 = vrsqrt.f32 %v3246_v54  ;;  %v3172_v39 = vmul.f32 %v9643_v5, %v9643_v5  ;;  %vm3287_vm4 = vmor %vm3285_vm2, %vm3286_vm15  ;;  %vm3295_vm5 = vweird.f32 %v3246_v54 }
 0x7c8   : > { %v3278_v9 = vsel %vm3277_vm14, %v7800_v51, %v3274_v29  ;;  %v3281_v61 = vmul.f32 %v7802_v13, %v3280_v46 }
 0x7c9   : > { %v3420_v57 = vmul.f32 %v3278_v9, %v9526_v58  ;;  %v3206_v10 = vsel %vm860_vm1, %v3172_v39, 0.0 }
 0x7ca   : > { %v3282_v21 = vmul.f32 0.5, %v3281_v61  ;;  %v3115_v63 = vpop.xlane.xlu1 %3114  ;;  %3207 = vadd.xlane.f32.xlu2 %v3206_v10  ;;  %v3193_v14 = vpop.xlane.xlu2 %3192  ;;  %3129 = vadd.xlane.f32.xlu1 %v3128_v23 }
 0x7cb   : > { %v3435_v41 = vpack.c.bf16 %v3420_v57, %v3419_v45  ;;  %v3141_v1 = vmul.f32 %v3115_v63, %v11511_v27  ;;  %v3231_v51 = vmul.f32 %v3193_v14, %v11511_v27 }
 0x7cc   : > { %v3283_v56 = vsub.f32 1.5, %v3282_v21 }
 0x7cd   : > { %v7804_v16 = vpop.eup %7803  ;;  %v9656_v20 = vsub.f32 %v9562_v59, %v3141_v1  ;;  %v3247_v58 = vadd.f32 1e-12, %v3231_v51  ;;  %7397 = vmatmul.msk.bf16.vlgmr.msrb.gmra.mxu2 %vm860_vm1, %v3435_v41 }
 0x7ce   : > { %v3290_v34 = vmul.f32 %v7804_v16, %v3246_v54  ;;  %v3284_v60 = vmul.f32 %v7802_v13, %v3283_v56  ;;  %vm3296_vm3 = vweird.f32 %v7804_v16 }
 0x7cf   : > { %7805 = vrsqrt.f32 %v3247_v58  ;;  %v3173_v40 = vmul.f32 %v9656_v20, %v9656_v20  ;;  %vm3297_vm6 = vmor %vm3295_vm5, %vm3296_vm3  ;;  %vm3305_vm8 = vweird.f32 %v3247_v58 }
 0x7d0   : > { %v3291_v31 = vmul.f32 %v7804_v16, %v3290_v34  ;;  %v3288_v46 = vsel %vm3287_vm4, %v7802_v13, %v3284_v60 }
 0x7d1   : > { %v3209_v11 = vsel %vm860_vm1, %v3173_v40, 0.0  ;;  %v3421_v10 = vmul.f32 %v3288_v46, %v9539_v44 }
 0x7d2   : > { %v3292_v15 = vmul.f32 0.5, %v3291_v31  ;;  %3210 = vadd.xlane.f32.xlu2 %v3209_v11  ;;  %v3118_v26 = vpop.xlane.xlu2 %3117  ;;  %v3196_v36 = vpop.xlane.xlu0 %3195 }
 0x7d3   : > { %v3142_v32 = vmul.f32 %v3118_v26, %v11511_v27  ;;  %v3232_v6 = vmul.f32 %v3196_v36, %v11511_v27 }
 0x7d4   : > { %v3293_v22 = vsub.f32 1.5, %v3292_v15 }
 0x7d5   : > { %v7806_v19 = vpop.eup %7805  ;;  %v9666_v38 = vsub.f32 %v9575_v55, %v3142_v32  ;;  %v3248_v29 = vadd.f32 1e-12, %v3232_v6 }
 0x7d6   : > { %v3294_v39 = vmul.f32 %v7804_v16, %v3293_v22  ;;  %v3300_v9 = vmul.f32 %v7806_v19, %v3247_v58  ;;  %vm3306_vm7 = vweird.f32 %v7806_v19 }
 0x7d7   : > { %7807 = vrsqrt.f32 %v3248_v29  ;;  %v3174_v61 = vmul.f32 %v9666_v38, %v9666_v38  ;;  %vm3307_vm10 = vmor %vm3305_vm8, %vm3306_vm7  ;;  %vm3315_vm11 = vweird.f32 %v3248_v29 }
 0x7d8   : > { %v3298_v45 = vsel %vm3297_vm6, %v7804_v16, %v3294_v39  ;;  %v3301_v57 = vmul.f32 %v7806_v19, %v3300_v9 }
 0x7d9   : > { %v3212_v33 = vsel %vm860_vm1, %v3174_v61, 0.0  ;;  %v3422_v23 = vmul.f32 %v3298_v45, %v9552_v12 }
 0x7da   : > { %v3302_v21 = vmul.f32 0.5, %v3301_v57  ;;  %3213 = vadd.xlane.f32.xlu0 %v3212_v33  ;;  %v3121_v63 = vpop.xlane.xlu2 %3120  ;;  %v3199_v13 = vpop.xlane.xlu0 %3198 }
 0x7db   : > { %v3143_v54 = vmul.f32 %v3121_v63, %v11511_v27  ;;  %v3436_v14 = vpack.c.bf16 %v3422_v23, %v3421_v10 }
 0x7dc   : > { %v3303_v51 = vsub.f32 1.5, %v3302_v21 }
 0x7dd   : > { %v7808_v41 = vpop.eup %7807  ;;  %v9675_v1 = vsub.f32 %v9588_v42, %v3143_v54  ;;  %7398 = vmatmul.msk.bf16.gmra.mxu2 %vm860_vm1, %v3436_v14 }
 0x7de   : > { %v3310_v16 = vmul.f32 %v7808_v41, %v3248_v29  ;;  %v3304_v34 = vmul.f32 %v7806_v19, %v3303_v51  ;;  %vm3316_vm9 = vweird.f32 %v7808_v41 }
 0x7df   : > { %v3175_v44 = vmul.f32 %v9675_v1, %v9675_v1  ;;  %vm3317_vm12 = vmor %vm3315_vm11, %vm3316_vm9 }
 0x7e0   : > { %v3311_v56 = vmul.f32 %v7808_v41, %v3310_v16  ;;  %v3308_v26 = vsel %vm3307_vm10, %v7806_v19, %v3304_v34 }
 0x7e1   : > { %v3215_v12 = vsel %vm860_vm1, %v3175_v44, 0.0  ;;  %v3423_v46 = vmul.f32 %v3308_v26, %v9565_v50  ;;  %v3233_v50 = vmul.f32 %v3199_v13, %v11511_v27 }
 0x7e2   : > { %v3312_v40 = vmul.f32 0.5, %v3311_v56  ;;  %3216 = vadd.xlane.f32.xlu1 %v3215_v12  ;;  %v3124_v31 = vpop.xlane.xlu0 %3123 }
 0x7e3   : > { %v3144_v11 = vmul.f32 %v3124_v31, %v11511_v27  ;;  %v3249_v57 = vadd.f32 1e-12, %v3233_v50 }
 0x7e4   : > { %v3313_v60 = vsub.f32 1.5, %v3312_v40 }
 0x7e5   : > { %v9683_v15 = vsub.f32 %v9600_v53, %v3144_v11  ;;  %7809 = vrsqrt.f32 %v3249_v57  ;;  %vm3325_vm14 = vweird.f32 %v3249_v57 }
 0x7e6   : > { %v3314_v36 = vmul.f32 %v7808_v41, %v3313_v60 }
 0x7e7   : > { %v3176_v32 = vmul.f32 %v9683_v15, %v9683_v15 }
 0x7e8   : > { %v3318_v6 = vsel %vm3317_vm12, %v7808_v41, %v3314_v36 }
 0x7e9   : > { %v3218_v22 = vsel %vm860_vm1, %v3176_v32, 0.0  ;;  %v3424_v58 = vmul.f32 %v3318_v6, %v9578_v62 }
 0x7ea   : > { %3219 = vadd.xlane.f32.xlu2 %v3218_v22  ;;  %v3127_v39 = vpop.xlane.xlu0 %3126 }
 0x7eb   : > { %v3145_v9 = vmul.f32 %v3127_v39, %v11511_v27  ;;  %v3437_v61 = vpack.c.bf16 %v3424_v58, %v3423_v46  ;;  %v7810_v62 = vpop.eup %7809 }
 0x7ec   : > { %v3320_v33 = vmul.f32 %v7810_v62, %v3249_v57  ;;  %vm3326_vm13 = vweird.f32 %v7810_v62 }
 0x7ed   : > { %v9692_v19 = vsub.f32 %v9606_v25, %v3145_v9  ;;  %7399 = vmatmul.msk.bf16.gmra.mxu2 %vm860_vm1, %v3437_v61  ;;  %vm3327_vm2 = vmor %vm3325_vm14, %vm3326_vm13 }
 0x7ee   : > { %v3321_v63 = vmul.f32 %v7810_v62, %v3320_v33 }
 0x7ef   : > { %v3177_v29 = vmul.f32 %v9692_v19, %v9692_v19 }
 0x7f0   : > { %v3322_v54 = vmul.f32 0.5, %v3321_v63 }
 0x7f1   : > { %v3221_v45 = vsel %vm860_vm1, %v3177_v29, 0.0 }
 0x7f2   : > { %3222 = vadd.xlane.f32.xlu0 %v3221_v45  ;;  %v3323_v44 = vsub.f32 1.5, %v3322_v54 }
 0x7f4   : > { %v3324_v12 = vmul.f32 %v7810_v62, %v3323_v44 }
 0x7f6   : > { %v3328_v22 = vsel %vm3327_vm2, %v7810_v62, %v3324_v12 }
 0x7f7   : > { %v3425_v45 = vmul.f32 %v3328_v22, %v9591_v28 }
 0x82d   : > { %v3202_v10 = vpop.xlane.xlu1 %3201 }
 0x82e   : > { %v3234_v23 = vmul.f32 %v3202_v10, %v11511_v27 }
 0x830   : > { %v3250_v21 = vadd.f32 1e-12, %v3234_v23 }
 0x832   : > { %7811 = vrsqrt.f32 %v3250_v21  ;;  %vm3335_vm3 = vweird.f32 %v3250_v21 }
 0x835   : > { %v3205_v14 = vpop.xlane.xlu1 %3204 }
 0x836   : > { %v3235_v41 = vmul.f32 %v3205_v14, %v11511_v27 }
 0x838   : > { %v7812_v51 = vpop.eup %7811  ;;  %v3251_v16 = vadd.f32 1e-12, %v3235_v41 }
 0x839   : > { %v3330_v56 = vmul.f32 %v7812_v51, %v3250_v21  ;;  %vm3336_vm15 = vweird.f32 %v7812_v51 }
 0x83a   : > { %7813 = vrsqrt.f32 %v3251_v16  ;;  %vm3337_vm4 = vmor %vm3335_vm3, %vm3336_vm15  ;;  %vm3345_vm6 = vweird.f32 %v3251_v16 }
 0x83b   : > { %v3331_v13 = vmul.f32 %v7812_v51, %v3330_v56 }
 0x83d   : > { %v3332_v34 = vmul.f32 0.5, %v3331_v13  ;;  %v3208_v40 = vpop.xlane.xlu2 %3207  ;;  %v3130_v31 = vpop.xlane.xlu1 %3129 }
 0x83e   : > { %v3236_v11 = vmul.f32 %v3208_v40, %v11511_v27  ;;  %v3146_v60 = vmul.f32 %v3130_v31, %v11511_v27 }
 0x83f   : > { %v3333_v26 = vsub.f32 1.5, %v3332_v34 }
 0x840   : > { %v7814_v36 = vpop.eup %7813  ;;  %v3252_v32 = vadd.f32 1e-12, %v3236_v11  ;;  %v9704_v6 = vsub.f32 %v9640_v17, %v3146_v60 }
 0x841   : > { %v3334_v46 = vmul.f32 %v7812_v51, %v3333_v26  ;;  %v3340_v58 = vmul.f32 %v7814_v36, %v3251_v16  ;;  %vm3346_vm5 = vweird.f32 %v7814_v36 }
 0x842   : > { %7815 = vrsqrt.f32 %v3252_v32  ;;  %v3178_v39 = vmul.f32 %v9704_v6, %v9704_v6  ;;  %vm3347_vm8 = vmor %vm3345_vm6, %vm3346_vm5  ;;  %vm3355_vm9 = vweird.f32 %v3252_v32 }
 0x843   : > { %v3338_v9 = vsel %vm3337_vm4, %v7812_v51, %v3334_v46  ;;  %v3341_v61 = vmul.f32 %v7814_v36, %v3340_v58  ;;  %v9719_v51 = vld [vmem:[%s11428_s11] ss:$0 sm:$0xff] }
 0x844   : > { %v3224_v29 = vsel %vm860_vm1, %v3178_v39, 0.0  ;;  %v3426_v50 = vmul.f32 %v3338_v9, %v9614_v30 }
 0x845   : > { %v3342_v57 = vmul.f32 0.5, %v3341_v61  ;;  %v3211_v33 = vpop.xlane.xlu2 %3210  ;;  %3225 = vadd.xlane.f32.xlu1 %v3224_v29 }
 0x846   : > { %v3237_v62 = vmul.f32 %v3211_v33, %v11511_v27  ;;  %v3438_v10 = vpack.c.bf16 %v3426_v50, %v3425_v45 }
 0x847   : > { %v3343_v63 = vsub.f32 1.5, %v3342_v57 }
 0x848   : > { %v7816_v23 = vpop.eup %7815  ;;  %v9712_v21 = vadd.f32 1e-12, %v3237_v62  ;;  %7400 = vmatmul.msk.bf16.gmra.mxu2 %vm860_vm1, %v3438_v10 }
 0x849   : > { %v3350_v54 = vmul.f32 %v7816_v23, %v3252_v32  ;;  %v3344_v41 = vmul.f32 %v7814_v36, %v3343_v63  ;;  %vm3356_vm7 = vweird.f32 %v7816_v23  ;;  %v7624_v63 = vld [vmem:[%s11429_s12 + $0x10] sm:$0xff] }
 0x84a   : > { %7817 = vrsqrt.f32 %v9712_v21  ;;  %vm3357_vm10 = vmor %vm3355_vm9, %vm3356_vm7  ;;  %vm3365_vm12 = vweird.f32 %v9712_v21 }
 0x84b   : > { %v3351_v14 = vmul.f32 %v7816_v23, %v3350_v54  ;;  %v3348_v40 = vsel %vm3347_vm8, %v7814_v36, %v3344_v41 }
 0x84c   : > { %v3427_v32 = vmul.f32 %v3348_v40, %v9630_v18  ;;  %v7625_v18 = vld [vmem:[%s11429_s12 + $0x18] sm:$0xff] }
 0x84d   : > { %v3352_v28 = vmul.f32 0.5, %v3351_v14  ;;  %v3214_v30 = vpop.xlane.xlu0 %3213  ;;  %3752 = vmatpush.bf16.msra.mxu1 %v7625_v18 }
 0x84e   : > { %v3238_v44 = vmul.f32 %v3214_v30, %v11511_v27 }
 0x84f   : > { %v3353_v56 = vsub.f32 1.5, %v3352_v28 }
 0x850   : > { %v9722_v13 = vpop.eup %7817  ;;  %v3254_v12 = vadd.f32 1e-12, %v3238_v44  ;;  %v3496_v34 = vpop.f32.mrf.mxu2 }
 0x851   : > { %v3354_v31 = vmul.f32 %v7816_v23, %v3353_v56  ;;  %v3360_v11 = vmul.f32 %v9722_v13, %v9712_v21  ;;  %v9727_v60 = vadd.f32 %v9719_v51, %v3496_v34  ;;  %vm3366_vm11 = vweird.f32 %v9722_v13  ;;  %3753 = vmatpush.bf16.msra.mxu1 %v7624_v63  ;;  %v7623_v34 = vld [vmem:[%s11429_s12 + $0x8] sm:$0xff] }
 0x852   : > { %7819 = vrsqrt.f32 %v3254_v12  ;;  %vm9762_vm14 = vmor %vm3365_vm12, %vm3366_vm11  ;;  %vm3375_vm15 = vweird.f32 %v3254_v12 }
 0x853   : > { %v3358_v26 = vsel %vm3357_vm10, %v7816_v23, %v3354_v31  ;;  %v3361_v16 = vmul.f32 %v9722_v13, %v3360_v11  ;;  %v3536_v22 = vmul.f32 %v9727_v60, %v9727_v60 }
 0x854   : > { %v3428_v46 = vmul.f32 %v3358_v26, %v9643_v5 }
 0x855   : > { %v3362_v36 = vmul.f32 0.5, %v3361_v16  ;;  %v3552_v58 = vmul.f32 %v3536_v22, %v9727_v60  ;;  %v3217_v39 = vpop.xlane.xlu1 %3216  ;;  %3754 = vmatpush.bf16.msra.mxu1 %v7623_v34 }
 0x856   : > { %v3239_v9 = vmul.f32 %v3217_v39, %v11511_v27  ;;  %v3439_v61 = vpack.c.bf16 %v3428_v46, %v3427_v32 }
 0x857   : > { %v3568_v29 = vmul.f32 0.044715, %v3552_v58  ;;  %v3363_v33 = vsub.f32 1.5, %v3362_v36 }
 0x858   : > { %v7820_v45 = vpop.eup %7819  ;;  %v9736_v50 = vadd.f32 1e-12, %v3239_v9  ;;  %v3498_v57 = vpop.f32.mrf.mxu2  ;;  %7401 = vmatmul.msk.bf16.gmra.mxu2 %vm860_vm1, %v3439_v61 }
 0x859   : > { %v3370_v5 = vmul.f32 %v7820_v45, %v3254_v12  ;;  %v3584_v62 = vadd.f32 %v3568_v29, %v9727_v60  ;;  %v9745_v10 = vadd.f32 %v9719_v51, %v3498_v57  ;;  %v3364_v41 = vmul.f32 %v9722_v13, %v3363_v33 }
 0x85a   : > { %7821 = vrsqrt.f32 %v9736_v50  ;;  %vm3376_vm13 = vweird.f32 %v7820_v45  ;;  %vm3385_vm4 = vweird.f32 %v9736_v50 }
 0x85b   : > { %v3371_v23 = vmul.f32 %v7820_v45, %v3370_v5  ;;  %v3600_v54 = vmul.f32 0.7978846, %v3584_v62  ;;  %v3537_v14 = vmul.f32 %v9745_v10, %v9745_v10  ;;  %v3368_v32 = vsel %vm9762_vm14, %v9722_v13, %v3364_v41  ;;  %vm3377_vm2 = vmor %vm3375_vm15, %vm3376_vm13 }
 0x85c   : > { %v3429_v13 = vmul.f32 %v3368_v32, %v9656_v20  ;;  %v7622_v20 = vld [vmem:[%s11429_s12] sm:$0xff] }
 0x85d   : > { %v3372_v28 = vmul.f32 0.5, %v3371_v23  ;;  %v3220_v30 = vpop.xlane.xlu2 %3219  ;;  %v3553_v44 = vmul.f32 %v3537_v14, %v9745_v10  ;;  %7823 = vtanh.f32 %v3600_v54  ;;  %3755 = vmatpush.bf16.msra.mxu1 %v7622_v20 }
 0x85e   : > { %v3240_v56 = vmul.f32 %v3220_v30, %v11511_v27 }
 0x85f   : > { %v3373_v40 = vsub.f32 1.5, %v3372_v28  ;;  %v3569_v26 = vmul.f32 0.044715, %v3553_v44 }
 0x860   : > { %v9760_v31 = vpop.eup %7821  ;;  %v3256_v16 = vadd.f32 1e-12, %v3240_v56  ;;  %v3501_v22 = vpop.f32.mrf.mxu2 }
 0x861   : > { %v3374_v46 = vmul.f32 %v7820_v45, %v3373_v40  ;;  %v3380_v21 = vmul.f32 %v9760_v31, %v9736_v50  ;;  %v9772_v36 = vadd.f32 %v9719_v51, %v3501_v22  ;;  %v3585_v58 = vadd.f32 %v3569_v26, %v9745_v10 }
 0x862   : > { %7825 = vrsqrt.f32 %v3256_v16  ;;  %vm3386_vm3 = vweird.f32 %v9760_v31  ;;  %vm3395_vm7 = vweird.f32 %v3256_v16 }
 0x863   : > { %v3378_v12 = vsel %vm3377_vm2, %v7820_v45, %v3374_v46  ;;  %v3381_v39 = vmul.f32 %v9760_v31, %v3380_v21  ;;  %v3538_v9 = vmul.f32 %v9772_v36, %v9772_v36  ;;  %v3601_v61 = vmul.f32 0.7978846, %v3585_v58  ;;  %v7824_v33 = vpop.eup %7823  ;;  %vm9790_vm6 = vmor %vm3385_vm4, %vm3386_vm3 }
 0x864   : > { %v3430_v29 = vmul.f32 %v3378_v12, %v9666_v38  ;;  %v3632_v45 = vadd.f32 1.0, %v7824_v33 }
 0x865   : > { %v3382_v57 = vmul.f32 0.5, %v3381_v39  ;;  %v3554_v18 = vmul.f32 %v3538_v9, %v9772_v36  ;;  %7827 = vtanh.f32 %v3601_v61 }
 0x866   : > { %v3440_v5 = vpack.c.bf16 %v3430_v29, %v3429_v13  ;;  %v3648_v34 = vmul.f32 0.5, %v3632_v45 }
 0x867   : > { %v3570_v62 = vmul.f32 0.044715, %v3554_v18  ;;  %v3383_v54 = vsub.f32 1.5, %v3382_v57 }
 0x868   : > { %v7826_v23 = vpop.eup %7825  ;;  %v3503_v63 = vpop.f32.mrf.mxu2  ;;  %7402 = vmatmul.msk.bf16.gmra.mxu2 %vm860_vm1, %v3440_v5  ;;  %v3664_v39 = vmul.f32 %v3648_v34, %v9727_v60 }
 0x869   : > { %v3390_v14 = vmul.f32 %v7826_v23, %v3256_v16  ;;  %v3586_v41 = vadd.f32 %v3570_v62, %v9772_v36  ;;  %v3504_v38 = vadd.f32 %v9719_v51, %v3503_v63  ;;  %v3384_v40 = vmul.f32 %v9760_v31, %v3383_v54 }
 0x86a   : > { %vm3396_vm5 = vweird.f32 %v7826_v23 }
 0x86b   : > { %v3391_v28 = vmul.f32 %v7826_v23, %v3390_v14  ;;  %v7828_v30 = vpop.eup %7827  ;;  %v3602_v44 = vmul.f32 0.7978846, %v3586_v41  ;;  %v3539_v56 = vmul.f32 %v3504_v38, %v3504_v38  ;;  %v3388_v9 = vsel %vm9790_vm6, %v9760_v31, %v3384_v40  ;;  %vm3397_vm8 = vmor %vm3395_vm7, %vm3396_vm5 }
 0x86c   : > { %v3633_v11 = vadd.f32 1.0, %v7828_v30  ;;  %v3431_v5 = vmul.f32 %v3388_v9, %v9675_v1 }
 0x86d   : > { %v3392_v26 = vmul.f32 0.5, %v3391_v28  ;;  %v3555_v22 = vmul.f32 %v3539_v56, %v3504_v38  ;;  %7829 = vtanh.f32 %v3602_v44 }
 0x86e   : > { %v3649_v32 = vmul.f32 0.5, %v3633_v11 }
 0x86f   : > { %v3393_v46 = vsub.f32 1.5, %v3392_v26  ;;  %v3571_v58 = vmul.f32 0.044715, %v3555_v22 }
 0x870   : > { %v3506_v12 = vpop.f32.mrf.mxu2  ;;  %v3665_v61 = vmul.f32 %v3649_v32, %v9745_v10 }
 0x871   : > { %v3394_v50 = vmul.f32 %v7826_v23, %v3393_v46  ;;  %v3587_v13 = vadd.f32 %v3571_v58, %v3504_v38  ;;  %v3507_v29 = vadd.f32 %v9719_v51, %v3506_v12 }
 0x872   : > { %v3680_v57 = vpack.c.bf16 %v3665_v61, %v3664_v39 }
 0x873   : > { %v3398_v18 = vsel %vm3397_vm8, %v7826_v23, %v3394_v50  ;;  %v3603_v33 = vmul.f32 0.7978846, %v3587_v13  ;;  %v3540_v16 = vmul.f32 %v3507_v29, %v3507_v29  ;;  %v7830_v60 = vpop.eup %7829  ;;  %v3223_v13 = vpop.xlane.xlu0 %3222 }
 0x874   : > { %v3432_v62 = vmul.f32 %v3398_v18, %v9683_v15  ;;  %7421 = vmatmul.msk.bf16.vlgmr.msra.gmra.mxu1 %vm711_vm0, %v3680_v57  ;;  %v3634_v54 = vadd.f32 1.0, %v7830_v60 }
 0x875   : > { %7831 = vtanh.f32 %v3603_v33  ;;  %v3556_v31 = vmul.f32 %v3540_v16, %v3507_v29 }
 0x876   : > { %v3441_v63 = vpack.c.bf16 %v3432_v62, %v3431_v5  ;;  %v3650_v1 = vmul.f32 0.5, %v3634_v54 }
 0x877   : > { %v3572_v10 = vmul.f32 0.044715, %v3556_v31 }
 0x878   : > { %v3508_v45 = vpop.f32.mrf.mxu2  ;;  %7403 = vmatmul.msk.bf16.gmra.mxu2 %vm860_vm1, %v3441_v63  ;;  %v3666_v34 = vmul.f32 %v3650_v1, %v9772_v36  ;;  %v3241_v36 = vmul.f32 %v3223_v13, %v11511_v27 }
 0x879   : > { %v3509_v14 = vadd.f32 %v9719_v51, %v3508_v45  ;;  %v3588_v23 = vadd.f32 %v3572_v10, %v3507_v29 }
 0x87b   : > { %v3541_v41 = vmul.f32 %v3509_v14, %v3509_v14  ;;  %v7832_v20 = vpop.eup %7831  ;;  %v3604_v28 = vmul.f32 0.7978846, %v3588_v23 }
 0x87c   : > { %v3635_v15 = vadd.f32 1.0, %v7832_v20 }
 0x87d   : > { %v3557_v30 = vmul.f32 %v3541_v41, %v3509_v14  ;;  %7833 = vtanh.f32 %v3604_v28 }
 0x87e   : > { %v3651_v56 = vmul.f32 0.5, %v3635_v15 }
 0x87f   : > { %v3573_v44 = vmul.f32 0.044715, %v3557_v30 }
 0x880   : > { %v3667_v11 = vmul.f32 %v3651_v56, %v3504_v38  ;;  %v3257_v38 = vadd.f32 1e-12, %v3241_v36 }
 0x881   : > { %v3589_v40 = vadd.f32 %v3573_v44, %v3509_v14 }
 0x882   : > { %v3681_v22 = vpack.c.bf16 %v3667_v11, %v3666_v34  ;;  %vm3405_vm10 = vweird.f32 %v3257_v38 }
 0x883   : > { %v3605_v26 = vmul.f32 0.7978846, %v3589_v40  ;;  %v7834_v32 = vpop.eup %7833 }
 0x884   : > { %7422 = vmatmul.msk.bf16.gmra.mxu1 %vm711_vm0, %v3681_v22  ;;  %v3636_v46 = vadd.f32 1.0, %v7834_v32 }
 0x885   : > { %7835 = vtanh.f32 %v3605_v26 }
 0x886   : > { %v3652_v58 = vmul.f32 0.5, %v3636_v46  ;;  %7837 = vrsqrt.f32 %v3257_v38 }
 0x888   : > { %v3668_v9 = vmul.f32 %v3652_v58, %v3507_v29 }
 0x88b   : > { %v7836_v21 = vpop.eup %7835 }
 0x88c   : > { %v3637_v12 = vadd.f32 1.0, %v7836_v21  ;;  %v7838_v57 = vpop.eup %7837 }
 0x88d   : > { %v3400_v18 = vmul.f32 %v7838_v57, %v3257_v38  ;;  %vm3406_vm9 = vweird.f32 %v7838_v57 }
 0x88e   : > { %v3653_v39 = vmul.f32 0.5, %v3637_v12  ;;  %vm3407_vm12 = vmor %vm3405_vm10, %vm3406_vm9 }
 0x88f   : > { %v3401_v62 = vmul.f32 %v7838_v57, %v3400_v18 }
 0x890   : > { %v3669_v61 = vmul.f32 %v3653_v39, %v3509_v14 }
 0x891   : > { %v3402_v60 = vmul.f32 0.5, %v3401_v62 }
 0x892   : > { %v3682_v50 = vpack.c.bf16 %v3669_v61, %v3668_v9 }
 0x893   : > { %v3403_v29 = vsub.f32 1.5, %v3402_v60 }
 0x894   : > { %7423 = vmatmul.msk.bf16.gmra.mxu1 %vm711_vm0, %v3682_v50 }
 0x895   : > { %v3404_v45 = vmul.f32 %v7838_v57, %v3403_v29 }
 0x897   : > { %v3408_v41 = vsel %vm3407_vm12, %v7838_v57, %v3404_v45 }
 0x898   : > { %v3433_v15 = vmul.f32 %v3408_v41, %v9692_v19 }
 0x8b8   : > { %v3226_v33 = vpop.xlane.xlu1 %3225 }
 0x8b9   : > { %v3242_v16 = vmul.f32 %v3226_v33, %v11511_v27 }
 0x8bb   : > { %v3258_v5 = vadd.f32 1e-12, %v3242_v16 }
 0x8bd   : > { %7839 = vrsqrt.f32 %v3258_v5  ;;  %vm3415_vm13 = vweird.f32 %v3258_v5 }
 0x8c3   : > { %v7840_v31 = vpop.eup %7839 }
 0x8c4   : > { %v3410_v63 = vmul.f32 %v7840_v31, %v3258_v5  ;;  %vm3416_vm11 = vweird.f32 %v7840_v31 }
 0x8c5   : > { %vm3417_vm14 = vmor %vm3415_vm13, %vm3416_vm11 }
 0x8c6   : > { %v3411_v10 = vmul.f32 %v7840_v31, %v3410_v63 }
 0x8c8   : > { %v3412_v54 = vmul.f32 0.5, %v3411_v10 }
 0x8ca   : > { %v3413_v14 = vsub.f32 1.5, %v3412_v54 }
 0x8cb   : > { %v3511_v23 = vpop.f32.mrf.mxu2 }
 0x8cc   : > { %v3414_v20 = vmul.f32 %v7840_v31, %v3413_v14  ;;  %v3512_v28 = vadd.f32 %v9719_v51, %v3511_v23 }
 0x8ce   : > { %v3418_v1 = vsel %vm3417_vm14, %v7840_v31, %v3414_v20  ;;  %v3542_v30 = vmul.f32 %v3512_v28, %v3512_v28 }
 0x8cf   : > { %v3434_v44 = vmul.f32 %v3418_v1, %v9704_v6 }
 0x8d0   : > { %v3558_v56 = vmul.f32 %v3542_v30, %v3512_v28  ;;  %v9826_v30 = vld [vmem:[%s11430_s13] ss:$0 sm:$0xff] }
 0x8d1   : > { %v3442_v34 = vpack.c.bf16 %v3434_v44, %v3433_v15 }
 0x8d2   : > { %v3574_v40 = vmul.f32 0.044715, %v3558_v56 }
 0x8d3   : > { %v3513_v11 = vpop.f32.mrf.mxu2  ;;  %7404 = vmatmul.msk.bf16.gmra.mxu2 %vm860_vm1, %v3442_v34 }
 0x8d4   : > { %v3590_v26 = vadd.f32 %v3574_v40, %v3512_v28  ;;  %v3514_v22 = vadd.f32 %v9719_v51, %v3513_v11 }
 0x8d6   : > { %v3606_v32 = vmul.f32 0.7978846, %v3590_v26  ;;  %v3543_v46 = vmul.f32 %v3514_v22, %v3514_v22 }
 0x8d8   : > { %v3559_v21 = vmul.f32 %v3543_v46, %v3514_v22  ;;  %7841 = vtanh.f32 %v3606_v32 }
 0x8da   : > { %v3575_v58 = vmul.f32 0.044715, %v3559_v21 }
 0x8db   : > { %v3516_v12 = vpop.f32.mrf.mxu2 }
 0x8dc   : > { %v3591_v39 = vadd.f32 %v3575_v58, %v3514_v22  ;;  %v3517_v19 = vadd.f32 %v9719_v51, %v3516_v12 }
 0x8de   : > { %v3607_v9 = vmul.f32 0.7978846, %v3591_v39  ;;  %v3544_v6 = vmul.f32 %v3517_v19, %v3517_v19  ;;  %v7842_v61 = vpop.eup %7841 }
 0x8df   : > { %v3638_v36 = vadd.f32 1.0, %v7842_v61 }
 0x8e0   : > { %7843 = vtanh.f32 %v3607_v9  ;;  %v3560_v50 = vmul.f32 %v3544_v6, %v3517_v19 }
 0x8e1   : > { %v3654_v62 = vmul.f32 0.5, %v3638_v36 }
 0x8e2   : > { %v3576_v13 = vmul.f32 0.044715, %v3560_v50 }
 0x8e3   : > { %v3518_v38 = vpop.f32.mrf.mxu2  ;;  %v3670_v10 = vmul.f32 %v3654_v62, %v3512_v28 }
 0x8e4   : > { %v3592_v57 = vadd.f32 %v3576_v13, %v3517_v19  ;;  %v3519_v18 = vadd.f32 %v9719_v51, %v3518_v38 }
 0x8e6   : > { %v7844_v33 = vpop.eup %7843  ;;  %v3608_v16 = vmul.f32 0.7978846, %v3592_v57  ;;  %v3545_v5 = vmul.f32 %v3519_v18, %v3519_v18 }
 0x8e7   : > { %v3639_v60 = vadd.f32 1.0, %v7844_v33 }
 0x8e8   : > { %v3561_v31 = vmul.f32 %v3545_v5, %v3519_v18  ;;  %7845 = vtanh.f32 %v3608_v16 }
 0x8e9   : > { %v3655_v29 = vmul.f32 0.5, %v3639_v60 }
 0x8ea   : > { %v3577_v63 = vmul.f32 0.044715, %v3561_v31 }
 0x8eb   : > { %v3521_v45 = vpop.f32.mrf.mxu2  ;;  %v3671_v54 = vmul.f32 %v3655_v29, %v3514_v22 }
 0x8ec   : > { %v3593_v14 = vadd.f32 %v3577_v63, %v3519_v18  ;;  %v9818_v23 = vadd.f32 %v9719_v51, %v3521_v45 }
 0x8ed   : > { %v3683_v41 = vpack.c.bf16 %v3671_v54, %v3670_v10 }
 0x8ee   : > { %v3609_v20 = vmul.f32 0.7978846, %v3593_v14  ;;  %v3546_v1 = vmul.f32 %v9818_v23, %v9818_v23  ;;  %v7846_v15 = vpop.eup %7845 }
 0x8ef   : > { %7424 = vmatmul.msk.bf16.gmra.mxu1 %vm711_vm0, %v3683_v41  ;;  %v3640_v34 = vadd.f32 1.0, %v7846_v15 }
 0x8f0   : > { %7847 = vtanh.f32 %v3609_v20  ;;  %v3562_v28 = vmul.f32 %v3546_v1, %v9818_v23 }
 0x8f1   : > { %v3757_v56 = vpop.f32.mrf.mxu1  ;;  %v3656_v12 = vmul.f32 0.5, %v3640_v34 }
 0x8f2   : > { %v3578_v44 = vmul.f32 0.044715, %v3562_v28  ;;  %v3758_v40 = vadd.f32 %v9826_v30, %v3757_v56 }
 0x8f3   : > { %v3523_v11 = vpop.f32.mrf.mxu2  ;;  %v3672_v36 = vmul.f32 %v3656_v12, %v3517_v19 }
 0x8f4   : > { %v3594_v26 = vadd.f32 %v3578_v44, %v9818_v23  ;;  %v3524_v22 = vadd.f32 %v9719_v51, %v3523_v11  ;;  %v9833_v32 = vadd.f32 %v3758_v40, %v9473_v24 }
 0x8f6   : > { %v7848_v46 = vpop.eup %7847  ;;  %v3610_v21 = vmul.f32 0.7978846, %v3594_v26  ;;  %v3547_v58 = vmul.f32 %v3524_v22, %v3524_v22  ;;  %v3813_v39 = vsel %vm860_vm1, %v9833_v32, 0.0 }
 0x8f7   : > { %v3641_v9 = vadd.f32 1.0, %v7848_v46  ;;  %3814 = vadd.xlane.f32.xlu2 %v3813_v39 }
 0x8f8   : > { %v3563_v6 = vmul.f32 %v3547_v58, %v3524_v22  ;;  %7849 = vtanh.f32 %v3610_v21 }
 0x8f9   : > { %v3657_v61 = vmul.f32 0.5, %v3641_v9  ;;  %v3759_v13 = vpop.f32.mrf.mxu1 }
 0x8fa   : > { %v3579_v50 = vmul.f32 0.044715, %v3563_v6  ;;  %v3760_v38 = vadd.f32 %v9826_v30, %v3759_v13 }
 0x8fb   : > { %v3526_v57 = vpop.f32.mrf.mxu2  ;;  %v3673_v24 = vmul.f32 %v3657_v61, %v3519_v18 }
 0x8fc   : > { %v3595_v33 = vadd.f32 %v3579_v50, %v3524_v22  ;;  %v3527_v16 = vadd.f32 %v9719_v51, %v3526_v57  ;;  %v9840_v5 = vadd.f32 %v3760_v38, %v9479_v2 }
 0x8fd   : > { %v3684_v62 = vpack.c.bf16 %v3673_v24, %v3672_v36 }
 0x8fe   : > { %v3611_v60 = vmul.f32 0.7978846, %v3595_v33  ;;  %v3548_v31 = vmul.f32 %v3527_v16, %v3527_v16  ;;  %v3816_v29 = vsel %vm860_vm1, %v9840_v5, 0.0  ;;  %v7850_v63 = vpop.eup %7849 }
 0x8ff   : > { %7425 = vmatmul.msk.bf16.gmra.mxu1 %vm711_vm0, %v3684_v62  ;;  %3817 = vadd.xlane.f32.xlu0 %v3816_v29  ;;  %v3642_v45 = vadd.f32 1.0, %v7850_v63 }
 0x900   : > { %7851 = vtanh.f32 %v3611_v60  ;;  %v3564_v19 = vmul.f32 %v3548_v31, %v3527_v16 }
 0x901   : > { %v3762_v18 = vpop.f32.mrf.mxu1  ;;  %v3658_v44 = vmul.f32 0.5, %v3642_v45 }
 0x902   : > { %v3580_v10 = vmul.f32 0.044715, %v3564_v19  ;;  %v3763_v54 = vadd.f32 %v9826_v30, %v3762_v18 }
 0x903   : > { %v3528_v14 = vpop.f32.mrf.mxu2  ;;  %v3674_v21 = vmul.f32 %v3658_v44, %v9818_v23 }
 0x904   : > { %v3596_v2 = vadd.f32 %v3580_v10, %v3527_v16  ;;  %v3529_v41 = vadd.f32 %v9719_v51, %v3528_v14  ;;  %v9848_v20 = vadd.f32 %v3763_v54, %v9485_v35 }
 0x906   : > { %v7852_v1 = vpop.eup %7851  ;;  %v3612_v15 = vmul.f32 0.7978846, %v3596_v2  ;;  %v3549_v28 = vmul.f32 %v3529_v41, %v3529_v41  ;;  %v3819_v56 = vsel %vm860_vm1, %v9848_v20, 0.0 }
 0x907   : > { %v3643_v34 = vadd.f32 1.0, %v7852_v1  ;;  %3820 = vadd.xlane.f32.xlu1 %v3819_v56 }
 0x908   : > { %v3565_v40 = vmul.f32 %v3549_v28, %v3529_v41  ;;  %7853 = vtanh.f32 %v3612_v15 }
 0x909   : > { %v3659_v11 = vmul.f32 0.5, %v3643_v34  ;;  %v3764_v46 = vpop.f32.mrf.mxu1 }
 0x90a   : > { %v3581_v26 = vmul.f32 0.044715, %v3565_v40  ;;  %v3765_v58 = vadd.f32 %v9826_v30, %v3764_v46 }
 0x90b   : > { %v3675_v35 = vmul.f32 %v3659_v11, %v3524_v22 }
 0x90c   : > { %v3597_v12 = vadd.f32 %v3581_v26, %v3529_v41  ;;  %v9855_v39 = vadd.f32 %v3765_v58, %v9491_v43 }
 0x90d   : > { %v3685_v9 = vpack.c.bf16 %v3675_v35, %v3674_v21 }
 0x90e   : > { %v3613_v6 = vmul.f32 0.7978846, %v3597_v12  ;;  %v3822_v61 = vsel %vm860_vm1, %v9855_v39, 0.0  ;;  %v7854_v50 = vpop.eup %7853 }
 0x90f   : > { %7426 = vmatmul.msk.bf16.gmra.mxu1 %vm711_vm0, %v3685_v9  ;;  %3823 = vadd.xlane.f32.xlu2 %v3822_v61  ;;  %v3644_v36 = vadd.f32 1.0, %v7854_v50 }
 0x910   : > { %7855 = vtanh.f32 %v3613_v6 }
 0x911   : > { %v3767_v13 = vpop.f32.mrf.mxu1  ;;  %v3660_v43 = vmul.f32 0.5, %v3644_v36 }
 0x912   : > { %v3768_v23 = vadd.f32 %v9826_v30, %v3767_v13 }
 0x913   : > { %v3676_v60 = vmul.f32 %v3660_v43, %v3527_v16 }
 0x914   : > { %v9862_v22 = vadd.f32 %v3768_v23, %v9497_v3 }
 0x916   : > { %v7856_v38 = vpop.eup %7855  ;;  %v3825_v57 = vsel %vm860_vm1, %v9862_v22, 0.0 }
 0x917   : > { %v3645_v24 = vadd.f32 1.0, %v7856_v38  ;;  %3826 = vadd.xlane.f32.xlu0 %v3825_v57 }
 0x919   : > { %v3661_v33 = vmul.f32 0.5, %v3645_v24  ;;  %v3769_v62 = vpop.f32.mrf.mxu1 }
 0x91a   : > { %v3770_v31 = vadd.f32 %v9826_v30, %v3769_v62 }
 0x91b   : > { %v3677_v29 = vmul.f32 %v3661_v33, %v3529_v41 }
 0x91c   : > { %v9868_v63 = vadd.f32 %v3770_v31, %v9503_v8 }
 0x91d   : > { %v3686_v19 = vpack.c.bf16 %v3677_v29, %v3676_v60 }
 0x91e   : > { %v3828_v3 = vsel %vm860_vm1, %v9868_v63, 0.0 }
 0x91f   : > { %7427 = vmatmul.msk.bf16.gmra.mxu1 %vm711_vm0, %v3686_v19  ;;  %3829 = vadd.xlane.f32.xlu1 %v3828_v3 }
 0x956   : > { %v3531_v10 = vpop.f32.mrf.mxu2 }
 0x957   : > { %v3532_v18 = vadd.f32 %v9719_v51, %v3531_v10 }
 0x959   : > { %v3550_v45 = vmul.f32 %v3532_v18, %v3532_v18 }
 0x95b   : > { %v3566_v54 = vmul.f32 %v3550_v45, %v3532_v18 }
 0x95d   : > { %v3582_v14 = vmul.f32 0.044715, %v3566_v54 }
 0x95e   : > { %v3533_v16 = vpop.f32.mrf.mxu2 }
 0x95f   : > { %v3598_v2 = vadd.f32 %v3582_v14, %v3532_v18  ;;  %v3534_v41 = vadd.f32 %v9719_v51, %v3533_v16 }
 0x961   : > { %v3614_v1 = vmul.f32 0.7978846, %v3598_v2  ;;  %v3551_v8 = vmul.f32 %v3534_v41, %v3534_v41 }
 0x963   : > { %v3567_v15 = vmul.f32 %v3551_v8, %v3534_v41  ;;  %7857 = vtanh.f32 %v3614_v1 }
 0x965   : > { %v3583_v28 = vmul.f32 0.044715, %v3567_v15 }
 0x967   : > { %v3599_v44 = vadd.f32 %v3583_v28, %v3534_v41 }
 0x969   : > { %v3615_v56 = vmul.f32 0.7978846, %v3599_v44  ;;  %v7858_v34 = vpop.eup %7857 }
 0x96a   : > { %v3815_v40 = vpop.xlane.xlu2 %3814  ;;  %v3646_v21 = vadd.f32 1.0, %v7858_v34 }
 0x96b   : > { %7859 = vtanh.f32 %v3615_v56  ;;  %v3861_v11 = vmul.f32 %v3815_v40, %v11511_v27 }
 0x96c   : > { %v3772_v26 = vpop.f32.mrf.mxu1  ;;  %v3662_v6 = vmul.f32 0.5, %v3646_v21 }
 0x96d   : > { %v3773_v46 = vadd.f32 %v9826_v30, %v3772_v26  ;;  %v9878_v58 = vsub.f32 %v9833_v32, %v3861_v11 }
 0x96e   : > { %v3678_v43 = vmul.f32 %v3662_v6, %v3532_v18 }
 0x96f   : > { %v9881_v51 = vadd.f32 %v3773_v46, %v9509_v47  ;;  %v3893_v35 = vmul.f32 %v9878_v58, %v9878_v58 }
 0x971   : > { %v7860_v12 = vpop.eup %7859  ;;  %v3831_v9 = vsel %vm860_vm1, %v9881_v51, 0.0  ;;  %v3909_v61 = vsel %vm860_vm1, %v3893_v35, 0.0 }
 0x972   : > { %3832 = vadd.xlane.f32.xlu1 %v3831_v9  ;;  %v3647_v50 = vadd.f32 1.0, %v7860_v12  ;;  %3910 = vadd.xlane.f32.xlu2 %v3909_v61  ;;  %v3818_v13 = vpop.xlane.xlu0 %3817 }
 0x973   : > { %v3862_v36 = vmul.f32 %v3818_v13, %v11511_v27 }
 0x974   : > { %v3774_v23 = vpop.f32.mrf.mxu1  ;;  %v3663_v38 = vmul.f32 0.5, %v3647_v50 }
 0x975   : > { %v3775_v47 = vadd.f32 %v9826_v30, %v3774_v23  ;;  %v9891_v57 = vsub.f32 %v9840_v5, %v3862_v36 }
 0x976   : > { %v3679_v24 = vmul.f32 %v3663_v38, %v3534_v41 }
 0x977   : > { %v9894_v33 = vadd.f32 %v3775_v47, %v9523_v0  ;;  %v3894_v60 = vmul.f32 %v9891_v57, %v9891_v57 }
 0x978   : > { %v3687_v62 = vpack.c.bf16 %v3679_v24, %v3678_v43 }
 0x979   : > { %11525 = vst [vmem:[#allocation11_spill] sm:$0xff] %v9894_v33  ;;  %v3834_v31 = vsel %vm860_vm1, %v9894_v33, 0.0  ;;  %v3912_v29 = vsel %vm860_vm1, %v3894_v60, 0.0 }
 0x97a   : > { %7428 = vmatmul.msk.bf16.gmra.mxu1 %vm711_vm0, %v3687_v62  ;;  %v3821_v19 = vpop.xlane.xlu1 %3820  ;;  %3835 = vadd.xlane.f32.xlu2 %v3834_v31 }
 0x97b   : > { %3913 = vadd.xlane.f32.xlu0 %v3912_v29  ;;  %v3863_v3 = vmul.f32 %v3821_v19, %v11511_v27 }
 0x97c   : > { %v3777_v10 = vpop.f32.mrf.mxu1 }
 0x97d   : > { %v3778_v0 = vadd.f32 %v9826_v30, %v3777_v10  ;;  %v9905_v18 = vsub.f32 %v9848_v20, %v3863_v3 }
 0x97f   : > { %v9908_v45 = vadd.f32 %v3778_v0, %v9536_v37  ;;  %v3895_v54 = vmul.f32 %v9905_v18, %v9905_v18 }
 0x981   : > { %11526 = vst [vmem:[#allocation12_spill] sm:$0xff] %v9908_v45  ;;  %v3837_v14 = vsel %vm860_vm1, %v9908_v45, 0.0  ;;  %v3915_v16 = vsel %vm860_vm1, %v3895_v54, 0.0 }
 0x982   : > { %3838 = vadd.xlane.f32.xlu2 %v3837_v14  ;;  %v3824_v2 = vpop.xlane.xlu2 %3823 }
 0x983   : > { %3916 = vadd.xlane.f32.xlu0 %v3915_v16  ;;  %v3864_v41 = vmul.f32 %v3824_v2, %v11511_v27 }
 0x984   : > { %v3779_v1 = vpop.f32.mrf.mxu1 }
 0x985   : > { %v3780_v8 = vadd.f32 %v9826_v30, %v3779_v1  ;;  %v9918_v15 = vsub.f32 %v9855_v39, %v3864_v41 }
 0x987   : > { %v9921_v37 = vadd.f32 %v3780_v8, %v9549_v52  ;;  %v3896_v28 = vmul.f32 %v9918_v15, %v9918_v15 }
 0x989   : > { %11527 = vst [vmem:[#allocation14_spill] sm:$0xff] %v9921_v37  ;;  %v3840_v44 = vsel %vm860_vm1, %v9921_v37, 0.0  ;;  %v3918_v56 = vsel %vm860_vm1, %v3896_v28, 0.0 }
 0x98a   : > { %3919 = vadd.xlane.f32.xlu1 %v3918_v56  ;;  %v3827_v34 = vpop.xlane.xlu0 %3826 }
 0x98b   : > { %3841 = vadd.xlane.f32.xlu0 %v3840_v44  ;;  %v3865_v40 = vmul.f32 %v3827_v34, %v11511_v27 }
 0x98c   : > { %v3782_v11 = vpop.f32.mrf.mxu1 }
 0x98d   : > { %v3783_v26 = vadd.f32 %v9826_v30, %v3782_v11  ;;  %v9931_v46 = vsub.f32 %v9862_v22, %v3865_v40 }
 0x98f   : > { %v9934_v52 = vadd.f32 %v3783_v26, %v9562_v59  ;;  %v3897_v21 = vmul.f32 %v9931_v46, %v9931_v46 }
 0x991   : > { %11528 = vst [vmem:[#allocation16_spill] sm:$0xff] %v9934_v52  ;;  %v3843_v35 = vsel %vm860_vm1, %v9934_v52, 0.0  ;;  %v3921_v12 = vsel %vm860_vm1, %v3897_v21, 0.0 }
 0x992   : > { %v3830_v9 = vpop.xlane.xlu1 %3829  ;;  %3922 = vadd.xlane.f32.xlu1 %v3921_v12 }
 0x993   : > { %3844 = vadd.xlane.f32.xlu0 %v3843_v35  ;;  %v3866_v6 = vmul.f32 %v3830_v9, %v11511_v27  ;;  %v7626_v9 = vld [vmem:[%s11423_s6 + $0x10] sm:$0xff] }
 0x994   : > { %v3784_v61 = vpop.f32.mrf.mxu1 }
 0x995   : > { %v3785_v50 = vadd.f32 %v9826_v30, %v3784_v61  ;;  %v9944_v13 = vsub.f32 %v9868_v63, %v3866_v6 }
 0x997   : > { %v9947_v59 = vadd.f32 %v3785_v50, %v9575_v55  ;;  %v3898_v36 = vmul.f32 %v9944_v13, %v9944_v13 }
 0x999   : > { %11529 = vst [vmem:[#allocation15_spill] sm:$0xff] %v9947_v59  ;;  %v3846_v23 = vsel %vm860_vm1, %v9947_v59, 0.0  ;;  %v3924_v38 = vsel %vm860_vm1, %v3898_v36, 0.0 }
 0x99a   : > { %3925 = vadd.xlane.f32.xlu2 %v3924_v38  ;;  %3847 = vadd.xlane.f32.xlu1 %v3846_v23 }
 0x99c   : > { %v3787_v47 = vpop.f32.mrf.mxu1 }
 0x99d   : > { %v3788_v43 = vadd.f32 %v9826_v30, %v3787_v47 }
 0x99f   : > { %v9956_v24 = vadd.f32 %v3788_v43, %v9588_v42 }
 0x9a1   : > { %11530 = vst [vmem:[#allocation13_spill] sm:$0xff] %v9956_v24  ;;  %v3849_v55 = vsel %vm860_vm1, %v9956_v24, 0.0 }
 0x9a2   : > { %3850 = vadd.xlane.f32.xlu1 %v3849_v55 }
 0x9a4   : > { %v3789_v3 = vpop.f32.mrf.mxu1 }
 0x9a5   : > { %v3790_v42 = vadd.f32 %v9826_v30, %v3789_v3 }
 0x9a7   : > { %v9972_v1 = vadd.f32 %v3790_v42, %v9600_v53  ;;  %v7627_v53 = vld [vmem:[%s11423_s6 + $0x18] sm:$0xff] }
 0x9a8   : > { %4225 = vmatpush.bf16.msra.mxu0 %v7627_v53 }
 0x9a9   : > { %11531 = vst [vmem:[#allocation17_spill] sm:$0xff] %v9972_v1  ;;  %v3852_v11 = vsel %vm860_vm1, %v9972_v1, 0.0 }
 0x9ac   : > { %4226 = vmatpush.bf16.msra.mxu0 %v7626_v9 }
 0x9e5   : > { %v3833_v62 = vpop.xlane.xlu1 %3832  ;;  %v3911_v31 = vpop.xlane.xlu2 %3910 }
 0x9e6   : > { %v3867_v60 = vmul.f32 %v3833_v62, %v11511_v27  ;;  %v3957_v29 = vmul.f32 %v3911_v31, %v11511_v27 }
 0x9e8   : > { %v9963_v19 = vsub.f32 %v9881_v51, %v3867_v60  ;;  %v3973_v10 = vadd.f32 1e-12, %v3957_v29 }
 0x9ea   : > { %v3899_v0 = vmul.f32 %v9963_v19, %v9963_v19  ;;  %7861 = vrsqrt.f32 %v3973_v10  ;;  %vm3995_vm2 = vweird.f32 %v3973_v10 }
 0x9ec   : > { %v3927_v54 = vsel %vm860_vm1, %v3899_v0, 0.0 }
 0x9ed   : > { %3928 = vadd.xlane.f32.xlu2 %v3927_v54  ;;  %v3836_v14 = vpop.xlane.xlu2 %3835 }
 0x9ee   : > { %v3914_v16 = vpop.xlane.xlu0 %3913  ;;  %v3868_v2 = vmul.f32 %v3836_v14, %v11511_v27 }
 0x9ef   : > { %v3958_v41 = vmul.f32 %v3914_v16, %v11511_v27 }
 0x9f0   : > { %v9974_v8 = vpop.eup %7861  ;;  %v9977_v28 = vsub.f32 %v9894_v33, %v3868_v2 }
 0x9f1   : > { %v3974_v44 = vadd.f32 1e-12, %v3958_v41  ;;  %v3990_v56 = vmul.f32 %v9974_v8, %v3973_v10  ;;  %vm3996_vm15 = vweird.f32 %v9974_v8 }
 0x9f2   : > { %v3900_v34 = vmul.f32 %v9977_v28, %v9977_v28  ;;  %vm3997_vm4 = vmor %vm3995_vm2, %vm3996_vm15 }
 0x9f3   : > { %7863 = vrsqrt.f32 %v3974_v44  ;;  %v3991_v40 = vmul.f32 %v9974_v8, %v3990_v56  ;;  %vm4005_vm5 = vweird.f32 %v3974_v44 }
 0x9f4   : > { %v3930_v26 = vsel %vm860_vm1, %v3900_v34, 0.0 }
 0x9f5   : > { %3853 = vadd.xlane.f32.xlu2 %v3852_v11  ;;  %v3992_v21 = vmul.f32 0.5, %v3991_v40  ;;  %v3839_v35 = vpop.xlane.xlu2 %3838  ;;  %3931 = vadd.xlane.f32.xlu0 %v3930_v26 }
 0x9f6   : > { %v3917_v12 = vpop.xlane.xlu0 %3916  ;;  %v3869_v6 = vmul.f32 %v3839_v35, %v11511_v27 }
 0x9f7   : > { %v3959_v61 = vmul.f32 %v3917_v12, %v11511_v27  ;;  %v3792_v50 = vpop.f32.mrf.mxu1  ;;  %v3993_v43 = vsub.f32 1.5, %v3992_v21 }
 0x9f8   : > { %v3793_v36 = vadd.f32 %v9826_v30, %v3792_v50  ;;  %v9996_v38 = vsub.f32 %v9908_v45, %v3869_v6 }
 0x9f9   : > { %v7864_v23 = vpop.eup %7863  ;;  %v9998_v47 = vadd.f32 1e-12, %v3959_v61  ;;  %v3994_v0 = vmul.f32 %v9974_v8, %v3993_v43 }
 0x9fa   : > { %v4000_v55 = vmul.f32 %v7864_v23, %v3974_v44  ;;  %v10001_v62 = vadd.f32 %v3793_v36, %v9606_v25  ;;  %v3901_v60 = vmul.f32 %v9996_v38, %v9996_v38  ;;  %vm4006_vm3 = vweird.f32 %v7864_v23 }
 0x9fb   : > { %7865 = vrsqrt.f32 %v9998_v47  ;;  %v3998_v53 = vsel %vm3997_vm4, %v9974_v8, %v3994_v0  ;;  %vm4007_vm6 = vmor %vm4005_vm5, %vm4006_vm3  ;;  %vm4015_vm8 = vweird.f32 %v9998_v47 }
 0x9fc   : > { %11532 = vst [vmem:[#allocation19_spill] sm:$0xff] %v10001_v62  ;;  %v4001_v31 = vmul.f32 %v7864_v23, %v4000_v55  ;;  %v3855_v29 = vsel %vm860_vm1, %v10001_v62, 0.0  ;;  %v3933_v3 = vsel %vm860_vm1, %v3901_v60, 0.0  ;;  %v4149_v9 = vmul.f32 %v3998_v53, %v9878_v58 }
 0x9fd   : > { %3856 = vadd.xlane.f32.xlu2 %v3855_v29  ;;  %v3920_v25 = vpop.xlane.xlu1 %3919  ;;  %3934 = vadd.xlane.f32.xlu0 %v3933_v3 }
 0x9fe   : > { %v4002_v42 = vmul.f32 0.5, %v4001_v31  ;;  %v3842_v54 = vpop.xlane.xlu0 %3841  ;;  %v3960_v14 = vmul.f32 %v3920_v25, %v11511_v27 }
 0x9ff   : > { %v3870_v16 = vmul.f32 %v3842_v54, %v11511_v27  ;;  %v3794_v2 = vpop.f32.mrf.mxu1 }
 0xa00   : > { %v4003_v41 = vsub.f32 1.5, %v4002_v42  ;;  %v3795_v56 = vadd.f32 %v9826_v30, %v3794_v2  ;;  %v3976_v40 = vadd.f32 1e-12, %v3960_v14 }
 0xa01   : > { %v7866_v34 = vpop.eup %7865  ;;  %v10015_v11 = vsub.f32 %v9921_v37, %v3870_v16 }
 0xa02   : > { %v4004_v26 = vmul.f32 %v7864_v23, %v4003_v41  ;;  %v4010_v21 = vmul.f32 %v7866_v34, %v9998_v47  ;;  %v10020_v35 = vadd.f32 %v3795_v56, %v9640_v17  ;;  %7867 = vrsqrt.f32 %v3976_v40 }
 0xa03   : > { %v3902_v30 = vmul.f32 %v10015_v11, %v10015_v11  ;;  %vm4016_vm7 = vweird.f32 %v7866_v34  ;;  %vm4025_vm11 = vweird.f32 %v3976_v40 }
 0xa04   : > { %11533 = vst [vmem:[#allocation18_spill] sm:$0xff] %v10020_v35  ;;  %v4008_v10 = vsel %vm4007_vm6, %v7864_v23, %v4004_v26  ;;  %v4011_v12 = vmul.f32 %v7866_v34, %v4010_v21  ;;  %v3858_v44 = vsel %vm860_vm1, %v10020_v35, 0.0  ;;  %vm4017_vm10 = vmor %vm4015_vm8, %vm4016_vm7 }
 0xa05   : > { %v4150_v8 = vmul.f32 %v4008_v10, %v9891_v57  ;;  %v3936_v6 = vsel %vm860_vm1, %v3902_v30, 0.0  ;;  %3859 = vadd.xlane.f32.xlu0 %v3858_v44  ;;  %v3923_v17 = vpop.xlane.xlu1 %3922 }
 0xa06   : > { %v4012_v61 = vmul.f32 0.5, %v4011_v12  ;;  %3937 = vadd.xlane.f32.xlu1 %v3936_v6  ;;  %v3845_v50 = vpop.xlane.xlu0 %3844  ;;  %v3961_v43 = vmul.f32 %v3923_v17, %v11511_v27 }
 0xa07   : > { %v4165_v36 = vpack.c.bf16 %v4150_v8, %v4149_v9  ;;  %v3871_v23 = vmul.f32 %v3845_v50, %v11511_v27 }
 0xa08   : > { %v7868_v55 = vpop.eup %7867  ;;  %v3977_v60 = vadd.f32 1e-12, %v3961_v43  ;;  %v4013_v58 = vsub.f32 1.5, %v4012_v61 }
 0xa09   : > { %v10032_v31 = vsub.f32 %v9934_v52, %v3871_v23  ;;  %7442 = vmatmul.msk.bf16.vlgmr.msra.gmra.mxu0 %vm860_vm1, %v4165_v36  ;;  %v4020_v57 = vmul.f32 %v7868_v55, %v3976_v40  ;;  %vm4026_vm9 = vweird.f32 %v7868_v55 }
 0xa0a   : > { %7869 = vrsqrt.f32 %v3977_v60  ;;  %v4014_v42 = vmul.f32 %v7866_v34, %v4013_v58  ;;  %vm4027_vm12 = vmor %vm4025_vm11, %vm4026_vm9  ;;  %vm4035_vm14 = vweird.f32 %v3977_v60 }
 0xa0b   : > { %v3903_v29 = vmul.f32 %v10032_v31, %v10032_v31  ;;  %v4021_v3 = vmul.f32 %v7868_v55, %v4020_v57 }
 0xa0c   : > { %v4018_v21 = vsel %vm4017_vm10, %v7866_v34, %v4014_v42 }
 0xa0d   : > { %v3939_v0 = vsel %vm860_vm1, %v3903_v29, 0.0  ;;  %v4022_v25 = vmul.f32 0.5, %v4021_v3  ;;  %v3926_v54 = vpop.xlane.xlu2 %3925  ;;  %v3848_v14 = vpop.xlane.xlu1 %3847  ;;  %v4151_v8 = vmul.f32 %v4018_v21, %v9905_v18 }
 0xa0e   : > { %3940 = vadd.xlane.f32.xlu1 %v3939_v0  ;;  %v3962_v16 = vmul.f32 %v3926_v54, %v11511_v27  ;;  %v3872_v2 = vmul.f32 %v3848_v14, %v11511_v27 }
 0xa0f   : > { %v4023_v41 = vsub.f32 1.5, %v4022_v25 }
 0xa10   : > { %v7870_v56 = vpop.eup %7869  ;;  %v3978_v53 = vadd.f32 1e-12, %v3962_v16  ;;  %v10042_v26 = vsub.f32 %v9947_v59, %v3872_v2 }
 0xa11   : > { %v4024_v30 = vmul.f32 %v7868_v55, %v4023_v41  ;;  %v4030_v10 = vmul.f32 %v7870_v56, %v3977_v60  ;;  %vm4036_vm13 = vweird.f32 %v7870_v56 }
 0xa12   : > { %7871 = vrsqrt.f32 %v3978_v53  ;;  %v3904_v12 = vmul.f32 %v10042_v26, %v10042_v26  ;;  %vm4037_vm2 = vmor %vm4035_vm14, %vm4036_vm13  ;;  %vm4045_vm3 = vweird.f32 %v3978_v53 }
 0xa13   : > { %v4028_v44 = vsel %vm4027_vm12, %v7868_v55, %v4024_v30  ;;  %v4031_v9 = vmul.f32 %v7870_v56, %v4030_v10 }
 0xa14   : > { %v3942_v47 = vsel %vm860_vm1, %v3904_v12, 0.0  ;;  %v4152_v6 = vmul.f32 %v4028_v44, %v9918_v15 }
 0xa15   : > { %v4032_v61 = vmul.f32 0.5, %v4031_v9  ;;  %3943 = vadd.xlane.f32.xlu2 %v3942_v47  ;;  %v3851_v17 = vpop.xlane.xlu1 %3850 }
 0xa16   : > { %v3873_v34 = vmul.f32 %v3851_v17, %v11511_v27  ;;  %v4166_v40 = vpack.c.bf16 %v4152_v6, %v4151_v8 }
 0xa17   : > { %v4033_v43 = vsub.f32 1.5, %v4032_v61 }
 0xa18   : > { %v7872_v50 = vpop.eup %7871  ;;  %v10051_v36 = vsub.f32 %v9956_v24, %v3873_v34 }
 0xa19   : > { %7443 = vmatmul.msk.bf16.gmra.mxu0 %vm860_vm1, %v4166_v40  ;;  %v4040_v23 = vmul.f32 %v7872_v50, %v3978_v53  ;;  %v4034_v58 = vmul.f32 %v7870_v56, %v4033_v43  ;;  %vm4046_vm15 = vweird.f32 %v7872_v50 }
 0xa1a   : > { %v3905_v55 = vmul.f32 %v10051_v36, %v10051_v36  ;;  %vm4047_vm4 = vmor %vm4045_vm3, %vm4046_vm15 }
 0xa1b   : > { %v4041_v18 = vmul.f32 %v7872_v50, %v4040_v23  ;;  %v4038_v3 = vsel %vm4037_vm2, %v7870_v56, %v4034_v58 }
 0xa1c   : > { %v3945_v15 = vsel %vm860_vm1, %v3905_v55, 0.0  ;;  %v4153_v25 = vmul.f32 %v4038_v3, %v9931_v46 }
 0xa1d   : > { %v4042_v57 = vmul.f32 0.5, %v4041_v18  ;;  %3946 = vadd.xlane.f32.xlu0 %v3945_v15 }
 0xa1f   : > { %v4043_v29 = vsub.f32 1.5, %v4042_v57 }
 0xa21   : > { %v4044_v0 = vmul.f32 %v7872_v50, %v4043_v29 }
 0xa23   : > { %v4048_v42 = vsel %vm4047_vm4, %v7872_v50, %v4044_v0 }
 0xa24   : > { %v4154_v54 = vmul.f32 %v4048_v42, %v9944_v13 }
 0xa26   : > { %v4167_v14 = vpack.c.bf16 %v4154_v54, %v4153_v25 }
 0xa29   : > { %7444 = vmatmul.msk.bf16.gmra.mxu0 %vm860_vm1, %v4167_v14 }
 0xa60   : > { %v3929_v16 = vpop.xlane.xlu2 %3928 }
 0xa61   : > { %v3963_v2 = vmul.f32 %v3929_v16, %v11511_v27 }
 0xa63   : > { %v3979_v41 = vadd.f32 1e-12, %v3963_v2 }
 0xa65   : > { %7873 = vrsqrt.f32 %v3979_v41  ;;  %vm4055_vm6 = vweird.f32 %v3979_v41 }
 0xa68   : > { %v3854_v60 = vpop.xlane.xlu2 %3853  ;;  %v3932_v56 = vpop.xlane.xlu0 %3931 }
 0xa69   : > { %v3874_v21 = vmul.f32 %v3854_v60, %v11511_v27  ;;  %v3964_v53 = vmul.f32 %v3932_v56, %v11511_v27 }
 0xa6b   : > { %v7874_v30 = vpop.eup %7873  ;;  %v10064_v10 = vsub.f32 %v9972_v1, %v3874_v21  ;;  %v3980_v13 = vadd.f32 1e-12, %v3964_v53 }
 0xa6c   : > { %v4050_v46 = vmul.f32 %v7874_v30, %v3979_v41  ;;  %vm4056_vm5 = vweird.f32 %v7874_v30 }
 0xa6d   : > { %v3906_v12 = vmul.f32 %v10064_v10, %v10064_v10  ;;  %7875 = vrsqrt.f32 %v3980_v13  ;;  %vm4057_vm8 = vmor %vm4055_vm6, %vm4056_vm5  ;;  %vm4065_vm9 = vweird.f32 %v3980_v13 }
 0xa6e   : > { %v4051_v44 = vmul.f32 %v7874_v30, %v4050_v46 }
 0xa6f   : > { %v3948_v9 = vsel %vm860_vm1, %v3906_v12, 0.0 }
 0xa70   : > { %v3857_v47 = vpop.xlane.xlu2 %3856  ;;  %3949 = vadd.xlane.f32.xlu1 %v3948_v9  ;;  %v4052_v8 = vmul.f32 0.5, %v4051_v44  ;;  %v3935_v61 = vpop.xlane.xlu0 %3934 }
 0xa71   : > { %v3875_v6 = vmul.f32 %v3857_v47, %v11511_v27  ;;  %v3965_v17 = vmul.f32 %v3935_v61, %v11511_v27 }
 0xa72   : > { %v4053_v43 = vsub.f32 1.5, %v4052_v8  ;;  %v10099_v8 = vld [vmem:[%s11424_s7 + $0x1] ss:$0 sm:$0xff] }
 0xa73   : > { %v10072_v34 = vsub.f32 %v10001_v62, %v3875_v6  ;;  %v7876_v40 = vpop.eup %7875  ;;  %v10074_v50 = vadd.f32 1e-12, %v3965_v17 }
 0xa74   : > { %v4060_v23 = vmul.f32 %v7876_v40, %v3980_v13  ;;  %v4054_v58 = vmul.f32 %v7874_v30, %v4053_v43  ;;  %vm4066_vm7 = vweird.f32 %v7876_v40 }
 0xa75   : > { %v3907_v55 = vmul.f32 %v10072_v34, %v10072_v34  ;;  %7877 = vrsqrt.f32 %v10074_v50  ;;  %vm4067_vm10 = vmor %vm4065_vm9, %vm4066_vm7  ;;  %vm4075_vm12 = vweird.f32 %v10074_v50 }
 0xa76   : > { %v4061_v18 = vmul.f32 %v7876_v40, %v4060_v23  ;;  %v4058_v2 = vsel %vm4057_vm8, %v7874_v30, %v4054_v58 }
 0xa77   : > { %v3951_v15 = vsel %vm860_vm1, %v3907_v55, 0.0  ;;  %v4155_v12 = vmul.f32 %v4058_v2, %v9963_v19 }
 0xa78   : > { %3952 = vadd.xlane.f32.xlu2 %v3951_v15  ;;  %v4062_v57 = vmul.f32 0.5, %v4061_v18  ;;  %v3860_v3 = vpop.xlane.xlu0 %3859  ;;  %v11534_v15 = vld [vmem:[#allocation25_spill] sm:$0xff] }
 0xa79   : > { %v3938_v29 = vpop.xlane.xlu1 %3937  ;;  %v3876_v42 = vmul.f32 %v3860_v3, %v11511_v27  ;;  %v11536_v3 = vld [vmem:[#allocation24_spill] sm:$0xff] }
 0xa7a   : > { %v3966_v0 = vmul.f32 %v3938_v29, %v11511_v27  ;;  %v4063_v25 = vsub.f32 1.5, %v4062_v57  ;;  %v11535_v57 = vld [vmem:[#allocation23_spill] sm:$0xff] }
 0xa7b   : > { %v10082_v54 = vpop.eup %7877  ;;  %v10085_v16 = vsub.f32 %v10020_v35, %v3876_v42 }
 0xa7c   : > { %v3982_v14 = vadd.f32 1e-12, %v3966_v0  ;;  %v4064_v60 = vmul.f32 %v7876_v40, %v4063_v25  ;;  %v4070_v21 = vmul.f32 %v10082_v54, %v10074_v50  ;;  %vm4076_vm11 = vweird.f32 %v10082_v54  ;;  %v11537_v25 = vld [vmem:[#allocation22_spill] sm:$0xff] }
 0xa7d   : > { %v3908_v41 = vmul.f32 %v10085_v16, %v10085_v16  ;;  %vm10124_vm14 = vmor %vm4075_vm12, %vm4076_vm11 }
 0xa7e   : > { %7879 = vrsqrt.f32 %v3982_v14  ;;  %v4068_v56 = vsel %vm4067_vm10, %v7876_v40, %v4064_v60  ;;  %v4071_v53 = vmul.f32 %v10082_v54, %v4070_v21  ;;  %vm4085_vm15 = vweird.f32 %v3982_v14 }
 0xa7f   : > { %v3954_v46 = vsel %vm860_vm1, %v3908_v41, 0.0  ;;  %v4156_v44 = vmul.f32 %v4068_v56, %v9977_v28 }
 0xa80   : > { %v4072_v30 = vmul.f32 0.5, %v4071_v53  ;;  %3955 = vadd.xlane.f32.xlu0 %v3954_v46 }
 0xa81   : > { %v3941_v9 = vpop.xlane.xlu1 %3940  ;;  %v4168_v47 = vpack.c.bf16 %v4156_v44, %v4155_v12 }
 0xa82   : > { %v3967_v13 = vmul.f32 %v3941_v9, %v11511_v27  ;;  %v4073_v61 = vsub.f32 1.5, %v4072_v30 }
 0xa83   : > { %7445 = vmatmul.msk.bf16.gmra.mxu0 %vm860_vm1, %v4168_v47 }
 0xa84   : > { %v7880_v6 = vpop.eup %7879  ;;  %v10101_v17 = vadd.f32 1e-12, %v3967_v13  ;;  %v4074_v23 = vmul.f32 %v10082_v54, %v4073_v61 }
 0xa85   : > { %v4080_v19 = vmul.f32 %v7880_v6, %v3982_v14  ;;  %vm4086_vm13 = vweird.f32 %v7880_v6 }
 0xa86   : > { %7881 = vrsqrt.f32 %v10101_v17  ;;  %v4228_v28 = vpop.f32.mrf.mxu0  ;;  %v4078_v44 = vsel %vm10124_vm14, %v10082_v54, %v4074_v23  ;;  %vm4087_vm2 = vmor %vm4085_vm15, %vm4086_vm13  ;;  %vm4095_vm4 = vweird.f32 %v10101_v17 }
 0xa87   : > { %v4081_v40 = vmul.f32 %v7880_v6, %v4080_v19  ;;  %v10106_v43 = vadd.f32 %v10099_v8, %v4228_v28  ;;  %v4157_v23 = vmul.f32 %v4078_v44, %v9996_v38 }
 0xa88   : > { %v3944_v18 = vpop.xlane.xlu2 %3943 }
 0xa89   : > { %v4082_v55 = vmul.f32 0.5, %v4081_v40  ;;  %v4268_v58 = vmul.f32 %v10106_v43, %v11534_v15  ;;  %v4269_v29 = vmul.f32 %v10106_v43, %v11535_v57  ;;  %v4270_v0 = vmul.f32 %v10106_v43, %v11536_v3 }
 0xa8a   : > { %v3968_v42 = vmul.f32 %v3944_v18, %v11511_v27  ;;  %v4271_v2 = vmul.f32 %v10106_v43, %v11537_v25 }
 0xa8b   : > { %v4083_v60 = vsub.f32 1.5, %v4082_v55  ;;  %v4332_v21 = vpack.c.bf16 %v4268_v58, %v4268_v58  ;;  %v4333_v41 = vpack.c.bf16 %v4269_v29, %v4269_v29  ;;  %v4334_v56 = vpack.c.bf16 %v4270_v0, %v4270_v0 }
 0xa8c   : > { %v10120_v53 = vpop.eup %7881  ;;  %v10128_v50 = vadd.f32 1e-12, %v3968_v42  ;;  %v4335_v12 = vpack.c.bf16 %v4271_v2, %v4271_v2 }
 0xa8d   : > { %v4084_v30 = vmul.f32 %v7880_v6, %v4083_v60  ;;  %v4090_v9 = vmul.f32 %v10120_v53, %v10101_v17  ;;  %v4544_v13 = vunpack.c.l.b16 %v4332_v21  ;;  %v4545_v61 = vunpack.c.l.b16 %v4333_v41 }
 0xa8e   : > { %7883 = vrsqrt.f32 %v10128_v50  ;;  %v4230_v47 = vpop.f32.mrf.mxu0  ;;  %v4546_v19 = vunpack.c.l.b16 %v4334_v56  ;;  %v4547_v55 = vunpack.c.l.b16 %v4335_v12  ;;  %vm4096_vm3 = vweird.f32 %v10120_v53 }
 0xa8f   : > { %v4088_v14 = vsel %vm4087_vm2, %v7880_v6, %v4084_v30  ;;  %v4091_v28 = vmul.f32 %v10120_v53, %v4090_v9  ;;  %v10139_v40 = vadd.f32 %v10099_v8, %v4230_v47  ;;  %v4548_v54 = vpack.c.b16 %v4545_v61, %v4544_v13  ;;  %vm10173_vm6 = vmor %vm4095_vm4, %vm4096_vm3 }
 0xa90   : > { %v4158_v18 = vmul.f32 %v4088_v14, %v10015_v11  ;;  %v4549_v29 = vpack.c.b16 %v4547_v55, %v4546_v19  ;;  %vm4105_vm7 = vweird.f32 %v10128_v50 }
 0xa91   : > { %v4092_v58 = vmul.f32 0.5, %v4091_v28  ;;  %v4272_v0 = vmul.f32 %v10139_v40, %v11534_v15  ;;  %v4273_v42 = vmul.f32 %v10139_v40, %v11535_v57  ;;  %4550 = vrot.lane.b32.xlu2 %v4548_v54, %s8100_s17  ;;  %v4274_v2 = vmul.f32 %v10139_v40, %v11536_v3 }
 0xa92   : > { %v4169_v6 = vpack.c.bf16 %v4158_v18, %v4157_v23  ;;  %v4275_v60 = vmul.f32 %v10139_v40, %v11537_v25  ;;  %4552 = vrot.lane.b32.xlu1 %v4549_v29, %s8100_s17 }
 0xa93   : > { %v4336_v38 = vpack.c.bf16 %v4272_v0, %v4272_v0  ;;  %v4337_v11 = vpack.c.bf16 %v4273_v42, %v4273_v42  ;;  %v4093_v41 = vsub.f32 1.5, %v4092_v58  ;;  %v4338_v56 = vpack.c.bf16 %v4274_v2, %v4274_v2 }
 0xa94   : > { %v7884_v21 = vpop.eup %7883  ;;  %7446 = vmatmul.msk.bf16.gmra.mxu0 %vm860_vm1, %v4169_v6  ;;  %v4339_v46 = vpack.c.bf16 %v4275_v60, %v4275_v60 }
 0xa95   : > { %v4100_v12 = vmul.f32 %v7884_v21, %v10128_v50  ;;  %v4580_v44 = vunpack.c.l.b16 %v4336_v38  ;;  %v4581_v9 = vunpack.c.l.b16 %v4337_v11  ;;  %v4582_v13 = vunpack.c.l.b16 %v4338_v56 }
 0xa96   : > { %v4233_v30 = vpop.f32.mrf.mxu0  ;;  %v4583_v19 = vunpack.c.l.b16 %v4339_v46  ;;  %v4094_v14 = vmul.f32 %v10120_v53, %v4093_v41  ;;  %vm4106_vm5 = vweird.f32 %v7884_v21 }
 0xa97   : > { %v4101_v47 = vmul.f32 %v7884_v21, %v4100_v12  ;;  %v10156_v61 = vadd.f32 %v10099_v8, %v4233_v30  ;;  %v4584_v28 = vpack.c.b16 %v4581_v9, %v4580_v44  ;;  %vm4107_vm8 = vmor %vm4105_vm7, %vm4106_vm5 }
 0xa98   : > { %v4585_v54 = vpack.c.b16 %v4583_v19, %v4582_v13  ;;  %v4098_v38 = vsel %vm10173_vm6, %v10120_v53, %v4094_v14 }
 0xa99   : > { %v4102_v55 = vmul.f32 0.5, %v4101_v47  ;;  %v4276_v23 = vmul.f32 %v10156_v61, %v11534_v15  ;;  %v4277_v18 = vmul.f32 %v10156_v61, %v11535_v57  ;;  %4586 = vrot.lane.b32.xlu2 %v4584_v28, %s8100_s17  ;;  %v4278_v58 = vmul.f32 %v10156_v61, %v11536_v3 }
 0xa9a   : > { %v4279_v29 = vmul.f32 %v10156_v61, %v11537_v25  ;;  %4588 = vrot.lane.b32.xlu0 %v4585_v54, %s8100_s17  ;;  %v4159_v19 = vmul.f32 %v4098_v38, %v10032_v31 }
 0xa9b   : > { %v4103_v0 = vsub.f32 1.5, %v4102_v55  ;;  %v4340_v42 = vpack.c.bf16 %v4276_v23, %v4276_v23  ;;  %v4341_v6 = vpack.c.bf16 %v4277_v18, %v4277_v18  ;;  %v4342_v17 = vpack.c.bf16 %v4278_v58, %v4278_v58 }
 0xa9c   : > { %v4343_v60 = vpack.c.bf16 %v4279_v29, %v4279_v29 }
 0xa9d   : > { %v4104_v11 = vmul.f32 %v7884_v21, %v4103_v0  ;;  %v4616_v41 = vunpack.c.l.b16 %v4340_v42  ;;  %v4617_v46 = vunpack.c.l.b16 %v4341_v6  ;;  %v4618_v12 = vunpack.c.l.b16 %v4342_v17 }
 0xa9e   : > { %v4235_v56 = vpop.f32.mrf.mxu0  ;;  %v4619_v44 = vunpack.c.l.b16 %v4343_v60 }
 0xa9f   : > { %v4108_v30 = vsel %vm4107_vm8, %v7884_v21, %v4104_v11  ;;  %v10182_v9 = vadd.f32 %v10099_v8, %v4235_v56  ;;  %v4620_v13 = vpack.c.b16 %v4617_v46, %v4616_v41 }
 0xaa0   : > { %v4621_v47 = vpack.c.b16 %v4619_v44, %v4618_v12  ;;  %v4160_v28 = vmul.f32 %v4108_v30, %v10042_v26 }
 0xaa1   : > { %v4280_v53 = vmul.f32 %v10182_v9, %v11534_v15  ;;  %v4281_v50 = vmul.f32 %v10182_v9, %v11535_v57  ;;  %v4282_v14 = vmul.f32 %v10182_v9, %v11536_v3  ;;  %4622 = vrot.lane.b32.xlu2 %v4620_v13, %s8100_s17  ;;  %v4283_v55 = vmul.f32 %v10182_v9, %v11537_v25 }
 0xaa2   : > { %4624 = vrot.lane.b32.xlu1 %v4621_v47, %s8100_s17  ;;  %v4170_v21 = vpack.c.bf16 %v4160_v28, %v4159_v19  ;;  %v4408_v24 = vmul.f32 %v10182_v9, %v9245_v4 }
 0xaa3   : > { %v4344_v31 = vpack.c.bf16 %v4280_v53, %v4280_v53  ;;  %v4345_v54 = vpack.c.bf16 %v4281_v50, %v4281_v50  ;;  %v4346_v26 = vpack.c.bf16 %v4282_v14, %v4282_v14  ;;  %v4347_v23 = vpack.c.bf16 %v4283_v55, %v4283_v55 }
 0xaa4   : > { %7447 = vmatmul.msk.bf16.gmra.mxu0 %vm860_vm1, %v4170_v21 }
 0xaa5   : > { %v4652_v18 = vunpack.c.l.b16 %v4344_v31  ;;  %v4653_v58 = vunpack.c.l.b16 %v4345_v54  ;;  %v4654_v29 = vunpack.c.l.b16 %v4346_v26  ;;  %v4655_v42 = vunpack.c.l.b16 %v4347_v23 }
 0xaa6   : > { %v4238_v0 = vpop.f32.mrf.mxu0 }
 0xaa7   : > { %v10198_v6 = vadd.f32 %v10099_v8, %v4238_v0  ;;  %v4656_v2 = vpack.c.b16 %v4653_v58, %v4652_v18  ;;  %v4657_v17 = vpack.c.b16 %v4655_v42, %v4654_v29 }
 0xaa9   : > { %v4284_v60 = vmul.f32 %v10198_v6, %v11534_v15  ;;  %v4285_v38 = vmul.f32 %v10198_v6, %v11535_v57  ;;  %v4286_v11 = vmul.f32 %v10198_v6, %v11536_v3  ;;  %v4287_v41 = vmul.f32 %v10198_v6, %v11537_v25  ;;  %4660 = vrot.lane.b32.xlu0 %v4657_v17, %s8100_s17 }
 0xaaa   : > { %4658 = vrot.lane.b32.xlu1 %v4656_v2, %s8100_s17  ;;  %v4413_v37 = vmul.f32 %v10198_v6, %v9228_v49 }
 0xaab   : > { %v4348_v56 = vpack.c.bf16 %v4284_v60, %v4284_v60  ;;  %v4349_v46 = vpack.c.bf16 %v4285_v38, %v4285_v38  ;;  %v4350_v12 = vpack.c.bf16 %v4286_v11, %v4286_v11  ;;  %v4351_v44 = vpack.c.bf16 %v4287_v41, %v4287_v41  ;;  %v3947_v38 = vpop.xlane.xlu0 %3946 }
 0xaac   : > { %v3969_v11 = vmul.f32 %v3947_v38, %v11511_v27 }
 0xaad   : > { %v4688_v30 = vunpack.c.l.b16 %v4348_v56  ;;  %v4689_v13 = vunpack.c.l.b16 %v4349_v46  ;;  %v4690_v47 = vunpack.c.l.b16 %v4350_v12  ;;  %v4691_v19 = vunpack.c.l.b16 %v4351_v44 }
 0xaae   : > { %v4240_v28 = vpop.f32.mrf.mxu0  ;;  %v3985_v41 = vadd.f32 1e-12, %v3969_v11 }
 0xaaf   : > { %v10211_v53 = vadd.f32 %v10099_v8, %v4240_v28  ;;  %v4692_v50 = vpack.c.b16 %v4689_v13, %v4688_v30  ;;  %v4693_v14 = vpack.c.b16 %v4691_v19, %v4690_v47 }
 0xab0   : > { %7885 = vrsqrt.f32 %v3985_v41  ;;  %vm4115_vm10 = vweird.f32 %v3985_v41 }
 0xab1   : > { %4694 = vrot.lane.b32.xlu2 %v4692_v50, %s8100_s17  ;;  %v4288_v21 = vmul.f32 %v10211_v53, %v11534_v15  ;;  %v4289_v55 = vmul.f32 %v10211_v53, %v11535_v57  ;;  %v4290_v31 = vmul.f32 %v10211_v53, %v11536_v3  ;;  %v4291_v54 = vmul.f32 %v10211_v53, %v11537_v25 }
 0xab2   : > { %4696 = vrot.lane.b32.xlu0 %v4693_v14, %s8100_s17 }
 0xab3   : > { %v4352_v26 = vpack.c.bf16 %v4288_v21, %v4288_v21  ;;  %v4353_v23 = vpack.c.bf16 %v4289_v55, %v4289_v55  ;;  %v4354_v18 = vpack.c.bf16 %v4290_v31, %v4290_v31  ;;  %v4355_v58 = vpack.c.bf16 %v4291_v54, %v4291_v54 }
 0xab5   : > { %v4724_v29 = vunpack.c.l.b16 %v4352_v26  ;;  %v4725_v0 = vunpack.c.l.b16 %v4353_v23  ;;  %v4726_v42 = vunpack.c.l.b16 %v4354_v18  ;;  %v4727_v2 = vunpack.c.l.b16 %v4355_v58 }
 0xab6   : > { %v7886_v56 = vpop.eup %7885 }
 0xab7   : > { %v4728_v17 = vpack.c.b16 %v4725_v0, %v4724_v29  ;;  %v4729_v60 = vpack.c.b16 %v4727_v2, %v4726_v42  ;;  %v4110_v46 = vmul.f32 %v7886_v56, %v3985_v41  ;;  %vm4116_vm9 = vweird.f32 %v7886_v56 }
 0xab8   : > { %vm4117_vm11 = vmor %vm4115_vm10, %vm4116_vm9 }
 0xab9   : > { %4730 = vrot.lane.b32.xlu2 %v4728_v17, %s8100_s17  ;;  %4732 = vrot.lane.b32.xlu1 %v4729_v60, %s8100_s17  ;;  %v4111_v30 = vmul.f32 %v7886_v56, %v4110_v46 }
 0xabb   : > { %v4112_v47 = vmul.f32 0.5, %v4111_v30 }
 0xabd   : > { %v4113_v14 = vsub.f32 1.5, %v4112_v47 }
 0xabf   : > { %v4114_v54 = vmul.f32 %v7886_v56, %v4113_v14 }
 0xac1   : > { %v4118_v0 = vsel %vm4117_vm11, %v7886_v56, %v4114_v54 }
 0xac2   : > { %v4161_v11 = vmul.f32 %v4118_v0, %v10051_v36 }
 0xae3   : > { %v3950_v12 = vpop.xlane.xlu1 %3949 }
 0xae4   : > { %v3970_v44 = vmul.f32 %v3950_v12, %v11511_v27 }
 0xae6   : > { %v3986_v13 = vadd.f32 1e-12, %v3970_v44 }
 0xae8   : > { %7887 = vrsqrt.f32 %v3986_v13  ;;  %vm4125_vm13 = vweird.f32 %v3986_v13 }
 0xaeb   : > { %v3953_v19 = vpop.xlane.xlu2 %3952 }
 0xaec   : > { %v3971_v28 = vmul.f32 %v3953_v19, %v11511_v27 }
 0xaee   : > { %v7888_v50 = vpop.eup %7887  ;;  %v3987_v21 = vadd.f32 1e-12, %v3971_v28 }
 0xaef   : > { %v4120_v55 = vmul.f32 %v7888_v50, %v3986_v13  ;;  %vm4126_vm12 = vweird.f32 %v7888_v50 }
 0xaf0   : > { %7889 = vrsqrt.f32 %v3987_v21  ;;  %vm4127_vm14 = vmor %vm4125_vm13, %vm4126_vm12  ;;  %vm4135_vm2 = vweird.f32 %v3987_v21 }
 0xaf1   : > { %v4121_v31 = vmul.f32 %v7888_v50, %v4120_v55 }
 0xaf3   : > { %v4122_v26 = vmul.f32 0.5, %v4121_v31  ;;  %v3956_v23 = vpop.xlane.xlu0 %3955  ;;  %v4551_v54 = vpop.permute.xlu2 %4550 }
 0xaf4   : > { %v3972_v58 = vmul.f32 %v3956_v23, %v11511_v27 }
 0xaf5   : > { %v4123_v18 = vsub.f32 1.5, %v4122_v26 }
 0xaf6   : > { %v7890_v29 = vpop.eup %7889  ;;  %v3988_v17 = vadd.f32 1e-12, %v3972_v58 }
 0xaf7   : > { %v4124_v42 = vmul.f32 %v7888_v50, %v4123_v18  ;;  %v4130_v2 = vmul.f32 %v7890_v29, %v3987_v21  ;;  %vm4136_vm15 = vweird.f32 %v7890_v29 }
 0xaf8   : > { %7891 = vrsqrt.f32 %v3988_v17  ;;  %vm10245_vm4 = vmor %vm4135_vm2, %vm4136_vm15  ;;  %vm4145_vm5 = vweird.f32 %v3988_v17 }
 0xaf9   : > { %v4128_v60 = vsel %vm4127_vm14, %v7888_v50, %v4124_v42  ;;  %v4131_v38 = vmul.f32 %v7890_v29, %v4130_v2 }
 0xafa   : > { %v4162_v41 = vmul.f32 %v4128_v60, %v10064_v10 }
 0xafb   : > { %v4132_v46 = vmul.f32 0.5, %v4131_v38 }
 0xafc   : > { %v4171_v12 = vpack.c.bf16 %v4162_v41, %v4161_v11 }
 0xafd   : > { %v4133_v30 = vsub.f32 1.5, %v4132_v46 }
 0xafe   : > { %7448 = vmatmul.msk.bf16.gmra.mxu0 %vm860_vm1, %v4171_v12  ;;  %v7892_v44 = vpop.eup %7891 }
 0xaff   : > { %v4140_v47 = vmul.f32 %v7892_v44, %v3988_v17  ;;  %v4134_v28 = vmul.f32 %v7890_v29, %v4133_v30  ;;  %vm4146_vm3 = vweird.f32 %v7892_v44 }
 0xb00   : > { %v4243_v56 = vpop.f32.mrf.mxu0  ;;  %vm4147_vm6 = vmor %vm4145_vm5, %vm4146_vm3 }
 0xb01   : > { %v4141_v19 = vmul.f32 %v7892_v44, %v4140_v47  ;;  %v10233_v13 = vadd.f32 %v10099_v8, %v4243_v56  ;;  %v4138_v2 = vsel %vm10245_vm4, %v7890_v29, %v4134_v28 }
 0xb03   : > { %v4142_v50 = vmul.f32 0.5, %v4141_v19  ;;  %v4292_v36 = vmul.f32 %v10233_v13, %v11534_v15  ;;  %v4293_v10 = vmul.f32 %v10233_v13, %v11535_v57  ;;  %v4294_v55 = vmul.f32 %v10233_v13, %v11536_v3 }
 0xb04   : > { %v4553_v14 = vpop.permute.xlu1 %4552  ;;  %v4295_v31 = vmul.f32 %v10233_v13, %v11537_v25  ;;  %v4163_v19 = vmul.f32 %v4138_v2, %v10072_v34 }
 0xb05   : > { %v4143_v26 = vsub.f32 1.5, %v4142_v50  ;;  %v4561_v23 = vsel %vm860_vm1, %v4553_v14, 0  ;;  %v4356_v18 = vpack.c.bf16 %v4292_v36, %v4292_v36  ;;  %v4357_v58 = vpack.c.bf16 %v4293_v10, %v4293_v10 }
 0xb06   : > { %4569 = vmatpush.bf16.xpose.msra.mxu3 %v4561_v23  ;;  %v4358_v21 = vpack.c.bf16 %v4294_v55, %v4294_v55  ;;  %v4359_v42 = vpack.c.bf16 %v4295_v31, %v4295_v31  ;;  %v4558_v36 = vsel %vm860_vm1, %v4551_v54, 0 }
 0xb07   : > { %v4144_v60 = vmul.f32 %v7892_v44, %v4143_v26  ;;  %v4760_v38 = vunpack.c.l.b16 %v4356_v18  ;;  %v4761_v11 = vunpack.c.l.b16 %v4357_v58  ;;  %v4587_v18 = vpop.permute.xlu2 %4586 }
 0xb08   : > { %v4245_v41 = vpop.f32.mrf.mxu0  ;;  %v4762_v46 = vunpack.c.l.b16 %v4358_v21  ;;  %v4763_v12 = vunpack.c.l.b16 %v4359_v42 }
 0xb09   : > { %v4148_v30 = vsel %vm4147_vm6, %v7892_v44, %v4144_v60  ;;  %v10253_v47 = vadd.f32 %v10099_v8, %v4245_v41  ;;  %v4764_v56 = vpack.c.b16 %v4761_v11, %v4760_v38  ;;  %v4524_v41 = vpack.c.bf16 %v10106_v43, %v10106_v43 }
 0xb0a   : > { %v4765_v17 = vpack.c.b16 %v4763_v12, %v4762_v46  ;;  %v4164_v50 = vmul.f32 %v4148_v30, %v10085_v16 }
 0xb0b   : > { %4766 = vrot.lane.b32.xlu1 %v4764_v56, %s8100_s17  ;;  %v4296_v29 = vmul.f32 %v10253_v47, %v11534_v15  ;;  %v4297_v28 = vmul.f32 %v10253_v47, %v11535_v57  ;;  %v4298_v44 = vmul.f32 %v10253_v47, %v11536_v3  ;;  %v4299_v34 = vmul.f32 %v10253_v47, %v11537_v25 }
 0xb0c   : > { %v4589_v10 = vpop.permute.xlu0 %4588  ;;  %4768 = vrot.lane.b32.xlu0 %v4765_v17, %s8100_s17  ;;  %v4172_v14 = vpack.c.bf16 %v4164_v50, %v4163_v19  ;;  %v4594_v19 = vsel %vm860_vm1, %v4587_v18, 0  ;;  %v4525_v18 = vpack.c.bf16 %v10139_v40, %v10139_v40 }
 0xb0d   : > { %v4597_v16 = vsel %vm860_vm1, %v4589_v10, 0  ;;  %v4360_v55 = vpack.c.bf16 %v4296_v29, %v4296_v29  ;;  %v4361_v31 = vpack.c.bf16 %v4297_v28, %v4297_v28  ;;  %v4362_v26 = vpack.c.bf16 %v4298_v44, %v4298_v44 }
 0xb0e   : > { %4570 = vmatpush.bf16.xpose.msra.mxu3 %v4558_v36  ;;  %4605 = vmatpush.bf16.xpose.msra.mxu2 %v4597_v16  ;;  %v4363_v23 = vpack.c.bf16 %v4299_v34, %v4299_v34 }
 0xb0f   : > { %7449 = vmatmul.msk.bf16.gmra.mxu0 %vm860_vm1, %v4172_v14  ;;  %v4796_v58 = vunpack.c.l.b16 %v4360_v55  ;;  %v4797_v54 = vunpack.c.l.b16 %v4361_v31  ;;  %v4798_v0 = vunpack.c.l.b16 %v4362_v26  ;;  %v4623_v55 = vpop.permute.xlu2 %4622 }
 0xb10   : > { %v4799_v42 = vunpack.c.l.b16 %v4363_v23 }
 0xb11   : > { %v4248_v21 = vpop.f32.mrf.mxu0  ;;  %v4800_v60 = vpack.c.b16 %v4797_v54, %v4796_v58 }
 0xb12   : > { %v10271_v2 = vadd.f32 %v10099_v8, %v4248_v21  ;;  %v4801_v38 = vpack.c.b16 %v4799_v42, %v4798_v0 }
 0xb13   : > { %4802 = vrot.lane.b32.xlu2 %v4800_v60, %s8100_s17  ;;  %v4630_v60 = vsel %vm860_vm1, %v4623_v55, 0 }
 0xb14   : > { %v4625_v11 = vpop.permute.xlu1 %4624  ;;  %v4302_v46 = vmul.f32 %v10271_v2, %v11536_v3  ;;  %v4303_v12 = vmul.f32 %v10271_v2, %v11537_v25  ;;  %v4300_v30 = vmul.f32 %v10271_v2, %v11534_v15  ;;  %4804 = vrot.lane.b32.xlu0 %v4801_v38, %s8100_s17  ;;  %v4301_v17 = vmul.f32 %v10271_v2, %v11535_v57 }
 0xb15   : > { %v4633_v56 = vsel %vm860_vm1, %v4625_v11, 0  ;;  %7450 = vmatmul.msk.bf16.vlgmr.msra.gmra.mxu3 %vm860_vm1, %v4524_v41 }
 0xb16   : > { %4641 = vmatpush.bf16.xpose.msrb.mxu1 %v4633_v56  ;;  %v4366_v50 = vpack.c.bf16 %v4302_v46, %v4302_v46  ;;  %v4367_v29 = vpack.c.bf16 %v4303_v12, %v4303_v12  ;;  %v4364_v28 = vpack.c.bf16 %v4300_v30, %v4300_v30  ;;  %4606 = vmatpush.bf16.xpose.msra.mxu2 %v4594_v19 }
 0xb17   : > { %v4365_v44 = vpack.c.bf16 %v4301_v17, %v4301_v17 }
 0xb18   : > { %v4834_v36 = vunpack.c.l.b16 %v4366_v50  ;;  %v4835_v10 = vunpack.c.l.b16 %v4367_v29  ;;  %v4832_v14 = vunpack.c.l.b16 %v4364_v28 }
 0xb19   : > { %v4250_v34 = vpop.f32.mrf.mxu0  ;;  %v4833_v16 = vunpack.c.l.b16 %v4365_v44 }
 0xb1a   : > { %v10289_v31 = vadd.f32 %v10099_v8, %v4250_v34  ;;  %v4837_v26 = vpack.c.b16 %v4835_v10, %v4834_v36  ;;  %v4526_v36 = vpack.c.bf16 %v10156_v61, %v10156_v61 }
 0xb1b   : > { %v4836_v23 = vpack.c.b16 %v4833_v16, %v4832_v14  ;;  %v4661_v58 = vpop.permute.xlu0 %4660 }
 0xb1c   : > { %4840 = vrot.lane.b32.xlu1 %v4837_v26, %s8100_s17  ;;  %v4306_v54 = vmul.f32 %v10289_v31, %v11536_v3  ;;  %v4307_v0 = vmul.f32 %v10289_v31, %v11537_v25  ;;  %v4304_v21 = vmul.f32 %v10289_v31, %v11534_v15  ;;  %v4305_v42 = vmul.f32 %v10289_v31, %v11535_v57  ;;  %v4659_v29 = vpop.permute.xlu1 %4658 }
 0xb1d   : > { %v4669_v38 = vsel %vm860_vm1, %v4661_v58, 0  ;;  %4838 = vrot.lane.b32.xlu0 %v4836_v23, %s8100_s17  ;;  %7451 = vmatmul.msk.bf16.vlgmr.msra.gmra.mxu2 %vm860_vm1, %v4525_v18  ;;  %v4666_v23 = vsel %vm860_vm1, %v4659_v29, 0 }
 0xb1e   : > { %4642 = vmatpush.bf16.xpose.msrb.mxu1 %v4630_v60  ;;  %v4370_v11 = vpack.c.bf16 %v4306_v54, %v4306_v54  ;;  %v4371_v41 = vpack.c.bf16 %v4307_v0, %v4307_v0  ;;  %v4368_v46 = vpack.c.bf16 %v4304_v21, %v4304_v21  ;;  %4677 = vmatpush.bf16.xpose.msrb.mxu3 %v4669_v38 }
 0xb1f   : > { %v4369_v12 = vpack.c.bf16 %v4305_v42, %v4305_v42  ;;  %v4695_v42 = vpop.permute.xlu2 %4694 }
 0xb20   : > { %v4870_v30 = vunpack.c.l.b16 %v4370_v11  ;;  %v4871_v56 = vunpack.c.l.b16 %v4371_v41  ;;  %v4868_v17 = vunpack.c.l.b16 %v4368_v46 }
 0xb21   : > { %v4253_v19 = vpop.f32.mrf.mxu0  ;;  %v4869_v50 = vunpack.c.l.b16 %v4369_v12 }
 0xb22   : > { %v10307_v28 = vadd.f32 %v10099_v8, %v4253_v19  ;;  %v4873_v44 = vpack.c.b16 %v4871_v56, %v4870_v30  ;;  %v4527_v19 = vpack.c.bf16 %v10182_v9, %v10182_v9 }
 0xb23   : > { %v4872_v10 = vpack.c.b16 %v4869_v50, %v4868_v17 }
 0xb24   : > { %v4697_v14 = vpop.permute.xlu0 %4696  ;;  %4876 = vrot.lane.b32.xlu2 %v4873_v44, %s8100_s17  ;;  %v4308_v34 = vmul.f32 %v10307_v28, %v11534_v15  ;;  %v4309_v16 = vmul.f32 %v10307_v28, %v11535_v57  ;;  %v4310_v55 = vmul.f32 %v10307_v28, %v11536_v3  ;;  %v4311_v26 = vmul.f32 %v10307_v28, %v11537_v25 }
 0xb25   : > { %v4705_v18 = vsel %vm860_vm1, %v4697_v14, 0  ;;  %7452 = vmatmul.msk.bf16.vlgmr.msrb.gmra.mxu1 %vm860_vm1, %v4526_v36  ;;  %4874 = vrot.lane.b32.xlu0 %v4872_v10, %s8100_s17  ;;  %v4702_v10 = vsel %vm860_vm1, %v4695_v42, 0  ;;  %v4528_v42 = vpack.c.bf16 %v10198_v6, %v10198_v6  ;;  %v4436_v33 = vmul.f32 %v10307_v28, %v9245_v4 }
 0xb26   : > { %4713 = vmatpush.bf16.xpose.msrb.mxu2 %v4705_v18  ;;  %v4372_v58 = vpack.c.bf16 %v4308_v34, %v4308_v34  ;;  %v4373_v54 = vpack.c.bf16 %v4309_v16, %v4309_v16  ;;  %v4374_v0 = vpack.c.bf16 %v4310_v55, %v4310_v55  ;;  %v4375_v21 = vpack.c.bf16 %v4311_v26, %v4311_v26 }
 0xb27   : > { %4678 = vmatpush.bf16.xpose.msrb.mxu3 %v4666_v23 }
 0xb28   : > { %v4904_v60 = vunpack.c.l.b16 %v4372_v58  ;;  %v4905_v38 = vunpack.c.l.b16 %v4373_v54  ;;  %v4906_v11 = vunpack.c.l.b16 %v4374_v0  ;;  %v4907_v41 = vunpack.c.l.b16 %v4375_v21  ;;  %v4731_v0 = vpop.permute.xlu2 %4730 }
 0xb29   : > { %v4255_v46 = vpop.f32.mrf.mxu0 }
 0xb2a   : > { %v10325_v12 = vadd.f32 %v10099_v8, %v4255_v46  ;;  %v4908_v30 = vpack.c.b16 %v4905_v38, %v4904_v60  ;;  %v4909_v56 = vpack.c.b16 %v4907_v41, %v4906_v11  ;;  %v4738_v38 = vsel %vm860_vm1, %v4731_v0, 0 }
 0xb2b   : > { %v4733_v17 = vpop.permute.xlu1 %4732  ;;  %v4529_v11 = vpack.c.bf16 %v10211_v53, %v10211_v53 }
 0xb2c   : > { %v4741_v50 = vsel %vm860_vm1, %v4733_v17, 0  ;;  %4910 = vrot.lane.b32.xlu2 %v4908_v30, %s8100_s17  ;;  %4912 = vrot.lane.b32.xlu1 %v4909_v56, %s8100_s17  ;;  %v4314_v29 = vmul.f32 %v10325_v12, %v11536_v3  ;;  %v4315_v44 = vmul.f32 %v10325_v12, %v11537_v25  ;;  %v4312_v36 = vmul.f32 %v10325_v12, %v11534_v15 }
 0xb2d   : > { %4749 = vmatpush.bf16.xpose.msra.mxu1 %v4741_v50  ;;  %v4313_v14 = vmul.f32 %v10325_v12, %v11535_v57 }
 0xb2e   : > { %7453 = vmatmul.msk.bf16.vlgmr.msrb.gmra.mxu3 %vm860_vm1, %v4527_v19  ;;  %4714 = vmatpush.bf16.xpose.msrb.mxu2 %v4702_v10  ;;  %v4378_v34 = vpack.c.bf16 %v4314_v29, %v4314_v29  ;;  %v4379_v16 = vpack.c.bf16 %v4315_v44, %v4315_v44  ;;  %v4376_v55 = vpack.c.bf16 %v4312_v36, %v4312_v36 }
 0xb2f   : > { %v4377_v26 = vpack.c.bf16 %v4313_v14, %v4313_v14 }
 0xb30   : > { %v4942_v23 = vunpack.c.l.b16 %v4378_v34  ;;  %v4943_v18 = vunpack.c.l.b16 %v4379_v16  ;;  %v4940_v58 = vunpack.c.l.b16 %v4376_v55 }
 0xb31   : > { %v4941_v54 = vunpack.c.l.b16 %v4377_v26 }
 0xb32   : > { %v4945_v21 = vpack.c.b16 %v4943_v18, %v4942_v23 }
 0xb33   : > { %v4944_v60 = vpack.c.b16 %v4941_v54, %v4940_v58 }
 0xb34   : > { %4948 = vrot.lane.b32.xlu1 %v4945_v21, %s8100_s17 }
 0xb35   : > { %4946 = vrot.lane.b32.xlu0 %v4944_v60, %s8100_s17  ;;  %7454 = vmatmul.msk.bf16.vlgmr.msrb.gmra.mxu2 %vm860_vm1, %v4528_v42 }
 0xb36   : > { %4750 = vmatpush.bf16.xpose.msra.mxu1 %v4738_v38 }
 0xb3d   : > { %7455 = vmatmul.msk.bf16.vlgmr.msra.gmra.mxu1 %vm860_vm1, %v4529_v11 }
 0xb6d   : > { %v4803_v41 = vpop.permute.xlu2 %4802 }
 0xb7b   : > { %v4258_v46 = vpop.f32.mrf.mxu0 }
 0xb7c   : > { %v10352_v30 = vadd.f32 %v10099_v8, %v4258_v46 }
 0xb7d   : > { %v4767_v0 = vpop.permute.xlu1 %4766 }
 0xb7e   : > { %v4877_v56 = vpop.permute.xlu2 %4876  ;;  %v4318_v17 = vmul.f32 %v10352_v30, %v11536_v3  ;;  %v4319_v19 = vmul.f32 %v10352_v30, %v11537_v25  ;;  %v4316_v50 = vmul.f32 %v10352_v30, %v11534_v15  ;;  %v4317_v29 = vmul.f32 %v10352_v30, %v11535_v57  ;;  %v4769_v36 = vpop.permute.xlu0 %4768 }
 0xb7f   : > { %v4885_v44 = vsel %vm860_vm1, %v4877_v56, 0  ;;  %v4777_v10 = vsel %vm860_vm1, %v4769_v36, 0 }
 0xb80   : > { %4893 = vmatpush.bf16.xpose.msrb.mxu1 %v4885_v44  ;;  %v4382_v14 = vpack.c.bf16 %v4318_v17, %v4318_v17  ;;  %v4383_v34 = vpack.c.bf16 %v4319_v19, %v4319_v19  ;;  %v4380_v16 = vpack.c.bf16 %v4316_v50, %v4316_v50  ;;  %4785 = vmatpush.bf16.xpose.msra.mxu3 %v4777_v10  ;;  %v4774_v17 = vsel %vm860_vm1, %v4767_v0, 0 }
 0xb81   : > { %v4381_v55 = vpack.c.bf16 %v4317_v29, %v4317_v29  ;;  %v4530_v0 = vpack.c.bf16 %v10233_v13, %v10233_v13 }
 0xb82   : > { %v4978_v26 = vunpack.c.l.b16 %v4382_v14  ;;  %v4979_v23 = vunpack.c.l.b16 %v4383_v34  ;;  %v4976_v18 = vunpack.c.l.b16 %v4380_v16 }
 0xb83   : > { %v4260_v58 = vpop.f32.mrf.mxu0  ;;  %v4977_v54 = vunpack.c.l.b16 %v4381_v55 }
 0xb84   : > { %v10365_v21 = vadd.f32 %v10099_v8, %v4260_v58  ;;  %v4981_v60 = vpack.c.b16 %v4979_v23, %v4978_v26 }
 0xb85   : > { %v4980_v42 = vpack.c.b16 %v4977_v54, %v4976_v18 }
 0xb86   : > { %4984 = vrot.lane.b32.xlu2 %v4981_v60, %s8100_s17  ;;  %v4322_v38 = vmul.f32 %v10365_v21, %v11536_v3  ;;  %v4323_v11 = vmul.f32 %v10365_v21, %v11537_v25  ;;  %v4320_v46 = vmul.f32 %v10365_v21, %v11534_v15  ;;  %v4321_v56 = vmul.f32 %v10365_v21, %v11535_v57  ;;  %v4805_v19 = vpop.permute.xlu0 %4804 }
 0xb87   : > { %4982 = vrot.lane.b32.xlu1 %v4980_v42, %s8100_s17  ;;  %v4813_v50 = vsel %vm860_vm1, %v4805_v19, 0 }
 0xb88   : > { %v4386_v29 = vpack.c.bf16 %v4322_v38, %v4322_v38  ;;  %v4387_v44 = vpack.c.bf16 %v4323_v11, %v4323_v11  ;;  %v4384_v36 = vpack.c.bf16 %v4320_v46, %v4320_v46  ;;  %4786 = vmatpush.bf16.xpose.msra.mxu3 %v4774_v17  ;;  %4821 = vmatpush.bf16.xpose.msra.mxu2 %v4813_v50  ;;  %v4810_v38 = vsel %vm860_vm1, %v4803_v41, 0 }
 0xb89   : > { %v4385_v10 = vpack.c.bf16 %v4321_v56, %v4321_v56 }
 0xb8a   : > { %v5014_v14 = vunpack.c.l.b16 %v4386_v29  ;;  %v5015_v34 = vunpack.c.l.b16 %v4387_v44  ;;  %v5012_v16 = vunpack.c.l.b16 %v4384_v36 }
 0xb8b   : > { %v5013_v55 = vunpack.c.l.b16 %v4385_v10 }
 0xb8c   : > { %v5017_v26 = vpack.c.b16 %v5015_v34, %v5014_v14  ;;  %v4263_v23 = vpop.f32.mrf.mxu0 }
 0xb8d   : > { %v5016_v18 = vpack.c.b16 %v5013_v55, %v5012_v16  ;;  %v10380_v58 = vadd.f32 %v10099_v8, %v4263_v23 }
 0xb8e   : > { %v4841_v54 = vpop.permute.xlu1 %4840  ;;  %5020 = vrot.lane.b32.xlu0 %v5017_v26, %s8100_s17  ;;  %v4531_v26 = vpack.c.bf16 %v10253_v47, %v10253_v47 }
 0xb8f   : > { %v4849_v60 = vsel %vm860_vm1, %v4841_v54, 0  ;;  %v4839_v42 = vpop.permute.xlu0 %4838  ;;  %5018 = vrot.lane.b32.xlu2 %v5016_v18, %s8100_s17  ;;  %7456 = vmatmul.msk.bf16.vlgmr.msra.gmra.mxu3 %vm860_vm1, %v4530_v0  ;;  %v4326_v11 = vmul.f32 %v10380_v58, %v11536_v3  ;;  %v4327_v46 = vmul.f32 %v10380_v58, %v11537_v25  ;;  %v4324_v56 = vmul.f32 %v10380_v58, %v11534_v15 }
 0xb90   : > { %4857 = vmatpush.bf16.xpose.msrb.mxu0 %v4849_v60  ;;  %4822 = vmatpush.bf16.xpose.msra.mxu2 %v4810_v38  ;;  %v4325_v17 = vmul.f32 %v10380_v58, %v11535_v57  ;;  %v4846_v23 = vsel %vm860_vm1, %v4839_v42, 0 }
 0xb91   : > { %v4390_v19 = vpack.c.bf16 %v4326_v11, %v4326_v11  ;;  %v4391_v50 = vpack.c.bf16 %v4327_v46, %v4327_v46  ;;  %v4388_v29 = vpack.c.bf16 %v4324_v56, %v4324_v56 }
 0xb92   : > { %v4389_v41 = vpack.c.bf16 %v4325_v17, %v4325_v17 }
 0xb93   : > { %v5050_v44 = vunpack.c.l.b16 %v4390_v19  ;;  %v5051_v36 = vunpack.c.l.b16 %v4391_v50  ;;  %v5048_v10 = vunpack.c.l.b16 %v4388_v29 }
 0xb94   : > { %v4265_v14 = vpop.f32.mrf.mxu0  ;;  %v5049_v34 = vunpack.c.l.b16 %v4389_v41 }
 0xb95   : > { %v10398_v16 = vadd.f32 %v10099_v8, %v4265_v14  ;;  %v5053_v55 = vpack.c.b16 %v5051_v36, %v5050_v44 }
 0xb96   : > { %v5052_v54 = vpack.c.b16 %v5049_v34, %v5048_v10 }
 0xb97   : > { %v4875_v18 = vpop.permute.xlu0 %4874  ;;  %5056 = vrot.lane.b32.xlu1 %v5053_v55, %s8100_s17  ;;  %7457 = vmatmul.msk.bf16.vlgmr.msra.gmra.mxu2 %vm860_vm1, %v4531_v26  ;;  %v4330_v60 = vmul.f32 %v10398_v16, %v11536_v3  ;;  %v4331_v8 = vmul.f32 %v10398_v16, %v11537_v25  ;;  %v4328_v38 = vmul.f32 %v10398_v16, %v11534_v15  ;;  %v4911_v26 = vpop.permute.xlu2 %4910 }
 0xb98   : > { %v4882_v0 = vsel %vm860_vm1, %v4875_v18, 0  ;;  %v4572_v11 = vpop.f32.mrf.mxu3  ;;  %5054 = vrot.lane.b32.xlu0 %v5052_v54, %s8100_s17  ;;  %4858 = vmatpush.bf16.xpose.msrb.mxu0 %v4846_v23  ;;  %v4329_v42 = vmul.f32 %v10398_v16, %v11535_v57  ;;  %v4532_v15 = vpack.c.bf16 %v10271_v2, %v10271_v2  ;;  %v4533_v57 = vpack.c.bf16 %v10289_v31, %v10289_v31 }
 0xb99   : > { %4894 = vmatpush.bf16.xpose.msrb.mxu1 %v4882_v0  ;;  %v4394_v46 = vpack.c.bf16 %v4330_v60, %v4330_v60  ;;  %v4395_v56 = vpack.c.bf16 %v4331_v8, %v4331_v8  ;;  %v4392_v17 = vpack.c.bf16 %v4328_v38, %v4328_v38  ;;  %v4918_v54 = vsel %vm860_vm1, %v4911_v26, 0 }
 0xb9a   : > { %v4393_v19 = vpack.c.bf16 %v4329_v42, %v4329_v42  ;;  %v4534_v42 = vpack.c.bf16 %v10307_v28, %v10307_v28 }
 0xb9b   : > { %v5086_v50 = vunpack.c.l.b16 %v4394_v46  ;;  %v5087_v3 = vunpack.c.l.b16 %v4395_v56  ;;  %v5084_v29 = vunpack.c.l.b16 %v4392_v17  ;;  %v4535_v56 = vpack.c.bf16 %v10325_v12, %v10325_v12 }
 0xb9c   : > { %v5085_v41 = vunpack.c.l.b16 %v4393_v19 }
 0xb9d   : > { %v5089_v44 = vpack.c.b16 %v5087_v3, %v5086_v50  ;;  %v10436_v3 = vld [vmem:[%s11509_s2] sm:$0xff] }
 0xb9e   : > { %v4913_v25 = vpop.permute.xlu1 %4912  ;;  %v5088_v10 = vpack.c.b16 %v5085_v41, %v5084_v29  ;;  %v10439_v29 = vadd.f32 %v10436_v3, %v4572_v11 }
 0xb9f   : > { %v4921_v36 = vsel %vm860_vm1, %v4913_v25, 0  ;;  %5092 = vrot.lane.b32.xlu2 %v5089_v44, %s8100_s17  ;;  %7458 = vmatmul.msk.bf16.vlgmr.msrb.gmra.mxu0 %vm860_vm1, %v4532_v15 }
 0xba0   : > { %v4574_v14 = vpop.f32.mrf.mxu3  ;;  %5090 = vrot.lane.b32.xlu1 %v5088_v10, %s8100_s17  ;;  %v4608_v34 = vpop.f32.mrf.mxu2  ;;  %7459 = vmatmul.msk.bf16.vlgmr.msrb.gmra.mxu1 %vm860_vm1, %v4533_v57  ;;  %v5116_v44 = vsel %vm860_vm1, %v10439_v29, -inf  ;;  %s515_s17 = sand.u32 1, %s8088_s22  }
 0xba1   : > { %4929 = vmatpush.bf16.xpose.msrb.mxu3 %v4921_v36  ;;  %v10444_v15 = vadd.f32 %v10436_v3, %v4608_v34  ;;  %s7185_s18 = sshll.u32 %s515_s17, 4 }
 0xba2   : > { %v4644_v55 = vpop.f32.mrf.mxu1  ;;  %s517_s21 = scalar_lea.vmem [#allocation2], %s7185_s18 }
 0xba3   : > { %v10447_v36 = vadd.f32 %v10436_v3, %v4644_v55  ;;  %v5119_v57 = vsel %vm860_vm1, %v10444_v15, -inf  ;;  %s7116_s28 = sshll.u32 %s517_s21, 4  ;;  %s7117_s28 = int_to_ptr.vmem [resolvable:$true] %s7116_s28 }
 0xba5   : > { %v5122_v11 = vsel %vm860_vm1, %v10447_v36, -inf }
 0xba6   : > { %v4949_v23 = vpop.permute.xlu1 %4948 }
 0xba7   : > { %v4957_v18 = vsel %vm860_vm1, %v4949_v23, 0  ;;  %v4947_v8 = vpop.permute.xlu0 %4946 }
 0xba8   : > { %4965 = vmatpush.bf16.xpose.msrb.mxu2 %v4957_v18  ;;  %v4610_v0 = vpop.f32.mrf.mxu2  ;;  %v4954_v38 = vsel %vm860_vm1, %v4947_v8, 0 }
 0xba9   : > { %4930 = vmatpush.bf16.xpose.msrb.mxu3 %v4918_v54 }
 0xbaa   : > { %v4646_v60 = vpop.f32.mrf.mxu1 }
 0xbb0   : > { %4966 = vmatpush.bf16.xpose.msrb.mxu2 %v4954_v38  ;;  %7460 = vmatmul.msk.bf16.vlgmr.msrb.gmra.mxu3 %vm860_vm1, %v4534_v42 }
 0xbb1   : > { %v4680_v46 = vpop.f32.mrf.mxu3 }
 0xbb2   : > { %v10450_v10 = vadd.f32 %v10436_v3, %v4680_v46  ;;  %v8030_v46 = vld [vmem:[%s11421_s4 + $0x18] sm:$0xff] }
 0xbb4   : > { %v5125_v14 = vsel %vm860_vm1, %v10450_v10, -inf }
 0xbb7   : > { %7461 = vmatmul.msk.bf16.vlgmr.msrb.gmra.mxu2 %vm860_vm1, %v4535_v56  ;;  %v8031_v56 = vld [vmem:[%s11421_s4 + $0x10] sm:$0xff] }
 0xbb8   : > { %v4716_v17 = vpop.f32.mrf.mxu2 }
 0xbb9   : > { %v4682_v19 = vpop.f32.mrf.mxu3  ;;  %v10459_v34 = vadd.f32 %v10436_v3, %v4716_v17 }
 0xbba   : > { %v4752_v50 = vpop.f32.mrf.mxu1  ;;  %v4536_v19 = vpack.c.bf16 %v10352_v30, %v10352_v30 }
 0xbbb   : > { %v10462_v55 = vadd.f32 %v10436_v3, %v4752_v50  ;;  %v5128_v26 = vsel %vm860_vm1, %v10459_v34, -inf  ;;  %v8032_v50 = vld [vmem:[%s11421_s4 + $0x8] sm:$0xff] }
 0xbbd   : > { %v5131_v23 = vsel %vm860_vm1, %v10462_v55, -inf }
 0xbc0   : > { %v4718_v41 = vpop.f32.mrf.mxu2 }
 0xbc2   : > { %v4754_v25 = vpop.f32.mrf.mxu1  ;;  %5117 = vmax.xlane.f32.xlu0 %v5116_v44 }
 0xbc3   : > { %v8033_v25 = vld [vmem:[%s11421_s4] sm:$0xff] }
 0xbc8   : > { %5120 = vmax.xlane.f32.xlu2 %v5119_v57 }
 0xbca   : > { %5123 = vmax.xlane.f32.xlu1 %v5122_v11  ;;  %5126 = vmax.xlane.f32.xlu0 %v5125_v14  ;;  %v4537_v14 = vpack.c.bf16 %v10365_v21, %v10365_v21 }
 0xbd0   : > { %5129 = vmax.xlane.f32.xlu2 %v5128_v26 }
 0xbd2   : > { %5132 = vmax.xlane.f32.xlu1 %v5131_v23 }
 0xbe0   : > { %v4985_v18 = vpop.permute.xlu2 %4984 }
 0xbe1   : > { %v4993_v54 = vsel %vm860_vm1, %v4985_v18, 0 }
 0xbe2   : > { %5001 = vmatpush.bf16.xpose.msra.mxu0 %v4993_v54 }
 0xbe9   : > { %v5019_v0 = vpop.permute.xlu2 %5018 }
 0xbea   : > { %v5026_v44 = vsel %vm860_vm1, %v5019_v0, 0 }
 0xbf9   : > { %v4983_v60 = vpop.permute.xlu1 %4982  ;;  %v5093_v38 = vpop.permute.xlu2 %5092 }
 0xbfa   : > { %v4990_v8 = vsel %vm860_vm1, %v4983_v60, 0  ;;  %v5101_v42 = vsel %vm860_vm1, %v5093_v38, 0  ;;  %v4538_v38 = vpack.c.bf16 %v10380_v58, %v10380_v58 }
 0xbfb   : > { %5002 = vmatpush.bf16.xpose.msra.mxu0 %v4990_v8  ;;  %5109 = vmatpush.bf16.xpose.msra.mxu2 %v5101_v42  ;;  %v4539_v42 = vpack.c.bf16 %v10398_v16, %v10398_v16 }
 0xc00   : > { %v5021_v17 = vpop.permute.xlu0 %5020 }
 0xc01   : > { %v5029_v41 = vsel %vm860_vm1, %v5021_v17, 0 }
 0xc02   : > { %7462 = vmatmul.msk.bf16.vlgmr.msra.gmra.mxu0 %vm860_vm1, %v4536_v19  ;;  %5037 = vmatpush.bf16.xpose.msra.mxu1 %v5029_v41 }
 0xc03   : > { %5272 = vmatpush.msrb.mxu0 %v8030_v46 }
 0xc05   : > { %5273 = vmatpush.msrb.mxu0 %v8031_v56 }
 0xc07   : > { %5274 = vmatpush.msrb.mxu0 %v8032_v50 }
 0xc09   : > { %5275 = vmatpush.msrb.mxu0 %v8033_v25  ;;  %v5057_v57 = vpop.permute.xlu1 %5056 }
 0xc0a   : > { %5038 = vmatpush.bf16.xpose.msra.mxu1 %v5026_v44  ;;  %v5065_v11 = vsel %vm860_vm1, %v5057_v57, 0  ;;  %v5055_v26 = vpop.permute.xlu0 %5054 }
 0xc0b   : > { %5073 = vmatpush.bf16.xpose.msra.mxu3 %v5065_v11  ;;  %v5062_v23 = vsel %vm860_vm1, %v5055_v26, 0 }
 0xc11   : > { %7463 = vmatmul.msk.bf16.vlgmr.msra.gmra.mxu1 %vm860_vm1, %v4537_v14 }
 0xc12   : > { %v5091_v18 = vpop.permute.xlu1 %5090  ;;  %v4788_v54 = vpop.f32.mrf.mxu3 }
 0xc13   : > { %v5098_v60 = vsel %vm860_vm1, %v5091_v18, 0  ;;  %v10495_v8 = vadd.f32 %v10436_v3, %v4788_v54  ;;  %5074 = vmatpush.bf16.xpose.msra.mxu3 %v5062_v23 }
 0xc14   : > { %5110 = vmatpush.bf16.xpose.msra.mxu2 %v5098_v60 }
 0xc15   : > { %v5134_v0 = vsel %vm860_vm1, %v10495_v8, -inf }
 0xc16   : > { %5135 = vmax.xlane.f32.xlu0 %v5134_v0 }
 0xc1a   : > { %v4790_v46 = vpop.f32.mrf.mxu3  ;;  %v4824_v56 = vpop.f32.mrf.mxu2  ;;  %7464 = vmatmul.msk.bf16.vlgmr.msra.gmra.mxu3 %vm860_vm1, %v4538_v38 }
 0xc1b   : > { %v10505_v17 = vadd.f32 %v10436_v3, %v4824_v56  ;;  %7465 = vmatmul.msk.bf16.vlgmr.msra.gmra.mxu2 %vm860_vm1, %v4539_v42 }
 0xc1c   : > { %v4860_v19 = vpop.f32.mrf.mxu0 }
 0xc1d   : > { %v10509_v50 = vadd.f32 %v10436_v3, %v4860_v19  ;;  %v4896_v41 = vpop.f32.mrf.mxu1  ;;  %v5137_v25 = vsel %vm860_vm1, %v10505_v17, -inf }
 0xc1e   : > { %v10514_v44 = vadd.f32 %v10436_v3, %v4896_v41  ;;  %5138 = vmax.xlane.f32.xlu2 %v5137_v25 }
 0xc1f   : > { %v5140_v57 = vsel %vm860_vm1, %v10509_v50, -inf }
 0xc20   : > { %5141 = vmax.xlane.f32.xlu1 %v5140_v57  ;;  %v5143_v11 = vsel %vm860_vm1, %v10514_v44, -inf }
 0xc21   : > { %5144 = vmax.xlane.f32.xlu0 %v5143_v11 }
 0xc22   : > { %v4826_v14 = vpop.f32.mrf.mxu2 }
 0xc24   : > { %v4862_v26 = vpop.f32.mrf.mxu0 }
 0xc25   : > { %v4898_v23 = vpop.f32.mrf.mxu1 }
 0xc33   : > { %v4932_v18 = vpop.f32.mrf.mxu3 }
 0xc34   : > { %v10521_v54 = vadd.f32 %v10436_v3, %v4932_v18 }
 0xc35   : > { %v5118_v60 = vpop.xlane.xlu0 %5117 }
 0xc36   : > { %v5164_v0 = vsub.f32 %v10439_v29, %v5118_v60  ;;  %v5146_v38 = vsel %vm860_vm1, %v10521_v54, -inf }
 0xc37   : > { %5147 = vmax.xlane.f32.xlu2 %v5146_v38 }
 0xc38   : > { %v5180_v42 = vmul.f32 1.442695, %v5164_v0 }
 0xc3a   : > { %v4968_v46 = vpop.f32.mrf.mxu2  ;;  %7893 = vpow2.f32 %v5180_v42 }
 0xc3b   : > { %v10527_v56 = vadd.f32 %v10436_v3, %v4968_v46  ;;  %v4934_v19 = vpop.f32.mrf.mxu3  ;;  %v5121_v41 = vpop.xlane.xlu2 %5120 }
 0xc3c   : > { %v5165_v25 = vsub.f32 %v10444_v15, %v5121_v41 }
 0xc3d   : > { %v5149_v57 = vsel %vm860_vm1, %v10527_v56, -inf  ;;  %v5124_v29 = vpop.xlane.xlu1 %5123  ;;  %v5127_v0 = vpop.xlane.xlu0 %5126 }
 0xc3e   : > { %5150 = vmax.xlane.f32.xlu1 %v5149_v57  ;;  %v5182_v11 = vmul.f32 1.442695, %v5165_v25  ;;  %v5166_v23 = vsub.f32 %v10447_v36, %v5124_v29  ;;  %v5167_v15 = vsub.f32 %v10450_v10, %v5127_v0  ;;  %v4399_v0 = vmul.f32 %v10106_v43, %v9197_v7 }
 0xc40   : > { %v10532_v14 = vpop.eup %7893  ;;  %7895 = vpow2.f32 %v5182_v11  ;;  %v5184_v60 = vmul.f32 1.442695, %v5166_v23  ;;  %v5186_v38 = vmul.f32 1.442695, %v5167_v15 }
 0xc41   : > { %7466 = vmatmul.msk.f32.vlgmr.msrb.gmra.mxu0 %vm860_vm1, %v10532_v14 }
 0xc42   : > { %v4970_v26 = vpop.f32.mrf.mxu2  ;;  %7897 = vpow2.f32 %v5184_v60  ;;  %v4398_v60 = vmul.f32 %v10106_v43, %v9191_v48 }
 0xc43   : > { %v5130_v42 = vpop.xlane.xlu2 %5129  ;;  %7899 = vpow2.f32 %v5186_v38 }
 0xc44   : > { %v5168_v36 = vsub.f32 %v10459_v34, %v5130_v42 }
 0xc45   : > { %v5133_v41 = vpop.xlane.xlu1 %5132 }
 0xc46   : > { %v10537_v18 = vpop.eup %7895  ;;  %v5188_v19 = vmul.f32 1.442695, %v5168_v36  ;;  %v5169_v10 = vsub.f32 %v10462_v55, %v5133_v41  ;;  %v4462_v36 = vpack.c.bf16 %v4398_v60, %v4398_v60 }
 0xc48   : > { %v10542_v46 = vpop.eup %7897  ;;  %7901 = vpow2.f32 %v5188_v19  ;;  %v5190_v57 = vmul.f32 1.442695, %v5169_v10  ;;  %v4463_v19 = vpack.c.bf16 %v4399_v0, %v4399_v0 }
 0xc49   : > { %7467 = vmatmul.msk.f32.gmra.mxu0 %vm860_vm1, %v10537_v18  ;;  %v10547_v25 = vpop.eup %7899 }
 0xc4a   : > { %7903 = vpow2.f32 %v5190_v57 }
 0xc4e   : > { %v10552_v11 = vpop.eup %7901 }
 0xc50   : > { %v10556_v29 = vpop.eup %7903 }
 0xc51   : > { %7468 = vmatmul.msk.f32.gmra.mxu0 %vm860_vm1, %v10542_v46 }
 0xc59   : > { %7469 = vmatmul.msk.f32.gmra.mxu0 %vm860_vm1, %v10547_v25 }
 0xc61   : > { %7470 = vmatmul.msk.f32.gmra.mxu0 %vm860_vm1, %v10552_v11 }
 0xc69   : > { %7471 = vmatmul.msk.f32.gmra.mxu0 %vm860_vm1, %v10556_v29 }
 0xc7f   : > { %v5004_v34 = vpop.f32.mrf.mxu0 }
 0xc80   : > { %v10561_v26 = vadd.f32 %v10436_v3, %v5004_v34  ;;  %v5379_v34 = vunpack.c.l.b16 %v4462_v36  ;;  %v4402_v36 = vmul.f32 %v10139_v40, %v9191_v48 }
 0xc82   : > { %v5152_v23 = vsel %vm860_vm1, %v10561_v26, -inf }
 0xc83   : > { %5153 = vmax.xlane.f32.xlu0 %v5152_v23  ;;  %v5380_v23 = vunpack.c.l.b16 %v4463_v19 }
 0xc85   : > { %v5382_v60 = vpack.c.b16 %v5380_v23, %v5379_v34 }
 0xc87   : > { %v5006_v55 = vpop.f32.mrf.mxu0 }
 0xc89   : > { %v5136_v15 = vpop.xlane.xlu0 %5135 }
 0xc8a   : > { %v5170_v38 = vsub.f32 %v10495_v8, %v5136_v15 }
 0xc8c   : > { %v5192_v42 = vmul.f32 1.442695, %v5170_v38 }
 0xc8e   : > { %v5040_v41 = vpop.f32.mrf.mxu1  ;;  %7905 = vpow2.f32 %v5192_v42 }
 0xc8f   : > { %v10571_v10 = vadd.f32 %v10436_v3, %v5040_v41 }
 0xc91   : > { %v5155_v57 = vsel %vm860_vm1, %v10571_v10, -inf  ;;  %v5139_v55 = vpop.xlane.xlu2 %5138 }
 0xc92   : > { %5156 = vmax.xlane.f32.xlu2 %v5155_v57  ;;  %v5171_v35 = vsub.f32 %v10505_v17, %v5139_v55  ;;  %v4403_v17 = vmul.f32 %v10139_v40, %v9197_v7  ;;  %v4466_v57 = vpack.c.bf16 %v4402_v36, %v4402_v36 }
 0xc93   : > { %v5142_v62 = vpop.xlane.xlu1 %5141 }
 0xc94   : > { %v10576_v1 = vpop.eup %7905  ;;  %v5194_v8 = vmul.f32 1.442695, %v5171_v35  ;;  %v5172_v15 = vsub.f32 %v10509_v50, %v5142_v62  ;;  %v5145_v42 = vpop.xlane.xlu0 %5144  ;;  %v4467_v34 = vpack.c.bf16 %v4403_v17, %v4403_v17 }
 0xc95   : > { %7472 = vmatmul.msk.f32.gmra.mxu0 %vm860_vm1, %v10576_v1  ;;  %v5173_v41 = vsub.f32 %v10514_v44, %v5145_v42 }
 0xc96   : > { %v5042_v0 = vpop.f32.mrf.mxu1  ;;  %7907 = vpow2.f32 %v5194_v8  ;;  %v5196_v38 = vmul.f32 1.442695, %v5172_v15  ;;  %v4406_v8 = vmul.f32 %v10156_v61, %v9191_v48  ;;  %v4407_v15 = vmul.f32 %v10156_v61, %v9197_v7 }
 0xc97   : > { %5385 = vrot.lane.b32.xlu0 %v5382_v60, %s8101_s23  ;;  %v5198_v55 = vmul.f32 1.442695, %v5173_v41  ;;  %v5411_v60 = vunpack.c.l.b16 %v4466_v57  ;;  %v5412_v0 = vunpack.c.l.b16 %v4467_v34 }
 0xc98   : > { %7909 = vpow2.f32 %v5196_v38  ;;  %v4470_v36 = vpack.c.bf16 %v4406_v8, %v4406_v8  ;;  %v4401_v8 = vmul.f32 %v10139_v40, %v9228_v49 }
 0xc99   : > { %7911 = vpow2.f32 %v5198_v55  ;;  %v5414_v17 = vpack.c.b16 %v5412_v0, %v5411_v60  ;;  %v4400_v55 = vmul.f32 %v10139_v40, %v9245_v4  ;;  %v4472_v0 = vpack.c.bf16 %v4408_v24, %v4408_v24 }
 0xc9a   : > { %v4404_v24 = vmul.f32 %v10156_v61, %v9245_v4 }
 0xc9b   : > { %v5473_v40 = vunpack.c.l.b16 %v4472_v0 }
 0xc9c   : > { %v10586_v19 = vpop.eup %7907  ;;  %v4468_v0 = vpack.c.bf16 %v4404_v24, %v4404_v24 }
 0xc9d   : > { %v5076_v35 = vpop.f32.mrf.mxu3  ;;  %7473 = vmatmul.msk.f32.gmra.mxu0 %vm860_vm1, %v10586_v19 }
 0xc9e   : > { %v10592_v62 = vadd.f32 %v10436_v3, %v5076_v35  ;;  %v5112_v50 = vpop.f32.mrf.mxu2  ;;  %v10600_v44 = vpop.eup %7909  ;;  %v4471_v35 = vpack.c.bf16 %v4407_v15, %v4407_v15 }
 0xc9f   : > { %v10610_v59 = vpop.eup %7911 }
 0xca0   : > { %v5158_v23 = vsel %vm860_vm1, %v10592_v62, -inf  ;;  %v5444_v34 = vunpack.c.l.b16 %v4471_v35 }
 0xca1   : > { %5159 = vmax.xlane.f32.xlu1 %v5158_v23  ;;  %v5443_v23 = vunpack.c.l.b16 %v4470_v36  ;;  %v4464_v36 = vpack.c.bf16 %v4400_v55, %v4400_v55 }
 0xca5   : > { %v5078_v38 = vpop.f32.mrf.mxu3  ;;  %7474 = vmatmul.msk.f32.gmra.mxu0 %vm860_vm1, %v10600_v44 }
 0xca6   : > { %v5114_v42 = vpop.f32.mrf.mxu2  ;;  %v4409_v38 = vmul.f32 %v10182_v9, %v9228_v49 }
 0xca8   : > { %v4473_v15 = vpack.c.bf16 %v4409_v38, %v4409_v38 }
 0xcaa   : > { %5417 = vrot.lane.b32.xlu2 %v5414_v17, %s8101_s23  ;;  %v5148_v41 = vpop.xlane.xlu2 %5147  ;;  %v4465_v17 = vpack.c.bf16 %v4401_v8, %v4401_v8  ;;  %v4477_v8 = vpack.c.bf16 %v4413_v37, %v4413_v37  ;;  %v4425_v37 = vmul.f32 %v10253_v47, %v9228_v49 }
 0xcab   : > { %v5174_v57 = vsub.f32 %v10521_v54, %v5148_v41  ;;  %v5446_v54 = vpack.c.b16 %v5444_v34, %v5443_v23  ;;  %v4412_v41 = vmul.f32 %v10198_v6, %v9245_v4  ;;  %v4405_v34 = vmul.f32 %v10156_v61, %v9228_v49 }
 0xcac   : > { %v5410_v23 = vunpack.c.l.b16 %v4465_v17  ;;  %v10637_v61 = vadd.f32 %v10436_v3, %v5112_v50  ;;  %v4424_v17 = vmul.f32 %v10253_v47, %v9245_v4 }
 0xcad   : > { %v5200_v60 = vmul.f32 1.442695, %v5174_v57  ;;  %7475 = vmatmul.msk.f32.gmra.mxu0 %vm860_vm1, %v10610_v59  ;;  %v5474_v57 = vunpack.c.l.b16 %v4473_v15  ;;  %v4476_v38 = vpack.c.bf16 %v4412_v41, %v4412_v41  ;;  %v4469_v15 = vpack.c.bf16 %v4405_v34, %v4405_v34 }
 0xcae   : > { %v5161_v3 = vsel %vm860_vm1, %v10637_v61, -inf }
 0xcaf   : > { %7913 = vpow2.f32 %v5200_v60  ;;  %v5409_v60 = vunpack.c.l.b16 %v4464_v36  ;;  %v5477_v55 = vpack.c.b16 %v5474_v57, %v5473_v40  ;;  %v5442_v41 = vunpack.c.l.b16 %v4469_v15 }
 0xcb0   : > { %v4414_v40 = vmul.f32 %v10198_v6, %v9191_v48  ;;  %v4415_v57 = vmul.f32 %v10198_v6, %v9197_v7  ;;  %v4430_v6 = vmul.f32 %v10271_v2, %v9191_v48 }
 0xcb1   : > { %v5151_v42 = vpop.xlane.xlu1 %5150 }
 0xcb2   : > { %v5175_v35 = vsub.f32 %v10527_v56, %v5151_v42  ;;  %5449 = vrot.lane.b32.xlu2 %v5446_v54, %s8101_s23  ;;  %v5413_v54 = vpack.c.b16 %v5410_v23, %v5409_v60  ;;  %v5505_v42 = vunpack.c.l.b16 %v4476_v38  ;;  %v4488_v60 = vpack.c.bf16 %v4424_v17, %v4424_v17 }
 0xcb3   : > { %v4489_v23 = vpack.c.bf16 %v4425_v37, %v4425_v37  ;;  %v4478_v34 = vpack.c.bf16 %v4414_v40, %v4414_v40  ;;  %v4479_v38 = vpack.c.bf16 %v4415_v57, %v4415_v57  ;;  %v4396_v17 = vmul.f32 %v10106_v43, %v9245_v4 }
 0xcb4   : > { %v5202_v52 = vmul.f32 1.442695, %v5175_v35  ;;  %v5441_v35 = vunpack.c.l.b16 %v4468_v0  ;;  %v4397_v37 = vmul.f32 %v10106_v43, %v9228_v49  ;;  %v4433_v43 = vmul.f32 %v10289_v31, %v9228_v49 }
 0xcb5   : > { %v10628_v56 = vpop.eup %7913  ;;  %v5507_v0 = vunpack.c.l.b16 %v4478_v34  ;;  %v5508_v15 = vunpack.c.l.b16 %v4479_v38  ;;  %v4432_v38 = vmul.f32 %v10289_v31, %v9245_v4 }
 0xcb6   : > { %7915 = vpow2.f32 %v5202_v52  ;;  %7476 = vmatmul.msk.f32.gmra.mxu0 %vm860_vm1, %v10628_v56  ;;  %v5506_v52 = vunpack.c.l.b16 %v4477_v8  ;;  %v5445_v24 = vpack.c.b16 %v5442_v41, %v5441_v35  ;;  %v5602_v8 = vunpack.c.l.b16 %v4489_v23 }
 0xcb7   : > { %v4494_v41 = vpack.c.bf16 %v4430_v6, %v4430_v6  ;;  %v5510_v57 = vpack.c.b16 %v5508_v15, %v5507_v0  ;;  %v4461_v23 = vpack.c.bf16 %v4397_v37, %v4397_v37  ;;  %v4422_v6 = vmul.f32 %v10233_v13, %v9191_v48 }
 0xcb8   : > { %v5509_v50 = vpack.c.b16 %v5506_v52, %v5505_v42  ;;  %v4416_v42 = vmul.f32 %v10211_v53, %v9245_v4  ;;  %v4417_v52 = vmul.f32 %v10211_v53, %v9228_v49  ;;  %v4496_v37 = vpack.c.bf16 %v4432_v38, %v4432_v38 }
 0xcb9   : > { %v5378_v15 = vunpack.c.l.b16 %v4461_v23  ;;  %v4428_v38 = vmul.f32 %v10271_v2, %v9245_v4 }
 0xcba   : > { %5479 = vrot.lane.b32.xlu2 %v5477_v55, %s8101_s23  ;;  %5415 = vrot.lane.b32.xlu1 %v5413_v54, %s8101_s23  ;;  %v5601_v55 = vunpack.c.l.b16 %v4488_v60  ;;  %v4431_v54 = vmul.f32 %v10271_v2, %v9197_v7  ;;  %v4460_v60 = vpack.c.bf16 %v4396_v17, %v4396_v17  ;;  %v5665_v23 = vunpack.c.l.b16 %v4496_v37 }
 0xcbc   : > { %v10634_v36 = vpop.eup %7915  ;;  %v5605_v35 = vpack.c.b16 %v5602_v8, %v5601_v55  ;;  %v4495_v40 = vpack.c.bf16 %v4431_v54, %v4431_v54  ;;  %v4423_v54 = vmul.f32 %v10233_v13, %v9197_v7  ;;  %v5377_v0 = vunpack.c.l.b16 %v4460_v60 }
 0xcbe   : > { %7477 = vmatmul.msk.f32.gmra.mxu0 %vm860_vm1, %v10634_v36  ;;  %v5636_v34 = vunpack.c.l.b16 %v4495_v40  ;;  %v4486_v40 = vpack.c.bf16 %v4422_v6, %v4422_v6  ;;  %v4418_v6 = vmul.f32 %v10211_v53, %v9191_v48 }
 0xcc1   : > { %5162 = vmax.xlane.f32.xlu0 %v5161_v3  ;;  %v4480_v3 = vpack.c.bf16 %v4416_v42, %v4416_v42  ;;  %v4410_v42 = vmul.f32 %v10182_v9, %v9191_v48 }
 0xcc2   : > { %5511 = vrot.lane.b32.xlu2 %v5509_v50, %s8101_s23  ;;  %5447 = vrot.lane.b32.xlu1 %v5445_v24, %s8101_s23  ;;  %v4481_v50 = vpack.c.bf16 %v4417_v52, %v4417_v52  ;;  %v5635_v24 = vunpack.c.l.b16 %v4494_v41  ;;  %v4411_v52 = vmul.f32 %v10182_v9, %v9197_v7  ;;  %v4437_v9 = vmul.f32 %v10307_v28, %v9228_v49 }
 0xcc3   : > { %v5537_v55 = vunpack.c.l.b16 %v4480_v3  ;;  %v5381_v3 = vpack.c.b16 %v5378_v15, %v5377_v0  ;;  %v4500_v15 = vpack.c.bf16 %v4436_v33, %v4436_v33 }
 0xcc4   : > { %v5538_v8 = vunpack.c.l.b16 %v4481_v50  ;;  %v5638_v17 = vpack.c.b16 %v5636_v34, %v5635_v24  ;;  %v4474_v50 = vpack.c.bf16 %v4410_v42, %v4410_v42  ;;  %v4475_v60 = vpack.c.bf16 %v4411_v52, %v4411_v52 }
 0xcc5   : > { %v5571_v24 = vunpack.c.l.b16 %v4486_v40  ;;  %v4501_v42 = vpack.c.bf16 %v4437_v9, %v4437_v9  ;;  %v5697_v40 = vunpack.c.l.b16 %v4500_v15 }
 0xcc6   : > { %v5541_v41 = vpack.c.b16 %v5538_v8, %v5537_v55  ;;  %v5475_v55 = vunpack.c.l.b16 %v4474_v50  ;;  %v5476_v8 = vunpack.c.l.b16 %v4475_v60  ;;  %v4438_v50 = vmul.f32 %v10307_v28, %v9191_v48 }
 0xcc7   : > { %v4439_v60 = vmul.f32 %v10307_v28, %v9197_v7 }
 0xcca   : > { %5607 = vrot.lane.b32.xlu2 %v5605_v35, %s8101_s23  ;;  %5513 = vrot.lane.b32.xlu1 %v5510_v57, %s8101_s23  ;;  %v4497_v35 = vpack.c.bf16 %v4433_v43, %v4433_v43  ;;  %v4487_v57 = vpack.c.bf16 %v4423_v54, %v4423_v54  ;;  %v4429_v43 = vmul.f32 %v10271_v2, %v9228_v49 }
 0xccb   : > { %v4419_v54 = vmul.f32 %v10211_v53, %v9197_v7  ;;  %v4482_v2 = vpack.c.bf16 %v4418_v6, %v4418_v6  ;;  %v4502_v6 = vpack.c.bf16 %v4438_v50, %v4438_v50 }
 0xccc   : > { %v5666_v45 = vunpack.c.l.b16 %v4497_v35  ;;  %v5572_v34 = vunpack.c.l.b16 %v4487_v57  ;;  %v4493_v37 = vpack.c.bf16 %v4429_v43, %v4429_v43  ;;  %v5478_v35 = vpack.c.b16 %v5476_v8, %v5475_v55 }
 0xccd   : > { %v5698_v57 = vunpack.c.l.b16 %v4501_v42 }
 0xcce   : > { %v5669_v0 = vpack.c.b16 %v5666_v45, %v5665_v23  ;;  %v5574_v52 = vpack.c.b16 %v5572_v34, %v5571_v24  ;;  %v4449_v45 = vmul.f32 %v10365_v21, %v9228_v49  ;;  %v5634_v53 = vunpack.c.l.b16 %v4493_v37 }
 0xccf   : > { %v5539_v23 = vunpack.c.l.b16 %v4482_v2  ;;  %v4426_v24 = vmul.f32 %v10253_v47, %v9191_v48  ;;  %v4427_v34 = vmul.f32 %v10253_v47, %v9197_v7  ;;  %v4455_v47 = vmul.f32 %v10380_v58, %v9197_v7 }
 0xcd0   : > { %v4513_v55 = vpack.c.bf16 %v4449_v45, %v4449_v45  ;;  %v5699_v37 = vunpack.c.l.b16 %v4502_v6  ;;  %v4440_v2 = vmul.f32 %v10325_v12, %v9245_v4  ;;  %v4421_v45 = vmul.f32 %v10233_v13, %v9228_v49 }
 0xcd1   : > { %v4490_v28 = vpack.c.bf16 %v4426_v24, %v4426_v24  ;;  %v4491_v15 = vpack.c.bf16 %v4427_v34, %v4427_v34  ;;  %v4519_v50 = vpack.c.bf16 %v4455_v47, %v4455_v47 }
 0xcd2   : > { %5641 = vrot.lane.b32.xlu2 %v5638_v17, %s8101_s23  ;;  %5543 = vrot.lane.b32.xlu1 %v5541_v41, %s8101_s23  ;;  %v4492_v17 = vpack.c.bf16 %v4428_v38, %v4428_v38  ;;  %v4483_v41 = vpack.c.bf16 %v4419_v54, %v4419_v54  ;;  %v5701_v38 = vpack.c.b16 %v5698_v57, %v5697_v40 }
 0xcd3   : > { %v4503_v54 = vpack.c.bf16 %v4439_v60, %v4439_v60  ;;  %v5603_v40 = vunpack.c.l.b16 %v4490_v28  ;;  %v5604_v57 = vunpack.c.l.b16 %v4491_v15  ;;  %v4447_v28 = vmul.f32 %v10352_v30, %v9197_v7 }
 0xcd4   : > { %v5633_v33 = vunpack.c.l.b16 %v4492_v17  ;;  %v5540_v9 = vunpack.c.l.b16 %v4483_v41  ;;  %v4454_v17 = vmul.f32 %v10380_v58, %v9191_v48  ;;  %v4441_v41 = vmul.f32 %v10325_v12, %v9228_v49 }
 0xcd5   : > { %5383 = vrot.lane.b32.xlu0 %v5381_v3, %s8101_s23  ;;  %v4448_v3 = vmul.f32 %v10365_v21, %v9245_v4  ;;  %v5606_v24 = vpack.c.b16 %v5604_v57, %v5603_v40  ;;  %v4434_v15 = vmul.f32 %v10289_v31, %v9191_v48  ;;  %v4511_v40 = vpack.c.bf16 %v4447_v28, %v4447_v28 }
 0xcd6   : > { %v5637_v8 = vpack.c.b16 %v5634_v53, %v5633_v33  ;;  %v4518_v53 = vpack.c.bf16 %v4454_v17, %v4454_v17  ;;  %v4435_v17 = vmul.f32 %v10289_v31, %v9197_v7  ;;  %v4452_v31 = vmul.f32 %v10380_v58, %v9245_v4 }
 0xcd7   : > { %v4512_v43 = vpack.c.bf16 %v4448_v3, %v4448_v3  ;;  %v4420_v3 = vmul.f32 %v10233_v13, %v9245_v4  ;;  %v4457_v13 = vmul.f32 %v10398_v16, %v9228_v49  ;;  %v4498_v57 = vpack.c.bf16 %v4434_v15, %v4434_v15 }
 0xcd9   : > { %v5793_v42 = vunpack.c.l.b16 %v4512_v43  ;;  %v4484_v34 = vpack.c.bf16 %v4420_v3, %v4420_v3  ;;  %v5827_v43 = vunpack.c.l.b16 %v4518_v53 }
 0xcda   : > { %5671 = vrot.lane.b32.xlu2 %v5669_v0, %s8101_s23  ;;  %5577 = vrot.lane.b32.xlu1 %v5574_v52, %s8101_s23  ;;  %v5542_v0 = vpack.c.b16 %v5540_v9, %v5539_v23  ;;  %v5794_v52 = vunpack.c.l.b16 %v4513_v55  ;;  %v4504_v23 = vpack.c.bf16 %v4440_v2, %v4440_v2  ;;  %v4505_v9 = vpack.c.bf16 %v4441_v41, %v4441_v41 }
 0xcdb   : > { %v5828_v55 = vunpack.c.l.b16 %v4519_v50 }
 0xcdc   : > { %v5797_v33 = vpack.c.b16 %v5794_v52, %v5793_v42  ;;  %v5729_v6 = vunpack.c.l.b16 %v4504_v23  ;;  %v5569_v42 = vunpack.c.l.b16 %v4484_v34  ;;  %v4453_v23 = vmul.f32 %v10380_v58, %v9228_v49 }
 0xcdd   : > { %5481 = vrot.lane.b32.xlu0 %v5478_v35, %s8101_s23  ;;  %v5700_v35 = vunpack.c.l.b16 %v4503_v54  ;;  %v5730_v54 = vunpack.c.l.b16 %v4505_v9  ;;  %v5830_v47 = vpack.c.b16 %v5828_v55, %v5827_v43  ;;  %v4442_v43 = vmul.f32 %v10325_v12, %v9191_v48 }
 0xcde   : > { %v4443_v55 = vmul.f32 %v10325_v12, %v9197_v7  ;;  %v4450_v12 = vmul.f32 %v10365_v21, %v9191_v48 }
 0xcdf   : > { %v5702_v60 = vpack.c.b16 %v5700_v35, %v5699_v37  ;;  %v4521_v35 = vpack.c.bf16 %v4457_v13, %v4457_v13  ;;  %v5733_v2 = vpack.c.b16 %v5730_v54, %v5729_v6  ;;  %v4516_v54 = vpack.c.bf16 %v4452_v31, %v4452_v31 }
 0xce0   : > { %v4506_v28 = vpack.c.bf16 %v4442_v43, %v4442_v43 }
 0xce1   : > { %v5858_v53 = vunpack.c.l.b16 %v4521_v35  ;;  %v5825_v15 = vunpack.c.l.b16 %v4516_v54 }
 0xce2   : > { %5703 = vrot.lane.b32.xlu2 %v5701_v38, %s8101_s23  ;;  %5639 = vrot.lane.b32.xlu1 %v5637_v8, %s8101_s23  ;;  %v4485_v38 = vpack.c.bf16 %v4421_v45, %v4421_v45  ;;  %v4456_v8 = vmul.f32 %v10398_v16, %v9245_v4  ;;  %v4499_v45 = vpack.c.bf16 %v4435_v17, %v4435_v17 }
 0xce4   : > { %v5570_v52 = vunpack.c.l.b16 %v4485_v38  ;;  %v4520_v37 = vpack.c.bf16 %v4456_v8, %v4456_v8  ;;  %v5668_v38 = vunpack.c.l.b16 %v4499_v45 }
 0xce5   : > { %5545 = vrot.lane.b32.xlu0 %v5542_v0, %s8101_s23  ;;  %v4446_v0 = vmul.f32 %v10352_v30, %v9191_v48 }
 0xce6   : > { %v5573_v3 = vpack.c.b16 %v5570_v52, %v5569_v42  ;;  %v5731_v52 = vunpack.c.l.b16 %v4506_v28 }
 0xce7   : > { %v4510_v41 = vpack.c.bf16 %v4446_v0, %v4446_v0  ;;  %v4517_v0 = vpack.c.bf16 %v4453_v23, %v4453_v23 }
 0xce9   : > { %v5763_v50 = vunpack.c.l.b16 %v4510_v41  ;;  %v5826_v42 = vunpack.c.l.b16 %v4517_v0 }
 0xcea   : > { %5799 = vrot.lane.b32.xlu2 %v5797_v33, %s8101_s23  ;;  %5705 = vrot.lane.b32.xlu1 %v5702_v60, %s8101_s23  ;;  %v5857_v33 = vunpack.c.l.b16 %v4520_v37  ;;  %v5764_v60 = vunpack.c.l.b16 %v4511_v40  ;;  %v10758_v37 = vpop.f32.mrf.mxu0  ;;  %v4514_v40 = vpack.c.bf16 %v4450_v12, %v4450_v12 }
 0xcec   : > { %v5861_v8 = vpack.c.b16 %v5858_v53, %v5857_v33  ;;  %v5766_v6 = vpack.c.b16 %v5764_v60, %v5763_v50  ;;  %v5795_v33 = vunpack.c.l.b16 %v4514_v40  ;;  %v4444_v53 = vmul.f32 %v10352_v30, %v9245_v4 }
 0xced   : > { %5609 = vrot.lane.b32.xlu0 %v5606_v24, %s8101_s23  ;;  %v5667_v24 = vunpack.c.l.b16 %v4498_v57  ;;  %v4445_v50 = vmul.f32 %v10352_v30, %v9228_v49  ;;  %v4458_v4 = vmul.f32 %v10398_v16, %v9191_v48  ;;  %v4459_v49 = vmul.f32 %v10398_v16, %v9197_v7 }
 0xcef   : > { %v5670_v58 = vpack.c.b16 %v5668_v38, %v5667_v24  ;;  %v4508_v24 = vpack.c.bf16 %v4444_v53, %v4444_v53 }
 0xcf2   : > { %5833 = vrot.lane.b32.xlu2 %v5830_v47, %s8101_s23  ;;  %5735 = vrot.lane.b32.xlu1 %v5733_v2, %s8101_s23  ;;  %v4451_v47 = vmul.f32 %v10365_v21, %v9197_v7  ;;  %v5829_v2 = vpack.c.b16 %v5826_v42, %v5825_v15  ;;  %v5280_v23 = vpop.f32.mrf.mxu0 }
 0xcf4   : > { %v4515_v57 = vpack.c.bf16 %v4451_v47, %v4451_v47 }
 0xcf5   : > { %5575 = vrot.lane.b32.xlu0 %v5573_v3, %s8101_s23 }
 0xcf6   : > { %v5154_v9 = vpop.xlane.xlu0 %5153  ;;  %v5796_v21 = vunpack.c.l.b16 %v4515_v57 }
 0xcf7   : > { %v5176_v34 = vsub.f32 %v10561_v26, %v5154_v9  ;;  %v4507_v26 = vpack.c.bf16 %v4443_v55, %v4443_v55 }
 0xcf8   : > { %v5798_v9 = vpack.c.b16 %v5796_v21, %v5795_v33 }
 0xcf9   : > { %v5204_v13 = vmul.f32 1.442695, %v5176_v34  ;;  %v5732_v17 = vunpack.c.l.b16 %v4507_v26  ;;  %v4509_v34 = vpack.c.bf16 %v4445_v50, %v4445_v50 }
 0xcfa   : > { %5863 = vrot.lane.b32.xlu2 %v5861_v8, %s8101_s23  ;;  %5769 = vrot.lane.b32.xlu1 %v5766_v6, %s8101_s23  ;;  %v4522_v8 = vpack.c.bf16 %v4458_v4, %v4458_v4  ;;  %v5283_v6 = vpop.f32.mrf.mxu0 }
 0xcfb   : > { %7917 = vpow2.f32 %v5204_v13  ;;  %v5734_v41 = vpack.c.b16 %v5732_v17, %v5731_v52  ;;  %v5762_v43 = vunpack.c.l.b16 %v4509_v34  ;;  %v4523_v13 = vpack.c.bf16 %v4459_v49, %v4459_v49 }
 0xcfc   : > { %v5859_v48 = vunpack.c.l.b16 %v4522_v8 }
 0xcfd   : > { %5673 = vrot.lane.b32.xlu0 %v5670_v58, %s8101_s23  ;;  %v5860_v28 = vunpack.c.l.b16 %v4523_v13 }
 0xcff   : > { %v5862_v7 = vpack.c.b16 %v5860_v28, %v5859_v48 }
 0xd01   : > { %v10760_v35 = vpop.eup %7917 }
 0xd02   : > { %7478 = vmatmul.msk.f32.gmra.mxu0 %vm860_vm1, %v10760_v35  ;;  %5831 = vrot.lane.b32.xlu1 %v5829_v2, %s8101_s23  ;;  %v5286_v16 = vpop.f32.mrf.mxu0 }
 0xd05   : > { %5737 = vrot.lane.b32.xlu0 %v5734_v41, %s8101_s23  ;;  %v5157_v3 = vpop.xlane.xlu2 %5156 }
 0xd06   : > { %v5177_v45 = vsub.f32 %v10571_v10, %v5157_v3  ;;  %v5761_v10 = vunpack.c.l.b16 %v4508_v24 }
 0xd08   : > { %v5206_v60 = vmul.f32 1.442695, %v5177_v45  ;;  %v5765_v55 = vpack.c.b16 %v5762_v43, %v5761_v10 }
 0xd09   : > { %v5386_v31 = vpop.permute.xlu0 %5385 }
 0xd0a   : > { %7919 = vpow2.f32 %v5206_v60  ;;  %5398 = vmatpush.bf16.msrb.mxu1 %v5386_v31  ;;  %v5289_v52 = vpop.f32.mrf.mxu0 }
 0xd0d   : > { %5801 = vrot.lane.b32.xlu0 %v5798_v9, %s8101_s23  ;;  %v5418_v38 = vpop.permute.xlu2 %5417 }
 0xd0e   : > { %5430 = vmatpush.bf16.msrb.mxu3 %v5418_v38 }
 0xd10   : > { %v10776_v30 = vpop.eup %7919 }
 0xd11   : > { %7479 = vmatmul.msk.f32.gmra.mxu0 %vm860_vm1, %v10776_v30 }
 0xd12   : > { %v5292_v41 = vpop.f32.mrf.mxu0 }
 0xd14   : > { %v5160_v54 = vpop.xlane.xlu1 %5159 }
 0xd15   : > { %5767 = vrot.lane.b32.xlu0 %v5765_v55, %s8101_s23  ;;  %v5450_v0 = vpop.permute.xlu2 %5449  ;;  %v5178_v58 = vsub.f32 %v10592_v62, %v5160_v54 }
 0xd16   : > { %5462 = vmatpush.bf16.msrb.mxu2 %v5450_v0 }
 0xd17   : > { %v5208_v26 = vmul.f32 1.442695, %v5178_v58 }
 0xd19   : > { %7921 = vpow2.f32 %v5208_v26 }
 0xd1a   : > { %7923 = vrcp.f32 %v5280_v23 }
 0xd1b   : > { %7925 = vrcp.f32 %v5283_v6 }
 0xd1c   : > { %7927 = vrcp.f32 %v5289_v52 }
 0xd1d   : > { %5865 = vrot.lane.b32.xlu0 %v5862_v7, %s8101_s23  ;;  %v5480_v45 = vpop.permute.xlu2 %5479  ;;  %s7104_s23 = scalar_lea.sflag [#allocation3], %s515_s17 }
 0xd1f   : > { %v10783_v15 = vpop.eup %7921 }
 0xd20   : > { %7480 = vmatmul.msk.f32.gmra.mxu0 %vm860_vm1, %v10783_v15  ;;  %v7924_v42 = vpop.eup %7923 }
 0xd21   : > { %v5342_v62 = vmul.f32 %v7924_v42, %v10537_v18  ;;  %v7926_v47 = vpop.eup %7925  ;;  %v5295_v18 = vpop.f32.mrf.mxu0 }
 0xd22   : > { %v5343_v2 = vmul.f32 %v7926_v47, %v10542_v46  ;;  %v7928_v53 = vpop.eup %7927 }
 0xd23   : > { %v5358_v12 = vpack.c.bf16 %v5342_v62, %v5342_v62  ;;  %v5345_v60 = vmul.f32 %v7928_v53, %v10552_v11 }
 0xd24   : > { %v5359_v33 = vpack.c.bf16 %v5343_v2, %v5343_v2 }
 0xd25   : > { %v5512_v31 = vpop.permute.xlu2 %5511  ;;  %v5361_v23 = vpack.c.bf16 %v5345_v60, %v5345_v60 }
 0xd29   : > { %v5298_v24 = vpop.f32.mrf.mxu0 }
 0xd2c   : > { %v5416_v17 = vpop.permute.xlu1 %5415 }
 0xd2d   : > { %5431 = vmatpush.bf16.msrb.mxu3 %v5416_v17  ;;  %v5608_v10 = vpop.permute.xlu2 %5607 }
 0xd30   : > { %7483 = vmatmul.msk.bf16.vlgmr.msrb.gmra.mxu3 %vm860_vm1, %v5358_v12 }
 0xd31   : > { %v5301_v43 = vpop.f32.mrf.mxu0 }
 0xd34   : > { %v5163_v40 = vpop.xlane.xlu0 %5162  ;;  %v5448_v57 = vpop.permute.xlu1 %5447 }
 0xd35   : > { %v5179_v3 = vsub.f32 %v10637_v61, %v5163_v40  ;;  %5463 = vmatpush.bf16.msrb.mxu2 %v5448_v57  ;;  %v5642_v55 = vpop.permute.xlu2 %5641 }
 0xd37   : > { %v5210_v21 = vmul.f32 1.442695, %v5179_v3 }
 0xd38   : > { %7484 = vmatmul.msk.bf16.vlgmr.msrb.gmra.mxu2 %vm860_vm1, %v5359_v33 }
 0xd39   : > { %7929 = vpow2.f32 %v5210_v21  ;;  %v5304_v58 = vpop.f32.mrf.mxu0 }
 0xd3a   : > { %7931 = vrcp.f32 %v10758_v37 }
 0xd3b   : > { %7933 = vrcp.f32 %v5286_v16 }
 0xd3c   : > { %v5514_v50 = vpop.permute.xlu1 %5513  ;;  %7935 = vrcp.f32 %v5292_v41 }
 0xd3d   : > { %5526 = vmatpush.bf16.msra.mxu3 %v5514_v50  ;;  %7937 = vrcp.f32 %v5298_v24  ;;  %v5672_v26 = vpop.permute.xlu2 %5671 }
 0xd3e   : > { %7939 = vrcp.f32 %v5295_v18 }
 0xd3f   : > { %v10793_v46 = vpop.eup %7929  ;;  %7941 = vrcp.f32 %v5301_v43 }
 0xd40   : > { %7481 = vmatmul.msk.f32.gmra.mxu0 %vm860_vm1, %v10793_v46  ;;  %v7932_v61 = vpop.eup %7931 }
 0xd41   : > { %5527 = vmatpush.bf16.msra.mxu3 %v5512_v31  ;;  %v5341_v9 = vmul.f32 %v7932_v61, %v10532_v14  ;;  %v7934_v49 = vpop.eup %7933 }
 0xd42   : > { %v5344_v14 = vmul.f32 %v7934_v49, %v10547_v25  ;;  %v7936_v8 = vpop.eup %7935 }
 0xd43   : > { %v5357_v38 = vpack.c.bf16 %v5341_v9, %v5341_v9  ;;  %v5346_v0 = vmul.f32 %v7936_v8, %v10556_v29  ;;  %v7938_v28 = vpop.eup %7937  ;;  %v5307_v29 = vpop.f32.mrf.mxu0 }
 0xd44   : > { %v5544_v34 = vpop.permute.xlu1 %5543  ;;  %7486 = vmatmul.msk.bf16.vlgmr.msra.gmra.mxu3 %vm860_vm1, %v5361_v23  ;;  %v5360_v54 = vpack.c.bf16 %v5344_v14, %v5344_v14  ;;  %v5348_v16 = vmul.f32 %v7938_v28, %v10586_v19  ;;  %v7940_v42 = vpop.eup %7939  ;;  %7943 = vrcp.f32 %v5307_v29 }
 0xd45   : > { %v5362_v48 = vpack.c.bf16 %v5346_v0, %v5346_v0  ;;  %v5347_v52 = vmul.f32 %v7940_v42, %v10576_v1  ;;  %v7942_v17 = vpop.eup %7941  ;;  %v5704_v47 = vpop.permute.xlu2 %5703  ;;  %7945 = vrcp.f32 %v5304_v58 }
 0xd46   : > { %v5364_v62 = vpack.c.bf16 %v5348_v16, %v5348_v16  ;;  %v5349_v41 = vmul.f32 %v7942_v17, %v10600_v44 }
 0xd47   : > { %v5384_v37 = vpop.permute.xlu0 %5383  ;;  %v5363_v2 = vpack.c.bf16 %v5347_v52, %v5347_v52 }
 0xd48   : > { %5399 = vmatpush.bf16.msrb.mxu1 %v5384_v37  ;;  %v5365_v40 = vpack.c.bf16 %v5349_v41, %v5349_v41 }
 0xd4a   : > { %v7944_v1 = vpop.eup %7943 }
 0xd4b   : > { %7482 = vmatmul.msk.bf16.vlgmr.msrb.gmra.mxu1 %vm860_vm1, %v5357_v38  ;;  %v5310_v57 = vpop.f32.mrf.mxu0  ;;  %v7946_v33 = vpop.eup %7945 }
 0xd4c   : > { %v5578_v11 = vpop.permute.xlu1 %5577  ;;  %7947 = vrcp.f32 %v5310_v57  ;;  %v5350_v44 = vmul.f32 %v7946_v33, %v10610_v59 }
 0xd4d   : > { %v5800_v21 = vpop.permute.xlu2 %5799 }
 0xd4e   : > { %v5366_v31 = vpack.c.bf16 %v5350_v44, %v5350_v44 }
 0xd4f   : > { %v5482_v4 = vpop.permute.xlu0 %5481 }
 0xd50   : > { %5494 = vmatpush.bf16.msra.mxu1 %v5482_v4 }
 0xd52   : > { %v7948_v50 = vpop.eup %7947 }
 0xd53   : > { %v5352_v61 = vmul.f32 %v7948_v50, %v10634_v36 }
 0xd54   : > { %5495 = vmatpush.bf16.msra.mxu1 %v5480_v45  ;;  %v5640_v13 = vpop.permute.xlu1 %5639  ;;  %v5351_v45 = vmul.f32 %v7944_v1, %v10628_v56 }
 0xd55   : > { %v5834_v23 = vpop.permute.xlu2 %5833  ;;  %v5368_v56 = vpack.c.bf16 %v5352_v61, %v5352_v61 }
 0xd56   : > { %v5367_v53 = vpack.c.bf16 %v5351_v45, %v5351_v45 }
 0xd57   : > { %v5546_v6 = vpop.permute.xlu0 %5545 }
 0xd58   : > { %5590 = vmatpush.bf16.msrb.mxu1 %v5578_v11  ;;  %5558 = vmatpush.bf16.msra.mxu2 %v5546_v6 }
 0xd5b   : > { %7485 = vmatmul.msk.bf16.vlgmr.msra.gmra.mxu1 %vm860_vm1, %v5360_v54  ;;  %v7628_v54 = vld [vmem:[%s11425_s8 + $0x10] sm:$0xff] }
 0xd5c   : > { %5559 = vmatpush.bf16.msra.mxu2 %v5544_v34  ;;  %v5706_v7 = vpop.permute.xlu1 %5705 }
 0xd5d   : > { %v5864_v43 = vpop.permute.xlu2 %5863 }
 0xd5f   : > { %7487 = vmatmul.msk.bf16.vlgmr.msra.gmra.mxu2 %vm860_vm1, %v5362_v48  ;;  %v5610_v25 = vpop.permute.xlu0 %5609 }
 0xd60   : > { %5654 = vmatpush.bf16.msrb.mxu2 %v5642_v55  ;;  %5622 = vmatpush.bf16.msrb.mxu3 %v5610_v25 }
 0xd64   : > { %5655 = vmatpush.bf16.msrb.mxu2 %v5640_v13  ;;  %5623 = vmatpush.bf16.msrb.mxu3 %v5608_v10  ;;  %v5736_v19 = vpop.permute.xlu1 %5735  ;;  %v7629_v13 = vld [vmem:[%s11425_s8 + $0x18] sm:$0xff] }
 0xd67   : > { %7489 = vmatmul.msk.bf16.vlgmr.msrb.gmra.mxu3 %vm860_vm1, %v5364_v62  ;;  %v5576_v12 = vpop.permute.xlu0 %5575 }
 0xd68   : > { %5718 = vmatpush.bf16.msra.mxu3 %v5706_v7  ;;  %5591 = vmatpush.bf16.msrb.mxu1 %v5576_v12 }
 0xd6b   : > { %7488 = vmatmul.msk.bf16.vlgmr.msrb.gmra.mxu1 %vm860_vm1, %v5363_v2 }
 0xd6c   : > { %5719 = vmatpush.bf16.msra.mxu3 %v5704_v47  ;;  %v5770_v18 = vpop.permute.xlu1 %5769 }
 0xd6f   : > { %7490 = vmatmul.msk.bf16.vlgmr.msrb.gmra.mxu2 %vm860_vm1, %v5365_v40  ;;  %v5674_v3 = vpop.permute.xlu0 %5673 }
 0xd70   : > { %5686 = vmatpush.bf16.msra.mxu1 %v5674_v3 }
 0xd74   : > { %5687 = vmatpush.bf16.msra.mxu1 %v5672_v26  ;;  %v5832_v24 = vpop.permute.xlu1 %5831 }
 0xd77   : > { %7492 = vmatmul.msk.bf16.vlgmr.msra.gmra.mxu3 %vm860_vm1, %v5367_v53  ;;  %v5738_v60 = vpop.permute.xlu0 %5737 }
 0xd78   : > { %5782 = vmatpush.bf16.msrb.mxu1 %v5770_v18  ;;  %5750 = vmatpush.bf16.msra.mxu2 %v5738_v60 }
 0xd7b   : > { %7491 = vmatmul.msk.bf16.vlgmr.msra.gmra.mxu1 %vm860_vm1, %v5366_v31 }
 0xd7c   : > { %5751 = vmatpush.bf16.msra.mxu2 %v5736_v19 }
 0xd7f   : > { %v5313_v9 = vpop.f32.mrf.mxu0  ;;  %7493 = vmatmul.msk.bf16.vlgmr.msra.gmra.mxu2 %vm860_vm1, %v5368_v56  ;;  %v5802_v59 = vpop.permute.xlu0 %5801 }
 0xd80   : > { %5846 = vmatpush.bf16.msrb.mxu2 %v5834_v23  ;;  %7949 = vrcp.f32 %v5313_v9  ;;  %5814 = vmatpush.bf16.msrb.mxu3 %v5802_v59 }
 0xd84   : > { %5847 = vmatpush.bf16.msrb.mxu2 %v5832_v24  ;;  %5815 = vmatpush.bf16.msrb.mxu3 %v5800_v21 }
 0xd86   : > { %v7950_v34 = vpop.eup %7949 }
 0xd87   : > { %v5353_v37 = vmul.f32 %v7950_v34, %v10760_v35  ;;  %v5768_v38 = vpop.permute.xlu0 %5767 }
 0xd88   : > { %5783 = vmatpush.bf16.msrb.mxu1 %v5768_v38  ;;  %5945 = vmatpush.bf16.msra.mxu3 %v7629_v13 }
 0xd89   : > { %v5369_v36 = vpack.c.bf16 %v5353_v37, %v5353_v37 }
 0xd8b   : > { %7494 = vmatmul.msk.bf16.vlgmr.msrb.gmra.mxu1 %vm860_vm1, %v5369_v36  ;;  %v10842_v36 = vld [vmem:[%s11426_s9 + $0x1] ss:$0 sm:$0xff] }
 0xd8c   : > { %5946 = vmatpush.bf16.msra.mxu3 %v7628_v54 }
 0xd8e   : > { %v5316_v10 = vpop.f32.mrf.mxu0 }
 0xd8f   : > { %7951 = vrcp.f32 %v5316_v10  ;;  %v5866_v11 = vpop.permute.xlu0 %5865 }
 0xd90   : > { %5878 = vmatpush.bf16.msra.mxu1 %v5866_v11 }
 0xd94   : > { %5879 = vmatpush.bf16.msra.mxu1 %v5864_v43 }
 0xd95   : > { %v7952_v4 = vpop.eup %7951 }
 0xd96   : > { %v5354_v49 = vmul.f32 %v7952_v4, %v10776_v30 }
 0xd98   : > { %v5370_v55 = vpack.c.bf16 %v5354_v49, %v5354_v49 }
 0xd9a   : > { %7495 = vmatmul.msk.bf16.vlgmr.msrb.gmra.mxu3 %vm860_vm1, %v5370_v55 }
 0xd9d   : > { %v5319_v14 = vpop.f32.mrf.mxu0 }
 0xd9e   : > { %7953 = vrcp.f32 %v5319_v14 }
 0xda4   : > { %v7954_v35 = vpop.eup %7953 }
 0xda5   : > { %v5355_v8 = vmul.f32 %v7954_v35, %v10783_v15 }
 0xda7   : > { %v5371_v6 = vpack.c.bf16 %v5355_v8, %v5355_v8 }
 0xda9   : > { %7496 = vmatmul.msk.bf16.vlgmr.msrb.gmra.mxu2 %vm860_vm1, %v5371_v6 }
 0xdb3   : > { %v5433_v30 = vpop.f32.mrf.mxu3 }
 0xdbb   : > { %v5435_v0 = vpop.f32.mrf.mxu3  ;;  %v5465_v58 = vpop.f32.mrf.mxu2 }
 0xdbd   : > { %v5322_v48 = vpop.f32.mrf.mxu0 }
 0xdbe   : > { %7955 = vrcp.f32 %v5322_v48 }
 0xdc3   : > { %v5467_v15 = vpop.f32.mrf.mxu2 }
 0xdc4   : > { %v7956_v28 = vpop.eup %7955 }
 0xdc5   : > { %v5356_v26 = vmul.f32 %v7956_v28, %v10793_v46 }
 0xdc7   : > { %v5372_v25 = vpack.c.bf16 %v5356_v26, %v5356_v26  ;;  %v5529_v7 = vpop.f32.mrf.mxu3 }
 0xdc8   : > { %v5401_v16 = vpop.f32.mrf.mxu1 }
 0xdc9   : > { %v5885_v42 = vpack.c.bf16 %v5433_v30, %v5401_v16  ;;  %7497 = vmatmul.msk.bf16.vlgmr.msra.gmra.mxu1 %vm860_vm1, %v5372_v25 }
 0xdcb   : > { %7511 = vmatmul.msk.bf16.vlgmr.msra.gmra.mxu3 %vm860_vm1, %v5885_v42 }
 0xdcf   : > { %v5531_v29 = vpop.f32.mrf.mxu3 }
 0xdd0   : > { %v5403_v52 = vpop.f32.mrf.mxu1 }
 0xdd8   : > { %v5497_v62 = vpop.f32.mrf.mxu1 }
 0xdd9   : > { %v5886_v17 = vpack.c.bf16 %v5497_v62, %v5465_v58 }
 0xddb   : > { %7512 = vmatmul.msk.bf16.gmra.mxu3 %vm860_vm1, %v5886_v17 }
 0xde0   : > { %v5499_v12 = vpop.f32.mrf.mxu1 }
 0xde2   : > { %v5561_v47 = vpop.f32.mrf.mxu2 }
 0xde3   : > { %v5887_v41 = vpack.c.bf16 %v5561_v47, %v5529_v7 }
 0xde8   : > { %v5593_v2 = vpop.f32.mrf.mxu1 }
 0xdea   : > { %v5563_v19 = vpop.f32.mrf.mxu2  ;;  %v5625_v46 = vpop.f32.mrf.mxu3 }
 0xdeb   : > { %7513 = vmatmul.msk.bf16.gmra.mxu3 %vm860_vm1, %v5887_v41  ;;  %v5888_v45 = vpack.c.bf16 %v5625_v46, %v5593_v2  ;;  %v11544_v46 = vld [vmem:[#allocation11_spill] sm:$0xff] }
 0xdf0   : > { %v5595_v40 = vpop.f32.mrf.mxu1 }
 0xdf2   : > { %v5627_v57 = vpop.f32.mrf.mxu3  ;;  %v5657_v1 = vpop.f32.mrf.mxu2 }
 0xdf8   : > { %v5689_v3 = vpop.f32.mrf.mxu1 }
 0xdf9   : > { %v5889_v60 = vpack.c.bf16 %v5689_v3, %v5657_v1 }
 0xdfa   : > { %v5659_v33 = vpop.f32.mrf.mxu2  ;;  %v5721_v21 = vpop.f32.mrf.mxu3 }
 0xdfb   : > { %7514 = vmatmul.msk.bf16.gmra.mxu3 %vm860_vm1, %v5888_v45 }
 0xe00   : > { %v5691_v18 = vpop.f32.mrf.mxu1 }
 0xe02   : > { %v5723_v44 = vpop.f32.mrf.mxu3  ;;  %v5753_v53 = vpop.f32.mrf.mxu2 }
 0xe03   : > { %v5890_v23 = vpack.c.bf16 %v5753_v53, %v5721_v21  ;;  %v11545_v53 = vld [vmem:[#allocation12_spill] sm:$0xff] }
 0xe08   : > { %v5785_v50 = vpop.f32.mrf.mxu1 }
 0xe0a   : > { %v5755_v31 = vpop.f32.mrf.mxu2 }
 0xe0b   : > { %7515 = vmatmul.msk.bf16.gmra.mxu3 %vm860_vm1, %v5889_v60 }
 0xe10   : > { %v5787_v61 = vpop.f32.mrf.mxu1 }
 0xe1b   : > { %7516 = vmatmul.msk.bf16.gmra.mxu3 %vm860_vm1, %v5890_v23 }
 0xe1d   : > { %v5817_v56 = vpop.f32.mrf.mxu3 }
 0xe1e   : > { %v5891_v59 = vpack.c.bf16 %v5817_v56, %v5785_v50 }
 0xe25   : > { %v5819_v9 = vpop.f32.mrf.mxu3 }
 0xe2b   : > { %7517 = vmatmul.msk.bf16.gmra.mxu3 %vm860_vm1, %v5891_v59 }
 0xe2c   : > { %v5849_v24 = vpop.f32.mrf.mxu2 }
 0xe34   : > { %v5851_v34 = vpop.f32.mrf.mxu2 }
 0xe35   : > { %v11546_v34 = vld [vmem:[#allocation14_spill] sm:$0xff] }
 0xe46   : > { %v5881_v37 = vpop.f32.mrf.mxu1 }
 0xe47   : > { %v5892_v38 = vpack.c.bf16 %v5881_v37, %v5849_v24 }
 0xe49   : > { %7518 = vmatmul.msk.bf16.gmra.mxu3 %vm860_vm1, %v5892_v38 }
 0xe4e   : > { %v5883_v10 = vpop.f32.mrf.mxu1  ;;  %v5948_v11 = vpop.f32.mrf.mxu3 }
 0xe4f   : > { %v5949_v43 = vadd.f32 %v10842_v36, %v5948_v11 }
 0xe51   : > { %v10846_v4 = vadd.f32 %v5949_v43, %v9833_v32 }
 0xe53   : > { %v6004_v49 = vsel %vm860_vm1, %v10846_v4, 0.0 }
 0xe54   : > { %6005 = vadd.xlane.f32.xlu1 %v6004_v49 }
 0xe56   : > { %v5950_v55 = vpop.f32.mrf.mxu3 }
 0xe57   : > { %v5951_v14 = vadd.f32 %v10842_v36, %v5950_v55 }
 0xe59   : > { %v10852_v35 = vadd.f32 %v5951_v14, %v9840_v5 }
 0xe5b   : > { %v6007_v8 = vsel %vm860_vm1, %v10852_v35, 0.0 }
 0xe5c   : > { %6008 = vadd.xlane.f32.xlu0 %v6007_v8 }
 0xe5e   : > { %v5953_v13 = vpop.f32.mrf.mxu3 }
 0xe5f   : > { %v5954_v6 = vadd.f32 %v10842_v36, %v5953_v13  ;;  %v11547_v13 = vld [vmem:[#allocation16_spill] sm:$0xff] }
 0xe61   : > { %v10858_v32 = vadd.f32 %v5954_v6, %v9848_v20 }
 0xe63   : > { %v6010_v54 = vsel %vm860_vm1, %v10858_v32, 0.0 }
 0xe64   : > { %6011 = vadd.xlane.f32.xlu2 %v6010_v54 }
 0xe66   : > { %v5955_v30 = vpop.f32.mrf.mxu3 }
 0xe67   : > { %v5956_v0 = vadd.f32 %v10842_v36, %v5955_v30 }
 0xe69   : > { %v10864_v5 = vadd.f32 %v5956_v0, %v9855_v39 }
 0xe6b   : > { %v6013_v58 = vsel %vm860_vm1, %v10864_v5, 0.0 }
 0xe6c   : > { %6014 = vadd.xlane.f32.xlu1 %v6013_v58 }
 0xe6e   : > { %v5958_v48 = vpop.f32.mrf.mxu3 }
 0xe6f   : > { %v5959_v28 = vadd.f32 %v10842_v36, %v5958_v48 }
 0xe71   : > { %v10870_v20 = vadd.f32 %v5959_v28, %v9862_v22 }
 0xe73   : > { %v6016_v15 = vsel %vm860_vm1, %v10870_v20, 0.0 }
 0xe74   : > { %6017 = vadd.xlane.f32.xlu0 %v6016_v15 }
 0xe76   : > { %v5960_v26 = vpop.f32.mrf.mxu3 }
 0xe77   : > { %v5961_v25 = vadd.f32 %v10842_v36, %v5960_v26 }
 0xe79   : > { %v10876_v39 = vadd.f32 %v5961_v25, %v9868_v63  ;;  %v11548_v25 = vld [vmem:[#allocation15_spill] sm:$0xff] }
 0xe7b   : > { %v6019_v7 = vsel %vm860_vm1, %v10876_v39, 0.0 }
 0xe7c   : > { %6020 = vadd.xlane.f32.xlu2 %v6019_v7 }
 0xe7e   : > { %v5963_v16 = vpop.f32.mrf.mxu3 }
 0xe7f   : > { %v5964_v42 = vadd.f32 %v10842_v36, %v5963_v16 }
 0xe81   : > { %v10882_v22 = vadd.f32 %v5964_v42, %v9881_v51 }
 0xe83   : > { %v6022_v29 = vsel %vm860_vm1, %v10882_v22, 0.0 }
 0xe84   : > { %6023 = vadd.xlane.f32.xlu2 %v6022_v29 }
 0xe86   : > { %v5965_v52 = vpop.f32.mrf.mxu3 }
 0xe87   : > { %v5966_v2 = vadd.f32 %v10842_v36, %v5965_v52 }
 0xe89   : > { %v10896_v40 = vadd.f32 %v5966_v2, %v11544_v46 }
 0xe8b   : > { %v6025_v33 = vsel %vm860_vm1, %v10896_v40, 0.0 }
 0xe8e   : > { %v5968_v63 = vpop.f32.mrf.mxu3 }
 0xe8f   : > { %v5969_v45 = vadd.f32 %v10842_v36, %v5968_v63 }
 0xe91   : > { %v10909_v50 = vadd.f32 %v5969_v45, %v11545_v53  ;;  %v11550_v45 = vld [vmem:[#allocation17_spill] sm:$0xff]  ;;  %v11551_v53 = vld [vmem:[#allocation19_spill] sm:$0xff] }
 0xe93   : > { %v6028_v56 = vsel %vm860_vm1, %v10909_v50, 0.0 }
 0xe96   : > { %v5970_v1 = vpop.f32.mrf.mxu3 }
 0xe97   : > { %v5971_v23 = vadd.f32 %v10842_v36, %v5970_v1 }
 0xe99   : > { %v10922_v37 = vadd.f32 %v5971_v23, %v11546_v34 }
 0xe9b   : > { %v6031_v49 = vsel %vm860_vm1, %v10922_v37, 0.0 }
 0xe9e   : > { %v5973_v61 = vpop.f32.mrf.mxu3 }
 0xe9f   : > { %v5974_v11 = vadd.f32 %v10842_v36, %v5973_v61 }
 0xea1   : > { %v10935_v6 = vadd.f32 %v5974_v11, %v11547_v13  ;;  %v7631_v13 = vld [vmem:[%s11427_s10 + $0x18] sm:$0xff] }
 0xea2   : > { %6416 = vmatpush.bf16.msra.mxu2 %v7631_v13 }
 0xea3   : > { %v6034_v58 = vsel %vm860_vm1, %v10935_v6, 0.0 }
 0xea6   : > { %v5975_v55 = vpop.f32.mrf.mxu3 }
 0xea7   : > { %v5976_v0 = vadd.f32 %v10842_v36, %v5975_v55 }
 0xea9   : > { %v10948_v7 = vadd.f32 %v5976_v0, %v11548_v25 }
 0xeae   : > { %v5978_v26 = vpop.f32.mrf.mxu3 }
 0xeaf   : > { %v5979_v29 = vadd.f32 %v10842_v36, %v5978_v26 }
 0xec7   : > { %v6006_v62 = vpop.xlane.xlu1 %6005 }
 0xec8   : > { %v6052_v17 = vmul.f32 %v6006_v62, %v11511_v27  ;;  %v6037_v62 = vsel %vm860_vm1, %v10948_v7, 0.0 }
 0xeca   : > { %v10888_v12 = vsub.f32 %v10846_v4, %v6052_v17 }
 0xecc   : > { %v6084_v47 = vmul.f32 %v10888_v12, %v10888_v12 }
 0xece   : > { %v6100_v51 = vsel %vm860_vm1, %v6084_v47, 0.0  ;;  %v11549_v47 = vld [vmem:[#allocation13_spill] sm:$0xff] }
 0xecf   : > { %6101 = vadd.xlane.f32.xlu1 %v6100_v51  ;;  %v6009_v41 = vpop.xlane.xlu0 %6008  ;;  %v10961_v2 = vadd.f32 %v5979_v29, %v11549_v47 }
 0xed0   : > { %v6053_v19 = vmul.f32 %v6009_v41, %v11511_v27  ;;  %v5980_v41 = vpop.f32.mrf.mxu3 }
 0xed1   : > { %v5981_v46 = vadd.f32 %v10842_v36, %v5980_v41 }
 0xed2   : > { %v10899_v57 = vsub.f32 %v10852_v35, %v6053_v19 }
 0xed4   : > { %v6085_v3 = vmul.f32 %v10899_v57, %v10899_v57 }
 0xed6   : > { %v6103_v21 = vsel %vm860_vm1, %v6085_v3, 0.0  ;;  %v6040_v3 = vsel %vm860_vm1, %v10961_v2, 0.0 }
 0xed7   : > { %v6012_v18 = vpop.xlane.xlu2 %6011  ;;  %6026 = vadd.xlane.f32.xlu1 %v6025_v33  ;;  %6104 = vadd.xlane.f32.xlu0 %v6103_v21  ;;  %v10973_v33 = vadd.f32 %v5981_v46, %v11550_v45 }
 0xed8   : > { %v6054_v44 = vmul.f32 %v6012_v18, %v11511_v27  ;;  %v5983_v21 = vpop.f32.mrf.mxu3 }
 0xed9   : > { %v5984_v18 = vadd.f32 %v10842_v36, %v5983_v21 }
 0xeda   : > { %v10912_v60 = vsub.f32 %v10858_v32, %v6054_v44  ;;  %v6043_v44 = vsel %vm860_vm1, %v10973_v33, 0.0 }
 0xedc   : > { %v6086_v31 = vmul.f32 %v10912_v60, %v10912_v60 }
 0xede   : > { %v6106_v9 = vsel %vm860_vm1, %v6086_v31, 0.0  ;;  %v10979_v31 = vadd.f32 %v5984_v18, %v11551_v53 }
 0xedf   : > { %6029 = vadd.xlane.f32.xlu1 %v6028_v56  ;;  %v6015_v59 = vpop.xlane.xlu1 %6014  ;;  %6107 = vadd.xlane.f32.xlu0 %v6106_v9 }
 0xee0   : > { %v6055_v24 = vmul.f32 %v6015_v59, %v11511_v27  ;;  %v6046_v61 = vsel %vm860_vm1, %v10979_v31, 0.0 }
 0xee2   : > { %v10925_v38 = vsub.f32 %v10864_v5, %v6055_v24 }
 0xee4   : > { %v6087_v10 = vmul.f32 %v10925_v38, %v10925_v38 }
 0xee6   : > { %v6109_v43 = vsel %vm860_vm1, %v6087_v10, 0.0 }
 0xee7   : > { %6110 = vadd.xlane.f32.xlu2 %v6109_v43  ;;  %6032 = vadd.xlane.f32.xlu0 %v6031_v49  ;;  %v6018_v14 = vpop.xlane.xlu0 %6017 }
 0xee8   : > { %v6056_v8 = vmul.f32 %v6018_v14, %v11511_v27 }
 0xeea   : > { %v10938_v54 = vsub.f32 %v10870_v20, %v6056_v8 }
 0xeec   : > { %v6088_v30 = vmul.f32 %v10938_v54, %v10938_v54 }
 0xeee   : > { %v6112_v48 = vsel %vm860_vm1, %v6088_v30, 0.0 }
 0xeef   : > { %v6021_v28 = vpop.xlane.xlu2 %6020  ;;  %6035 = vadd.xlane.f32.xlu0 %v6034_v58  ;;  %6113 = vadd.xlane.f32.xlu2 %v6112_v48 }
 0xef0   : > { %v6057_v15 = vmul.f32 %v6021_v28, %v11511_v27  ;;  %v7630_v28 = vld [vmem:[%s11427_s10 + $0x10] sm:$0xff] }
 0xef1   : > { %6417 = vmatpush.bf16.msra.mxu2 %v7630_v28 }
 0xef2   : > { %v10951_v16 = vsub.f32 %v10876_v39, %v6057_v15 }
 0xef4   : > { %v6089_v42 = vmul.f32 %v10951_v16, %v10951_v16 }
 0xef6   : > { %v6115_v52 = vsel %vm860_vm1, %v6089_v42, 0.0 }
 0xef7   : > { %v6024_v17 = vpop.xlane.xlu2 %6023  ;;  %6116 = vadd.xlane.f32.xlu1 %v6115_v52  ;;  %6038 = vadd.xlane.f32.xlu2 %v6037_v62  ;;  %v5985_v52 = vpop.f32.mrf.mxu3 }
 0xef8   : > { %v6058_v63 = vmul.f32 %v6024_v17, %v11511_v27  ;;  %v5986_v41 = vadd.f32 %v10842_v36, %v5985_v52 }
 0xefa   : > { %v10964_v51 = vsub.f32 %v10882_v22, %v6058_v63 }
 0xefc   : > { %v6090_v19 = vmul.f32 %v10964_v51, %v10964_v51 }
 0xefe   : > { %v6118_v1 = vsel %vm860_vm1, %v6090_v19, 0.0 }
 0xeff   : > { %6119 = vadd.xlane.f32.xlu1 %v6118_v1  ;;  %6041 = vadd.xlane.f32.xlu2 %v6040_v3 }
 0xf07   : > { %6044 = vadd.xlane.f32.xlu1 %v6043_v44 }
 0xf0f   : > { %6047 = vadd.xlane.f32.xlu1 %v6046_v61  ;;  %v11552_v61 = vld [vmem:[#allocation18_spill] sm:$0xff] }
 0xf42   : > { %v6102_v23 = vpop.xlane.xlu1 %6101 }
 0xf43   : > { %v6148_v56 = vmul.f32 %v6102_v23, %v11511_v27  ;;  %v11013_v23 = vadd.f32 %v5986_v41, %v11552_v61 }
 0xf45   : > { %v6164_v9 = vadd.f32 1e-12, %v6148_v56  ;;  %v6049_v13 = vsel %vm860_vm1, %v11013_v23, 0.0 }
 0xf47   : > { %7957 = vrsqrt.f32 %v6164_v9  ;;  %vm6186_vm8 = vweird.f32 %v6164_v9 }
 0xf4a   : > { %v6027_v59 = vpop.xlane.xlu1 %6026  ;;  %v6105_v24 = vpop.xlane.xlu0 %6104 }
 0xf4b   : > { %v6059_v34 = vmul.f32 %v6027_v59, %v11511_v27  ;;  %v6149_v10 = vmul.f32 %v6105_v24, %v11511_v27 }
 0xf4d   : > { %v7958_v11 = vpop.eup %7957  ;;  %v10987_v43 = vsub.f32 %v10896_v40, %v6059_v34  ;;  %v6165_v49 = vadd.f32 1e-12, %v6149_v10 }
 0xf4e   : > { %v6181_v55 = vmul.f32 %v7958_v11, %v6164_v9  ;;  %vm6187_vm7 = vweird.f32 %v7958_v11 }
 0xf4f   : > { %7959 = vrsqrt.f32 %v6165_v49  ;;  %v6091_v14 = vmul.f32 %v10987_v43, %v10987_v43  ;;  %vm6188_vm10 = vmor %vm6186_vm8, %vm6187_vm7  ;;  %vm6196_vm11 = vweird.f32 %v6165_v49 }
 0xf50   : > { %v6182_v8 = vmul.f32 %v7958_v11, %v6181_v55 }
 0xf51   : > { %v6121_v30 = vsel %vm860_vm1, %v6091_v14, 0.0 }
 0xf52   : > { %v6183_v0 = vmul.f32 0.5, %v6182_v8  ;;  %v6030_v58 = vpop.xlane.xlu1 %6029  ;;  %6122 = vadd.xlane.f32.xlu0 %v6121_v30  ;;  %v6108_v48 = vpop.xlane.xlu0 %6107 }
 0xf53   : > { %v6060_v15 = vmul.f32 %v6030_v58, %v11511_v27  ;;  %v6150_v26 = vmul.f32 %v6108_v48, %v11511_v27 }
 0xf54   : > { %v6184_v62 = vsub.f32 1.5, %v6183_v0 }
 0xf55   : > { %v7960_v25 = vpop.eup %7959  ;;  %v11001_v42 = vsub.f32 %v10909_v50, %v6060_v15  ;;  %v11003_v29 = vadd.f32 1e-12, %v6150_v26 }
 0xf56   : > { %v6191_v17 = vmul.f32 %v7960_v25, %v6165_v49  ;;  %v6185_v46 = vmul.f32 %v7958_v11, %v6184_v62  ;;  %vm6197_vm9 = vweird.f32 %v7960_v25 }
 0xf57   : > { %7961 = vrsqrt.f32 %v11003_v29  ;;  %v6092_v63 = vmul.f32 %v11001_v42, %v11001_v42  ;;  %vm6198_vm12 = vmor %vm6196_vm11, %vm6197_vm9  ;;  %vm6206_vm14 = vweird.f32 %v11003_v29 }
 0xf58   : > { %v6192_v47 = vmul.f32 %v7960_v25, %v6191_v17  ;;  %v6189_v59 = vsel %vm6188_vm10, %v7958_v11, %v6185_v46 }
 0xf59   : > { %v6124_v19 = vsel %vm860_vm1, %v6092_v63, 0.0  ;;  %v6340_v14 = vmul.f32 %v6189_v59, %v10888_v12 }
 0xf5a   : > { %v6193_v1 = vmul.f32 0.5, %v6192_v47  ;;  %v6111_v3 = vpop.xlane.xlu2 %6110  ;;  %6125 = vadd.xlane.f32.xlu0 %v6124_v19  ;;  %v6033_v45 = vpop.xlane.xlu0 %6032 }
 0xf5b   : > { %v6151_v21 = vmul.f32 %v6111_v3, %v11511_v27  ;;  %v6061_v18 = vmul.f32 %v6033_v45, %v11511_v27 }
 0xf5c   : > { %v6194_v44 = vsub.f32 1.5, %v6193_v1 }
 0xf5d   : > { %v7962_v53 = vpop.eup %7961  ;;  %v6167_v36 = vadd.f32 1e-12, %v6151_v21  ;;  %v11016_v56 = vsub.f32 %v10922_v37, %v6061_v18 }
 0xf5e   : > { %v6195_v24 = vmul.f32 %v7960_v25, %v6194_v44  ;;  %v6201_v34 = vmul.f32 %v7962_v53, %v11003_v29  ;;  %vm6207_vm13 = vweird.f32 %v7962_v53 }
 0xf5f   : > { %7963 = vrsqrt.f32 %v6167_v36  ;;  %v6093_v9 = vmul.f32 %v11016_v56, %v11016_v56  ;;  %vm6208_vm2 = vmor %vm6206_vm14, %vm6207_vm13  ;;  %vm6216_vm3 = vweird.f32 %v6167_v36 }
 0xf60   : > { %v6199_v10 = vsel %vm6198_vm12, %v7960_v25, %v6195_v24  ;;  %v6202_v55 = vmul.f32 %v7962_v53, %v6201_v34 }
 0xf61   : > { %v6341_v8 = vmul.f32 %v6199_v10, %v10899_v57  ;;  %v6127_v11 = vsel %vm860_vm1, %v6093_v9, 0.0 }
 0xf62   : > { %v6203_v30 = vmul.f32 0.5, %v6202_v55  ;;  %6050 = vadd.xlane.f32.xlu0 %v6049_v13  ;;  %v6114_v49 = vpop.xlane.xlu2 %6113  ;;  %6128 = vadd.xlane.f32.xlu2 %v6127_v11  ;;  %v6036_v0 = vpop.xlane.xlu0 %6035 }
 0xf63   : > { %v6356_v58 = vpack.c.bf16 %v6341_v8, %v6340_v14  ;;  %v6152_v48 = vmul.f32 %v6114_v49, %v11511_v27  ;;  %v6062_v28 = vmul.f32 %v6036_v0, %v11511_v27 }
 0xf64   : > { %v6204_v57 = vsub.f32 1.5, %v6203_v30 }
 0xf65   : > { %v7964_v15 = vpop.eup %7963  ;;  %v6168_v26 = vadd.f32 1e-12, %v6152_v48  ;;  %v11029_v12 = vsub.f32 %v10935_v6, %v6062_v28  ;;  %7532 = vmatmul.msk.bf16.vlgmr.msra.gmra.mxu2 %vm860_vm1, %v6356_v58 }
 0xf66   : > { %v6211_v25 = vmul.f32 %v7964_v15, %v6167_v36  ;;  %v6205_v63 = vmul.f32 %v7962_v53, %v6204_v57  ;;  %vm6217_vm15 = vweird.f32 %v7964_v15 }
 0xf67   : > { %7965 = vrsqrt.f32 %v6168_v26  ;;  %v6094_v52 = vmul.f32 %v11029_v12, %v11029_v12  ;;  %vm6218_vm4 = vmor %vm6216_vm3, %vm6217_vm15  ;;  %vm6226_vm6 = vweird.f32 %v6168_v26 }
 0xf68   : > { %v6212_v62 = vmul.f32 %v7964_v15, %v6211_v25  ;;  %v6209_v44 = vsel %vm6208_vm2, %v7962_v53, %v6205_v63 }
 0xf69   : > { %v6130_v17 = vsel %vm860_vm1, %v6094_v52, 0.0  ;;  %v6342_v10 = vmul.f32 %v6209_v44, %v10912_v60 }
 0xf6a   : > { %v6213_v47 = vmul.f32 0.5, %v6212_v62  ;;  %v6117_v41 = vpop.xlane.xlu1 %6116  ;;  %v6039_v19 = vpop.xlane.xlu2 %6038  ;;  %6131 = vadd.xlane.f32.xlu2 %v6130_v17 }
 0xf6b   : > { %v6153_v46 = vmul.f32 %v6117_v41, %v11511_v27  ;;  %v6063_v1 = vmul.f32 %v6039_v19, %v11511_v27 }
 0xf6c   : > { %v6214_v3 = vsub.f32 1.5, %v6213_v47 }
 0xf6d   : > { %v7966_v45 = vpop.eup %7965  ;;  %v6169_v21 = vadd.f32 1e-12, %v6153_v46  ;;  %v11039_v18 = vsub.f32 %v10948_v7, %v6063_v1 }
 0xf6e   : > { %v6215_v61 = vmul.f32 %v7964_v15, %v6214_v3  ;;  %v6221_v59 = vmul.f32 %v7966_v45, %v6168_v26  ;;  %vm6227_vm5 = vweird.f32 %v7966_v45 }
 0xf6f   : > { %7967 = vrsqrt.f32 %v6169_v21  ;;  %v6095_v24 = vmul.f32 %v11039_v18, %v11039_v18  ;;  %vm6228_vm8 = vmor %vm6226_vm6, %vm6227_vm5  ;;  %vm6236_vm9 = vweird.f32 %v6169_v21 }
 0xf70   : > { %v6219_v34 = vsel %vm6218_vm4, %v7964_v15, %v6215_v61  ;;  %v6222_v9 = vmul.f32 %v7966_v45, %v6221_v59 }
 0xf71   : > { %v6133_v29 = vsel %vm860_vm1, %v6095_v24, 0.0  ;;  %v6343_v55 = vmul.f32 %v6219_v34, %v10925_v38 }
 0xf72   : > { %v6223_v14 = vmul.f32 0.5, %v6222_v9  ;;  %v6120_v8 = vpop.xlane.xlu1 %6119  ;;  %6134 = vadd.xlane.f32.xlu1 %v6133_v29  ;;  %v6042_v53 = vpop.xlane.xlu2 %6041 }
 0xf73   : > { %v6064_v36 = vmul.f32 %v6042_v53, %v11511_v27  ;;  %v6357_v13 = vpack.c.bf16 %v6343_v55, %v6342_v10 }
 0xf74   : > { %v6224_v49 = vsub.f32 1.5, %v6223_v14 }
 0xf75   : > { %v7968_v11 = vpop.eup %7967  ;;  %v11048_v30 = vsub.f32 %v10961_v2, %v6064_v36  ;;  %7533 = vmatmul.msk.bf16.gmra.mxu2 %vm860_vm1, %v6357_v13 }
 0xf76   : > { %v6231_v0 = vmul.f32 %v7968_v11, %v6169_v21  ;;  %v6225_v48 = vmul.f32 %v7966_v45, %v6224_v49  ;;  %vm6237_vm7 = vweird.f32 %v7968_v11 }
 0xf77   : > { %v6096_v60 = vmul.f32 %v11048_v30, %v11048_v30  ;;  %vm6238_vm10 = vmor %vm6236_vm9, %vm6237_vm7 }
 0xf78   : > { %v6232_v58 = vmul.f32 %v7968_v11, %v6231_v0  ;;  %v6229_v62 = vsel %vm6228_vm8, %v7966_v45, %v6225_v48 }
 0xf79   : > { %v6136_v38 = vsel %vm860_vm1, %v6096_v60, 0.0  ;;  %v6344_v19 = vmul.f32 %v6229_v62, %v10938_v54  ;;  %v6154_v54 = vmul.f32 %v6120_v8, %v11511_v27 }
 0xf7a   : > { %v6233_v28 = vmul.f32 0.5, %v6232_v58  ;;  %v6045_v15 = vpop.xlane.xlu1 %6044  ;;  %6137 = vadd.xlane.f32.xlu0 %v6136_v38 }
 0xf7b   : > { %v6065_v57 = vmul.f32 %v6045_v15, %v11511_v27  ;;  %v6170_v61 = vadd.f32 1e-12, %v6154_v54 }
 0xf7c   : > { %v6234_v25 = vsub.f32 1.5, %v6233_v28 }
 0xf7d   : > { %v11056_v52 = vsub.f32 %v10973_v33, %v6065_v57  ;;  %7969 = vrsqrt.f32 %v6170_v61  ;;  %vm6246_vm12 = vweird.f32 %v6170_v61 }
 0xf7e   : > { %v6235_v17 = vmul.f32 %v7968_v11, %v6234_v25 }
 0xf7f   : > { %v6097_v63 = vmul.f32 %v11056_v52, %v11056_v52 }
 0xf80   : > { %v6239_v47 = vsel %vm6238_vm10, %v7968_v11, %v6235_v17 }
 0xf81   : > { %v6139_v41 = vsel %vm860_vm1, %v6097_v63, 0.0  ;;  %v6345_v26 = vmul.f32 %v6239_v47, %v10951_v16 }
 0xf82   : > { %v6048_v46 = vpop.xlane.xlu1 %6047  ;;  %6140 = vadd.xlane.f32.xlu2 %v6139_v41 }
 0xf83   : > { %v6066_v1 = vmul.f32 %v6048_v46, %v11511_v27  ;;  %v6358_v3 = vpack.c.bf16 %v6345_v26, %v6344_v19  ;;  %v7970_v16 = vpop.eup %7969 }
 0xf84   : > { %v6241_v59 = vmul.f32 %v7970_v16, %v6170_v61  ;;  %vm6247_vm11 = vweird.f32 %v7970_v16 }
 0xf85   : > { %v11065_v45 = vsub.f32 %v10979_v31, %v6066_v1  ;;  %7534 = vmatmul.msk.bf16.gmra.mxu2 %vm860_vm1, %v6358_v3  ;;  %vm6248_vm14 = vmor %vm6246_vm12, %vm6247_vm11 }
 0xf86   : > { %v6242_v29 = vmul.f32 %v7970_v16, %v6241_v59 }
 0xf87   : > { %v6098_v21 = vmul.f32 %v11065_v45, %v11065_v45 }
 0xf88   : > { %v6243_v10 = vmul.f32 0.5, %v6242_v29 }
 0xf89   : > { %v6142_v44 = vsel %vm860_vm1, %v6098_v21, 0.0 }
 0xf8a   : > { %6143 = vadd.xlane.f32.xlu1 %v6142_v44  ;;  %v6244_v13 = vsub.f32 1.5, %v6243_v10 }
 0xf8c   : > { %v6245_v49 = vmul.f32 %v7970_v16, %v6244_v13 }
 0xf8e   : > { %v6249_v62 = vsel %vm6248_vm14, %v7970_v16, %v6245_v49 }
 0xf8f   : > { %v6346_v46 = vmul.f32 %v6249_v62, %v10964_v51 }
 0xfc5   : > { %v6123_v24 = vpop.xlane.xlu0 %6122 }
 0xfc6   : > { %v6155_v34 = vmul.f32 %v6123_v24, %v11511_v27 }
 0xfc8   : > { %v6171_v9 = vadd.f32 1e-12, %v6155_v34 }
 0xfca   : > { %7971 = vrsqrt.f32 %v6171_v9  ;;  %vm6256_vm15 = vweird.f32 %v6171_v9 }
 0xfcd   : > { %v6126_v55 = vpop.xlane.xlu0 %6125 }
 0xfce   : > { %v6156_v14 = vmul.f32 %v6126_v55, %v11511_v27 }
 0xfd0   : > { %v7972_v53 = vpop.eup %7971  ;;  %v6172_v36 = vadd.f32 1e-12, %v6156_v14 }
 0xfd1   : > { %v6251_v11 = vmul.f32 %v7972_v53, %v6171_v9  ;;  %vm6257_vm13 = vweird.f32 %v7972_v53 }
 0xfd2   : > { %7973 = vrsqrt.f32 %v6172_v36  ;;  %vm6258_vm2 = vmor %vm6256_vm15, %vm6257_vm13  ;;  %vm6266_vm4 = vweird.f32 %v6172_v36 }
 0xfd3   : > { %v6252_v8 = vmul.f32 %v7972_v53, %v6251_v11 }
 0xfd5   : > { %v6253_v0 = vmul.f32 0.5, %v6252_v8  ;;  %v6129_v60 = vpop.xlane.xlu2 %6128  ;;  %v6051_v58 = vpop.xlane.xlu0 %6050 }
 0xfd6   : > { %v6157_v38 = vmul.f32 %v6129_v60, %v11511_v27  ;;  %v6067_v48 = vmul.f32 %v6051_v58, %v11511_v27 }
 0xfd7   : > { %v6254_v28 = vsub.f32 1.5, %v6253_v0 }
 0xfd8   : > { %v7974_v15 = vpop.eup %7973  ;;  %v6173_v57 = vadd.f32 1e-12, %v6157_v38  ;;  %v11077_v25 = vsub.f32 %v11013_v23, %v6067_v48 }
 0xfd9   : > { %v6255_v17 = vmul.f32 %v7972_v53, %v6254_v28  ;;  %v6261_v63 = vmul.f32 %v7974_v15, %v6172_v36  ;;  %vm6267_vm3 = vweird.f32 %v7974_v15 }
 0xfda   : > { %7975 = vrsqrt.f32 %v6173_v57  ;;  %v6099_v47 = vmul.f32 %v11077_v25, %v11077_v25  ;;  %vm6268_vm6 = vmor %vm6266_vm4, %vm6267_vm3  ;;  %vm6276_vm7 = vweird.f32 %v6173_v57 }
 0xfdb   : > { %v6259_v41 = vsel %vm6258_vm2, %v7972_v53, %v6255_v17  ;;  %v6262_v19 = vmul.f32 %v7974_v15, %v6261_v63 }
 0xfdc   : > { %v6145_v26 = vsel %vm860_vm1, %v6099_v47, 0.0  ;;  %v6347_v1 = vmul.f32 %v6259_v41, %v10987_v43  ;;  %v11089_v43 = vld [vmem:[%s11428_s11 + $0x1] ss:$0 sm:$0xff] }
 0xfdd   : > { %v6263_v3 = vmul.f32 0.5, %v6262_v19  ;;  %v6132_v21 = vpop.xlane.xlu2 %6131  ;;  %6146 = vadd.xlane.f32.xlu0 %v6145_v26 }
 0xfde   : > { %v6158_v44 = vmul.f32 %v6132_v21, %v11511_v27  ;;  %v6359_v54 = vpack.c.bf16 %v6347_v1, %v6346_v46 }
 0xfdf   : > { %v6264_v59 = vsub.f32 1.5, %v6263_v3 }
 0xfe0   : > { %v7976_v61 = vpop.eup %7975  ;;  %v6174_v16 = vadd.f32 1e-12, %v6158_v44  ;;  %7535 = vmatmul.msk.bf16.gmra.mxu2 %vm860_vm1, %v6359_v54 }
 0xfe1   : > { %v6271_v24 = vmul.f32 %v7976_v61, %v6173_v57  ;;  %v6265_v9 = vmul.f32 %v7974_v15, %v6264_v59  ;;  %vm6277_vm5 = vweird.f32 %v7976_v61 }
 0xfe2   : > { %7977 = vrsqrt.f32 %v6174_v16  ;;  %vm6278_vm8 = vmor %vm6276_vm7, %vm6277_vm5  ;;  %vm6286_vm10 = vweird.f32 %v6174_v16 }
 0xfe3   : > { %v6272_v34 = vmul.f32 %v7976_v61, %v6271_v24  ;;  %v6269_v11 = vsel %vm6268_vm6, %v7974_v15, %v6265_v9 }
 0xfe4   : > { %v6348_v38 = vmul.f32 %v6269_v11, %v11001_v42  ;;  %v7635_v42 = vld [vmem:[%s11429_s12 + $0x38] sm:$0xff] }
 0xfe5   : > { %v6273_v29 = vmul.f32 0.5, %v6272_v34  ;;  %v6135_v51 = vpop.xlane.xlu1 %6134  ;;  %6677 = vmatpush.bf16.msrb.mxu1 %v7635_v42 }
 0xfe6   : > { %v6159_v10 = vmul.f32 %v6135_v51, %v11511_v27 }
 0xfe7   : > { %v6274_v55 = vsub.f32 1.5, %v6273_v29 }
 0xfe8   : > { %v11092_v14 = vpop.eup %7977  ;;  %v6175_v53 = vadd.f32 1e-12, %v6159_v10  ;;  %v6419_v13 = vpop.f32.mrf.mxu2 }
 0xfe9   : > { %v6275_v8 = vmul.f32 %v7976_v61, %v6274_v55  ;;  %v6281_v49 = vmul.f32 %v11092_v14, %v6174_v16  ;;  %v11096_v0 = vadd.f32 %v11089_v43, %v6419_v13  ;;  %vm6287_vm9 = vweird.f32 %v11092_v14 }
 0xfea   : > { %7979 = vrsqrt.f32 %v6175_v53  ;;  %vm11124_vm12 = vmor %vm6286_vm10, %vm6287_vm9  ;;  %vm6296_vm13 = vweird.f32 %v6175_v53 }
 0xfeb   : > { %v6279_v60 = vsel %vm6278_vm8, %v7976_v61, %v6275_v8  ;;  %v6282_v36 = vmul.f32 %v11092_v14, %v6281_v49  ;;  %v6459_v58 = vmul.f32 %v11096_v0, %v11096_v0 }
 0xfec   : > { %v6349_v48 = vmul.f32 %v6279_v60, %v11016_v56  ;;  %v7634_v60 = vld [vmem:[%s11429_s12 + $0x30] sm:$0xff] }
 0xfed   : > { %v6283_v28 = vmul.f32 0.5, %v6282_v36  ;;  %v6475_v15 = vmul.f32 %v6459_v58, %v11096_v0  ;;  %v6138_v57 = vpop.xlane.xlu0 %6137  ;;  %6678 = vmatpush.bf16.msrb.mxu1 %v7634_v60 }
 0xfee   : > { %v6160_v62 = vmul.f32 %v6138_v57, %v11511_v27  ;;  %v6360_v17 = vpack.c.bf16 %v6349_v48, %v6348_v38  ;;  %v7633_v38 = vld [vmem:[%s11429_s12 + $0x28] sm:$0xff] }
 0xfef   : > { %v6491_v63 = vmul.f32 0.044715, %v6475_v15  ;;  %v6284_v26 = vsub.f32 1.5, %v6283_v28 }
 0xff0   : > { %v7980_v47 = vpop.eup %7979  ;;  %v11105_v41 = vadd.f32 1e-12, %v6160_v62  ;;  %v6421_v19 = vpop.f32.mrf.mxu2  ;;  %7536 = vmatmul.msk.bf16.gmra.mxu2 %vm860_vm1, %v6360_v17 }
 0xff1   : > { %v6291_v56 = vmul.f32 %v7980_v47, %v6175_v53  ;;  %v6507_v46 = vadd.f32 %v6491_v63, %v11096_v0  ;;  %v11114_v1 = vadd.f32 %v11089_v43, %v6421_v19  ;;  %v6285_v54 = vmul.f32 %v11092_v14, %v6284_v26  ;;  %6679 = vmatpush.bf16.msrb.mxu1 %v7633_v38 }
 0xff2   : > { %7981 = vrsqrt.f32 %v11105_v41  ;;  %vm6297_vm11 = vweird.f32 %v7980_v47  ;;  %vm6306_vm2 = vweird.f32 %v11105_v41 }
 0xff3   : > { %v6292_v3 = vmul.f32 %v7980_v47, %v6291_v56  ;;  %v6523_v21 = vmul.f32 0.7978846, %v6507_v46  ;;  %v6460_v44 = vmul.f32 %v11114_v1, %v11114_v1  ;;  %v6289_v11 = vsel %vm11124_vm12, %v11092_v14, %v6285_v54  ;;  %vm6298_vm14 = vmor %vm6296_vm13, %vm6297_vm11 }
 0xff4   : > { %v6350_v28 = vmul.f32 %v6289_v11, %v11029_v12  ;;  %v7632_v12 = vld [vmem:[%s11429_s12 + $0x20] sm:$0xff]  ;;  %vm6755_vm13 = vcmask 1041409  }
 0xff5   : > { %v6293_v61 = vmul.f32 0.5, %v6292_v3  ;;  %v6141_v59 = vpop.xlane.xlu2 %6140  ;;  %v6476_v24 = vmul.f32 %v6460_v44, %v11114_v1  ;;  %7983 = vtanh.f32 %v6523_v21  ;;  %6680 = vmatpush.bf16.msrb.mxu1 %v7632_v12 }
 0xff6   : > { %v6161_v34 = vmul.f32 %v6141_v59, %v11511_v27 }
 0xff7   : > { %v6294_v9 = vsub.f32 1.5, %v6293_v61  ;;  %v6492_v10 = vmul.f32 0.044715, %v6476_v24 }
 0xff8   : > { %v11122_v29 = vpop.eup %7981  ;;  %v6177_v55 = vadd.f32 1e-12, %v6161_v34  ;;  %v6424_v13 = vpop.f32.mrf.mxu2 }
 0xff9   : > { %v6295_v8 = vmul.f32 %v7980_v47, %v6294_v9  ;;  %v6301_v16 = vmul.f32 %v11122_v29, %v11105_v41  ;;  %v11134_v49 = vadd.f32 %v11089_v43, %v6424_v13  ;;  %v6508_v53 = vadd.f32 %v6492_v10, %v11114_v1 }
 0xffa   : > { %7985 = vrsqrt.f32 %v6177_v55  ;;  %vm6307_vm15 = vweird.f32 %v11122_v29  ;;  %vm6316_vm5 = vweird.f32 %v6177_v55 }
 0xffb   : > { %v6299_v36 = vsel %vm6298_vm14, %v7980_v47, %v6295_v8  ;;  %v6302_v58 = vmul.f32 %v11122_v29, %v6301_v16  ;;  %v6461_v14 = vmul.f32 %v11134_v49, %v11134_v49  ;;  %v6524_v48 = vmul.f32 0.7978846, %v6508_v53  ;;  %v7984_v17 = vpop.eup %7983  ;;  %vm11158_vm4 = vmor %vm6306_vm2, %vm6307_vm15 }
 0xffc   : > { %v6351_v15 = vmul.f32 %v6299_v36, %v11039_v18  ;;  %v6555_v26 = vadd.f32 1.0, %v7984_v17  ;;  %vm6758_vm14 = vcmask 1042434   ;;  %vm6761_vm15 = vcmask 1043459  }
 0xffd   : > { %v6303_v57 = vmul.f32 0.5, %v6302_v58  ;;  %v6477_v62 = vmul.f32 %v6461_v14, %v11134_v49  ;;  %7987 = vtanh.f32 %v6524_v48  ;;  %vm6764_vm2 = vcmask 1044484  }
 0xffe   : > { %v6361_v63 = vpack.c.bf16 %v6351_v15, %v6350_v28  ;;  %v6571_v59 = vmul.f32 0.5, %v6555_v26 }
 0xfff   : > { %v6493_v47 = vmul.f32 0.044715, %v6477_v62  ;;  %v6304_v56 = vsub.f32 1.5, %v6303_v57 }
0x1000   : > { %v7986_v19 = vpop.eup %7985  ;;  %v6426_v42 = vpop.f32.mrf.mxu2  ;;  %7537 = vmatmul.msk.bf16.gmra.mxu2 %vm860_vm1, %v6361_v63  ;;  %v6587_v60 = vmul.f32 %v6571_v59, %v11096_v0 }
0x1001   : > { %v6311_v46 = vmul.f32 %v7986_v19, %v6177_v55  ;;  %v6509_v3 = vadd.f32 %v6493_v47, %v11134_v49  ;;  %v6427_v18 = vadd.f32 %v11089_v43, %v6426_v42  ;;  %v6305_v24 = vmul.f32 %v11122_v29, %v6304_v56 }
0x1002   : > { %vm6317_vm3 = vweird.f32 %v7986_v19 }
0x1003   : > { %v6312_v21 = vmul.f32 %v7986_v19, %v6311_v46  ;;  %v7988_v44 = vpop.eup %7987  ;;  %v6525_v54 = vmul.f32 0.7978846, %v6509_v3  ;;  %v6462_v61 = vmul.f32 %v6427_v18, %v6427_v18  ;;  %v6309_v53 = vsel %vm11158_vm4, %v11122_v29, %v6305_v24  ;;  %vm6318_vm6 = vmor %vm6316_vm5, %vm6317_vm3 }
0x1004   : > { %v6556_v34 = vadd.f32 1.0, %v7988_v44  ;;  %v6352_v15 = vmul.f32 %v6309_v53, %v11048_v30  ;;  %vm6767_vm3 = vcmask 1045509   ;;  %vm6770_vm4 = vcmask 1046534  }
0x1005   : > { %v6313_v9 = vmul.f32 0.5, %v6312_v21  ;;  %v6478_v51 = vmul.f32 %v6462_v61, %v6427_v18  ;;  %7989 = vtanh.f32 %v6525_v54  ;;  %vm6773_vm5 = vcmask 1047559  }
0x1006   : > { %v6572_v10 = vmul.f32 0.5, %v6556_v34 }
0x1007   : > { %v6314_v13 = vsub.f32 1.5, %v6313_v9  ;;  %v6494_v8 = vmul.f32 0.044715, %v6478_v51 }
0x1008   : > { %v6429_v16 = vpop.f32.mrf.mxu2  ;;  %v6588_v36 = vmul.f32 %v6572_v10, %v11114_v1 }
0x1009   : > { %v6315_v41 = vmul.f32 %v7986_v19, %v6314_v13  ;;  %v6510_v58 = vadd.f32 %v6494_v8, %v6427_v18  ;;  %v6430_v14 = vadd.f32 %v11089_v43, %v6429_v16 }
0x100a   : > { %v6603_v38 = vpack.c.bf16 %v6588_v36, %v6587_v60  ;;  %v6144_v60 = vpop.xlane.xlu1 %6143 }
0x100b   : > { %v6319_v48 = vsel %vm6318_vm6, %v7986_v19, %v6315_v41  ;;  %v6526_v28 = vmul.f32 0.7978846, %v6510_v58  ;;  %v6463_v55 = vmul.f32 %v6430_v14, %v6430_v14  ;;  %v7990_v0 = vpop.eup %7989 }
0x100c   : > { %v6353_v57 = vmul.f32 %v6319_v48, %v11056_v52  ;;  %7565 = vmatmul.msk.bf16.vlgmr.msrb.gmra.mxu1 %vm711_vm0, %v6603_v38  ;;  %v6557_v63 = vadd.f32 1.0, %v7990_v0 }
0x100d   : > { %7991 = vtanh.f32 %v6526_v28  ;;  %v6479_v29 = vmul.f32 %v6463_v55, %v6430_v14 }
0x100e   : > { %v6362_v62 = vpack.c.bf16 %v6353_v57, %v6352_v15  ;;  %v6573_v30 = vmul.f32 0.5, %v6557_v63 }
0x100f   : > { %v6495_v1 = vmul.f32 0.044715, %v6479_v29 }
0x1010   : > { %v6431_v17 = vpop.f32.mrf.mxu2  ;;  %7538 = vmatmul.msk.bf16.gmra.mxu2 %vm860_vm1, %v6362_v62  ;;  %v6589_v21 = vmul.f32 %v6573_v30, %v11134_v49  ;;  %v6162_v49 = vmul.f32 %v6144_v60, %v11511_v27 }
0x1011   : > { %v6432_v47 = vadd.f32 %v11089_v43, %v6431_v17  ;;  %v6511_v19 = vadd.f32 %v6495_v1, %v6430_v14 }
0x1013   : > { %v6464_v42 = vmul.f32 %v6432_v47, %v6432_v47  ;;  %v7992_v26 = vpop.eup %7991  ;;  %v6527_v56 = vmul.f32 0.7978846, %v6511_v19 }
0x1014   : > { %v6558_v46 = vadd.f32 1.0, %v7992_v26 }
0x1015   : > { %v6480_v52 = vmul.f32 %v6464_v42, %v6432_v47  ;;  %7993 = vtanh.f32 %v6527_v56 }
0x1016   : > { %v6574_v3 = vmul.f32 0.5, %v6558_v46 }
0x1017   : > { %v6496_v12 = vmul.f32 0.044715, %v6480_v52 }
0x1018   : > { %v6590_v44 = vmul.f32 %v6574_v3, %v6427_v18  ;;  %v6178_v18 = vadd.f32 1e-12, %v6162_v49 }
0x1019   : > { %v6512_v54 = vadd.f32 %v6496_v12, %v6432_v47 }
0x101a   : > { %v6604_v59 = vpack.c.bf16 %v6590_v44, %v6589_v21  ;;  %vm6326_vm8 = vweird.f32 %v6178_v18 }
0x101b   : > { %v6528_v61 = vmul.f32 0.7978846, %v6512_v54  ;;  %v7994_v24 = vpop.eup %7993 }
0x101c   : > { %7566 = vmatmul.msk.bf16.gmra.mxu1 %vm711_vm0, %v6604_v59  ;;  %v6559_v34 = vadd.f32 1.0, %v7994_v24 }
0x101d   : > { %7995 = vtanh.f32 %v6528_v61 }
0x101e   : > { %v6575_v51 = vmul.f32 0.5, %v6559_v34  ;;  %7997 = vrsqrt.f32 %v6178_v18 }
0x1020   : > { %v6591_v11 = vmul.f32 %v6575_v51, %v6430_v14 }
0x1023   : > { %v7996_v9 = vpop.eup %7995 }
0x1024   : > { %v6560_v10 = vadd.f32 1.0, %v7996_v9  ;;  %v7998_v53 = vpop.eup %7997 }
0x1025   : > { %v6321_v36 = vmul.f32 %v7998_v53, %v6178_v18  ;;  %vm6327_vm7 = vweird.f32 %v7998_v53 }
0x1026   : > { %v6576_v13 = vmul.f32 0.5, %v6560_v10  ;;  %vm6328_vm10 = vmor %vm6326_vm8, %vm6327_vm7 }
0x1027   : > { %v6322_v48 = vmul.f32 %v7998_v53, %v6321_v36 }
0x1028   : > { %v6592_v8 = vmul.f32 %v6576_v13, %v6432_v47 }
0x1029   : > { %v6323_v28 = vmul.f32 0.5, %v6322_v48 }
0x102a   : > { %v6605_v16 = vpack.c.bf16 %v6592_v8, %v6591_v11 }
0x102b   : > { %v6324_v14 = vsub.f32 1.5, %v6323_v28 }
0x102c   : > { %7567 = vmatmul.msk.bf16.gmra.mxu1 %vm711_vm0, %v6605_v16 }
0x102d   : > { %v6325_v0 = vmul.f32 %v7998_v53, %v6324_v14 }
0x102f   : > { %v6329_v17 = vsel %vm6328_vm10, %v7998_v53, %v6325_v0 }
0x1030   : > { %v6354_v26 = vmul.f32 %v6329_v17, %v11065_v45 }
0x1050   : > { %v6147_v41 = vpop.xlane.xlu0 %6146 }
0x1051   : > { %v6163_v58 = vmul.f32 %v6147_v41, %v11511_v27 }
0x1053   : > { %v6179_v38 = vadd.f32 1e-12, %v6163_v58 }
0x1055   : > { %7999 = vrsqrt.f32 %v6179_v38  ;;  %vm6336_vm11 = vweird.f32 %v6179_v38 }
0x105b   : > { %v8000_v55 = vpop.eup %7999 }
0x105c   : > { %v6331_v15 = vmul.f32 %v8000_v55, %v6179_v38  ;;  %vm6337_vm9 = vweird.f32 %v8000_v55 }
0x105d   : > { %vm6338_vm12 = vmor %vm6336_vm11, %vm6337_vm9 }
0x105e   : > { %v6332_v57 = vmul.f32 %v8000_v55, %v6331_v15 }
0x1060   : > { %v6333_v29 = vmul.f32 0.5, %v6332_v57 }
0x1062   : > { %v6334_v62 = vsub.f32 1.5, %v6333_v29 }
0x1063   : > { %v6434_v1 = vpop.f32.mrf.mxu2 }
0x1064   : > { %v6335_v63 = vmul.f32 %v8000_v55, %v6334_v62  ;;  %v6435_v47 = vadd.f32 %v11089_v43, %v6434_v1 }
0x1066   : > { %v6339_v19 = vsel %vm6338_vm12, %v8000_v55, %v6335_v63  ;;  %v6465_v42 = vmul.f32 %v6435_v47, %v6435_v47 }
0x1067   : > { %v6355_v56 = vmul.f32 %v6339_v19, %v11077_v25 }
0x1068   : > { %v6481_v30 = vmul.f32 %v6465_v42, %v6435_v47 }
0x1069   : > { %v6363_v46 = vpack.c.bf16 %v6355_v56, %v6354_v26 }
0x106a   : > { %v6497_v52 = vmul.f32 0.044715, %v6481_v30 }
0x106b   : > { %v6436_v3 = vpop.f32.mrf.mxu2  ;;  %7539 = vmatmul.msk.bf16.gmra.mxu2 %vm860_vm1, %v6363_v46 }
0x106c   : > { %v6513_v12 = vadd.f32 %v6497_v52, %v6435_v47  ;;  %v6437_v21 = vadd.f32 %v11089_v43, %v6436_v3 }
0x106e   : > { %v6529_v44 = vmul.f32 0.7978846, %v6513_v12  ;;  %v6466_v54 = vmul.f32 %v6437_v21, %v6437_v21 }
0x1070   : > { %v6482_v61 = vmul.f32 %v6466_v54, %v6437_v21  ;;  %8001 = vtanh.f32 %v6529_v44 }
0x1072   : > { %v6498_v59 = vmul.f32 0.044715, %v6482_v61 }
0x1073   : > { %v6439_v24 = vpop.f32.mrf.mxu2 }
0x1074   : > { %v6514_v34 = vadd.f32 %v6498_v59, %v6437_v21  ;;  %v6440_v45 = vadd.f32 %v11089_v43, %v6439_v24 }
0x1076   : > { %v6530_v9 = vmul.f32 0.7978846, %v6514_v34  ;;  %v6467_v25 = vmul.f32 %v6440_v45, %v6440_v45  ;;  %v8002_v51 = vpop.eup %8001 }
0x1077   : > { %v6561_v11 = vadd.f32 1.0, %v8002_v51 }
0x1078   : > { %8003 = vtanh.f32 %v6530_v9  ;;  %v6483_v10 = vmul.f32 %v6467_v25, %v6440_v45 }
0x1079   : > { %v6577_v36 = vmul.f32 0.5, %v6561_v11 }
0x107a   : > { %v6499_v13 = vmul.f32 0.044715, %v6483_v10 }
0x107b   : > { %v6441_v8 = vpop.f32.mrf.mxu2  ;;  %v6593_v28 = vmul.f32 %v6577_v36, %v6435_v47 }
0x107c   : > { %v6515_v16 = vadd.f32 %v6499_v13, %v6440_v45  ;;  %v6442_v60 = vadd.f32 %v11089_v43, %v6441_v8 }
0x107e   : > { %v8004_v49 = vpop.eup %8003  ;;  %v6531_v18 = vmul.f32 0.7978846, %v6515_v16  ;;  %v6468_v53 = vmul.f32 %v6442_v60, %v6442_v60 }
0x107f   : > { %v6562_v41 = vadd.f32 1.0, %v8004_v49 }
0x1080   : > { %v6484_v58 = vmul.f32 %v6468_v53, %v6442_v60  ;;  %8005 = vtanh.f32 %v6531_v18 }
0x1081   : > { %v6578_v38 = vmul.f32 0.5, %v6562_v41 }
0x1082   : > { %v6500_v48 = vmul.f32 0.044715, %v6484_v58 }
0x1083   : > { %v6594_v55 = vmul.f32 %v6578_v38, %v6437_v21  ;;  %v6444_v14 = vpop.f32.mrf.mxu2 }
0x1084   : > { %v6516_v15 = vadd.f32 %v6500_v48, %v6442_v60  ;;  %v6445_v57 = vadd.f32 %v11089_v43, %v6444_v14 }
0x1085   : > { %v6606_v0 = vpack.c.bf16 %v6594_v55, %v6593_v28 }
0x1086   : > { %v6532_v29 = vmul.f32 0.7978846, %v6516_v15  ;;  %v6469_v62 = vmul.f32 %v6445_v57, %v6445_v57  ;;  %v8006_v1 = vpop.eup %8005 }
0x1087   : > { %7568 = vmatmul.msk.bf16.gmra.mxu1 %vm711_vm0, %v6606_v0  ;;  %v6563_v19 = vadd.f32 1.0, %v8006_v1 }
0x1088   : > { %8007 = vtanh.f32 %v6532_v29  ;;  %v6485_v17 = vmul.f32 %v6469_v62, %v6445_v57 }
0x1089   : > { %v6579_v52 = vmul.f32 0.5, %v6563_v19 }
0x108a   : > { %v6501_v63 = vmul.f32 0.044715, %v6485_v17 }
0x108b   : > { %v6446_v42 = vpop.f32.mrf.mxu2  ;;  %v6595_v54 = vmul.f32 %v6579_v52, %v6440_v45 }
0x108c   : > { %v6517_v26 = vadd.f32 %v6501_v63, %v6445_v57  ;;  %v6447_v56 = vadd.f32 %v11089_v43, %v6446_v42 }
0x108e   : > { %v8008_v47 = vpop.eup %8007  ;;  %v6533_v30 = vmul.f32 0.7978846, %v6517_v26  ;;  %v6470_v46 = vmul.f32 %v6447_v56, %v6447_v56 }
0x108f   : > { %v6564_v3 = vadd.f32 1.0, %v8008_v47 }
0x1090   : > { %v6486_v12 = vmul.f32 %v6470_v46, %v6447_v56  ;;  %8009 = vtanh.f32 %v6533_v30  ;;  %v6682_v30 = vpop.f32.mrf.mxu1 }
0x1091   : > { %v6580_v21 = vmul.f32 0.5, %v6564_v3 }
0x1092   : > { %v6502_v44 = vmul.f32 0.044715, %v6486_v12 }
0x1093   : > { %v6596_v61 = vmul.f32 %v6580_v21, %v6442_v60  ;;  %v6449_v59 = vpop.f32.mrf.mxu2 }
0x1094   : > { %v6518_v24 = vadd.f32 %v6502_v44, %v6447_v56  ;;  %v6450_v34 = vadd.f32 %v11089_v43, %v6449_v59 }
0x1095   : > { %v6607_v9 = vpack.c.bf16 %v6596_v61, %v6595_v54 }
0x1096   : > { %v6534_v25 = vmul.f32 0.7978846, %v6518_v24  ;;  %v6471_v51 = vmul.f32 %v6450_v34, %v6450_v34  ;;  %v8010_v10 = vpop.eup %8009 }
0x1097   : > { %7569 = vmatmul.msk.bf16.gmra.mxu1 %vm711_vm0, %v6607_v9  ;;  %v6565_v8 = vadd.f32 1.0, %v8010_v10 }
0x1098   : > { %8011 = vtanh.f32 %v6534_v25  ;;  %v6487_v13 = vmul.f32 %v6471_v51, %v6450_v34 }
0x1099   : > { %v6581_v36 = vmul.f32 0.5, %v6565_v8 }
0x109a   : > { %v6503_v11 = vmul.f32 0.044715, %v6487_v13  ;;  %v11198_v13 = vld [vmem:[%s11430_s13 + $0x1] ss:$0 sm:$0xff] }
0x109b   : > { %v6451_v16 = vpop.f32.mrf.mxu2  ;;  %v6597_v28 = vmul.f32 %v6581_v36, %v6445_v57  ;;  %v6684_v57 = vpop.f32.mrf.mxu1 }
0x109c   : > { %v6519_v49 = vadd.f32 %v6503_v11, %v6450_v34  ;;  %v6452_v18 = vadd.f32 %v11089_v43, %v6451_v16  ;;  %v6685_v8 = vadd.f32 %v11198_v13, %v6684_v57 }
0x109e   : > { %v8012_v45 = vpop.eup %8011  ;;  %v6535_v60 = vmul.f32 0.7978846, %v6519_v49  ;;  %v6472_v53 = vmul.f32 %v6452_v18, %v6452_v18 }
0x109f   : > { %v6566_v41 = vadd.f32 1.0, %v8012_v45  ;;  %v11204_v45 = vadd.f32 %v6685_v8, %v10852_v35 }
0x10a0   : > { %v6488_v58 = vmul.f32 %v6472_v53, %v6452_v18  ;;  %8013 = vtanh.f32 %v6535_v60 }
0x10a1   : > { %v6582_v38 = vmul.f32 0.5, %v6566_v41 }
0x10a2   : > { %v6504_v48 = vmul.f32 0.044715, %v6488_v58  ;;  %v6683_v58 = vadd.f32 %v11198_v13, %v6682_v30 }
0x10a3   : > { %v6598_v55 = vmul.f32 %v6582_v38, %v6447_v56  ;;  %v6687_v56 = vpop.f32.mrf.mxu1 }
0x10a4   : > { %v6520_v14 = vadd.f32 %v6504_v48, %v6452_v18  ;;  %v6688_v16 = vadd.f32 %v11198_v13, %v6687_v56 }
0x10a5   : > { %v6608_v15 = vpack.c.bf16 %v6598_v55, %v6597_v28  ;;  %v6754_v55 = vrot.slane %v11204_v45, 7 }
0x10a6   : > { %v6536_v0 = vmul.f32 0.7978846, %v6520_v14  ;;  %v8014_v29 = vpop.eup %8013  ;;  %v11208_v36 = vadd.f32 %v6688_v16, %v10858_v32 }
0x10a7   : > { %7570 = vmatmul.msk.bf16.gmra.mxu1 %vm711_vm0, %v6608_v15  ;;  %v6567_v62 = vadd.f32 1.0, %v8014_v29 }
0x10a8   : > { %8015 = vtanh.f32 %v6536_v0  ;;  %v6757_v15 = vrot.slane %v11208_v36, 6  ;;  %v6722_v0 = vadd.f32 %v6683_v58, %v10846_v4 }
0x10a9   : > { %v6583_v17 = vmul.f32 0.5, %v6567_v62 }
0x10ab   : > { %v6599_v42 = vmul.f32 %v6583_v17, %v6450_v34  ;;  %v6689_v46 = vpop.f32.mrf.mxu1 }
0x10ae   : > { %v8016_v1 = vpop.eup %8015 }
0x10af   : > { %v6568_v63 = vadd.f32 1.0, %v8016_v1 }
0x10b1   : > { %v6584_v19 = vmul.f32 0.5, %v6568_v63 }
0x10b3   : > { %v6600_v26 = vmul.f32 %v6584_v19, %v6452_v18  ;;  %v6692_v21 = vpop.f32.mrf.mxu1 }
0x10b4   : > { %v6693_v60 = vadd.f32 %v11198_v13, %v6692_v21 }
0x10b5   : > { %v6609_v47 = vpack.c.bf16 %v6600_v26, %v6599_v42 }
0x10b6   : > { %v6726_v35 = vadd.f32 %v6693_v60, %v10870_v20 }
0x10b7   : > { %7571 = vmatmul.msk.bf16.gmra.mxu1 %vm711_vm0, %v6609_v47 }
0x10b8   : > { %v6763_v63 = vrot.slane %v6726_v35, 4 }
0x10bb   : > { %v6694_v51 = vpop.f32.mrf.mxu1 }
0x10bc   : > { %v6695_v41 = vadd.f32 %v11198_v13, %v6694_v51 }
0x10be   : > { %v6727_v32 = vadd.f32 %v6695_v41, %v10876_v39 }
0x10c0   : > { %v6766_v26 = vrot.slane %v6727_v32, 3 }
0x10ee   : > { %v6454_v52 = vpop.f32.mrf.mxu2 }
0x10ef   : > { %v6455_v3 = vadd.f32 %v11089_v43, %v6454_v52 }
0x10f1   : > { %v6473_v12 = vmul.f32 %v6455_v3, %v6455_v3 }
0x10f3   : > { %v6489_v44 = vmul.f32 %v6473_v12, %v6455_v3 }
0x10f5   : > { %v6505_v54 = vmul.f32 0.044715, %v6489_v44 }
0x10f6   : > { %v6456_v61 = vpop.f32.mrf.mxu2 }
0x10f7   : > { %v6521_v59 = vadd.f32 %v6505_v54, %v6455_v3  ;;  %v6457_v24 = vadd.f32 %v11089_v43, %v6456_v61  ;;  %v6690_v43 = vadd.f32 %v11198_v13, %v6689_v46 }
0x10f9   : > { %v6537_v34 = vmul.f32 0.7978846, %v6521_v59  ;;  %v6474_v9 = vmul.f32 %v6457_v24, %v6457_v24  ;;  %v6725_v28 = vadd.f32 %v6690_v43, %v10864_v5  ;;  %v6756_v5 = vsel %vm6755_vm13, %v6754_v55, %v6722_v0 }
0x10fa   : > { %v6759_v42 = vsel %vm6758_vm14, %v6757_v15, %v6756_v5 }
0x10fb   : > { %v6490_v25 = vmul.f32 %v6474_v9, %v6457_v24  ;;  %8017 = vtanh.f32 %v6537_v34  ;;  %v6760_v17 = vrot.slane %v6725_v28, 5 }
0x10fd   : > { %v6506_v10 = vmul.f32 0.044715, %v6490_v25  ;;  %v6762_v57 = vsel %vm6761_vm15, %v6760_v17, %v6759_v42 }
0x10fe   : > { %v6765_v56 = vsel %vm6764_vm2, %v6763_v63, %v6762_v57 }
0x10ff   : > { %v6522_v11 = vadd.f32 %v6506_v10, %v6457_v24  ;;  %v6768_v12 = vsel %vm6767_vm3, %v6766_v26, %v6765_v56 }
0x1101   : > { %v6538_v49 = vmul.f32 0.7978846, %v6522_v11  ;;  %v8018_v18 = vpop.eup %8017 }
0x1102   : > { %v6569_v38 = vadd.f32 1.0, %v8018_v18 }
0x1103   : > { %8019 = vtanh.f32 %v6538_v49 }
0x1104   : > { %v6697_v53 = vpop.f32.mrf.mxu1  ;;  %v6585_v29 = vmul.f32 0.5, %v6569_v38 }
0x1105   : > { %v6698_v48 = vadd.f32 %v11198_v13, %v6697_v53 }
0x1106   : > { %v6601_v39 = vmul.f32 %v6585_v29, %v6455_v3 }
0x1107   : > { %v6728_v1 = vadd.f32 %v6698_v48, %v10882_v22 }
0x1109   : > { %v8020_v14 = vpop.eup %8019  ;;  %v6769_v4 = vrot.slane %v6728_v1, 2 }
0x110a   : > { %v6570_v62 = vadd.f32 1.0, %v8020_v14 }
0x110b   : > { %v6771_v21 = vsel %vm6770_vm4, %v6769_v4, %v6768_v12 }
0x110c   : > { %v6586_v19 = vmul.f32 0.5, %v6570_v62  ;;  %v6699_v20 = vpop.f32.mrf.mxu1 }
0x110d   : > { %v6700_v47 = vadd.f32 %v11198_v13, %v6699_v20 }
0x110e   : > { %v6602_v30 = vmul.f32 %v6586_v19, %v6457_v24 }
0x110f   : > { %v6729_v22 = vadd.f32 %v6700_v47, %v10896_v40 }
0x1110   : > { %v6610_v46 = vpack.c.bf16 %v6602_v30, %v6601_v39 }
0x1111   : > { %v6772_v52 = vrot.slane %v6729_v22, 1 }
0x1112   : > { %7572 = vmatmul.msk.bf16.gmra.mxu1 %vm711_vm0, %v6610_v46 }
0x1113   : > { %v6774_v3 = vsel %vm6773_vm5, %v6772_v52, %v6771_v21 }
0x1114   : > { %v6791_v44 = vsel %vm860_vm1, %v6774_v3, 0.0  ;;  %v6702_v54 = vpop.f32.mrf.mxu1 }
0x1115   : > { %6792 = vadd.xlane.f32.xlu2 %v6791_v44  ;;  %v6703_v42 = vadd.f32 %v11198_v13, %v6702_v54 }
0x111c   : > { %v6704_v61 = vpop.f32.mrf.mxu1 }
0x111d   : > { %v6705_v34 = vadd.f32 %v11198_v13, %v6704_v61 }
0x111f   : > { %v11234_v10 = vadd.f32 %v6705_v34, %v10922_v37 }
0x1121   : > { %v6775_v57 = vrot.slane %v11234_v10, 7 }
0x1124   : > { %v6707_v40 = vpop.f32.mrf.mxu1 }
0x1125   : > { %v6708_v11 = vadd.f32 %v11198_v13, %v6707_v40 }
0x112c   : > { %v6709_v59 = vpop.f32.mrf.mxu1 }
0x112d   : > { %v6710_v55 = vadd.f32 %v11198_v13, %v6709_v59 }
0x112f   : > { %v6733_v26 = vadd.f32 %v6710_v55, %v10948_v7  ;;  %v7637_v55 = vld [vmem:[%s11431_s14 + $0x8] sm:$0xff] }
0x1130   : > { %7093 = vmatpush.bf16.msra.mxu0 %v7637_v55 }
0x1131   : > { %v6779_v3 = vrot.slane %v6733_v26, 5 }
0x1134   : > { %v6712_v24 = vpop.f32.mrf.mxu1 }
0x1135   : > { %v6713_v14 = vadd.f32 %v11198_v13, %v6712_v24 }
0x1137   : > { %v6734_v47 = vadd.f32 %v6713_v14, %v10961_v2  ;;  %v6730_v2 = vadd.f32 %v6703_v42, %v10909_v50 }
0x1139   : > { %v6781_v61 = vrot.slane %v6734_v47, 4  ;;  %v6776_v24 = vsel %vm6755_vm13, %v6775_v57, %v6730_v2 }
0x113c   : > { %v6714_v9 = vpop.f32.mrf.mxu1 }
0x113d   : > { %v6715_v17 = vadd.f32 %v11198_v13, %v6714_v9 }
0x1188   : > { %v6793_v25 = vpop.xlane.xlu2 %6792 }
0x1189   : > { %v6797_v51 = vmul.f32 %v6793_v25, %v11511_v27 }
0x118b   : > { %v6801_v8 = vrot.slane %v6797_v51, 1  ;;  %v6802_v16 = vrot.slane %v6797_v51, 2  ;;  %v6803_v49 = vrot.slane %v6797_v51, 3  ;;  %v6804_v18 = vrot.slane %v6797_v51, 4 }
0x118c   : > { %v6805_v43 = vrot.slane %v6797_v51, 5  ;;  %v6806_v60 = vrot.slane %v6797_v51, 6  ;;  %v6807_v53 = vrot.slane %v6797_v51, 7  ;;  %v11237_v41 = vsub.f32 %v6722_v0, %v6797_v51 }
0x118d   : > { %v11240_v58 = vsub.f32 %v11204_v45, %v6801_v8  ;;  %v11243_v38 = vsub.f32 %v11208_v36, %v6802_v16  ;;  %v11245_v48 = vsub.f32 %v6725_v28, %v6803_v49  ;;  %v11247_v37 = vsub.f32 %v6726_v35, %v6804_v18 }
0x118e   : > { %v11251_v15 = vsub.f32 %v6727_v32, %v6805_v43  ;;  %v11253_v29 = vsub.f32 %v6728_v1, %v6806_v60  ;;  %v11255_v62 = vsub.f32 %v6729_v22, %v6807_v53  ;;  %v6732_v35 = vadd.f32 %v6708_v11, %v10935_v6 }
0x118f   : > { %v6717_v0 = vpop.f32.mrf.mxu1  ;;  %v6848_v45 = vmul.f32 %v11240_v58, %v11240_v58  ;;  %v6849_v36 = vmul.f32 %v11243_v38, %v11243_v38  ;;  %v6850_v28 = vmul.f32 %v11245_v48, %v11245_v48  ;;  %v6847_v32 = vmul.f32 %v11237_v41, %v11237_v41 }
0x1190   : > { %v6851_v1 = vmul.f32 %v11247_v37, %v11247_v37  ;;  %v6718_v5 = vadd.f32 %v11198_v13, %v6717_v0  ;;  %v6852_v63 = vmul.f32 %v11251_v15, %v11251_v15  ;;  %v6853_v6 = vmul.f32 %v11253_v29, %v11253_v29 }
0x1191   : > { %v6879_v19 = vrot.slane %v6848_v45, 7  ;;  %v6881_v20 = vrot.slane %v6849_v36, 6  ;;  %v6854_v39 = vmul.f32 %v11255_v62, %v11255_v62  ;;  %v6883_v4 = vrot.slane %v6850_v28, 5 }
0x1192   : > { %v6735_v22 = vadd.f32 %v6715_v17, %v10973_v33  ;;  %v6885_v46 = vrot.slane %v6851_v1, 4  ;;  %v6777_v52 = vrot.slane %v6732_v35, 6  ;;  %v6736_v7 = vadd.f32 %v6718_v5, %v10979_v31 }
0x1193   : > { %v6880_v30 = vsel %vm6755_vm13, %v6879_v19, %v6847_v32  ;;  %v6887_v21 = vrot.slane %v6852_v63, 3  ;;  %v6889_v54 = vrot.slane %v6853_v6, 2  ;;  %v6891_v33 = vrot.slane %v6854_v39, 1 }
0x1194   : > { %v6882_v56 = vsel %vm6758_vm14, %v6881_v20, %v6880_v30  ;;  %v6783_v34 = vrot.slane %v6735_v22, 3  ;;  %v6778_v25 = vsel %vm6758_vm14, %v6777_v52, %v6776_v24  ;;  %v6785_v51 = vrot.slane %v6736_v7, 2 }
0x1195   : > { %v6884_v12 = vsel %vm6761_vm15, %v6883_v4, %v6882_v56  ;;  %v6780_v11 = vsel %vm6761_vm15, %v6779_v3, %v6778_v25 }
0x1196   : > { %v6886_v44 = vsel %vm6764_vm2, %v6885_v46, %v6884_v12  ;;  %v6782_v49 = vsel %vm6764_vm2, %v6781_v61, %v6780_v11 }
0x1197   : > { %v6719_v40 = vpop.f32.mrf.mxu1  ;;  %v6888_v59 = vsel %vm6767_vm3, %v6887_v21, %v6886_v44  ;;  %v6784_v43 = vsel %vm6767_vm3, %v6783_v34, %v6782_v49 }
0x1198   : > { %v6720_v9 = vadd.f32 %v11198_v13, %v6719_v40  ;;  %v6890_v31 = vsel %vm6770_vm4, %v6889_v54, %v6888_v59  ;;  %v6786_v13 = vsel %vm6770_vm4, %v6785_v51, %v6784_v43 }
0x1199   : > { %v6892_v50 = vsel %vm6773_vm5, %v6891_v33, %v6890_v31 }
0x119a   : > { %v6737_v8 = vadd.f32 %v6720_v9, %v11013_v23  ;;  %v6909_v16 = vsel %vm860_vm1, %v6892_v50, 0.0 }
0x119b   : > { %6910 = vadd.xlane.f32.xlu0 %v6909_v16 }
0x119c   : > { %v6787_v18 = vrot.slane %v6737_v8, 1 }
0x119e   : > { %v6788_v60 = vsel %vm6773_vm5, %v6787_v18, %v6786_v13 }
0x119f   : > { %v6794_v53 = vsel %vm860_vm1, %v6788_v60, 0.0 }
0x11a0   : > { %6795 = vadd.xlane.f32.xlu1 %v6794_v53 }
0x120e   : > { %v6911_v9 = vpop.xlane.xlu0 %6910 }
0x120f   : > { %v6915_v31 = vmul.f32 %v6911_v9, %v11511_v27 }
0x1211   : > { %v6917_v25 = vadd.f32 1e-12, %v6915_v31 }
0x1213   : > { %v6796_v23 = vpop.xlane.xlu1 %6795  ;;  %8021 = vrsqrt.f32 %v6917_v25  ;;  %vm6925_vm6 = vweird.f32 %v6917_v25 }
0x1214   : > { %v6798_v14 = vmul.f32 %v6796_v23, %v11511_v27  ;;  %v7636_v23 = vld [vmem:[%s11431_s14] sm:$0xff] }
0x1215   : > { %7094 = vmatpush.bf16.msra.mxu0 %v7636_v23 }
0x1216   : > { %v6808_v0 = vrot.slane %v6798_v14, 1  ;;  %v6809_v45 = vrot.slane %v6798_v14, 2  ;;  %v6810_v36 = vrot.slane %v6798_v14, 3  ;;  %v6811_v28 = vrot.slane %v6798_v14, 4 }
0x1217   : > { %v6812_v17 = vrot.slane %v6798_v14, 5  ;;  %v6813_v32 = vrot.slane %v6798_v14, 6  ;;  %v6814_v1 = vrot.slane %v6798_v14, 7  ;;  %v11305_v5 = vsub.f32 %v6730_v2, %v6798_v14 }
0x1218   : > { %v11308_v63 = vsub.f32 %v11234_v10, %v6808_v0  ;;  %v11310_v19 = vsub.f32 %v6732_v35, %v6809_v45  ;;  %v11312_v20 = vsub.f32 %v6733_v26, %v6810_v36  ;;  %v11314_v42 = vsub.f32 %v6734_v47, %v6811_v28 }
0x1219   : > { %v11316_v6 = vsub.f32 %v6735_v22, %v6812_v17  ;;  %v11318_v39 = vsub.f32 %v6736_v7, %v6813_v32  ;;  %v11324_v57 = vsub.f32 %v6737_v8, %v6814_v1  ;;  %v6855_v26 = vmul.f32 %v11305_v5, %v11305_v5  ;;  %v8022_v51 = vpop.eup %8021 }
0x121a   : > { %v6856_v30 = vmul.f32 %v11308_v63, %v11308_v63  ;;  %v6857_v4 = vmul.f32 %v11310_v19, %v11310_v19  ;;  %v6858_v10 = vmul.f32 %v11312_v20, %v11312_v20  ;;  %v6859_v35 = vmul.f32 %v11314_v42, %v11314_v42 }
0x121b   : > { %v6860_v47 = vmul.f32 %v11316_v6, %v11316_v6  ;;  %v6861_v46 = vmul.f32 %v11318_v39, %v11318_v39  ;;  %v6862_v12 = vmul.f32 %v11324_v57, %v11324_v57  ;;  %v6920_v50 = vmul.f32 %v8022_v51, %v6917_v25 }
0x121c   : > { %v6893_v22 = vrot.slane %v6856_v30, 7  ;;  %v6895_v56 = vrot.slane %v6857_v4, 6  ;;  %v6897_v7 = vrot.slane %v6858_v10, 5  ;;  %v6899_v2 = vrot.slane %v6859_v35, 4 }
0x121d   : > { %v6901_v44 = vrot.slane %v6860_v47, 3  ;;  %v6903_v61 = vrot.slane %v6861_v46, 2  ;;  %v6905_v33 = vrot.slane %v6862_v12, 1  ;;  %v6921_v11 = vmul.f32 %v8022_v51, %v6920_v50 }
0x121e   : > { %v6894_v52 = vsel %vm6755_vm13, %v6893_v22, %v6855_v26  ;;  %vm6926_vm0 = vweird.f32 %v8022_v51 }
0x121f   : > { %v6896_v21 = vsel %vm6758_vm14, %v6895_v56, %v6894_v52  ;;  %v6922_v8 = vmul.f32 0.5, %v6921_v11  ;;  %vm6927_vm7 = vmor %vm6925_vm6, %vm6926_vm0 }
0x1220   : > { %v6898_v3 = vsel %vm6761_vm15, %v6897_v7, %v6896_v21 }
0x1221   : > { %v6900_v54 = vsel %vm6764_vm2, %v6899_v2, %v6898_v3  ;;  %v6923_v16 = vsub.f32 1.5, %v6922_v8 }
0x1222   : > { %v6902_v40 = vsel %vm6767_vm3, %v6901_v44, %v6900_v54 }
0x1223   : > { %v6904_v59 = vsel %vm6770_vm4, %v6903_v61, %v6902_v40  ;;  %v6924_v49 = vmul.f32 %v8022_v51, %v6923_v16 }
0x1224   : > { %v6906_v24 = vsel %vm6773_vm5, %v6905_v33, %v6904_v59 }
0x1225   : > { %v6912_v34 = vsel %vm860_vm1, %v6906_v24, 0.0  ;;  %v6928_v18 = vsel %vm6927_vm7, %v8022_v51, %v6924_v49 }
0x1226   : > { %6913 = vadd.xlane.f32.xlu2 %v6912_v34  ;;  %v6941_v43 = vrot.slane %v6928_v18, 1  ;;  %v6942_v13 = vrot.slane %v6928_v18, 2  ;;  %v6943_v45 = vrot.slane %v6928_v18, 3  ;;  %v6971_v28 = vmul.f32 %v6928_v18, %v11237_v41 }
0x1227   : > { %v6944_v1 = vrot.slane %v6928_v18, 4  ;;  %v6945_v30 = vrot.slane %v6928_v18, 5  ;;  %v6946_v56 = vrot.slane %v6928_v18, 6  ;;  %v6947_v3 = vrot.slane %v6928_v18, 7 }
0x1228   : > { %v6972_v60 = vmul.f32 %v6941_v43, %v11240_v58  ;;  %v6973_v14 = vmul.f32 %v6942_v13, %v11243_v38  ;;  %v6974_v32 = vmul.f32 %v6943_v45, %v11245_v48 }
0x1229   : > { %v6975_v38 = vmul.f32 %v6944_v1, %v11247_v37  ;;  %v6976_v22 = vmul.f32 %v6945_v30, %v11251_v15  ;;  %v6977_v54 = vmul.f32 %v6946_v56, %v11253_v29  ;;  %v6978_v24 = vmul.f32 %v6947_v3, %v11255_v62 }
0x122a   : > { %v6988_v36 = vpack.c.bf16 %v6972_v60, %v6972_v60  ;;  %v6989_v17 = vpack.c.bf16 %v6973_v14, %v6973_v14  ;;  %v6990_v35 = vpack.c.bf16 %v6974_v32, %v6974_v32 }
0x122b   : > { %v6991_v21 = vpack.c.bf16 %v6975_v38, %v6975_v38  ;;  %v6992_v2 = vpack.c.bf16 %v6976_v22, %v6976_v22  ;;  %v6993_v34 = vpack.c.bf16 %v6977_v54, %v6977_v54 }
0x122c   : > { %v7028_v58 = vunpack.c.l.b16 %v6988_v36  ;;  %v7029_v10 = vunpack.c.l.b16 %v6989_v17  ;;  %v7030_v7 = vunpack.c.l.b16 %v6990_v35 }
0x122d   : > { %v7031_v15 = vunpack.c.l.b16 %v6991_v21  ;;  %v7032_v59 = vunpack.c.l.b16 %v6992_v2 }
0x122e   : > { %v7043_v26 = vrot.slane %v7028_v58, 7  ;;  %v7045_v41 = vrot.slane %v7029_v10, 6  ;;  %v7047_v37 = vrot.slane %v7030_v7, 5  ;;  %v7033_v58 = vunpack.c.l.b16 %v6993_v34 }
0x122f   : > { %v7051_v1 = vrot.slane %v7032_v59, 3 }
0x1230   : > { %v7053_v56 = vrot.slane %v7033_v58, 2 }
0x1299   : > { %v6914_v53 = vpop.xlane.xlu2 %6913 }
0x129a   : > { %v6916_v55 = vmul.f32 %v6914_v53, %v11511_v27  ;;  %v6987_v27 = vpack.c.bf16 %v6971_v28, %v6971_v28 }
0x129c   : > { %v6918_v0 = vadd.f32 1e-12, %v6916_v55  ;;  %v7027_v46 = vunpack.c.l.b16 %v6987_v27 }
0x129e   : > { %8023 = vrsqrt.f32 %v6918_v0  ;;  %v7044_v48 = vsel %vm6755_vm13, %v7043_v26, %v7027_v46  ;;  %vm6935_vm9 = vweird.f32 %v6918_v0 }
0x129f   : > { %v7046_v61 = vsel %vm6758_vm14, %v7045_v41, %v7044_v48 }
0x12a0   : > { %v7048_v9 = vsel %vm6761_vm15, %v7047_v37, %v7046_v61 }
0x12a4   : > { %v8024_v4 = vpop.eup %8023 }
0x12a5   : > { %v6930_v47 = vmul.f32 %v8024_v4, %v6918_v0  ;;  %vm6936_vm8 = vweird.f32 %v8024_v4 }
0x12a6   : > { %vm6937_vm10 = vmor %vm6935_vm9, %vm6936_vm8 }
0x12a7   : > { %v6931_v52 = vmul.f32 %v8024_v4, %v6930_v47 }
0x12a9   : > { %v6932_v12 = vmul.f32 0.5, %v6931_v52 }
0x12ab   : > { %v6933_v44 = vsub.f32 1.5, %v6932_v12 }
0x12ad   : > { %v6934_v40 = vmul.f32 %v8024_v4, %v6933_v44 }
0x12af   : > { %v6938_v33 = vsel %vm6937_vm10, %v8024_v4, %v6934_v40  ;;  %v7698_v40 = vld [vmem:[%s11432_s15] ss:$0 sm:$0xff] }
0x12b0   : > { %v6948_v31 = vrot.slane %v6938_v33, 1  ;;  %v6949_v25 = vrot.slane %v6938_v33, 2  ;;  %v6950_v51 = vrot.slane %v6938_v33, 3  ;;  %v6951_v50 = vrot.slane %v6938_v33, 4 }
0x12b1   : > { %v6952_v11 = vrot.slane %v6938_v33, 5  ;;  %v6953_v29 = vrot.slane %v6938_v33, 6  ;;  %v6954_v8 = vrot.slane %v6938_v33, 7  ;;  %v6979_v16 = vmul.f32 %v6938_v33, %v11305_v5 }
0x12b2   : > { %v6980_v49 = vmul.f32 %v6948_v31, %v11308_v63  ;;  %v6981_v18 = vmul.f32 %v6949_v25, %v11310_v19  ;;  %v6982_v43 = vmul.f32 %v6950_v51, %v11312_v20  ;;  %v6983_v62 = vmul.f32 %v6951_v50, %v11314_v42 }
0x12b3   : > { %v6984_v13 = vmul.f32 %v6952_v11, %v11316_v6  ;;  %v6995_v60 = vpack.c.bf16 %v6979_v16, %v6979_v16  ;;  %v6985_v53 = vmul.f32 %v6953_v29, %v11318_v39  ;;  %v6986_v55 = vmul.f32 %v6954_v8, %v11324_v57 }
0x12b4   : > { %v6996_v23 = vpack.c.bf16 %v6980_v49, %v6980_v49  ;;  %v6997_v14 = vpack.c.bf16 %v6981_v18, %v6981_v18  ;;  %v6998_v0 = vpack.c.bf16 %v6982_v43, %v6982_v43  ;;  %v6999_v45 = vpack.c.bf16 %v6983_v62, %v6983_v62 }
0x12b5   : > { %v7049_v5 = vrot.slane %v7031_v15, 4  ;;  %v7000_v36 = vpack.c.bf16 %v6984_v13, %v6984_v13  ;;  %v6994_v63 = vpack.c.bf16 %v6978_v24, %v6978_v24  ;;  %v7001_v28 = vpack.c.bf16 %v6985_v53, %v6985_v53 }
0x12b6   : > { %v7036_v19 = vunpack.c.l.b16 %v6996_v23  ;;  %v7037_v17 = vunpack.c.l.b16 %v6997_v14  ;;  %v7038_v20 = vunpack.c.l.b16 %v6998_v0  ;;  %v7002_v32 = vpack.c.bf16 %v6986_v55, %v6986_v55 }
0x12b7   : > { %v7039_v42 = vunpack.c.l.b16 %v6999_v45  ;;  %v7050_v6 = vsel %vm6764_vm2, %v7049_v5, %v7048_v9  ;;  %v7035_v39 = vunpack.c.l.b16 %v6995_v60  ;;  %v7040_v30 = vunpack.c.l.b16 %v7000_v36 }
0x12b8   : > { %v7057_v57 = vrot.slane %v7036_v19, 7  ;;  %v7059_v27 = vrot.slane %v7037_v17, 6  ;;  %v7034_v4 = vunpack.c.l.b16 %v6994_v63  ;;  %v7041_v10 = vunpack.c.l.b16 %v7001_v28 }
0x12b9   : > { %v7061_v26 = vrot.slane %v7038_v20, 5  ;;  %v7042_v47 = vunpack.c.l.b16 %v7002_v32  ;;  %v7052_v38 = vsel %vm6767_vm3, %v7051_v1, %v7050_v6  ;;  %v7063_v22 = vrot.slane %v7039_v42, 4 }
0x12ba   : > { %v7058_v35 = vsel %vm6755_vm13, %v7057_v57, %v7035_v39  ;;  %v7065_v41 = vrot.slane %v7040_v30, 3  ;;  %v7054_v7 = vsel %vm6770_vm4, %v7053_v56, %v7052_v38  ;;  %v7067_v12 = vrot.slane %v7041_v10, 2 }
0x12bb   : > { %v7060_v46 = vsel %vm6758_vm14, %v7059_v27, %v7058_v35  ;;  %v7055_v21 = vrot.slane %v7034_v4, 1  ;;  %v7069_v3 = vrot.slane %v7042_v47, 1 }
0x12bc   : > { %v7062_v52 = vsel %vm6761_vm15, %v7061_v26, %v7060_v46 }
0x12bd   : > { %v7064_v48 = vsel %vm6764_vm2, %v7063_v22, %v7062_v52  ;;  %v7056_v54 = vsel %vm6773_vm5, %v7055_v21, %v7054_v7 }
0x12be   : > { %v7066_v2 = vsel %vm6767_vm3, %v7065_v41, %v7064_v48 }
0x12bf   : > { %v7068_v44 = vsel %vm6770_vm4, %v7067_v12, %v7066_v2 }
0x12c0   : > { %v7070_v61 = vsel %vm6773_vm5, %v7069_v3, %v7068_v44 }
0x12c1   : > { %v7071_v37 = vpack.c.b16 %v7070_v61, %v7056_v54 }
0x12c3   : > { %7581 = vmatmul.msk.bf16.vlgmr.msra.gmra.mxu0 %vm860_vm1, %v7071_v37 }
0x1340   : > { %v7096_v15 = vpop.f32.mrf.mxu0 }
0x1341   : > { %v7097_v59 = vadd.f32 %v7698_v40, %v7096_v15 }
0x1343   : > { %7101 = vst [vmem:[%s517_s21] sm:$0xff] %v7097_v59 }
0x1348   : > { %v7098_v33 = vpop.f32.mrf.mxu0 }
0x1349   : > { %v7099_v24 = vadd.f32 %v7698_v40, %v7098_v33 }
0x134b   : > { %7102 = vst [vmem:[%s517_s21 + $0x8] sm:$0xff] %v7099_v24 }
0x134c   : > { %8061 = shalt.err (!%p8058_p3)
}
0x134d   : > { %s8102_s17 = smov 128   ;;  %s8103_s21 = smov 8  }
0x134e   : > { %7645 = dma.vmem_to_hbm [thread:$0]  (%p8224_p5), %s7117_s28, 256, %s7119_s27, %s7104_s23, %s8102_s17, %s8102_s17, %s8103_s21  }
0x134f PF: > { %s11557_s30 = sld [smem:[#allocation7_spill]] }
0x1350   : > { %s11558_s1 = sld [smem:[#allocation5_spill]] }
0x1355   : > { %p7651_p4 = scmp.ge.s32.totalorder %s11557_s30, 2 }
0x1356   : > { %s7133_s18 = sand.u32 1, %s11558_s1  }
0x1357   : > { %p7648_p7 = pnand %p7651_p4, %p8228_p6  ;;  %s7134_s25 = scalar_lea.sflag [#allocation3], %s7133_s18 }
0x1359   : > { %p7649_p8 = pneg %p7648_p7 }
0x135b   : > { %8079 = dma.done.wait (%p7649_p8), %s7134_s25, 256  }
0x135c   : > { %8081 = vsyncadd (%p7649_p8), %s7134_s25, 4294967040  ;;  %s11560_s24 = sld [smem:[#allocation8_spill]]  ;;  %s11563_s21 = smov %s8088_s22 }
0x135d   : > { %s11561_s29 = sld [smem:[#allocation6_spill]] }
0x135e   : > { %s11562_s23 = sld [smem:[#allocation9_spill]] }
0x1362   : > { %p26_p9 = scmp.ge.s32.totalorder %s11560_s24, 4  }
0x1363   : > { %s11564_s22 = smov %s11561_s29 }
0x1364   :  { %28 = sbr.rel (!%p26_p9) target bundleno = 7 (0x7), region = 127 }
0x1369   :  { %7140 = vsyncpa [#allocation3], 1 }
0x136a   :  { %7142 = vsyncpa [#allocation3 + $0x1], 1 }

</bundles_post_ra>
